<compile_context>
chip_gen: v7x
topology: tpu7x:2x2x1
jax: 0.10.0
libtpu: 0.0.40
codegen_flags: <defaults>
</compile_context>

<pallas_src>
import jax
import jax.numpy as jnp
from jax.experimental import pallas as pl
from jax.experimental.pallas import tpu as pltpu

_PADW = 8  # W-axis halo. Left halo of 8 keeps interior writes sublane-aligned;
           # the 3x3 conv taps read columns [_PADW-1, _PADW+W].


def _convgru_kernel(x_ref, h0_ref, wx_ref, whrz_ref, whc_ref, brz_ref, bc_ref,
                    o_ref, hT_ref,
                    hpad_ref, xpad_ref, pim_ref):
    t = pl.program_id(1)
    nt = pl.num_programs(1)

    Hp, Wtot, C = hpad_ref.shape
    H = Hp - 2
    W = Wtot - 2 * _PADW
    N = H * W

    @pl.when(t == 0)
    def _init():
        # Zero the halos once per batch element, then drop h0 into the interior.
        hpad_ref[...] = jnp.zeros_like(hpad_ref)
        xpad_ref[...] = jnp.zeros_like(xpad_ref)
        hpad_ref[1:H + 1, _PADW:_PADW + W, :] = h0_ref[0].astype(jnp.float32)

    # Stage the current frame into the padded buffer (halo stays zero).
    xpad_ref[1:H + 1, _PADW:_PADW + W, :] = x_ref[0, 0].astype(jnp.float32)

    def im2col_bf16(src_ref):
        # Gather the 9 shifted 3x3 taps into the shared (N, 9*C) buffer and
        # return it as a bf16 MXU operand (f32 math elsewhere).
        for dy in range(3):
            for dx in range(3):
                k = dy * 3 + dx
                patch = src_ref[dy:dy + H,
                                _PADW - 1 + dx:_PADW - 1 + dx + W, :]
                pim_ref[:, k * C:(k + 1) * C] = patch.reshape(N, C)
        return pim_ref[...].astype(jnp.bfloat16)

    # Fused gate matmuls (bf16 operands, f32 accumulation on the MXU).
    gx = jnp.dot(im2col_bf16(xpad_ref), wx_ref[...],
                 preferred_element_type=jnp.float32)            # (N, 3C): [r|z|c]
    gh = jnp.dot(im2col_bf16(hpad_ref), whrz_ref[...],
                 preferred_element_type=jnp.float32)            # (N, 2C): [r|z]

    h_in = hpad_ref[1:H + 1, _PADW:_PADW + W, :].reshape(N, C)  # f32 state

    rz = jax.nn.sigmoid(gx[:, :2 * C] + gh + brz_ref[...])
    r = rz[:, :C]
    z = rz[:, C:]

    # Reuse the x staging buffer for r*h (the x taps are already consumed).
    xpad_ref[1:H + 1, _PADW:_PADW + W, :] = (r * h_in).reshape(H, W, C)
    gc = jnp.dot(im2col_bf16(xpad_ref), whc_ref[...],
                 preferred_element_type=jnp.float32)            # (N, C)
    c = jnp.tanh(gx[:, 2 * C:] + gc + bc_ref[...])

    h_new = (1.0 - z) * h_in + z * c                            # f32 recurrence
    h_new_hwc = h_new.reshape(H, W, C)

    o_ref[0, 0] = h_new_hwc.astype(o_ref.dtype)
    hpad_ref[1:H + 1, _PADW:_PADW + W, :] = h_new_hwc

    @pl.when(t == nt - 1)
    def _final():
        hT_ref[0] = h_new_hwc.astype(hT_ref.dtype)


def convgru_pallas(x_bthwc, h0_bhwc, wx, whrz, whc, brz, bc):
    """x: (B, T, H, W, Cg) native dtype; h0: (B, H, W, Cg). Returns (o, hT)."""
    B, T, H, W, C = x_bthwc.shape
    Wtot = W + 2 * _PADW

    o, hT = pl.pallas_call(
        _convgru_kernel,
        out_shape=(jax.ShapeDtypeStruct((B, T, H, W, C), x_bthwc.dtype),
                   jax.ShapeDtypeStruct((B, H, W, C), x_bthwc.dtype)),
        grid_spec=pltpu.PrefetchScalarGridSpec(
            num_scalar_prefetch=0,
            grid=(B, T),
            in_specs=[
                pl.BlockSpec((1, 1, H, W, C), lambda b, t: (b, t, 0, 0, 0)),
                pl.BlockSpec((1, H, W, C), lambda b, t: (b, 0, 0, 0)),
                pl.BlockSpec((9 * C, 3 * C), lambda b, t: (0, 0)),
                pl.BlockSpec((9 * C, 2 * C), lambda b, t: (0, 0)),
                pl.BlockSpec((9 * C, C), lambda b, t: (0, 0)),
                pl.BlockSpec((1, 2 * C), lambda b, t: (0, 0)),
                pl.BlockSpec((1, C), lambda b, t: (0, 0)),
            ],
            out_specs=(
                pl.BlockSpec((1, 1, H, W, C), lambda b, t: (b, t, 0, 0, 0)),
                pl.BlockSpec((1, H, W, C), lambda b, t: (b, 0, 0, 0)),
            ),
            scratch_shapes=[
                pltpu.VMEM((H + 2, Wtot, C), jnp.float32),   # padded hidden state
                pltpu.VMEM((H + 2, Wtot, C), jnp.float32),   # padded x / r*h stage
                pltpu.VMEM((H * W, 9 * C), jnp.float32),     # shared im2col buffer
            ]),
        compiler_params=pltpu.CompilerParams(
            dimension_semantics=("parallel", "arbitrary")),
    )(x_bthwc, h0_bhwc, wx, whrz, whc, brz, bc)
    return o, hT


def bottleneck_block(x, r, params, channels):
    """BottleneckBlock.forward. x: (B,T,C,H,W) or (B,C,H,W) (PyTorch layout)."""
    Cg = channels // 2
    Wih, bih, Whh, bhh = params  # torch layouts: OIHW weights, (O,) biases

    # One-time weight prep: OIHW -> HWIO, fuse gates, flatten taps, cast bf16.
    Wih_hwio = jnp.transpose(Wih, (2, 3, 1, 0))   # (3, 3, 2Cg, 2Cg) [ky,kx,in,out]
    Whh_hwio = jnp.transpose(Whh, (2, 3, 1, 0))   # (3, 3, 2Cg, Cg)
    wx = jnp.concatenate([Wih_hwio[:, :, :Cg, :],       # x -> [r | z]
                          Whh_hwio[:, :, :Cg, :]],      # x -> c
                         axis=-1).reshape(9 * Cg, 3 * Cg).astype(jnp.bfloat16)
    whrz = Wih_hwio[:, :, Cg:, :].reshape(9 * Cg, 2 * Cg).astype(jnp.bfloat16)
    whc = Whh_hwio[:, :, Cg:, :].reshape(9 * Cg, Cg).astype(jnp.bfloat16)
    brz = bih.reshape(1, 2 * Cg).astype(jnp.float32)
    bc = bhh.reshape(1, Cg).astype(jnp.float32)

    single_frame = (x.ndim == 4)
    if single_frame:
        x = x[:, None]                            # (B, 1, C, H, W)
    B, T, _, H, W = x.shape
    a = x[:, :, :Cg]                              # pass-through half
    b = x[:, :, Cg:]                              # GRU half

    if r is None:
        r = jnp.zeros((B, Cg, H, W), x.dtype)

    b_bthwc = jnp.transpose(b, (0, 1, 3, 4, 2))   # (B, T, H, W, Cg), native dtype
    h0 = jnp.transpose(r, (0, 2, 3, 1))           # (B, H, W, Cg)

    o, hT = convgru_pallas(b_bthwc, h0, wx, whrz, whc, brz, bc)

    o = jnp.transpose(o, (0, 1, 4, 2, 3))         # (B, T, Cg, H, W)
    hT = jnp.transpose(hT, (0, 3, 1, 2))          # (B, Cg, H, W)

    out = jnp.concatenate([a, o.astype(x.dtype)], axis=2)
    if single_frame:
        out = out[:, 0]
    return out, hT.astype(x.dtype)


# ---------------- pure-JAX reference (matches the PyTorch module) -------------
def _conv2d_ref(x, w, b):
    y = jax.lax.conv_general_dilated(
        x, w, window_strides=(1, 1), padding=((1, 1), (1, 1)),
        dimension_numbers=('NCHW', 'OIHW', 'NCHW'))
    return y + b[None, :, None, None]


def bottleneck_ref(x, r, params, channels):
    Cg = channels // 2
    Wih, bih, Whh, bhh = params
    a, b = x[:, :, :Cg], x[:, :, Cg:]
    B, T, _, H, W = x.shape
    h = jnp.zeros((B, Cg, H, W), x.dtype) if r is None else r
    outs = []
    for t in range(T):
        xt = b[:, t]
        rz = jax.nn.sigmoid(_conv2d_ref(jnp.concatenate([xt, h], 1), Wih, bih))
        rr, zz = rz[:, :Cg], rz[:, Cg:]
        c = jnp.tanh(_conv2d_ref(jnp.concatenate([xt, rr * h], 1), Whh, bhh))
        h = (1 - zz) * h + zz * c
        outs.append(h)
    o = jnp.stack(outs, axis=1)
    return jnp.concatenate([a, o], axis=2), h


if __name__ == "__main__":
    channels = 8                 # BottleneckBlock(channels); GRU works on Cg = 4
    Cg = channels // 2
    B, T, H, W = 2, 3, 16, 16

    key = jax.random.PRNGKey(0)
    k = jax.random.split(key, 6)
    x = jax.random.normal(k[0], (B, T, channels, H, W), jnp.float32)
    r = jax.random.normal(k[1], (B, Cg, H, W), jnp.float32) * 0.5

    # Deterministic parameter init (same shapes as nn.Conv2d in ConvGRU).
    Wih = jax.random.normal(k[2], (2 * Cg, 2 * Cg, 3, 3), jnp.float32) * 0.1
    bih = jax.random.normal(k[3], (2 * Cg,), jnp.float32) * 0.1
    Whh = jax.random.normal(k[4], (Cg, 2 * Cg, 3, 3), jnp.float32) * 0.1
    bhh = jax.random.normal(k[5], (Cg,), jnp.float32) * 0.1
    params = (Wih, bih, Whh, bhh)

    out, r_new = bottleneck_block(x, r, params, channels)
    out = jax.block_until_ready(out)
    r_new = jax.block_until_ready(r_new)

    out_ref, r_ref = bottleneck_ref(x, r, params, channels)
    assert out.shape == (B, T, channels, H, W)
    assert r_new.shape == (B, Cg, H, W)
    # bf16 MXU operands (f32 accumulation) -> looser tolerance than pure f32.
    assert jnp.allclose(out, out_ref, atol=7.5e-2, rtol=7.5e-2), \
        float(jnp.max(jnp.abs(out - out_ref)))
    assert jnp.allclose(r_new, r_ref, atol=7.5e-2, rtol=7.5e-2), \
        float(jnp.max(jnp.abs(r_new - r_ref)))

    print("KERNEL_OK")
</pallas_src>

<mosaic_0001>
module attributes {stable_mosaic.version = 11 : i64} {
  func.func @_convgru_kernel(%arg0: i32, %arg1: i32, %arg2: memref<1x1x16x16x4xf32, #tpu.memory_space<vmem>>, %arg3: memref<1x16x16x4xf32, #tpu.memory_space<vmem>>, %arg4: memref<36x12xbf16, #tpu.memory_space<vmem>>, %arg5: memref<36x8xbf16, #tpu.memory_space<vmem>>, %arg6: memref<36x4xbf16, #tpu.memory_space<vmem>>, %arg7: memref<1x8xf32, #tpu.memory_space<vmem>>, %arg8: memref<1x4xf32, #tpu.memory_space<vmem>>, %arg9: memref<1x1x16x16x4xf32, #tpu.memory_space<vmem>>, %arg10: memref<1x16x16x4xf32, #tpu.memory_space<vmem>>, %arg11: memref<18x32x4xf32, #tpu.memory_space<vmem>>, %arg12: memref<18x32x4xf32, #tpu.memory_space<vmem>>, %arg13: memref<256x36xf32, #tpu.memory_space<vmem>>) attributes {dimension_semantics = [#tpu.dimension_semantics<parallel>, #tpu.dimension_semantics<arbitrary>], iteration_bounds = array<i64: 2, 3>, scalar_prefetch = 0 : i64, scratch_operands = 3 : i64, tpu.core_type = #tpu.core_type<tc>, window_params = [{transform_indices = @transform_0, window_bounds = array<i64: 1, 1, 16, 16, 4>}, {transform_indices = @transform_1, window_bounds = array<i64: 1, 16, 16, 4>}, {pipeline_mode = #tpu.pipeline_mode<synchronous>, transform_indices = @transform_2, window_bounds = array<i64: 36, 12>}, {pipeline_mode = #tpu.pipeline_mode<synchronous>, transform_indices = @transform_3, window_bounds = array<i64: 36, 8>}, {pipeline_mode = #tpu.pipeline_mode<synchronous>, transform_indices = @transform_4, window_bounds = array<i64: 36, 4>}, {pipeline_mode = #tpu.pipeline_mode<synchronous>, transform_indices = @transform_5, window_bounds = array<i64: 1, 8>}, {pipeline_mode = #tpu.pipeline_mode<synchronous>, transform_indices = @transform_6, window_bounds = array<i64: 1, 4>}, {transform_indices = @transform_7, window_bounds = array<i64: 1, 1, 16, 16, 4>}, {transform_indices = @transform_8, window_bounds = array<i64: 1, 16, 16, 4>}]} {
    %c0_i32 = arith.constant 0 : i32
    %0 = arith.cmpi eq, %arg1, %c0_i32 : i32
    %1 = arith.extui %0 : i1 to i32
    %c0_i32_0 = arith.constant 0 : i32
    %2 = arith.cmpi ne, %1, %c0_i32_0 : i32
    scf.if %2 {
      %cst_166 = arith.constant 0.000000e+00 : f32
      %135 = vector.broadcast %cst_166 : f32 to vector<18x32x4xf32>
      %c0_167 = arith.constant 0 : index
      %c0_168 = arith.constant 0 : index
      %c0_169 = arith.constant 0 : index
      %136 = vector.load %arg11[%c0_167, %c0_168, %c0_169] : memref<18x32x4xf32, #tpu.memory_space<vmem>>, vector<18x32x4xf32>
      tpu.vector_store %arg11[%c0_167, %c0_168, %c0_169], %135 {strides = array<i32>} : memref<18x32x4xf32, #tpu.memory_space<vmem>>, vector<18x32x4xf32>,
      %cst_170 = arith.constant 0.000000e+00 : f32
      %137 = vector.broadcast %cst_170 : f32 to vector<18x32x4xf32>
      %c0_171 = arith.constant 0 : index
      %c0_172 = arith.constant 0 : index
      %c0_173 = arith.constant 0 : index
      %138 = vector.load %arg12[%c0_171, %c0_172, %c0_173] : memref<18x32x4xf32, #tpu.memory_space<vmem>>, vector<18x32x4xf32>
      tpu.vector_store %arg12[%c0_171, %c0_172, %c0_173], %137 {strides = array<i32>} : memref<18x32x4xf32, #tpu.memory_space<vmem>>, vector<18x32x4xf32>,
      %c0_174 = arith.constant 0 : index
      %c0_175 = arith.constant 0 : index
      %c0_176 = arith.constant 0 : index
      %c0_177 = arith.constant 0 : index
      %139 = vector.load %arg3[%c0_174, %c0_175, %c0_176, %c0_177] : memref<1x16x16x4xf32, #tpu.memory_space<vmem>>, vector<1x16x16x4xf32>
      %140 = vector.shape_cast %139 : vector<1x16x16x4xf32> to vector<16x16x4xf32>
      %c1_178 = arith.constant 1 : index
      %c8_179 = arith.constant 8 : index
      %c0_180 = arith.constant 0 : index
      %141 = vector.load %arg11[%c1_178, %c8_179, %c0_180] : memref<18x32x4xf32, #tpu.memory_space<vmem>>, vector<16x16x4xf32>
      tpu.vector_store %arg11[%c1_178, %c8_179, %c0_180], %140 {strides = array<i32>} : memref<18x32x4xf32, #tpu.memory_space<vmem>>, vector<16x16x4xf32>,
    } else {
    }
    %c0 = arith.constant 0 : index
    %c0_1 = arith.constant 0 : index
    %c0_2 = arith.constant 0 : index
    %c0_3 = arith.constant 0 : index
    %c0_4 = arith.constant 0 : index
    %3 = vector.load %arg2[%c0, %c0_1, %c0_2, %c0_3, %c0_4] : memref<1x1x16x16x4xf32, #tpu.memory_space<vmem>>, vector<1x1x16x16x4xf32>
    %4 = vector.shape_cast %3 : vector<1x1x16x16x4xf32> to vector<16x16x4xf32>
    %c1 = arith.constant 1 : index
    %c8 = arith.constant 8 : index
    %c0_5 = arith.constant 0 : index
    %5 = vector.load %arg12[%c1, %c8, %c0_5] : memref<18x32x4xf32, #tpu.memory_space<vmem>>, vector<16x16x4xf32>
    tpu.vector_store %arg12[%c1, %c8, %c0_5], %4 {strides = array<i32>} : memref<18x32x4xf32, #tpu.memory_space<vmem>>, vector<16x16x4xf32>,
    %c0_6 = arith.constant 0 : index
    %c7 = arith.constant 7 : index
    %c0_7 = arith.constant 0 : index
    %6 = vector.load %arg12[%c0_6, %c7, %c0_7] : memref<18x32x4xf32, #tpu.memory_space<vmem>>, vector<16x16x4xf32>
    %7 = vector.shape_cast %6 : vector<16x16x4xf32> to vector<256x4xf32>
    %c0_8 = arith.constant 0 : index
    %c0_9 = arith.constant 0 : index
    %8 = vector.load %arg13[%c0_8, %c0_9] : memref<256x36xf32, #tpu.memory_space<vmem>>, vector<256x4xf32>
    tpu.vector_store %arg13[%c0_8, %c0_9], %7 {strides = array<i32>} : memref<256x36xf32, #tpu.memory_space<vmem>>, vector<256x4xf32>,
    %c0_10 = arith.constant 0 : index
    %c8_11 = arith.constant 8 : index
    %c0_12 = arith.constant 0 : index
    %9 = vector.load %arg12[%c0_10, %c8_11, %c0_12] : memref<18x32x4xf32, #tpu.memory_space<vmem>>, vector<16x16x4xf32>
    %10 = vector.shape_cast %9 : vector<16x16x4xf32> to vector<256x4xf32>
    %c0_13 = arith.constant 0 : index
    %c4 = arith.constant 4 : index
    %11 = vector.load %arg13[%c0_13, %c4] : memref<256x36xf32, #tpu.memory_space<vmem>>, vector<256x4xf32>
    tpu.vector_store %arg13[%c0_13, %c4], %10 {strides = array<i32>} : memref<256x36xf32, #tpu.memory_space<vmem>>, vector<256x4xf32>,
    %c0_14 = arith.constant 0 : index
    %c9 = arith.constant 9 : index
    %c0_15 = arith.constant 0 : index
    %12 = vector.load %arg12[%c0_14, %c9, %c0_15] : memref<18x32x4xf32, #tpu.memory_space<vmem>>, vector<16x16x4xf32>
    %13 = vector.shape_cast %12 : vector<16x16x4xf32> to vector<256x4xf32>
    %c0_16 = arith.constant 0 : index
    %c8_17 = arith.constant 8 : index
    %14 = vector.load %arg13[%c0_16, %c8_17] : memref<256x36xf32, #tpu.memory_space<vmem>>, vector<256x4xf32>
    tpu.vector_store %arg13[%c0_16, %c8_17], %13 {strides = array<i32>} : memref<256x36xf32, #tpu.memory_space<vmem>>, vector<256x4xf32>,
    %c1_18 = arith.constant 1 : index
    %c7_19 = arith.constant 7 : index
    %c0_20 = arith.constant 0 : index
    %15 = vector.load %arg12[%c1_18, %c7_19, %c0_20] : memref<18x32x4xf32, #tpu.memory_space<vmem>>, vector<16x16x4xf32>
    %16 = vector.shape_cast %15 : vector<16x16x4xf32> to vector<256x4xf32>
    %c0_21 = arith.constant 0 : index
    %c12 = arith.constant 12 : index
    %17 = vector.load %arg13[%c0_21, %c12] : memref<256x36xf32, #tpu.memory_space<vmem>>, vector<256x4xf32>
    tpu.vector_store %arg13[%c0_21, %c12], %16 {strides = array<i32>} : memref<256x36xf32, #tpu.memory_space<vmem>>, vector<256x4xf32>,
    %c1_22 = arith.constant 1 : index
    %c8_23 = arith.constant 8 : index
    %c0_24 = arith.constant 0 : index
    %18 = vector.load %arg12[%c1_22, %c8_23, %c0_24] : memref<18x32x4xf32, #tpu.memory_space<vmem>>, vector<16x16x4xf32>
    %19 = vector.shape_cast %18 : vector<16x16x4xf32> to vector<256x4xf32>
    %c0_25 = arith.constant 0 : index
    %c16 = arith.constant 16 : index
    %20 = vector.load %arg13[%c0_25, %c16] : memref<256x36xf32, #tpu.memory_space<vmem>>, vector<256x4xf32>
    tpu.vector_store %arg13[%c0_25, %c16], %19 {strides = array<i32>} : memref<256x36xf32, #tpu.memory_space<vmem>>, vector<256x4xf32>,
    %c1_26 = arith.constant 1 : index
    %c9_27 = arith.constant 9 : index
    %c0_28 = arith.constant 0 : index
    %21 = vector.load %arg12[%c1_26, %c9_27, %c0_28] : memref<18x32x4xf32, #tpu.memory_space<vmem>>, vector<16x16x4xf32>
    %22 = vector.shape_cast %21 : vector<16x16x4xf32> to vector<256x4xf32>
    %c0_29 = arith.constant 0 : index
    %c20 = arith.constant 20 : index
    %23 = vector.load %arg13[%c0_29, %c20] : memref<256x36xf32, #tpu.memory_space<vmem>>, vector<256x4xf32>
    tpu.vector_store %arg13[%c0_29, %c20], %22 {strides = array<i32>} : memref<256x36xf32, #tpu.memory_space<vmem>>, vector<256x4xf32>,
    %c2 = arith.constant 2 : index
    %c7_30 = arith.constant 7 : index
    %c0_31 = arith.constant 0 : index
    %24 = vector.load %arg12[%c2, %c7_30, %c0_31] : memref<18x32x4xf32, #tpu.memory_space<vmem>>, vector<16x16x4xf32>
    %25 = vector.shape_cast %24 : vector<16x16x4xf32> to vector<256x4xf32>
    %c0_32 = arith.constant 0 : index
    %c24 = arith.constant 24 : index
    %26 = vector.load %arg13[%c0_32, %c24] : memref<256x36xf32, #tpu.memory_space<vmem>>, vector<256x4xf32>
    tpu.vector_store %arg13[%c0_32, %c24], %25 {strides = array<i32>} : memref<256x36xf32, #tpu.memory_space<vmem>>, vector<256x4xf32>,
    %c2_33 = arith.constant 2 : index
    %c8_34 = arith.constant 8 : index
    %c0_35 = arith.constant 0 : index
    %27 = vector.load %arg12[%c2_33, %c8_34, %c0_35] : memref<18x32x4xf32, #tpu.memory_space<vmem>>, vector<16x16x4xf32>
    %28 = vector.shape_cast %27 : vector<16x16x4xf32> to vector<256x4xf32>
    %c0_36 = arith.constant 0 : index
    %c28 = arith.constant 28 : index
    %29 = vector.load %arg13[%c0_36, %c28] : memref<256x36xf32, #tpu.memory_space<vmem>>, vector<256x4xf32>
    tpu.vector_store %arg13[%c0_36, %c28], %28 {strides = array<i32>} : memref<256x36xf32, #tpu.memory_space<vmem>>, vector<256x4xf32>,
    %c2_37 = arith.constant 2 : index
    %c9_38 = arith.constant 9 : index
    %c0_39 = arith.constant 0 : index
    %30 = vector.load %arg12[%c2_37, %c9_38, %c0_39] : memref<18x32x4xf32, #tpu.memory_space<vmem>>, vector<16x16x4xf32>
    %31 = vector.shape_cast %30 : vector<16x16x4xf32> to vector<256x4xf32>
    %c0_40 = arith.constant 0 : index
    %c32 = arith.constant 32 : index
    %32 = vector.load %arg13[%c0_40, %c32] : memref<256x36xf32, #tpu.memory_space<vmem>>, vector<256x4xf32>
    tpu.vector_store %arg13[%c0_40, %c32], %31 {strides = array<i32>} : memref<256x36xf32, #tpu.memory_space<vmem>>, vector<256x4xf32>,
    %c0_41 = arith.constant 0 : index
    %c0_42 = arith.constant 0 : index
    %33 = vector.load %arg13[%c0_41, %c0_42] : memref<256x36xf32, #tpu.memory_space<vmem>>, vector<256x36xf32>
    %34 = arith.truncf %33 : vector<256x36xf32> to vector<256x36xbf16>
    %c0_43 = arith.constant 0 : index
    %c0_44 = arith.constant 0 : index
    %35 = vector.load %arg4[%c0_43, %c0_44] : memref<36x12xbf16, #tpu.memory_space<vmem>>, vector<36x12xbf16>
    %cst = arith.constant dense<0.000000e+00> : vector<256x12xf32>
    %36 = tpu.matmul %34, %35, %cst {dimension_numbers = #tpu.dot_dimension_numbers<[1], [0], [0], [1], [0, 0, 1, 1], [], []>} : vector<256x36xbf16>, vector<36x12xbf16>, vector<256x12xf32> -> vector<256x12xf32>
    %c0_45 = arith.constant 0 : index
    %c7_46 = arith.constant 7 : index
    %c0_47 = arith.constant 0 : index
    %37 = vector.load %arg11[%c0_45, %c7_46, %c0_47] : memref<18x32x4xf32, #tpu.memory_space<vmem>>, vector<16x16x4xf32>
    %38 = vector.shape_cast %37 : vector<16x16x4xf32> to vector<256x4xf32>
    %c0_48 = arith.constant 0 : index
    %c0_49 = arith.constant 0 : index
    %39 = vector.load %arg13[%c0_48, %c0_49] : memref<256x36xf32, #tpu.memory_space<vmem>>, vector<256x4xf32>
    tpu.vector_store %arg13[%c0_48, %c0_49], %38 {strides = array<i32>} : memref<256x36xf32, #tpu.memory_space<vmem>>, vector<256x4xf32>,
    %c0_50 = arith.constant 0 : index
    %c8_51 = arith.constant 8 : index
    %c0_52 = arith.constant 0 : index
    %40 = vector.load %arg11[%c0_50, %c8_51, %c0_52] : memref<18x32x4xf32, #tpu.memory_space<vmem>>, vector<16x16x4xf32>
    %41 = vector.shape_cast %40 : vector<16x16x4xf32> to vector<256x4xf32>
    %c0_53 = arith.constant 0 : index
    %c4_54 = arith.constant 4 : index
    %42 = vector.load %arg13[%c0_53, %c4_54] : memref<256x36xf32, #tpu.memory_space<vmem>>, vector<256x4xf32>
    tpu.vector_store %arg13[%c0_53, %c4_54], %41 {strides = array<i32>} : memref<256x36xf32, #tpu.memory_space<vmem>>, vector<256x4xf32>,
    %c0_55 = arith.constant 0 : index
    %c9_56 = arith.constant 9 : index
    %c0_57 = arith.constant 0 : index
    %43 = vector.load %arg11[%c0_55, %c9_56, %c0_57] : memref<18x32x4xf32, #tpu.memory_space<vmem>>, vector<16x16x4xf32>
    %44 = vector.shape_cast %43 : vector<16x16x4xf32> to vector<256x4xf32>
    %c0_58 = arith.constant 0 : index
    %c8_59 = arith.constant 8 : index
    %45 = vector.load %arg13[%c0_58, %c8_59] : memref<256x36xf32, #tpu.memory_space<vmem>>, vector<256x4xf32>
    tpu.vector_store %arg13[%c0_58, %c8_59], %44 {strides = array<i32>} : memref<256x36xf32, #tpu.memory_space<vmem>>, vector<256x4xf32>,
    %c1_60 = arith.constant 1 : index
    %c7_61 = arith.constant 7 : index
    %c0_62 = arith.constant 0 : index
    %46 = vector.load %arg11[%c1_60, %c7_61, %c0_62] : memref<18x32x4xf32, #tpu.memory_space<vmem>>, vector<16x16x4xf32>
    %47 = vector.shape_cast %46 : vector<16x16x4xf32> to vector<256x4xf32>
    %c0_63 = arith.constant 0 : index
    %c12_64 = arith.constant 12 : index
    %48 = vector.load %arg13[%c0_63, %c12_64] : memref<256x36xf32, #tpu.memory_space<vmem>>, vector<256x4xf32>
    tpu.vector_store %arg13[%c0_63, %c12_64], %47 {strides = array<i32>} : memref<256x36xf32, #tpu.memory_space<vmem>>, vector<256x4xf32>,
    %c1_65 = arith.constant 1 : index
    %c8_66 = arith.constant 8 : index
    %c0_67 = arith.constant 0 : index
    %49 = vector.load %arg11[%c1_65, %c8_66, %c0_67] : memref<18x32x4xf32, #tpu.memory_space<vmem>>, vector<16x16x4xf32>
    %50 = vector.shape_cast %49 : vector<16x16x4xf32> to vector<256x4xf32>
    %c0_68 = arith.constant 0 : index
    %c16_69 = arith.constant 16 : index
    %51 = vector.load %arg13[%c0_68, %c16_69] : memref<256x36xf32, #tpu.memory_space<vmem>>, vector<256x4xf32>
    tpu.vector_store %arg13[%c0_68, %c16_69], %50 {strides = array<i32>} : memref<256x36xf32, #tpu.memory_space<vmem>>, vector<256x4xf32>,
    %c1_70 = arith.constant 1 : index
    %c9_71 = arith.constant 9 : index
    %c0_72 = arith.constant 0 : index
    %52 = vector.load %arg11[%c1_70, %c9_71, %c0_72] : memref<18x32x4xf32, #tpu.memory_space<vmem>>, vector<16x16x4xf32>
    %53 = vector.shape_cast %52 : vector<16x16x4xf32> to vector<256x4xf32>
    %c0_73 = arith.constant 0 : index
    %c20_74 = arith.constant 20 : index
    %54 = vector.load %arg13[%c0_73, %c20_74] : memref<256x36xf32, #tpu.memory_space<vmem>>, vector<256x4xf32>
    tpu.vector_store %arg13[%c0_73, %c20_74], %53 {strides = array<i32>} : memref<256x36xf32, #tpu.memory_space<vmem>>, vector<256x4xf32>,
    %c2_75 = arith.constant 2 : index
    %c7_76 = arith.constant 7 : index
    %c0_77 = arith.constant 0 : index
    %55 = vector.load %arg11[%c2_75, %c7_76, %c0_77] : memref<18x32x4xf32, #tpu.memory_space<vmem>>, vector<16x16x4xf32>
    %56 = vector.shape_cast %55 : vector<16x16x4xf32> to vector<256x4xf32>
    %c0_78 = arith.constant 0 : index
    %c24_79 = arith.constant 24 : index
    %57 = vector.load %arg13[%c0_78, %c24_79] : memref<256x36xf32, #tpu.memory_space<vmem>>, vector<256x4xf32>
    tpu.vector_store %arg13[%c0_78, %c24_79], %56 {strides = array<i32>} : memref<256x36xf32, #tpu.memory_space<vmem>>, vector<256x4xf32>,
    %c2_80 = arith.constant 2 : index
    %c8_81 = arith.constant 8 : index
    %c0_82 = arith.constant 0 : index
    %58 = vector.load %arg11[%c2_80, %c8_81, %c0_82] : memref<18x32x4xf32, #tpu.memory_space<vmem>>, vector<16x16x4xf32>
    %59 = vector.shape_cast %58 : vector<16x16x4xf32> to vector<256x4xf32>
    %c0_83 = arith.constant 0 : index
    %c28_84 = arith.constant 28 : index
    %60 = vector.load %arg13[%c0_83, %c28_84] : memref<256x36xf32, #tpu.memory_space<vmem>>, vector<256x4xf32>
    tpu.vector_store %arg13[%c0_83, %c28_84], %59 {strides = array<i32>} : memref<256x36xf32, #tpu.memory_space<vmem>>, vector<256x4xf32>,
    %c2_85 = arith.constant 2 : index
    %c9_86 = arith.constant 9 : index
    %c0_87 = arith.constant 0 : index
    %61 = vector.load %arg11[%c2_85, %c9_86, %c0_87] : memref<18x32x4xf32, #tpu.memory_space<vmem>>, vector<16x16x4xf32>
    %62 = vector.shape_cast %61 : vector<16x16x4xf32> to vector<256x4xf32>
    %c0_88 = arith.constant 0 : index
    %c32_89 = arith.constant 32 : index
    %63 = vector.load %arg13[%c0_88, %c32_89] : memref<256x36xf32, #tpu.memory_space<vmem>>, vector<256x4xf32>
    tpu.vector_store %arg13[%c0_88, %c32_89], %62 {strides = array<i32>} : memref<256x36xf32, #tpu.memory_space<vmem>>, vector<256x4xf32>,
    %c0_90 = arith.constant 0 : index
    %c0_91 = arith.constant 0 : index
    %64 = vector.load %arg13[%c0_90, %c0_91] : memref<256x36xf32, #tpu.memory_space<vmem>>, vector<256x36xf32>
    %65 = arith.truncf %64 : vector<256x36xf32> to vector<256x36xbf16>
    %c0_92 = arith.constant 0 : index
    %c0_93 = arith.constant 0 : index
    %66 = vector.load %arg5[%c0_92, %c0_93] : memref<36x8xbf16, #tpu.memory_space<vmem>>, vector<36x8xbf16>
    %cst_94 = arith.constant dense<0.000000e+00> : vector<256x8xf32>
    %67 = tpu.matmul %65, %66, %cst_94 {dimension_numbers = #tpu.dot_dimension_numbers<[1], [0], [0], [1], [0, 0, 1, 1], [], []>} : vector<256x36xbf16>, vector<36x8xbf16>, vector<256x8xf32> -> vector<256x8xf32>
    %c1_95 = arith.constant 1 : index
    %c8_96 = arith.constant 8 : index
    %c0_97 = arith.constant 0 : index
    %68 = vector.load %arg11[%c1_95, %c8_96, %c0_97] : memref<18x32x4xf32, #tpu.memory_space<vmem>>, vector<16x16x4xf32>
    %69 = vector.shape_cast %68 : vector<16x16x4xf32> to vector<256x4xf32>
    %70 = vector.extract_strided_slice %36 {offsets = [0, 0], sizes = [256, 8], strides = [1, 1]} : vector<256x12xf32> to vector<256x8xf32>
    %71 = arith.addf %70, %67 : vector<256x8xf32>
    %c0_98 = arith.constant 0 : index
    %c0_99 = arith.constant 0 : index
    %72 = vector.load %arg7[%c0_98, %c0_99] : memref<1x8xf32, #tpu.memory_space<vmem>>, vector<1x8xf32>
    %73 = vector.broadcast %72 : vector<1x8xf32> to vector<256x8xf32>
    %74 = arith.addf %71, %73 : vector<256x8xf32>
    %75 = arith.negf %74 : vector<256x8xf32>
    %76 = math.exp %75 : vector<256x8xf32>
    %cst_100 = arith.constant 1.000000e+00 : f32
    %77 = vector.broadcast %cst_100 : f32 to vector<256x8xf32>
    %78 = arith.addf %77, %76 : vector<256x8xf32>
    %79 = arith.divf %77, %78 : vector<256x8xf32>
    %80 = vector.extract_strided_slice %79 {offsets = [0, 0], sizes = [256, 4], strides = [1, 1]} : vector<256x8xf32> to vector<256x4xf32>
    %81 = vector.extract_strided_slice %79 {offsets = [0, 4], sizes = [256, 4], strides = [1, 1]} : vector<256x8xf32> to vector<256x4xf32>
    %82 = arith.mulf %80, %69 : vector<256x4xf32>
    %83 = vector.shape_cast %82 : vector<256x4xf32> to vector<16x16x4xf32>
    %c1_101 = arith.constant 1 : index
    %c8_102 = arith.constant 8 : index
    %c0_103 = arith.constant 0 : index
    %84 = vector.load %arg12[%c1_101, %c8_102, %c0_103] : memref<18x32x4xf32, #tpu.memory_space<vmem>>, vector<16x16x4xf32>
    tpu.vector_store %arg12[%c1_101, %c8_102, %c0_103], %83 {strides = array<i32>} : memref<18x32x4xf32, #tpu.memory_space<vmem>>, vector<16x16x4xf32>,
    %c0_104 = arith.constant 0 : index
    %c7_105 = arith.constant 7 : index
    %c0_106 = arith.constant 0 : index
    %85 = vector.load %arg12[%c0_104, %c7_105, %c0_106] : memref<18x32x4xf32, #tpu.memory_space<vmem>>, vector<16x16x4xf32>
    %86 = vector.shape_cast %85 : vector<16x16x4xf32> to vector<256x4xf32>
    %c0_107 = arith.constant 0 : index
    %c0_108 = arith.constant 0 : index
    %87 = vector.load %arg13[%c0_107, %c0_108] : memref<256x36xf32, #tpu.memory_space<vmem>>, vector<256x4xf32>
    tpu.vector_store %arg13[%c0_107, %c0_108], %86 {strides = array<i32>} : memref<256x36xf32, #tpu.memory_space<vmem>>, vector<256x4xf32>,
    %c0_109 = arith.constant 0 : index
    %c8_110 = arith.constant 8 : index
    %c0_111 = arith.constant 0 : index
    %88 = vector.load %arg12[%c0_109, %c8_110, %c0_111] : memref<18x32x4xf32, #tpu.memory_space<vmem>>, vector<16x16x4xf32>
    %89 = vector.shape_cast %88 : vector<16x16x4xf32> to vector<256x4xf32>
    %c0_112 = arith.constant 0 : index
    %c4_113 = arith.constant 4 : index
    %90 = vector.load %arg13[%c0_112, %c4_113] : memref<256x36xf32, #tpu.memory_space<vmem>>, vector<256x4xf32>
    tpu.vector_store %arg13[%c0_112, %c4_113], %89 {strides = array<i32>} : memref<256x36xf32, #tpu.memory_space<vmem>>, vector<256x4xf32>,
    %c0_114 = arith.constant 0 : index
    %c9_115 = arith.constant 9 : index
    %c0_116 = arith.constant 0 : index
    %91 = vector.load %arg12[%c0_114, %c9_115, %c0_116] : memref<18x32x4xf32, #tpu.memory_space<vmem>>, vector<16x16x4xf32>
    %92 = vector.shape_cast %91 : vector<16x16x4xf32> to vector<256x4xf32>
    %c0_117 = arith.constant 0 : index
    %c8_118 = arith.constant 8 : index
    %93 = vector.load %arg13[%c0_117, %c8_118] : memref<256x36xf32, #tpu.memory_space<vmem>>, vector<256x4xf32>
    tpu.vector_store %arg13[%c0_117, %c8_118], %92 {strides = array<i32>} : memref<256x36xf32, #tpu.memory_space<vmem>>, vector<256x4xf32>,
    %c1_119 = arith.constant 1 : index
    %c7_120 = arith.constant 7 : index
    %c0_121 = arith.constant 0 : index
    %94 = vector.load %arg12[%c1_119, %c7_120, %c0_121] : memref<18x32x4xf32, #tpu.memory_space<vmem>>, vector<16x16x4xf32>
    %95 = vector.shape_cast %94 : vector<16x16x4xf32> to vector<256x4xf32>
    %c0_122 = arith.constant 0 : index
    %c12_123 = arith.constant 12 : index
    %96 = vector.load %arg13[%c0_122, %c12_123] : memref<256x36xf32, #tpu.memory_space<vmem>>, vector<256x4xf32>
    tpu.vector_store %arg13[%c0_122, %c12_123], %95 {strides = array<i32>} : memref<256x36xf32, #tpu.memory_space<vmem>>, vector<256x4xf32>,
    %c1_124 = arith.constant 1 : index
    %c8_125 = arith.constant 8 : index
    %c0_126 = arith.constant 0 : index
    %97 = vector.load %arg12[%c1_124, %c8_125, %c0_126] : memref<18x32x4xf32, #tpu.memory_space<vmem>>, vector<16x16x4xf32>
    %98 = vector.shape_cast %97 : vector<16x16x4xf32> to vector<256x4xf32>
    %c0_127 = arith.constant 0 : index
    %c16_128 = arith.constant 16 : index
    %99 = vector.load %arg13[%c0_127, %c16_128] : memref<256x36xf32, #tpu.memory_space<vmem>>, vector<256x4xf32>
    tpu.vector_store %arg13[%c0_127, %c16_128], %98 {strides = array<i32>} : memref<256x36xf32, #tpu.memory_space<vmem>>, vector<256x4xf32>,
    %c1_129 = arith.constant 1 : index
    %c9_130 = arith.constant 9 : index
    %c0_131 = arith.constant 0 : index
    %100 = vector.load %arg12[%c1_129, %c9_130, %c0_131] : memref<18x32x4xf32, #tpu.memory_space<vmem>>, vector<16x16x4xf32>
    %101 = vector.shape_cast %100 : vector<16x16x4xf32> to vector<256x4xf32>
    %c0_132 = arith.constant 0 : index
    %c20_133 = arith.constant 20 : index
    %102 = vector.load %arg13[%c0_132, %c20_133] : memref<256x36xf32, #tpu.memory_space<vmem>>, vector<256x4xf32>
    tpu.vector_store %arg13[%c0_132, %c20_133], %101 {strides = array<i32>} : memref<256x36xf32, #tpu.memory_space<vmem>>, vector<256x4xf32>,
    %c2_134 = arith.constant 2 : index
    %c7_135 = arith.constant 7 : index
    %c0_136 = arith.constant 0 : index
    %103 = vector.load %arg12[%c2_134, %c7_135, %c0_136] : memref<18x32x4xf32, #tpu.memory_space<vmem>>, vector<16x16x4xf32>
    %104 = vector.shape_cast %103 : vector<16x16x4xf32> to vector<256x4xf32>
    %c0_137 = arith.constant 0 : index
    %c24_138 = arith.constant 24 : index
    %105 = vector.load %arg13[%c0_137, %c24_138] : memref<256x36xf32, #tpu.memory_space<vmem>>, vector<256x4xf32>
    tpu.vector_store %arg13[%c0_137, %c24_138], %104 {strides = array<i32>} : memref<256x36xf32, #tpu.memory_space<vmem>>, vector<256x4xf32>,
    %c2_139 = arith.constant 2 : index
    %c8_140 = arith.constant 8 : index
    %c0_141 = arith.constant 0 : index
    %106 = vector.load %arg12[%c2_139, %c8_140, %c0_141] : memref<18x32x4xf32, #tpu.memory_space<vmem>>, vector<16x16x4xf32>
    %107 = vector.shape_cast %106 : vector<16x16x4xf32> to vector<256x4xf32>
    %c0_142 = arith.constant 0 : index
    %c28_143 = arith.constant 28 : index
    %108 = vector.load %arg13[%c0_142, %c28_143] : memref<256x36xf32, #tpu.memory_space<vmem>>, vector<256x4xf32>
    tpu.vector_store %arg13[%c0_142, %c28_143], %107 {strides = array<i32>} : memref<256x36xf32, #tpu.memory_space<vmem>>, vector<256x4xf32>,
    %c2_144 = arith.constant 2 : index
    %c9_145 = arith.constant 9 : index
    %c0_146 = arith.constant 0 : index
    %109 = vector.load %arg12[%c2_144, %c9_145, %c0_146] : memref<18x32x4xf32, #tpu.memory_space<vmem>>, vector<16x16x4xf32>
    %110 = vector.shape_cast %109 : vector<16x16x4xf32> to vector<256x4xf32>
    %c0_147 = arith.constant 0 : index
    %c32_148 = arith.constant 32 : index
    %111 = vector.load %arg13[%c0_147, %c32_148] : memref<256x36xf32, #tpu.memory_space<vmem>>, vector<256x4xf32>
    tpu.vector_store %arg13[%c0_147, %c32_148], %110 {strides = array<i32>} : memref<256x36xf32, #tpu.memory_space<vmem>>, vector<256x4xf32>,
    %c0_149 = arith.constant 0 : index
    %c0_150 = arith.constant 0 : index
    %112 = vector.load %arg13[%c0_149, %c0_150] : memref<256x36xf32, #tpu.memory_space<vmem>>, vector<256x36xf32>
    %113 = arith.truncf %112 : vector<256x36xf32> to vector<256x36xbf16>
    %c0_151 = arith.constant 0 : index
    %c0_152 = arith.constant 0 : index
    %114 = vector.load %arg6[%c0_151, %c0_152] : memref<36x4xbf16, #tpu.memory_space<vmem>>, vector<36x4xbf16>
    %cst_153 = arith.constant dense<0.000000e+00> : vector<256x4xf32>
    %115 = tpu.matmul %113, %114, %cst_153 {dimension_numbers = #tpu.dot_dimension_numbers<[1], [0], [0], [1], [0, 0, 1, 1], [], []>} : vector<256x36xbf16>, vector<36x4xbf16>, vector<256x4xf32> -> vector<256x4xf32>
    %116 = vector.extract_strided_slice %36 {offsets = [0, 8], sizes = [256, 4], strides = [1, 1]} : vector<256x12xf32> to vector<256x4xf32>
    %117 = arith.addf %116, %115 : vector<256x4xf32>
    %c0_154 = arith.constant 0 : index
    %c0_155 = arith.constant 0 : index
    %118 = vector.load %arg8[%c0_154, %c0_155] : memref<1x4xf32, #tpu.memory_space<vmem>>, vector<1x4xf32>
    %119 = vector.broadcast %118 : vector<1x4xf32> to vector<256x4xf32>
    %120 = arith.addf %117, %119 : vector<256x4xf32>
    %121 = math.tanh %120 : vector<256x4xf32>
    %cst_156 = arith.constant 1.000000e+00 : f32
    %122 = vector.broadcast %cst_156 : f32 to vector<256x4xf32>
    %123 = arith.subf %122, %81 : vector<256x4xf32>
    %124 = arith.mulf %123, %69 : vector<256x4xf32>
    %125 = arith.mulf %81, %121 : vector<256x4xf32>
    %126 = arith.addf %124, %125 : vector<256x4xf32>
    %127 = vector.shape_cast %126 : vector<256x4xf32> to vector<16x16x4xf32>
    %c0_157 = arith.constant 0 : index
    %c0_158 = arith.constant 0 : index
    %c0_159 = arith.constant 0 : index
    %c0_160 = arith.constant 0 : index
    %c0_161 = arith.constant 0 : index
    %128 = vector.load %arg9[%c0_157, %c0_158, %c0_159, %c0_160, %c0_161] : memref<1x1x16x16x4xf32, #tpu.memory_space<vmem>>, vector<1x1x16x16x4xf32>
    %129 = vector.shape_cast %128 : vector<1x1x16x16x4xf32> to vector<16x16x4xf32>
    %130 = vector.shape_cast %127 : vector<16x16x4xf32> to vector<1x1x16x16x4xf32>
    tpu.vector_store %arg9[%c0_157, %c0_158, %c0_159, %c0_160, %c0_161], %130 {strides = array<i32>} : memref<1x1x16x16x4xf32, #tpu.memory_space<vmem>>, vector<1x1x16x16x4xf32>,
    %c1_162 = arith.constant 1 : index
    %c8_163 = arith.constant 8 : index
    %c0_164 = arith.constant 0 : index
    %131 = vector.load %arg11[%c1_162, %c8_163, %c0_164] : memref<18x32x4xf32, #tpu.memory_space<vmem>>, vector<16x16x4xf32>
    tpu.vector_store %arg11[%c1_162, %c8_163, %c0_164], %127 {strides = array<i32>} : memref<18x32x4xf32, #tpu.memory_space<vmem>>, vector<16x16x4xf32>,
    %c2_i32 = arith.constant 2 : i32
    %132 = arith.cmpi eq, %arg1, %c2_i32 : i32
    %133 = arith.extui %132 : i1 to i32
    %c0_i32_165 = arith.constant 0 : i32
    %134 = arith.cmpi ne, %133, %c0_i32_165 : i32
    scf.if %134 {
      %c0_166 = arith.constant 0 : index
      %c0_167 = arith.constant 0 : index
      %c0_168 = arith.constant 0 : index
      %c0_169 = arith.constant 0 : index
      %135 = vector.load %arg10[%c0_166, %c0_167, %c0_168, %c0_169] : memref<1x16x16x4xf32, #tpu.memory_space<vmem>>, vector<1x16x16x4xf32>
      %136 = vector.shape_cast %135 : vector<1x16x16x4xf32> to vector<16x16x4xf32>
      %137 = vector.shape_cast %127 : vector<16x16x4xf32> to vector<1x16x16x4xf32>
      tpu.vector_store %arg10[%c0_166, %c0_167, %c0_168, %c0_169], %137 {strides = array<i32>} : memref<1x16x16x4xf32, #tpu.memory_space<vmem>>, vector<1x16x16x4xf32>,
    } else {
    }
    return
  }
  func.func @transform_0(%arg0: i32, %arg1: i32) -> (i32, i32, i32, i32, i32) {
    %c0_i32 = arith.constant 0 : i32
    %c0_i32_0 = arith.constant 0 : i32
    %c0_i32_1 = arith.constant 0 : i32
    %c0_i32_2 = arith.constant 0 : i32
    return %arg0, %arg1, %c0_i32, %c0_i32_0, %c0_i32_1 : i32, i32, i32, i32, i32
  }
  func.func @transform_1(%arg0: i32, %arg1: i32) -> (i32, i32, i32, i32) {
    %c0_i32 = arith.constant 0 : i32
    %c0_i32_0 = arith.constant 0 : i32
    %c0_i32_1 = arith.constant 0 : i32
    %c0_i32_2 = arith.constant 0 : i32
    return %arg0, %c0_i32, %c0_i32_0, %c0_i32_1 : i32, i32, i32, i32
  }
  func.func @transform_2(%arg0: i32, %arg1: i32) -> (i32, i32) {
    %c0_i32 = arith.constant 0 : i32
    %c0_i32_0 = arith.constant 0 : i32
    %c0_i32_1 = arith.constant 0 : i32
    return %c0_i32, %c0_i32_0 : i32, i32
  }
  func.func @transform_3(%arg0: i32, %arg1: i32) -> (i32, i32) {
    %c0_i32 = arith.constant 0 : i32
    %c0_i32_0 = arith.constant 0 : i32
    %c0_i32_1 = arith.constant 0 : i32
    return %c0_i32, %c0_i32_0 : i32, i32
  }
  func.func @transform_4(%arg0: i32, %arg1: i32) -> (i32, i32) {
    %c0_i32 = arith.constant 0 : i32
    %c0_i32_0 = arith.constant 0 : i32
    %c0_i32_1 = arith.constant 0 : i32
    return %c0_i32, %c0_i32_0 : i32, i32
  }
  func.func @transform_5(%arg0: i32, %arg1: i32) -> (i32, i32) {
    %c0_i32 = arith.constant 0 : i32
    %c0_i32_0 = arith.constant 0 : i32
    %c0_i32_1 = arith.constant 0 : i32
    return %c0_i32, %c0_i32_0 : i32, i32
  }
  func.func @transform_6(%arg0: i32, %arg1: i32) -> (i32, i32) {
    %c0_i32 = arith.constant 0 : i32
    %c0_i32_0 = arith.constant 0 : i32
    %c0_i32_1 = arith.constant 0 : i32
    return %c0_i32, %c0_i32_0 : i32, i32
  }
  func.func @transform_7(%arg0: i32, %arg1: i32) -> (i32, i32, i32, i32, i32) {
    %c0_i32 = arith.constant 0 : i32
    %c0_i32_0 = arith.constant 0 : i32
    %c0_i32_1 = arith.constant 0 : i32
    %c0_i32_2 = arith.constant 0 : i32
    return %arg0, %arg1, %c0_i32, %c0_i32_0, %c0_i32_1 : i32, i32, i32, i32, i32
  }
  func.func @transform_8(%arg0: i32, %arg1: i32) -> (i32, i32, i32, i32) {
    %c0_i32 = arith.constant 0 : i32
    %c0_i32_0 = arith.constant 0 : i32
    %c0_i32_1 = arith.constant 0 : i32
    %c0_i32_2 = arith.constant 0 : i32
    return %arg0, %c0_i32, %c0_i32_0, %c0_i32_1 : i32, i32, i32, i32
  }
}

</mosaic_0001>

<bundles_post_ra>
// kernel: tpu_custom_call.1
= control target key start
LH: loop header
LB: loop body
LE: loop exit
PB: predicated region body
PF: predicated region fallthrough
CT: control target
= control target key end

     0   :  { %s8325_s27 = smov 0   ;;  %s8327_s28 = smov 0   ;;  %s12569_s0 = inlined_call_operand.vmem [shape: f32[2,3,16,16,4], index: 0, kind: input, shape index: {}]   ;;  %s12570_s1 = inlined_call_operand.vmem [shape: f32[2,16,16,4], index: 1, kind: input, shape index: {}]   ;;  %s12571_s2 = inlined_call_operand.vmem [shape: bf16[36,12], index: 2, kind: input, shape index: {}]   ;;  %s12572_s3 = inlined_call_operand.vmem [shape: bf16[36,8], index: 3, kind: input, shape index: {}]   ;;  %s12573_s4 = inlined_call_operand.vmem [shape: bf16[36,4], index: 4, kind: input, shape index: {}]   ;;  %s12574_s5 = inlined_call_operand.vmem [shape: f32[1,8], index: 5, kind: input, shape index: {}]   ;;  %s12575_s6 = inlined_call_operand.vmem [shape: f32[1,4], index: 6, kind: input, shape index: {}]   ;;  %s12576_s7 = inlined_call_operand.vmem [shape: f32[2,3,16,16,4], index: 7, kind: output, shape index: {0}]   ;;  %s12577_s8 = inlined_call_operand.vmem [shape: f32[2,16,16,4], index: 8, kind: output, shape index: {1}]  }
   0x1   :  { %s8329_s29 = smov 0   ;;  %s8331_s30 = smov 0  }
   0x2   :  { %s8333_s9 = smov 0  }
   0x3 LB: > { %s28_s10 = sadd.s32 1, %s8260_s29  ;;  %s31_s11 = sadd.s32 1, %s8264_s30  ;;  %s8268_s9 = sphi %s8333_s9, %s19_s9   ;;  %s8264_s30 = sphi %s8331_s30, %s13021_s30   ;;  %s8260_s29 = sphi %s8329_s29, %s13020_s29   ;;  %s8256_s28 = sphi %s8327_s28, %s13019_s28   ;;  %s8252_s27 = sphi %s8325_s27, %s13018_s27  }
   0x4   : > { %p29_p0 = scmp.ge.s32.totalorder %s28_s10, 3  ;;  %p7657_p1 = scmp.ge.s32.totalorder %s8268_s9, 1 }
   0x5   : > { %p295_p2 = scmp.lt.s32.totalorder %s8268_s9, 7 }
   0x6   : > { %s13023_s10 = smov (%p29_p0, %s28_s10), 0  ;;  %s13025_s11 = smov (!%p29_p0, %s31_s11), %s8264_s30 }
   0x7   : > { %p296_p3 = pnand %p7657_p1, %p295_p2  ;;  %p33_p4 = scmp.ge.s32.totalorder %s13025_s11, 2 }
   0x9   : > { %s13027_s11 = smov (%p33_p4, %s13025_s11), 0  ;;  %299 = sbr.rel (%p296_p3) target bundleno = 2744 (0xab8), region = 48 }
   0xa   : > { %12750 = sst [smem:[#allocation5_spill]] %s13027_s11 }
  0x10   : > { %p347_p5 = scmp.lt.s32.totalorder %s8256_s28, 1  ;;  %p349_p6 = scmp.lt.s32.totalorder %s8252_s27, 2 }
  0x11   : > { %p7666_p7 = scmp.ne.s32.totalorder %s8252_s27, 0 }
  0x12   : > { %s13029_s28 = smov (!%p347_p5, %s8256_s28), 1  ;;  %vm380_vm0 = vcmask (!%p7666_p7), 31744   ;;  %v8270_v3 = vmov (!%p7666_p7), 0.0  }
  0x13   : > { %s350_s12 = scalar_select %p349_p6, %s8252_s27, 2 }
  0x14   : > { %s7944_s13 = smul.u32 96, %s13029_s28  ;;  %s7761_s14 = sshll.u32 %s13029_s28, 8  ;;  %386 = vst.msk [vmem:[#allocation2 + $0x28] sm:$0xff] (!%p7666_p7), %vm380_vm0, %v8270_v3  ;;  %381 = vst.msk [vmem:[#allocation2] sm:$0xff] (!%p7666_p7), %vm380_vm0, %v8270_v3 }
  0x15   : > { %s7658_s15 = sshll.u32 %s350_s12, 5  ;;  %s8362_s18 = scalar_lea.vmem %s12570_s1, %s7761_s14  ;;  %382 = vst.msk [vmem:[#allocation2 + $0x8] sm:$0xff] (!%p7666_p7), %vm380_vm0, %v8270_v3  ;;  %383 = vst.msk [vmem:[#allocation2 + $0x10] sm:$0xff] (!%p7666_p7), %vm380_vm0, %v8270_v3 }
  0x16   : > { %s353_s19 = sadd.s32 %s7944_s13, %s7658_s15  ;;  %s8367_s22 = scalar_lea.vmem %s12577_s8, %s7761_s14  ;;  %v8381_v0 = vld [vmem:[%s8362_s18] sm:$0xff] (!%p7666_p7)  ;;  %v8384_v1 = vld [vmem:[%s8362_s18 + $0x8] sm:$0xff] (!%p7666_p7)  ;;  %v8387_v2 = vld [vmem:[%s8362_s18 + $0x10] sm:$0xff] (!%p7666_p7)  ;;  %384 = vst.msk [vmem:[#allocation2 + $0x18] sm:$0xff] (!%p7666_p7), %vm380_vm0, %v8270_v3 }
  0x17   : > { %s7659_s23 = sshll.u32 %s353_s19, 3  ;;  %379 = sbr.rel (%p7666_p7) target bundleno = 109 (0x6d), region = 52  ;;  %385 = vst.msk [vmem:[#allocation2 + $0x20] sm:$0xff] (!%p7666_p7), %vm380_vm0, %v8270_v3  ;;  %387 = vst.msk [vmem:[#allocation2 + $0x30] sm:$0xff] (!%p7666_p7), %vm380_vm0, %v8270_v3  ;;  %v528_v4 = vld [vmem:[%s8362_s18 + $0x18] sm:$0xff] (!%p7666_p7)  ;;  %v529_v5 = vld [vmem:[%s8362_s18 + $0x20] sm:$0xff] (!%p7666_p7) }
  0x18   : > { %s8372_s26 = scalar_lea.vmem %s12569_s0, %s7659_s23  ;;  %s8377_s12 = scalar_lea.vmem %s12576_s7, %s7659_s23  ;;  %388 = vst.msk [vmem:[#allocation2 + $0x38] sm:$0xff] (!%p7666_p7), %vm380_vm0, %v8270_v3  ;;  %389 = vst.msk [vmem:[#allocation2 + $0x40] sm:$0xff] (!%p7666_p7), %vm380_vm0, %v8270_v3  ;;  %v530_v6 = vld [vmem:[%s8362_s18 + $0x28] sm:$0xff] (!%p7666_p7)  ;;  %v531_v7 = vld [vmem:[%s8362_s18 + $0x30] sm:$0xff] (!%p7666_p7) }
  0x19   : > { %390 = vst.msk [vmem:[#allocation2 + $0x48] sm:$0xff] (!%p7666_p7), %vm380_vm0, %v8270_v3  ;;  %391 = vst.msk [vmem:[#allocation2 + $0x50] sm:$0xff] (!%p7666_p7), %vm380_vm0, %v8270_v3  ;;  %v532_v8 = vld [vmem:[%s8362_s18 + $0x38] sm:$0xff] (!%p7666_p7)  ;;  %v533_v9 = vld [vmem:[%s8362_s18 + $0x40] sm:$0xff] (!%p7666_p7) }
  0x1a   : > { %392 = vst.msk [vmem:[#allocation2 + $0x58] sm:$0xff] (!%p7666_p7), %vm380_vm0, %v8270_v3  ;;  %393 = vst.msk [vmem:[#allocation2 + $0x60] sm:$0xff] (!%p7666_p7), %vm380_vm0, %v8270_v3  ;;  %v534_v10 = vld [vmem:[%s8362_s18 + $0x48] sm:$0xff] (!%p7666_p7)  ;;  %v535_v11 = vld [vmem:[%s8362_s18 + $0x50] sm:$0xff] (!%p7666_p7) }
  0x1b   : > { %394 = vst.msk [vmem:[#allocation2 + $0x68] sm:$0xff] (!%p7666_p7), %vm380_vm0, %v8270_v3  ;;  %395 = vst.msk [vmem:[#allocation2 + $0x70] sm:$0xff] (!%p7666_p7), %vm380_vm0, %v8270_v3  ;;  %v536_v12 = vld [vmem:[%s8362_s18 + $0x58] sm:$0xff] (!%p7666_p7)  ;;  %v537_v13 = vld [vmem:[%s8362_s18 + $0x60] sm:$0xff] (!%p7666_p7) }
  0x1c   : > { %396 = vst.msk [vmem:[#allocation2 + $0x78] sm:$0xff] (!%p7666_p7), %vm380_vm0, %v8270_v3  ;;  %397 = vst.msk [vmem:[#allocation2 + $0x80] sm:$0xff] (!%p7666_p7), %vm380_vm0, %v8270_v3  ;;  %v538_v14 = vld [vmem:[%s8362_s18 + $0x68] sm:$0xff] (!%p7666_p7)  ;;  %v539_v15 = vld [vmem:[%s8362_s18 + $0x70] sm:$0xff] (!%p7666_p7) }
  0x1d   : > { %398 = vst.msk [vmem:[#allocation2 + $0x88] sm:$0xff] (!%p7666_p7), %vm380_vm0, %v8270_v3  ;;  %399 = vst.msk [vmem:[#allocation2 + $0x90] sm:$0xff] (!%p7666_p7), %vm380_vm0, %v8270_v3  ;;  %v540_v16 = vld [vmem:[%s8362_s18 + $0x78] sm:$0xff] (!%p7666_p7)  ;;  %v541_v17 = vld [vmem:[%s8362_s18 + $0x80] sm:$0xff] (!%p7666_p7) }
  0x1e   : > { %400 = vst.msk [vmem:[#allocation2 + $0x98] sm:$0xff] %vm380_vm0, %v8270_v3  ;;  %401 = vst.msk [vmem:[#allocation2 + $0xa0] sm:$0xff] %vm380_vm0, %v8270_v3  ;;  %v542_v18 = vld [vmem:[%s8362_s18 + $0x88] sm:$0xff]  ;;  %v543_v19 = vld [vmem:[%s8362_s18 + $0x90] sm:$0xff] }
  0x1f   : > { %402 = vst.msk [vmem:[#allocation2 + $0xa8] sm:$0xff] %vm380_vm0, %v8270_v3  ;;  %403 = vst.msk [vmem:[#allocation2 + $0xb0] sm:$0xff] %vm380_vm0, %v8270_v3  ;;  %v544_v20 = vld [vmem:[%s8362_s18 + $0x98] sm:$0xff]  ;;  %v545_v21 = vld [vmem:[%s8362_s18 + $0xa0] sm:$0xff] }
  0x20   : > { %404 = vst.msk [vmem:[#allocation2 + $0xb8] sm:$0xff] %vm380_vm0, %v8270_v3  ;;  %405 = vst.msk [vmem:[#allocation2 + $0xc0] sm:$0xff] %vm380_vm0, %v8270_v3  ;;  %v546_v22 = vld [vmem:[%s8362_s18 + $0xa8] sm:$0xff]  ;;  %v547_v23 = vld [vmem:[%s8362_s18 + $0xb0] sm:$0xff] }
  0x21   : > { %406 = vst.msk [vmem:[#allocation2 + $0xc8] sm:$0xff] %vm380_vm0, %v8270_v3  ;;  %407 = vst.msk [vmem:[#allocation2 + $0xd0] sm:$0xff] %vm380_vm0, %v8270_v3  ;;  %v548_v24 = vld [vmem:[%s8362_s18 + $0xb8] sm:$0xff]  ;;  %v549_v25 = vld [vmem:[%s8362_s18 + $0xc0] sm:$0xff] }
  0x22   : > { %408 = vst.msk [vmem:[#allocation2 + $0xd8] sm:$0xff] %vm380_vm0, %v8270_v3  ;;  %409 = vst.msk [vmem:[#allocation2 + $0xe0] sm:$0xff] %vm380_vm0, %v8270_v3  ;;  %v550_v26 = vld [vmem:[%s8362_s18 + $0xc8] sm:$0xff]  ;;  %v551_v27 = vld [vmem:[%s8362_s18 + $0xd0] sm:$0xff] }
  0x23   : > { %410 = vst.msk [vmem:[#allocation2 + $0xe8] sm:$0xff] %vm380_vm0, %v8270_v3  ;;  %411 = vst.msk [vmem:[#allocation2 + $0xf0] sm:$0xff] %vm380_vm0, %v8270_v3  ;;  %v552_v28 = vld [vmem:[%s8362_s18 + $0xd8] sm:$0xff]  ;;  %v553_v29 = vld [vmem:[%s8362_s18 + $0xe0] sm:$0xff] }
  0x24   : > { %412 = vst.msk [vmem:[#allocation2 + $0xf8] sm:$0xff] %vm380_vm0, %v8270_v3  ;;  %413 = vst.msk [vmem:[#allocation2 + $0x100] sm:$0xff] %vm380_vm0, %v8270_v3  ;;  %v554_v30 = vld [vmem:[%s8362_s18 + $0xe8] sm:$0xff]  ;;  %v555_v31 = vld [vmem:[%s8362_s18 + $0xf0] sm:$0xff] }
  0x25   : > { %414 = vst.msk [vmem:[#allocation2 + $0x108] sm:$0xff] %vm380_vm0, %v8270_v3  ;;  %415 = vst.msk [vmem:[#allocation2 + $0x110] sm:$0xff] %vm380_vm0, %v8270_v3  ;;  %v556_v32 = vld [vmem:[%s8362_s18 + $0xf8] sm:$0xff] }
  0x26   : > { %416 = vst.msk [vmem:[#allocation2 + $0x118] sm:$0xff] %vm380_vm0, %v8270_v3  ;;  %417 = vst.msk [vmem:[#allocation2 + $0x120] sm:$0xff] %vm380_vm0, %v8270_v3 }
  0x27   : > { %418 = vst.msk [vmem:[#allocation2 + $0x128] sm:$0xff] %vm380_vm0, %v8270_v3  ;;  %419 = vst.msk [vmem:[#allocation2 + $0x130] sm:$0xff] %vm380_vm0, %v8270_v3 }
  0x28   : > { %420 = vst.msk [vmem:[#allocation2 + $0x138] sm:$0xff] %vm380_vm0, %v8270_v3  ;;  %421 = vst.msk [vmem:[#allocation2 + $0x140] sm:$0xff] %vm380_vm0, %v8270_v3 }
  0x29   : > { %422 = vst.msk [vmem:[#allocation2 + $0x148] sm:$0xff] %vm380_vm0, %v8270_v3  ;;  %423 = vst.msk [vmem:[#allocation2 + $0x150] sm:$0xff] %vm380_vm0, %v8270_v3 }
  0x2a   : > { %424 = vst.msk [vmem:[#allocation2 + $0x158] sm:$0xff] %vm380_vm0, %v8270_v3  ;;  %425 = vst.msk [vmem:[#allocation2 + $0x160] sm:$0xff] %vm380_vm0, %v8270_v3 }
  0x2b   : > { %426 = vst.msk [vmem:[#allocation2 + $0x168] sm:$0xff] %vm380_vm0, %v8270_v3  ;;  %427 = vst.msk [vmem:[#allocation2 + $0x170] sm:$0xff] %vm380_vm0, %v8270_v3 }
  0x2c   : > { %428 = vst.msk [vmem:[#allocation2 + $0x178] sm:$0xff] %vm380_vm0, %v8270_v3  ;;  %429 = vst.msk [vmem:[#allocation2 + $0x180] sm:$0xff] %vm380_vm0, %v8270_v3 }
  0x2d   : > { %430 = vst.msk [vmem:[#allocation2 + $0x188] sm:$0xff] %vm380_vm0, %v8270_v3  ;;  %431 = vst.msk [vmem:[#allocation2 + $0x190] sm:$0xff] %vm380_vm0, %v8270_v3 }
  0x2e   : > { %432 = vst.msk [vmem:[#allocation2 + $0x198] sm:$0xff] %vm380_vm0, %v8270_v3  ;;  %433 = vst.msk [vmem:[#allocation2 + $0x1a0] sm:$0xff] %vm380_vm0, %v8270_v3 }
  0x2f   : > { %434 = vst.msk [vmem:[#allocation2 + $0x1a8] sm:$0xff] %vm380_vm0, %v8270_v3  ;;  %435 = vst.msk [vmem:[#allocation2 + $0x1b0] sm:$0xff] %vm380_vm0, %v8270_v3 }
  0x30   : > { %436 = vst.msk [vmem:[#allocation2 + $0x1b8] sm:$0xff] %vm380_vm0, %v8270_v3  ;;  %437 = vst.msk [vmem:[#allocation2 + $0x1c0] sm:$0xff] %vm380_vm0, %v8270_v3 }
  0x31   : > { %438 = vst.msk [vmem:[#allocation2 + $0x1c8] sm:$0xff] %vm380_vm0, %v8270_v3  ;;  %439 = vst.msk [vmem:[#allocation2 + $0x1d0] sm:$0xff] %vm380_vm0, %v8270_v3 }
  0x32   : > { %440 = vst.msk [vmem:[#allocation2 + $0x1d8] sm:$0xff] %vm380_vm0, %v8270_v3  ;;  %441 = vst.msk [vmem:[#allocation2 + $0x1e0] sm:$0xff] %vm380_vm0, %v8270_v3 }
  0x33   : > { %442 = vst.msk [vmem:[#allocation2 + $0x1e8] sm:$0xff] %vm380_vm0, %v8270_v3  ;;  %443 = vst.msk [vmem:[#allocation2 + $0x1f0] sm:$0xff] %vm380_vm0, %v8270_v3 }
  0x34   : > { %444 = vst.msk [vmem:[#allocation2 + $0x1f8] sm:$0xff] %vm380_vm0, %v8270_v3  ;;  %445 = vst.msk [vmem:[#allocation2 + $0x200] sm:$0xff] %vm380_vm0, %v8270_v3 }
  0x35   : > { %446 = vst.msk [vmem:[#allocation2 + $0x208] sm:$0xff] %vm380_vm0, %v8270_v3  ;;  %447 = vst.msk [vmem:[#allocation2 + $0x210] sm:$0xff] %vm380_vm0, %v8270_v3 }
  0x36   : > { %448 = vst.msk [vmem:[#allocation2 + $0x218] sm:$0xff] %vm380_vm0, %v8270_v3  ;;  %449 = vst.msk [vmem:[#allocation2 + $0x220] sm:$0xff] %vm380_vm0, %v8270_v3 }
  0x37   : > { %450 = vst.msk [vmem:[#allocation2 + $0x228] sm:$0xff] %vm380_vm0, %v8270_v3  ;;  %451 = vst.msk [vmem:[#allocation2 + $0x230] sm:$0xff] %vm380_vm0, %v8270_v3 }
  0x38   : > { %452 = vst.msk [vmem:[#allocation2 + $0x238] sm:$0xff] %vm380_vm0, %v8270_v3  ;;  %453 = vst.msk [vmem:[#allocation3] sm:$0xff] %vm380_vm0, %v8270_v3 }
  0x39   : > { %454 = vst.msk [vmem:[#allocation3 + $0x8] sm:$0xff] %vm380_vm0, %v8270_v3  ;;  %455 = vst.msk [vmem:[#allocation3 + $0x10] sm:$0xff] %vm380_vm0, %v8270_v3 }
  0x3a   : > { %456 = vst.msk [vmem:[#allocation3 + $0x18] sm:$0xff] %vm380_vm0, %v8270_v3  ;;  %457 = vst.msk [vmem:[#allocation3 + $0x20] sm:$0xff] %vm380_vm0, %v8270_v3 }
  0x3b   : > { %458 = vst.msk [vmem:[#allocation3 + $0x28] sm:$0xff] %vm380_vm0, %v8270_v3  ;;  %459 = vst.msk [vmem:[#allocation3 + $0x30] sm:$0xff] %vm380_vm0, %v8270_v3 }
  0x3c   : > { %460 = vst.msk [vmem:[#allocation3 + $0x38] sm:$0xff] %vm380_vm0, %v8270_v3  ;;  %461 = vst.msk [vmem:[#allocation3 + $0x40] sm:$0xff] %vm380_vm0, %v8270_v3 }
  0x3d   : > { %462 = vst.msk [vmem:[#allocation3 + $0x48] sm:$0xff] %vm380_vm0, %v8270_v3  ;;  %463 = vst.msk [vmem:[#allocation3 + $0x50] sm:$0xff] %vm380_vm0, %v8270_v3 }
  0x3e   : > { %464 = vst.msk [vmem:[#allocation3 + $0x58] sm:$0xff] %vm380_vm0, %v8270_v3  ;;  %465 = vst.msk [vmem:[#allocation3 + $0x60] sm:$0xff] %vm380_vm0, %v8270_v3 }
  0x3f   : > { %466 = vst.msk [vmem:[#allocation3 + $0x68] sm:$0xff] %vm380_vm0, %v8270_v3  ;;  %467 = vst.msk [vmem:[#allocation3 + $0x70] sm:$0xff] %vm380_vm0, %v8270_v3 }
  0x40   : > { %468 = vst.msk [vmem:[#allocation3 + $0x78] sm:$0xff] %vm380_vm0, %v8270_v3  ;;  %469 = vst.msk [vmem:[#allocation3 + $0x80] sm:$0xff] %vm380_vm0, %v8270_v3 }
  0x41   : > { %470 = vst.msk [vmem:[#allocation3 + $0x88] sm:$0xff] %vm380_vm0, %v8270_v3  ;;  %471 = vst.msk [vmem:[#allocation3 + $0x90] sm:$0xff] %vm380_vm0, %v8270_v3 }
  0x42   : > { %472 = vst.msk [vmem:[#allocation3 + $0x98] sm:$0xff] %vm380_vm0, %v8270_v3  ;;  %473 = vst.msk [vmem:[#allocation3 + $0xa0] sm:$0xff] %vm380_vm0, %v8270_v3 }
  0x43   : > { %474 = vst.msk [vmem:[#allocation3 + $0xa8] sm:$0xff] %vm380_vm0, %v8270_v3  ;;  %475 = vst.msk [vmem:[#allocation3 + $0xb0] sm:$0xff] %vm380_vm0, %v8270_v3 }
  0x44   : > { %476 = vst.msk [vmem:[#allocation3 + $0xb8] sm:$0xff] %vm380_vm0, %v8270_v3  ;;  %477 = vst.msk [vmem:[#allocation3 + $0xc0] sm:$0xff] %vm380_vm0, %v8270_v3 }
  0x45   : > { %478 = vst.msk [vmem:[#allocation3 + $0xc8] sm:$0xff] %vm380_vm0, %v8270_v3  ;;  %479 = vst.msk [vmem:[#allocation3 + $0xd0] sm:$0xff] %vm380_vm0, %v8270_v3 }
  0x46   : > { %480 = vst.msk [vmem:[#allocation3 + $0xd8] sm:$0xff] %vm380_vm0, %v8270_v3  ;;  %481 = vst.msk [vmem:[#allocation3 + $0xe0] sm:$0xff] %vm380_vm0, %v8270_v3 }
  0x47   : > { %482 = vst.msk [vmem:[#allocation3 + $0xe8] sm:$0xff] %vm380_vm0, %v8270_v3  ;;  %483 = vst.msk [vmem:[#allocation3 + $0xf0] sm:$0xff] %vm380_vm0, %v8270_v3 }
  0x48   : > { %484 = vst.msk [vmem:[#allocation3 + $0xf8] sm:$0xff] %vm380_vm0, %v8270_v3  ;;  %485 = vst.msk [vmem:[#allocation3 + $0x100] sm:$0xff] %vm380_vm0, %v8270_v3 }
  0x49   : > { %486 = vst.msk [vmem:[#allocation3 + $0x108] sm:$0xff] %vm380_vm0, %v8270_v3  ;;  %487 = vst.msk [vmem:[#allocation3 + $0x110] sm:$0xff] %vm380_vm0, %v8270_v3 }
  0x4a   : > { %488 = vst.msk [vmem:[#allocation3 + $0x118] sm:$0xff] %vm380_vm0, %v8270_v3  ;;  %489 = vst.msk [vmem:[#allocation3 + $0x120] sm:$0xff] %vm380_vm0, %v8270_v3 }
  0x4b   : > { %490 = vst.msk [vmem:[#allocation3 + $0x128] sm:$0xff] %vm380_vm0, %v8270_v3  ;;  %491 = vst.msk [vmem:[#allocation3 + $0x130] sm:$0xff] %vm380_vm0, %v8270_v3 }
  0x4c   : > { %492 = vst.msk [vmem:[#allocation3 + $0x138] sm:$0xff] %vm380_vm0, %v8270_v3  ;;  %493 = vst.msk [vmem:[#allocation3 + $0x140] sm:$0xff] %vm380_vm0, %v8270_v3 }
  0x4d   : > { %494 = vst.msk [vmem:[#allocation3 + $0x148] sm:$0xff] %vm380_vm0, %v8270_v3  ;;  %495 = vst.msk [vmem:[#allocation3 + $0x150] sm:$0xff] %vm380_vm0, %v8270_v3 }
  0x4e   : > { %496 = vst.msk [vmem:[#allocation3 + $0x158] sm:$0xff] %vm380_vm0, %v8270_v3  ;;  %497 = vst.msk [vmem:[#allocation3 + $0x160] sm:$0xff] %vm380_vm0, %v8270_v3 }
  0x4f   : > { %498 = vst.msk [vmem:[#allocation3 + $0x168] sm:$0xff] %vm380_vm0, %v8270_v3  ;;  %499 = vst.msk [vmem:[#allocation3 + $0x170] sm:$0xff] %vm380_vm0, %v8270_v3 }
  0x50   : > { %500 = vst.msk [vmem:[#allocation3 + $0x178] sm:$0xff] %vm380_vm0, %v8270_v3  ;;  %501 = vst.msk [vmem:[#allocation3 + $0x180] sm:$0xff] %vm380_vm0, %v8270_v3 }
  0x51   : > { %502 = vst.msk [vmem:[#allocation3 + $0x188] sm:$0xff] %vm380_vm0, %v8270_v3  ;;  %503 = vst.msk [vmem:[#allocation3 + $0x190] sm:$0xff] %vm380_vm0, %v8270_v3 }
  0x52   : > { %504 = vst.msk [vmem:[#allocation3 + $0x198] sm:$0xff] %vm380_vm0, %v8270_v3  ;;  %505 = vst.msk [vmem:[#allocation3 + $0x1a0] sm:$0xff] %vm380_vm0, %v8270_v3 }
  0x53   : > { %506 = vst.msk [vmem:[#allocation3 + $0x1a8] sm:$0xff] %vm380_vm0, %v8270_v3  ;;  %507 = vst.msk [vmem:[#allocation3 + $0x1b0] sm:$0xff] %vm380_vm0, %v8270_v3 }
  0x54   : > { %508 = vst.msk [vmem:[#allocation3 + $0x1b8] sm:$0xff] %vm380_vm0, %v8270_v3  ;;  %509 = vst.msk [vmem:[#allocation3 + $0x1c0] sm:$0xff] %vm380_vm0, %v8270_v3 }
  0x55   : > { %510 = vst.msk [vmem:[#allocation3 + $0x1c8] sm:$0xff] %vm380_vm0, %v8270_v3  ;;  %511 = vst.msk [vmem:[#allocation3 + $0x1d0] sm:$0xff] %vm380_vm0, %v8270_v3 }
  0x56   : > { %512 = vst.msk [vmem:[#allocation3 + $0x1d8] sm:$0xff] %vm380_vm0, %v8270_v3  ;;  %513 = vst.msk [vmem:[#allocation3 + $0x1e0] sm:$0xff] %vm380_vm0, %v8270_v3 }
  0x57   : > { %514 = vst.msk [vmem:[#allocation3 + $0x1e8] sm:$0xff] %vm380_vm0, %v8270_v3  ;;  %515 = vst.msk [vmem:[#allocation3 + $0x1f0] sm:$0xff] %vm380_vm0, %v8270_v3 }
  0x58   : > { %516 = vst.msk [vmem:[#allocation3 + $0x1f8] sm:$0xff] %vm380_vm0, %v8270_v3  ;;  %517 = vst.msk [vmem:[#allocation3 + $0x200] sm:$0xff] %vm380_vm0, %v8270_v3 }
  0x59   : > { %518 = vst.msk [vmem:[#allocation3 + $0x208] sm:$0xff] %vm380_vm0, %v8270_v3  ;;  %519 = vst.msk [vmem:[#allocation3 + $0x210] sm:$0xff] %vm380_vm0, %v8270_v3 }
  0x5a   : > { %520 = vst.msk [vmem:[#allocation3 + $0x218] sm:$0xff] %vm380_vm0, %v8270_v3  ;;  %521 = vst.msk [vmem:[#allocation3 + $0x220] sm:$0xff] %vm380_vm0, %v8270_v3 }
  0x5b   : > { %522 = vst.msk [vmem:[#allocation3 + $0x228] sm:$0xff] %vm380_vm0, %v8270_v3  ;;  %523 = vst.msk [vmem:[#allocation3 + $0x230] sm:$0xff] %vm380_vm0, %v8270_v3 }
  0x5c   : > { %524 = vst.msk [vmem:[#allocation3 + $0x238] sm:$0xff] %vm380_vm0, %v8270_v3  ;;  %558 = vst.msk [vmem:[#allocation2 + $0x28] sm:$0xff] %vm380_vm0, %v8381_v0 }
  0x5d   : > { %559 = vst.msk [vmem:[#allocation2 + $0x30] sm:$0xff] %vm380_vm0, %v8384_v1  ;;  %560 = vst.msk [vmem:[#allocation2 + $0x48] sm:$0xff] %vm380_vm0, %v8387_v2 }
  0x5e   : > { %561 = vst.msk [vmem:[#allocation2 + $0x50] sm:$0xff] %vm380_vm0, %v528_v4  ;;  %562 = vst.msk [vmem:[#allocation2 + $0x68] sm:$0xff] %vm380_vm0, %v529_v5 }
  0x5f   : > { %563 = vst.msk [vmem:[#allocation2 + $0x70] sm:$0xff] %vm380_vm0, %v530_v6  ;;  %564 = vst.msk [vmem:[#allocation2 + $0x88] sm:$0xff] %vm380_vm0, %v531_v7 }
  0x60   : > { %565 = vst.msk [vmem:[#allocation2 + $0x90] sm:$0xff] %vm380_vm0, %v532_v8  ;;  %566 = vst.msk [vmem:[#allocation2 + $0xa8] sm:$0xff] %vm380_vm0, %v533_v9 }
  0x61   : > { %567 = vst.msk [vmem:[#allocation2 + $0xb0] sm:$0xff] %vm380_vm0, %v534_v10  ;;  %568 = vst.msk [vmem:[#allocation2 + $0xc8] sm:$0xff] %vm380_vm0, %v535_v11 }
  0x62   : > { %569 = vst.msk [vmem:[#allocation2 + $0xd0] sm:$0xff] %vm380_vm0, %v536_v12  ;;  %570 = vst.msk [vmem:[#allocation2 + $0xe8] sm:$0xff] %vm380_vm0, %v537_v13 }
  0x63   : > { %571 = vst.msk [vmem:[#allocation2 + $0xf0] sm:$0xff] %vm380_vm0, %v538_v14  ;;  %572 = vst.msk [vmem:[#allocation2 + $0x108] sm:$0xff] %vm380_vm0, %v539_v15 }
  0x64   : > { %573 = vst.msk [vmem:[#allocation2 + $0x110] sm:$0xff] %vm380_vm0, %v540_v16  ;;  %574 = vst.msk [vmem:[#allocation2 + $0x128] sm:$0xff] %vm380_vm0, %v541_v17 }
  0x65   : > { %575 = vst.msk [vmem:[#allocation2 + $0x130] sm:$0xff] %vm380_vm0, %v542_v18  ;;  %576 = vst.msk [vmem:[#allocation2 + $0x148] sm:$0xff] %vm380_vm0, %v543_v19 }
  0x66   : > { %577 = vst.msk [vmem:[#allocation2 + $0x150] sm:$0xff] %vm380_vm0, %v544_v20  ;;  %578 = vst.msk [vmem:[#allocation2 + $0x168] sm:$0xff] %vm380_vm0, %v545_v21 }
  0x67   : > { %579 = vst.msk [vmem:[#allocation2 + $0x170] sm:$0xff] %vm380_vm0, %v546_v22  ;;  %580 = vst.msk [vmem:[#allocation2 + $0x188] sm:$0xff] %vm380_vm0, %v547_v23 }
  0x68   : > { %581 = vst.msk [vmem:[#allocation2 + $0x190] sm:$0xff] %vm380_vm0, %v548_v24  ;;  %582 = vst.msk [vmem:[#allocation2 + $0x1a8] sm:$0xff] %vm380_vm0, %v549_v25 }
  0x69   : > { %583 = vst.msk [vmem:[#allocation2 + $0x1b0] sm:$0xff] %vm380_vm0, %v550_v26  ;;  %584 = vst.msk [vmem:[#allocation2 + $0x1c8] sm:$0xff] %vm380_vm0, %v551_v27 }
  0x6a   : > { %585 = vst.msk [vmem:[#allocation2 + $0x1d0] sm:$0xff] %vm380_vm0, %v552_v28  ;;  %586 = vst.msk [vmem:[#allocation2 + $0x1e8] sm:$0xff] %vm380_vm0, %v553_v29 }
  0x6b   : > { %587 = vst.msk [vmem:[#allocation2 + $0x1f0] sm:$0xff] %vm380_vm0, %v554_v30  ;;  %588 = vst.msk [vmem:[#allocation2 + $0x208] sm:$0xff] %vm380_vm0, %v555_v31 }
  0x6c   : > { %589 = vst.msk [vmem:[#allocation2 + $0x210] sm:$0xff] %vm380_vm0, %v556_v32 }
  0x6d PF: > { %v720_v33 = vld [vmem:[#allocation3 + $0x8] sm:$0xff]  ;;  %v590_v34 = vld [vmem:[%s8372_s26] sm:$0xff]  ;;  %vm623_vm1 = vcmask 31744   ;;  %v721_v35 = vld [vmem:[#allocation3 + $0x10] sm:$0xff]  ;;  %s8271_s11 = smov 4   ;;  %s8272_s13 = smov 8  }
  0x6e   : > { %784 = vrot.lane.b32.xlu0 %v720_v33, %s8271_s11  ;;  %624 = vst.msk [vmem:[#allocation3 + $0x28] sm:$0xff] %vm623_vm1, %v590_v34  ;;  %v591_v36 = vld [vmem:[%s8372_s26 + $0x8] sm:$0xff]  ;;  %v592_v37 = vld [vmem:[%s8372_s26 + $0x10] sm:$0xff]  ;;  %v593_v38 = vld [vmem:[%s8372_s26 + $0x18] sm:$0xff]  ;;  %vm880_vm2 = vcmask 64544   ;;  %s8273_s14 = smov 12  }
  0x6f   : > { %625 = vst.msk [vmem:[#allocation3 + $0x30] sm:$0xff] %vm623_vm1, %v591_v36  ;;  %626 = vst.msk [vmem:[#allocation3 + $0x48] sm:$0xff] %vm623_vm1, %v592_v37  ;;  %v594_v39 = vld [vmem:[%s8372_s26 + $0x20] sm:$0xff]  ;;  %v595_v40 = vld [vmem:[%s8372_s26 + $0x28] sm:$0xff]  ;;  %vm1073_vm3 = vcmask 97344   ;;  %s8274_s15 = smov 16  }
  0x70   : > { %627 = vst.msk [vmem:[#allocation3 + $0x50] sm:$0xff] %vm623_vm1, %v593_v38  ;;  %v596_v41 = vld [vmem:[%s8372_s26 + $0x30] sm:$0xff]  ;;  %628 = vst.msk [vmem:[#allocation3 + $0x68] sm:$0xff] %vm623_vm1, %v594_v39  ;;  %v597_v42 = vld [vmem:[%s8372_s26 + $0x38] sm:$0xff]  ;;  %vm1266_vm4 = vcmask 130144   ;;  %s8275_s16 = smov 20  }
  0x71   : > { %629 = vst.msk [vmem:[#allocation3 + $0x70] sm:$0xff] %vm623_vm1, %v595_v40  ;;  %630 = vst.msk [vmem:[#allocation3 + $0x88] sm:$0xff] %vm623_vm1, %v596_v41  ;;  %v598_v43 = vld [vmem:[%s8372_s26 + $0x40] sm:$0xff]  ;;  %v599_v44 = vld [vmem:[%s8372_s26 + $0x48] sm:$0xff]  ;;  %vm1459_vm5 = vcmask 162944   ;;  %s8276_s17 = smov 24  }
  0x72   : > { %631 = vst.msk [vmem:[#allocation3 + $0x90] sm:$0xff] %vm623_vm1, %v597_v42  ;;  %632 = vst.msk [vmem:[#allocation3 + $0xa8] sm:$0xff] %vm623_vm1, %v598_v43  ;;  %v600_v45 = vld [vmem:[%s8372_s26 + $0x50] sm:$0xff]  ;;  %v601_v46 = vld [vmem:[%s8372_s26 + $0x58] sm:$0xff]  ;;  %786 = vrot.lane.b32.xlu0 %v721_v35, %s8271_s11  ;;  %vm1652_vm6 = vcmask 195744   ;;  %s8277_s18 = smov 28  }
  0x73   : > { %633 = vst.msk [vmem:[#allocation3 + $0xb0] sm:$0xff] %vm623_vm1, %v599_v44  ;;  %v602_v47 = vld [vmem:[%s8372_s26 + $0x60] sm:$0xff]  ;;  %634 = vst.msk [vmem:[#allocation3 + $0xc8] sm:$0xff] %vm623_vm1, %v600_v45  ;;  %v603_v48 = vld [vmem:[%s8372_s26 + $0x68] sm:$0xff]  ;;  %vm1846_vm7 = vcmask 228544   ;;  %s8278_s24 = smov 32  }
  0x74   : > { %635 = vst.msk [vmem:[#allocation3 + $0xd0] sm:$0xff] %vm623_vm1, %v601_v46  ;;  %636 = vst.msk [vmem:[#allocation3 + $0xe8] sm:$0xff] %vm623_vm1, %v602_v47  ;;  %v604_v49 = vld [vmem:[%s8372_s26 + $0x70] sm:$0xff]  ;;  %v605_v50 = vld [vmem:[%s8372_s26 + $0x78] sm:$0xff]  ;;  %vm2382_vm8 = vcmask 1041408   ;;  %vm2039_vm9 = vcmask 261344  }
  0x75   : > { %637 = vst.msk [vmem:[#allocation3 + $0xf0] sm:$0xff] %vm623_vm1, %v603_v48  ;;  %638 = vst.msk [vmem:[#allocation3 + $0x108] sm:$0xff] %vm623_vm1, %v604_v49  ;;  %v606_v51 = vld [vmem:[%s8372_s26 + $0x80] sm:$0xff]  ;;  %v607_v52 = vld [vmem:[%s8372_s26 + $0x88] sm:$0xff]  ;;  %vm2232_vm10 = vcmask 294144   ;;  %vm2333_vm11 = vcmask 293888  }
  0x76   : > { %639 = vst.msk [vmem:[#allocation3 + $0x110] sm:$0xff] %vm623_vm1, %v605_v50  ;;  %v608_v53 = vld [vmem:[%s8372_s26 + $0x90] sm:$0xff]  ;;  %640 = vst.msk [vmem:[#allocation3 + $0x128] sm:$0xff] %vm623_vm1, %v606_v51  ;;  %v609_v54 = vld [vmem:[%s8372_s26 + $0x98] sm:$0xff]  ;;  %p7758_p8 = scmp.ne.s32.totalorder %s8252_s27, 2 }
  0x77   : > { %641 = vst.msk [vmem:[#allocation3 + $0x130] sm:$0xff] %vm623_vm1, %v607_v52  ;;  %642 = vst.msk [vmem:[#allocation3 + $0x148] sm:$0xff] %vm623_vm1, %v608_v53  ;;  %v610_v55 = vld [vmem:[%s8372_s26 + $0xa0] sm:$0xff]  ;;  %v611_v56 = vld [vmem:[%s8372_s26 + $0xa8] sm:$0xff] }
  0x78   : > { %v8784_v57 = vld [vmem:[#allocation3 + $0x28] sm:$0xff]  ;;  %643 = vst.msk [vmem:[#allocation3 + $0x150] sm:$0xff] %vm623_vm1, %v609_v54  ;;  %644 = vst.msk [vmem:[#allocation3 + $0x168] sm:$0xff] %vm623_vm1, %v610_v55  ;;  %v612_v58 = vld [vmem:[%s8372_s26 + $0xb0] sm:$0xff] }
  0x79   : > { %645 = vst.msk [vmem:[#allocation3 + $0x170] sm:$0xff] %vm623_vm1, %v611_v56  ;;  %v613_v59 = vld [vmem:[%s8372_s26 + $0xb8] sm:$0xff]  ;;  %788 = vrot.lane.b32.xlu1 %v8784_v57, %s8271_s11  ;;  %v8793_v60 = vld [vmem:[#allocation3 + $0x48] sm:$0xff]  ;;  %646 = vst.msk [vmem:[#allocation3 + $0x188] sm:$0xff] %vm623_vm1, %v612_v58 }
  0x7a   : > { %647 = vst.msk [vmem:[#allocation3 + $0x190] sm:$0xff] %vm623_vm1, %v613_v59  ;;  %v8797_v61 = vld [vmem:[#allocation3 + $0x30] sm:$0xff]  ;;  %792 = vrot.lane.b32.xlu0 %v8793_v60, %s8271_s11  ;;  %v8801_v62 = vld [vmem:[#allocation3 + $0x68] sm:$0xff]  ;;  %v614_v1 = vld [vmem:[%s8372_s26 + $0xc0] sm:$0xff] }
  0x7b   : > { %v8805_v63 = vld [vmem:[#allocation3 + $0x50] sm:$0xff]  ;;  %v8809_v0 = vld [vmem:[#allocation3 + $0x88] sm:$0xff]  ;;  %648 = vst.msk [vmem:[#allocation3 + $0x1a8] sm:$0xff] %vm623_vm1, %v614_v1  ;;  %v617_v4 = vld [vmem:[%s8372_s26 + $0xd8] sm:$0xff] }
  0x7c   : > { %v615_v2 = vld [vmem:[%s8372_s26 + $0xc8] sm:$0xff]  ;;  %v616_v3 = vld [vmem:[%s8372_s26 + $0xd0] sm:$0xff]  ;;  %651 = vst.msk [vmem:[#allocation3 + $0x1d0] sm:$0xff] %vm623_vm1, %v617_v4  ;;  %v618_v6 = vld [vmem:[%s8372_s26 + $0xe0] sm:$0xff] }
  0x7d   : > { %790 = vrot.lane.b32.xlu1 %v8797_v61, %s8271_s11  ;;  %v8818_v5 = vld [vmem:[#allocation3 + $0x70] sm:$0xff]  ;;  %649 = vst.msk [vmem:[#allocation3 + $0x1b0] sm:$0xff] %vm623_vm1, %v615_v2  ;;  %650 = vst.msk [vmem:[#allocation3 + $0x1c8] sm:$0xff] %vm623_vm1, %v616_v3  ;;  %v619_v7 = vld [vmem:[%s8372_s26 + $0xe8] sm:$0xff] }
  0x7e   : > { %796 = vrot.lane.b32.xlu0 %v8801_v62, %s8271_s11  ;;  %v8827_v8 = vld [vmem:[#allocation3 + $0xa8] sm:$0xff]  ;;  %652 = vst.msk [vmem:[#allocation3 + $0x1e8] sm:$0xff] %vm623_vm1, %v618_v6  ;;  %653 = vst.msk [vmem:[#allocation3 + $0x1f0] sm:$0xff] %vm623_vm1, %v619_v7  ;;  %v8833_v9 = vld [vmem:[#allocation3 + $0x90] sm:$0xff] }
  0x7f   : > { %v8837_v10 = vld [vmem:[#allocation3 + $0xc8] sm:$0xff]  ;;  %v8841_v11 = vld [vmem:[#allocation3 + $0xb0] sm:$0xff]  ;;  %v621_v4 = vld [vmem:[%s8372_s26 + $0xf8] sm:$0xff] }
  0x80   : > { %v8845_v12 = vld [vmem:[#allocation3 + $0xe8] sm:$0xff]  ;;  %v8851_v15 = vld [vmem:[#allocation3 + $0xd0] sm:$0xff]  ;;  %655 = vst.msk [vmem:[#allocation3 + $0x210] sm:$0xff] %vm623_vm1, %v621_v4 }
  0x81   : > { %794 = vrot.lane.b32.xlu1 %v8805_v63, %s8271_s11  ;;  %v656_v13 = vld [vmem:[#allocation3 + $0x7] sm:$0xff]  ;;  %v657_v16 = vld [vmem:[#allocation3 + $0xf] sm:$0xff] }
  0x82   : > { %800 = vrot.lane.b32.xlu0 %v8809_v0, %s8271_s11  ;;  %v8849_v14 = vld [vmem:[#allocation3 + $0x27] sm:$0xff]  ;;  %688 = vst.msk [vmem:[#allocation4] sm:$0xff] %vm623_vm1, %v656_v13  ;;  %689 = vst.msk [vmem:[#allocation4 + $0x8] sm:$0xff] %vm623_vm1, %v657_v16  ;;  %v8861_v18 = vld [vmem:[#allocation3 + $0x2f] sm:$0xff] }
  0x83   : > { %690 = vst.msk [vmem:[#allocation4 + $0x10] sm:$0xff] %vm623_vm1, %v8849_v14  ;;  %v8858_v17 = vld [vmem:[#allocation3 + $0x108] sm:$0xff]  ;;  %v8863_v19 = vld [vmem:[#allocation3 + $0xf0] sm:$0xff]  ;;  %691 = vst.msk [vmem:[#allocation4 + $0x18] sm:$0xff] %vm623_vm1, %v8861_v18 }
  0x84   : > { %v8867_v20 = vld [vmem:[#allocation3 + $0x47] sm:$0xff]  ;;  %v8869_v21 = vld [vmem:[#allocation3 + $0x4f] sm:$0xff] }
  0x85   : > { %798 = vrot.lane.b32.xlu1 %v8818_v5, %s8271_s11  ;;  %v8873_v22 = vld [vmem:[#allocation3 + $0x128] sm:$0xff]  ;;  %692 = vst.msk [vmem:[#allocation4 + $0x20] sm:$0xff] %vm623_vm1, %v8867_v20  ;;  %693 = vst.msk [vmem:[#allocation4 + $0x28] sm:$0xff] %vm623_vm1, %v8869_v21  ;;  %v8907_v31 = vld [vmem:[#allocation3 + $0x110] sm:$0xff] }
  0x86   : > { %804 = vrot.lane.b32.xlu0 %v8827_v8, %s8271_s11  ;;  %v8879_v23 = vld [vmem:[#allocation3 + $0x67] sm:$0xff]  ;;  %v8881_v24 = vld [vmem:[#allocation3 + $0x6f] sm:$0xff] }
  0x87   : > { %694 = vst.msk [vmem:[#allocation4 + $0x30] sm:$0xff] %vm623_vm1, %v8879_v23  ;;  %695 = vst.msk [vmem:[#allocation4 + $0x38] sm:$0xff] %vm623_vm1, %v8881_v24  ;;  %v8889_v25 = vld [vmem:[#allocation3 + $0x87] sm:$0xff]  ;;  %v8891_v26 = vld [vmem:[#allocation3 + $0x8f] sm:$0xff] }
  0x88   : > { %v8893_v27 = vld [vmem:[#allocation3 + $0xa7] sm:$0xff]  ;;  %696 = vst.msk [vmem:[#allocation4 + $0x40] sm:$0xff] %vm623_vm1, %v8889_v25  ;;  %697 = vst.msk [vmem:[#allocation4 + $0x48] sm:$0xff] %vm623_vm1, %v8891_v26  ;;  %v8901_v28 = vld [vmem:[#allocation3 + $0xaf] sm:$0xff] }
  0x89   : > { %802 = vrot.lane.b32.xlu1 %v8833_v9, %s8271_s11  ;;  %698 = vst.msk [vmem:[#allocation4 + $0x50] sm:$0xff] %vm623_vm1, %v8893_v27  ;;  %v8903_v29 = vld [vmem:[#allocation3 + $0xc7] sm:$0xff]  ;;  %v8905_v30 = vld [vmem:[#allocation3 + $0xcf] sm:$0xff]  ;;  %699 = vst.msk [vmem:[#allocation4 + $0x58] sm:$0xff] %vm623_vm1, %v8901_v28 }
  0x8a   : > { %808 = vrot.lane.b32.xlu0 %v8837_v10, %s8271_s11  ;;  %700 = vst.msk [vmem:[#allocation4 + $0x60] sm:$0xff] %vm623_vm1, %v8903_v29  ;;  %701 = vst.msk [vmem:[#allocation4 + $0x68] sm:$0xff] %vm623_vm1, %v8905_v30  ;;  %v8915_v32 = vld [vmem:[#allocation3 + $0xe7] sm:$0xff]  ;;  %v8917_v33 = vld [vmem:[#allocation3 + $0xef] sm:$0xff] }
  0x8b   : > { %v8919_v34 = vld [vmem:[#allocation3 + $0x107] sm:$0xff]  ;;  %702 = vst.msk [vmem:[#allocation4 + $0x70] sm:$0xff] %vm623_vm1, %v8915_v32  ;;  %703 = vst.msk [vmem:[#allocation4 + $0x78] sm:$0xff] %vm623_vm1, %v8917_v33  ;;  %v8931_v36 = vld [vmem:[#allocation3 + $0x10f] sm:$0xff] }
  0x8c   : > { %v8923_v35 = vld [vmem:[#allocation3 + $0x148] sm:$0xff]  ;;  %704 = vst.msk [vmem:[#allocation4 + $0x80] sm:$0xff] %vm623_vm1, %v8919_v34  ;;  %705 = vst.msk [vmem:[#allocation4 + $0x88] sm:$0xff] %vm623_vm1, %v8931_v36  ;;  %v8959_v43 = vld [vmem:[#allocation3 + $0x130] sm:$0xff] }
  0x8d   : > { %806 = vrot.lane.b32.xlu1 %v8841_v11, %s8271_s11  ;;  %v8933_v37 = vld [vmem:[#allocation3 + $0x127] sm:$0xff]  ;;  %v8935_v38 = vld [vmem:[#allocation3 + $0x12f] sm:$0xff] }
  0x8e   : > { %812 = vrot.lane.b32.xlu0 %v8845_v12, %s8271_s11  ;;  %706 = vst.msk [vmem:[#allocation4 + $0x90] sm:$0xff] %vm623_vm1, %v8933_v37  ;;  %707 = vst.msk [vmem:[#allocation4 + $0x98] sm:$0xff] %vm623_vm1, %v8935_v38  ;;  %v8945_v39 = vld [vmem:[#allocation3 + $0x147] sm:$0xff]  ;;  %v8947_v40 = vld [vmem:[#allocation3 + $0x14f] sm:$0xff] }
  0x8f   : > { %v8949_v41 = vld [vmem:[#allocation3 + $0x167] sm:$0xff]  ;;  %708 = vst.msk [vmem:[#allocation4 + $0xa0] sm:$0xff] %vm623_vm1, %v8945_v39  ;;  %709 = vst.msk [vmem:[#allocation4 + $0xa8] sm:$0xff] %vm623_vm1, %v8947_v40  ;;  %v8957_v42 = vld [vmem:[#allocation3 + $0x16f] sm:$0xff] }
  0x90   : > { %710 = vst.msk [vmem:[#allocation4 + $0xb0] sm:$0xff] %vm623_vm1, %v8949_v41  ;;  %711 = vst.msk [vmem:[#allocation4 + $0xb8] sm:$0xff] %vm623_vm1, %v8957_v42  ;;  %v8965_v44 = vld [vmem:[#allocation3 + $0x168] sm:$0xff]  ;;  %v8983_v49 = vld [vmem:[#allocation3 + $0x150] sm:$0xff] }
  0x91   : > { %810 = vrot.lane.b32.xlu1 %v8851_v15, %s8271_s11  ;;  %v8967_v45 = vld [vmem:[#allocation3 + $0x187] sm:$0xff]  ;;  %v8969_v46 = vld [vmem:[#allocation3 + $0x18f] sm:$0xff] }
  0x92   : > { %816 = vrot.lane.b32.xlu0 %v8858_v17, %s8271_s11  ;;  %712 = vst.msk [vmem:[#allocation4 + $0xc0] sm:$0xff] %vm623_vm1, %v8967_v45  ;;  %713 = vst.msk [vmem:[#allocation4 + $0xc8] sm:$0xff] %vm623_vm1, %v8969_v46  ;;  %v8979_v47 = vld [vmem:[#allocation3 + $0x1a7] sm:$0xff]  ;;  %v8981_v48 = vld [vmem:[#allocation3 + $0x1af] sm:$0xff] }
  0x93   : > { %714 = vst.msk [vmem:[#allocation4 + $0xd0] sm:$0xff] %vm623_vm1, %v8979_v47  ;;  %715 = vst.msk [vmem:[#allocation4 + $0xd8] sm:$0xff] %vm623_vm1, %v8981_v48  ;;  %v8991_v50 = vld [vmem:[#allocation3 + $0x188] sm:$0xff]  ;;  %v8999_v53 = vld [vmem:[#allocation3 + $0x170] sm:$0xff] }
  0x94   : > { %v8995_v51 = vld [vmem:[#allocation3 + $0x1c7] sm:$0xff]  ;;  %v8997_v52 = vld [vmem:[#allocation3 + $0x1cf] sm:$0xff] }
  0x95   : > { %814 = vrot.lane.b32.xlu1 %v8863_v19, %s8271_s11  ;;  %716 = vst.msk [vmem:[#allocation4 + $0xe0] sm:$0xff] %vm623_vm1, %v8995_v51  ;;  %717 = vst.msk [vmem:[#allocation4 + $0xe8] sm:$0xff] %vm623_vm1, %v8997_v52  ;;  %v9007_v54 = vld [vmem:[#allocation3 + $0x1a8] sm:$0xff]  ;;  %v9015_v58 = vld [vmem:[#allocation3 + $0x190] sm:$0xff] }
  0x96   : > { %820 = vrot.lane.b32.xlu0 %v8873_v22, %s8271_s11  ;;  %v9011_v55 = vld [vmem:[#allocation3 + $0x1e7] sm:$0xff]  ;;  %v9013_v56 = vld [vmem:[#allocation3 + $0x1ef] sm:$0xff] }
  0x97   : > { %718 = vst.msk [vmem:[#allocation4 + $0xf0] sm:$0xff] %vm623_vm1, %v9011_v55  ;;  %719 = vst.msk [vmem:[#allocation4 + $0xf8] sm:$0xff] %vm623_vm1, %v9013_v56  ;;  %v9023_v59 = vld [vmem:[#allocation3 + $0x1c8] sm:$0xff]  ;;  %v9027_v1 = vld [vmem:[#allocation3 + $0x1b0] sm:$0xff] }
  0x98   : > { %12751 = vst [vmem:[#allocation6_spill] sm:$0xff] %v9027_v1  ;;  %v9031_v2 = vld [vmem:[#allocation3 + $0x1e8] sm:$0xff]  ;;  %v620_v3 = vld [vmem:[%s8372_s26 + $0xf0] sm:$0xff] }
  0x99   : > { %818 = vrot.lane.b32.xlu1 %v8907_v31, %s8271_s11  ;;  %12752 = vst [vmem:[#allocation7_spill] sm:$0xff] %v9031_v2  ;;  %654 = vst.msk [vmem:[#allocation3 + $0x208] sm:$0xff] %vm623_vm1, %v620_v3  ;;  %v9039_v6 = vld [vmem:[#allocation3 + $0x1d0] sm:$0xff] }
  0x9a   : > { %824 = vrot.lane.b32.xlu0 %v8923_v35, %s8271_s11  ;;  %12753 = vst [vmem:[#allocation8_spill] sm:$0xff] %v9039_v6  ;;  %v913_v7 = vld [vmem:[#allocation3 + $0x9] sm:$0xff]  ;;  %v914_v3 = vld [vmem:[#allocation3 + $0x11] sm:$0xff] }
  0x9b   : > { %v9045_v13 = vld [vmem:[#allocation3 + $0x1f0] sm:$0xff] }
  0x9c   : > { %12754 = vst [vmem:[#allocation9_spill] sm:$0xff] %v9045_v13  ;;  %v9048_v16 = vld [vmem:[#allocation3 + $0x29] sm:$0xff] }
  0x9d   : > { %822 = vrot.lane.b32.xlu1 %v8959_v43, %s8271_s11  ;;  %12755 = vst [vmem:[#allocation10_spill] sm:$0xff] %v9048_v16  ;;  %v9054_v4 = vld [vmem:[#allocation3 + $0x49] sm:$0xff] }
  0x9e   : > { %828 = vrot.lane.b32.xlu0 %v8965_v44, %s8271_s11  ;;  %12756 = vst [vmem:[#allocation11_spill] sm:$0xff] %v9054_v4 }
  0xa1   : > { %826 = vrot.lane.b32.xlu1 %v8983_v49, %s8271_s11 }
  0xa2   : > { %832 = vrot.lane.b32.xlu0 %v8991_v50, %s8271_s11 }
  0xa5   : > { %830 = vrot.lane.b32.xlu1 %v8999_v53, %s8271_s11 }
  0xa6   : > { %836 = vrot.lane.b32.xlu0 %v9007_v54, %s8271_s11 }
  0xa9   : > { %834 = vrot.lane.b32.xlu1 %v9015_v58, %s8271_s11 }
  0xaa   : > { %840 = vrot.lane.b32.xlu0 %v9023_v59, %s8271_s11 }
  0xad   : > { %838 = vrot.lane.b32.xlu1 %v9027_v1, %s8271_s11 }
  0xae   : > { %844 = vrot.lane.b32.xlu0 %v9031_v2, %s8271_s11  ;;  %v9057_v2 = vld [vmem:[#allocation3 + $0x31] sm:$0xff] }
  0xaf   : > { %12757 = vst [vmem:[#allocation12_spill] sm:$0xff] %v9057_v2 }
  0xb1   : > { %842 = vrot.lane.b32.xlu1 %v9039_v6, %s8271_s11  ;;  %v9061_v6 = vld [vmem:[#allocation3 + $0x69] sm:$0xff] }
  0xb2   : > { %977 = vrot.lane.b32.xlu0 %v913_v7, %s8272_s13  ;;  %12758 = vst [vmem:[#allocation13_spill] sm:$0xff] %v9061_v6  ;;  %v9065_v7 = vld [vmem:[#allocation3 + $0x51] sm:$0xff] }
  0xb3   : > { %12759 = vst [vmem:[#allocation14_spill] sm:$0xff] %v9065_v7 }
  0xb5   : > { %846 = vrot.lane.b32.xlu1 %v9045_v13, %s8271_s11  ;;  %v9141_v13 = vld [vmem:[#allocation3 + $0x1a9] sm:$0xff] }
  0xb6   : > { %981 = vrot.lane.b32.xlu0 %v9048_v16, %s8272_s13  ;;  %v9069_v16 = vld [vmem:[#allocation3 + $0x89] sm:$0xff] }
  0xb7   : > { %12760 = vst [vmem:[#allocation15_spill] sm:$0xff] %v9069_v16 }
  0xb9   : > { %979 = vrot.lane.b32.xlu1 %v914_v3, %s8272_s13  ;;  %v9073_v3 = vld [vmem:[#allocation3 + $0x71] sm:$0xff] }
  0xba   : > { %985 = vrot.lane.b32.xlu0 %v9054_v4, %s8272_s13  ;;  %12761 = vst [vmem:[#allocation16_spill] sm:$0xff] %v9073_v3  ;;  %v9077_v4 = vld [vmem:[#allocation3 + $0xa9] sm:$0xff] }
  0xbb   : > { %12762 = vst [vmem:[#allocation17_spill] sm:$0xff] %v9077_v4 }
  0xbd   : > { %983 = vrot.lane.b32.xlu1 %v9057_v2, %s8272_s13  ;;  %v9081_v2 = vld [vmem:[#allocation3 + $0x91] sm:$0xff] }
  0xbe   : > { %989 = vrot.lane.b32.xlu0 %v9061_v6, %s8272_s13  ;;  %12763 = vst [vmem:[#allocation18_spill] sm:$0xff] %v9081_v2  ;;  %v9085_v6 = vld [vmem:[#allocation3 + $0xc9] sm:$0xff] }
  0xbf   : > { %12764 = vst [vmem:[#allocation19_spill] sm:$0xff] %v9085_v6 }
  0xc1   : > { %987 = vrot.lane.b32.xlu1 %v9065_v7, %s8272_s13  ;;  %v9089_v7 = vld [vmem:[#allocation3 + $0xb1] sm:$0xff] }
  0xc2   : > { %993 = vrot.lane.b32.xlu0 %v9069_v16, %s8272_s13  ;;  %12765 = vst [vmem:[#allocation20_spill] sm:$0xff] %v9089_v7  ;;  %v9093_v16 = vld [vmem:[#allocation3 + $0xe9] sm:$0xff] }
  0xc3   : > { %12766 = vst [vmem:[#allocation21_spill] sm:$0xff] %v9093_v16 }
  0xc5   : > { %991 = vrot.lane.b32.xlu1 %v9073_v3, %s8272_s13  ;;  %v9097_v3 = vld [vmem:[#allocation3 + $0xd1] sm:$0xff] }
  0xc6   : > { %997 = vrot.lane.b32.xlu0 %v9077_v4, %s8272_s13  ;;  %12767 = vst [vmem:[#allocation22_spill] sm:$0xff] %v9097_v3  ;;  %v9101_v4 = vld [vmem:[#allocation3 + $0x109] sm:$0xff] }
  0xc7   : > { %12768 = vst [vmem:[#allocation23_spill] sm:$0xff] %v9101_v4 }
  0xc9   : > { %995 = vrot.lane.b32.xlu1 %v9081_v2, %s8272_s13  ;;  %v9105_v2 = vld [vmem:[#allocation3 + $0xf1] sm:$0xff] }
  0xca   : > { %1001 = vrot.lane.b32.xlu0 %v9085_v6, %s8272_s13  ;;  %12769 = vst [vmem:[#allocation24_spill] sm:$0xff] %v9105_v2  ;;  %v9109_v6 = vld [vmem:[#allocation3 + $0x129] sm:$0xff] }
  0xcb   : > { %12770 = vst [vmem:[#allocation25_spill] sm:$0xff] %v9109_v6 }
  0xcd   : > { %999 = vrot.lane.b32.xlu1 %v9089_v7, %s8272_s13  ;;  %v9113_v7 = vld [vmem:[#allocation3 + $0x111] sm:$0xff] }
  0xce   : > { %1005 = vrot.lane.b32.xlu0 %v9093_v16, %s8272_s13  ;;  %12771 = vst [vmem:[#allocation26_spill] sm:$0xff] %v9113_v7  ;;  %v9117_v16 = vld [vmem:[#allocation3 + $0x149] sm:$0xff] }
  0xcf   : > { %12772 = vst [vmem:[#allocation27_spill] sm:$0xff] %v9117_v16 }
  0xd1   : > { %1003 = vrot.lane.b32.xlu1 %v9097_v3, %s8272_s13  ;;  %v9121_v3 = vld [vmem:[#allocation3 + $0x131] sm:$0xff] }
  0xd2   : > { %1009 = vrot.lane.b32.xlu0 %v9101_v4, %s8272_s13  ;;  %12773 = vst [vmem:[#allocation28_spill] sm:$0xff] %v9121_v3  ;;  %v9125_v4 = vld [vmem:[#allocation3 + $0x169] sm:$0xff] }
  0xd3   : > { %12774 = vst [vmem:[#allocation29_spill] sm:$0xff] %v9125_v4 }
  0xd5   : > { %1007 = vrot.lane.b32.xlu1 %v9105_v2, %s8272_s13  ;;  %v9129_v2 = vld [vmem:[#allocation3 + $0x151] sm:$0xff] }
  0xd6   : > { %1013 = vrot.lane.b32.xlu0 %v9109_v6, %s8272_s13  ;;  %12775 = vst [vmem:[#allocation30_spill] sm:$0xff] %v9129_v2  ;;  %v9133_v6 = vld [vmem:[#allocation3 + $0x189] sm:$0xff] }
  0xd7   : > { %12776 = vst [vmem:[#allocation31_spill] sm:$0xff] %v9133_v6 }
  0xd9   : > { %1011 = vrot.lane.b32.xlu1 %v9113_v7, %s8272_s13  ;;  %v9137_v7 = vld [vmem:[#allocation3 + $0x171] sm:$0xff] }
  0xda   : > { %1017 = vrot.lane.b32.xlu0 %v9117_v16, %s8272_s13  ;;  %12777 = vst [vmem:[#allocation32_spill] sm:$0xff] %v9137_v7 }
  0xdd   : > { %1015 = vrot.lane.b32.xlu1 %v9121_v3, %s8272_s13  ;;  %v9150_v3 = vld [vmem:[#allocation3 + $0x1c9] sm:$0xff] }
  0xde   : > { %1021 = vrot.lane.b32.xlu0 %v9125_v4, %s8272_s13  ;;  %v9146_v4 = vld [vmem:[#allocation3 + $0x191] sm:$0xff]  ;;  %12779 = vst [vmem:[#allocation34_spill] sm:$0xff] %v9150_v3 }
  0xdf   : > { %12778 = vst [vmem:[#allocation33_spill] sm:$0xff] %v9146_v4 }
  0xe0   : > { %v785_v16 = vpop.permute.xlu0 %784 }
  0xe1   : > { %1019 = vrot.lane.b32.xlu1 %v9129_v2, %s8272_s13  ;;  %881 = vst.msk [vmem:[#allocation4] sm:$0xff] %vm880_vm2, %v785_v16 }
  0xe2   : > { %1025 = vrot.lane.b32.xlu0 %v9133_v6, %s8272_s13  ;;  %v9155_v6 = vld [vmem:[#allocation3 + $0x1b1] sm:$0xff] }
  0xe3   : > { %12780 = vst [vmem:[#allocation35_spill] sm:$0xff] %v9155_v6 }
  0xe4   : > { %v787_v2 = vpop.permute.xlu0 %786 }
  0xe5   : > { %1023 = vrot.lane.b32.xlu1 %v9137_v7, %s8272_s13  ;;  %882 = vst.msk [vmem:[#allocation4 + $0x8] sm:$0xff] %vm880_vm2, %v787_v2  ;;  %v9159_v7 = vld [vmem:[#allocation3 + $0x1e9] sm:$0xff]  ;;  %v9165_v2 = vld [vmem:[#allocation3 + $0x1d1] sm:$0xff] }
  0xe6   : > { %1029 = vrot.lane.b32.xlu0 %v9141_v13, %s8272_s13 }
  0xe9   : > { %1027 = vrot.lane.b32.xlu1 %v9146_v4, %s8272_s13 }
  0xea   : > { %1033 = vrot.lane.b32.xlu0 %v9150_v3, %s8272_s13 }
  0xeb   : > { %v789_v16 = vpop.permute.xlu1 %788 }
  0xec   : > { %883 = vst.msk [vmem:[#allocation4 + $0x10] sm:$0xff] %vm880_vm2, %v789_v16  ;;  %v793_v1 = vpop.permute.xlu0 %792  ;;  %v9173_v16 = vld [vmem:[#allocation3 + $0x1f1] sm:$0xff] }
  0xed   : > { %1031 = vrot.lane.b32.xlu1 %v9155_v6, %s8272_s13  ;;  %885 = vst.msk [vmem:[#allocation4 + $0x20] sm:$0xff] %vm880_vm2, %v793_v1 }
  0xee   : > { %1037 = vrot.lane.b32.xlu0 %v9159_v7, %s8272_s13 }
  0xef   : > { %v791_v4 = vpop.permute.xlu1 %790 }
  0xf0   : > { %884 = vst.msk [vmem:[#allocation4 + $0x18] sm:$0xff] %vm880_vm2, %v791_v4  ;;  %v797_v3 = vpop.permute.xlu0 %796 }
  0xf1   : > { %1035 = vrot.lane.b32.xlu1 %v9165_v2, %s8272_s13  ;;  %887 = vst.msk [vmem:[#allocation4 + $0x30] sm:$0xff] %vm880_vm2, %v797_v3 }
  0xf2   : > { %1170 = vrot.lane.b32.xlu0 %v8849_v14, %s8273_s14 }
  0xf3   : > { %v795_v1 = vpop.permute.xlu1 %794 }
  0xf4   : > { %886 = vst.msk [vmem:[#allocation4 + $0x28] sm:$0xff] %vm880_vm2, %v795_v1  ;;  %v801_v6 = vpop.permute.xlu0 %800 }
  0xf5   : > { %1039 = vrot.lane.b32.xlu1 %v9173_v16, %s8272_s13  ;;  %889 = vst.msk [vmem:[#allocation4 + $0x40] sm:$0xff] %vm880_vm2, %v801_v6 }
  0xf6   : > { %1174 = vrot.lane.b32.xlu0 %v8867_v20, %s8273_s14 }
  0xf7   : > { %v799_v4 = vpop.permute.xlu1 %798 }
  0xf8   : > { %888 = vst.msk [vmem:[#allocation4 + $0x38] sm:$0xff] %vm880_vm2, %v799_v4  ;;  %v805_v3 = vpop.permute.xlu0 %804 }
  0xf9   : > { %1172 = vrot.lane.b32.xlu1 %v8861_v18, %s8273_s14  ;;  %891 = vst.msk [vmem:[#allocation4 + $0x50] sm:$0xff] %vm880_vm2, %v805_v3 }
  0xfa   : > { %1178 = vrot.lane.b32.xlu0 %v8879_v23, %s8273_s14 }
  0xfb   : > { %v803_v14 = vpop.permute.xlu1 %802 }
  0xfc   : > { %890 = vst.msk [vmem:[#allocation4 + $0x48] sm:$0xff] %vm880_vm2, %v803_v14  ;;  %v809_v1 = vpop.permute.xlu0 %808 }
  0xfd   : > { %1176 = vrot.lane.b32.xlu1 %v8869_v21, %s8273_s14  ;;  %893 = vst.msk [vmem:[#allocation4 + $0x60] sm:$0xff] %vm880_vm2, %v809_v1 }
  0xfe   : > { %1182 = vrot.lane.b32.xlu0 %v8889_v25, %s8273_s14 }
  0xff   : > { %v807_v6 = vpop.permute.xlu1 %806 }
 0x100   : > { %892 = vst.msk [vmem:[#allocation4 + $0x58] sm:$0xff] %vm880_vm2, %v807_v6  ;;  %v813_v18 = vpop.permute.xlu0 %812 }
 0x101   : > { %1180 = vrot.lane.b32.xlu1 %v8881_v24, %s8273_s14  ;;  %895 = vst.msk [vmem:[#allocation4 + $0x70] sm:$0xff] %vm880_vm2, %v813_v18 }
 0x102   : > { %1186 = vrot.lane.b32.xlu0 %v8893_v27, %s8273_s14 }
 0x103   : > { %v811_v4 = vpop.permute.xlu1 %810 }
 0x104   : > { %894 = vst.msk [vmem:[#allocation4 + $0x68] sm:$0xff] %vm880_vm2, %v811_v4  ;;  %v817_v3 = vpop.permute.xlu0 %816 }
 0x105   : > { %1184 = vrot.lane.b32.xlu1 %v8891_v26, %s8273_s14  ;;  %897 = vst.msk [vmem:[#allocation4 + $0x80] sm:$0xff] %vm880_vm2, %v817_v3 }
 0x106   : > { %1190 = vrot.lane.b32.xlu0 %v8903_v29, %s8273_s14 }
 0x107   : > { %v815_v14 = vpop.permute.xlu1 %814 }
 0x108   : > { %896 = vst.msk [vmem:[#allocation4 + $0x78] sm:$0xff] %vm880_vm2, %v815_v14  ;;  %v821_v1 = vpop.permute.xlu0 %820 }
 0x109   : > { %1188 = vrot.lane.b32.xlu1 %v8901_v28, %s8273_s14  ;;  %899 = vst.msk [vmem:[#allocation4 + $0x90] sm:$0xff] %vm880_vm2, %v821_v1 }
 0x10a   : > { %1194 = vrot.lane.b32.xlu0 %v8915_v32, %s8273_s14 }
 0x10b   : > { %v819_v6 = vpop.permute.xlu1 %818 }
 0x10c   : > { %898 = vst.msk [vmem:[#allocation4 + $0x88] sm:$0xff] %vm880_vm2, %v819_v6  ;;  %v825_v18 = vpop.permute.xlu0 %824 }
 0x10d   : > { %1192 = vrot.lane.b32.xlu1 %v8905_v30, %s8273_s14  ;;  %901 = vst.msk [vmem:[#allocation4 + $0xa0] sm:$0xff] %vm880_vm2, %v825_v18 }
 0x10e   : > { %1198 = vrot.lane.b32.xlu0 %v8919_v34, %s8273_s14 }
 0x10f   : > { %v823_v4 = vpop.permute.xlu1 %822 }
 0x110   : > { %900 = vst.msk [vmem:[#allocation4 + $0x98] sm:$0xff] %vm880_vm2, %v823_v4  ;;  %v829_v3 = vpop.permute.xlu0 %828 }
 0x111   : > { %1196 = vrot.lane.b32.xlu1 %v8917_v33, %s8273_s14  ;;  %903 = vst.msk [vmem:[#allocation4 + $0xb0] sm:$0xff] %vm880_vm2, %v829_v3 }
 0x112   : > { %1202 = vrot.lane.b32.xlu0 %v8933_v37, %s8273_s14 }
 0x113   : > { %v827_v14 = vpop.permute.xlu1 %826 }
 0x114   : > { %902 = vst.msk [vmem:[#allocation4 + $0xa8] sm:$0xff] %vm880_vm2, %v827_v14  ;;  %v833_v1 = vpop.permute.xlu0 %832 }
 0x115   : > { %1200 = vrot.lane.b32.xlu1 %v8931_v36, %s8273_s14  ;;  %905 = vst.msk [vmem:[#allocation4 + $0xc0] sm:$0xff] %vm880_vm2, %v833_v1 }
 0x116   : > { %1206 = vrot.lane.b32.xlu0 %v8945_v39, %s8273_s14 }
 0x117   : > { %v831_v6 = vpop.permute.xlu1 %830 }
 0x118   : > { %904 = vst.msk [vmem:[#allocation4 + $0xb8] sm:$0xff] %vm880_vm2, %v831_v6  ;;  %v837_v18 = vpop.permute.xlu0 %836 }
 0x119   : > { %1204 = vrot.lane.b32.xlu1 %v8935_v38, %s8273_s14  ;;  %907 = vst.msk [vmem:[#allocation4 + $0xd0] sm:$0xff] %vm880_vm2, %v837_v18 }
 0x11a   : > { %1210 = vrot.lane.b32.xlu0 %v8949_v41, %s8273_s14 }
 0x11b   : > { %v835_v4 = vpop.permute.xlu1 %834 }
 0x11c   : > { %906 = vst.msk [vmem:[#allocation4 + $0xc8] sm:$0xff] %vm880_vm2, %v835_v4  ;;  %v841_v3 = vpop.permute.xlu0 %840 }
 0x11d   : > { %1208 = vrot.lane.b32.xlu1 %v8947_v40, %s8273_s14  ;;  %909 = vst.msk [vmem:[#allocation4 + $0xe0] sm:$0xff] %vm880_vm2, %v841_v3 }
 0x11e   : > { %1214 = vrot.lane.b32.xlu0 %v8967_v45, %s8273_s14 }
 0x11f   : > { %v839_v14 = vpop.permute.xlu1 %838 }
 0x120   : > { %908 = vst.msk [vmem:[#allocation4 + $0xd8] sm:$0xff] %vm880_vm2, %v839_v14  ;;  %v845_v1 = vpop.permute.xlu0 %844 }
 0x121   : > { %1212 = vrot.lane.b32.xlu1 %v8957_v42, %s8273_s14  ;;  %911 = vst.msk [vmem:[#allocation4 + $0xf0] sm:$0xff] %vm880_vm2, %v845_v1  ;;  %v9261_v1 = vld [vmem:[#allocation3 + $0x207] sm:$0xff] }
 0x122   : > { %1218 = vrot.lane.b32.xlu0 %v8979_v47, %s8273_s14 }
 0x123   : > { %v843_v6 = vpop.permute.xlu1 %842 }
 0x124   : > { %910 = vst.msk [vmem:[#allocation4 + $0xe8] sm:$0xff] %vm880_vm2, %v843_v6  ;;  %v978_v18 = vpop.permute.xlu0 %977 }
 0x125   : > { %1216 = vrot.lane.b32.xlu1 %v8969_v46, %s8273_s14  ;;  %1074 = vst.msk [vmem:[#allocation4] sm:$0xff] %vm1073_vm3, %v978_v18 }
 0x126   : > { %1222 = vrot.lane.b32.xlu0 %v8995_v51, %s8273_s14 }
 0x127   : > { %v847_v4 = vpop.permute.xlu1 %846 }
 0x128   : > { %912 = vst.msk [vmem:[#allocation4 + $0xf8] sm:$0xff] %vm880_vm2, %v847_v4  ;;  %v982_v3 = vpop.permute.xlu0 %981 }
 0x129   : > { %1220 = vrot.lane.b32.xlu1 %v8981_v48, %s8273_s14  ;;  %1076 = vst.msk [vmem:[#allocation4 + $0x10] sm:$0xff] %vm1073_vm3, %v982_v3  ;;  %v9273_v3 = vld [vmem:[#allocation3 + $0x20f] sm:$0xff] }
 0x12a   : > { %1226 = vrot.lane.b32.xlu0 %v9011_v55, %s8273_s14 }
 0x12b   : > { %v980_v14 = vpop.permute.xlu1 %979 }
 0x12c   : > { %1075 = vst.msk [vmem:[#allocation4 + $0x8] sm:$0xff] %vm1073_vm3, %v980_v14  ;;  %v986_v6 = vpop.permute.xlu0 %985 }
 0x12d   : > { %1224 = vrot.lane.b32.xlu1 %v8997_v52, %s8273_s14  ;;  %1078 = vst.msk [vmem:[#allocation4 + $0x20] sm:$0xff] %vm1073_vm3, %v986_v6 }
 0x12e   : > { %1230 = vrot.lane.b32.xlu0 %v9261_v1, %s8273_s14 }
 0x12f   : > { %v984_v18 = vpop.permute.xlu1 %983 }
 0x130   : > { %1077 = vst.msk [vmem:[#allocation4 + $0x18] sm:$0xff] %vm1073_vm3, %v984_v18  ;;  %v990_v4 = vpop.permute.xlu0 %989 }
 0x131   : > { %1228 = vrot.lane.b32.xlu1 %v9013_v56, %s8273_s14  ;;  %1080 = vst.msk [vmem:[#allocation4 + $0x30] sm:$0xff] %vm1073_vm3, %v990_v4 }
 0x132   : > { %1363 = vrot.lane.b32.xlu0 %v8784_v57, %s8274_s15 }
 0x133   : > { %v988_v14 = vpop.permute.xlu1 %987 }
 0x134   : > { %1079 = vst.msk [vmem:[#allocation4 + $0x28] sm:$0xff] %vm1073_vm3, %v988_v14  ;;  %v994_v6 = vpop.permute.xlu0 %993 }
 0x135   : > { %1232 = vrot.lane.b32.xlu1 %v9273_v3, %s8273_s14  ;;  %1082 = vst.msk [vmem:[#allocation4 + $0x40] sm:$0xff] %vm1073_vm3, %v994_v6  ;;  %v12781_v6 = vld [vmem:[#allocation6_spill] sm:$0xff] }
 0x136   : > { %1367 = vrot.lane.b32.xlu0 %v8793_v60, %s8274_s15 }
 0x137   : > { %v992_v18 = vpop.permute.xlu1 %991 }
 0x138   : > { %1081 = vst.msk [vmem:[#allocation4 + $0x38] sm:$0xff] %vm1073_vm3, %v992_v18  ;;  %v998_v4 = vpop.permute.xlu0 %997 }
 0x139   : > { %1365 = vrot.lane.b32.xlu1 %v8797_v61, %s8274_s15  ;;  %1084 = vst.msk [vmem:[#allocation4 + $0x50] sm:$0xff] %vm1073_vm3, %v998_v4  ;;  %v9361_v4 = vld [vmem:[#allocation3 + $0x208] sm:$0xff] }
 0x13a   : > { %1371 = vrot.lane.b32.xlu0 %v8801_v62, %s8274_s15 }
 0x13b   : > { %v996_v57 = vpop.permute.xlu1 %995 }
 0x13c   : > { %1083 = vst.msk [vmem:[#allocation4 + $0x48] sm:$0xff] %vm1073_vm3, %v996_v57  ;;  %v1002_v14 = vpop.permute.xlu0 %1001 }
 0x13d   : > { %1369 = vrot.lane.b32.xlu1 %v8805_v63, %s8274_s15  ;;  %1086 = vst.msk [vmem:[#allocation4 + $0x60] sm:$0xff] %vm1073_vm3, %v1002_v14 }
 0x13e   : > { %1375 = vrot.lane.b32.xlu0 %v8809_v0, %s8274_s15 }
 0x13f   : > { %v1000_v60 = vpop.permute.xlu1 %999 }
 0x140   : > { %1085 = vst.msk [vmem:[#allocation4 + $0x58] sm:$0xff] %vm1073_vm3, %v1000_v60  ;;  %v1006_v61 = vpop.permute.xlu0 %1005  ;;  %v12784_v60 = vld [vmem:[#allocation9_spill] sm:$0xff] }
 0x141   : > { %1373 = vrot.lane.b32.xlu1 %v8818_v5, %s8274_s15  ;;  %1088 = vst.msk [vmem:[#allocation4 + $0x70] sm:$0xff] %vm1073_vm3, %v1006_v61  ;;  %v9373_v61 = vld [vmem:[#allocation3 + $0x210] sm:$0xff] }
 0x142   : > { %1379 = vrot.lane.b32.xlu0 %v8827_v8, %s8274_s15 }
 0x143   : > { %v1004_v62 = vpop.permute.xlu1 %1003 }
 0x144   : > { %1087 = vst.msk [vmem:[#allocation4 + $0x68] sm:$0xff] %vm1073_vm3, %v1004_v62  ;;  %v1010_v63 = vpop.permute.xlu0 %1009  ;;  %v12785_v62 = vld [vmem:[#allocation10_spill] sm:$0xff] }
 0x145   : > { %1377 = vrot.lane.b32.xlu1 %v8833_v9, %s8274_s15  ;;  %1090 = vst.msk [vmem:[#allocation4 + $0x80] sm:$0xff] %vm1073_vm3, %v1010_v63 }
 0x146   : > { %1383 = vrot.lane.b32.xlu0 %v8837_v10, %s8274_s15 }
 0x147   : > { %v1008_v0 = vpop.permute.xlu1 %1007 }
 0x148   : > { %1089 = vst.msk [vmem:[#allocation4 + $0x78] sm:$0xff] %vm1073_vm3, %v1008_v0  ;;  %v1014_v5 = vpop.permute.xlu0 %1013 }
 0x149   : > { %1381 = vrot.lane.b32.xlu1 %v8841_v11, %s8274_s15  ;;  %1092 = vst.msk [vmem:[#allocation4 + $0x90] sm:$0xff] %vm1073_vm3, %v1014_v5  ;;  %v12786_v5 = vld [vmem:[#allocation11_spill] sm:$0xff] }
 0x14a   : > { %1387 = vrot.lane.b32.xlu0 %v8845_v12, %s8274_s15 }
 0x14b   : > { %v1012_v8 = vpop.permute.xlu1 %1011 }
 0x14c   : > { %1091 = vst.msk [vmem:[#allocation4 + $0x88] sm:$0xff] %vm1073_vm3, %v1012_v8  ;;  %v1018_v9 = vpop.permute.xlu0 %1017 }
 0x14d   : > { %1385 = vrot.lane.b32.xlu1 %v8851_v15, %s8274_s15  ;;  %1094 = vst.msk [vmem:[#allocation4 + $0xa0] sm:$0xff] %vm1073_vm3, %v1018_v9 }
 0x14e   : > { %1391 = vrot.lane.b32.xlu0 %v8858_v17, %s8274_s15 }
 0x14f   : > { %v1016_v10 = vpop.permute.xlu1 %1015 }
 0x150   : > { %1093 = vst.msk [vmem:[#allocation4 + $0x98] sm:$0xff] %vm1073_vm3, %v1016_v10  ;;  %v1022_v11 = vpop.permute.xlu0 %1021  ;;  %v12787_v10 = vld [vmem:[#allocation12_spill] sm:$0xff] }
 0x151   : > { %1389 = vrot.lane.b32.xlu1 %v8863_v19, %s8274_s15  ;;  %1096 = vst.msk [vmem:[#allocation4 + $0xb0] sm:$0xff] %vm1073_vm3, %v1022_v11  ;;  %v12788_v11 = vld [vmem:[#allocation13_spill] sm:$0xff] }
 0x152   : > { %1395 = vrot.lane.b32.xlu0 %v8873_v22, %s8274_s15 }
 0x153   : > { %v1020_v12 = vpop.permute.xlu1 %1019 }
 0x154   : > { %1095 = vst.msk [vmem:[#allocation4 + $0xa8] sm:$0xff] %vm1073_vm3, %v1020_v12  ;;  %v1026_v15 = vpop.permute.xlu0 %1025 }
 0x155   : > { %1393 = vrot.lane.b32.xlu1 %v8907_v31, %s8274_s15  ;;  %1098 = vst.msk [vmem:[#allocation4 + $0xc0] sm:$0xff] %vm1073_vm3, %v1026_v15 }
 0x156   : > { %1399 = vrot.lane.b32.xlu0 %v8923_v35, %s8274_s15 }
 0x157   : > { %v1024_v17 = vpop.permute.xlu1 %1023 }
 0x158   : > { %1097 = vst.msk [vmem:[#allocation4 + $0xb8] sm:$0xff] %vm1073_vm3, %v1024_v17  ;;  %v1030_v19 = vpop.permute.xlu0 %1029  ;;  %v12789_v17 = vld [vmem:[#allocation14_spill] sm:$0xff] }
 0x159   : > { %1397 = vrot.lane.b32.xlu1 %v8959_v43, %s8274_s15  ;;  %1100 = vst.msk [vmem:[#allocation4 + $0xd0] sm:$0xff] %vm1073_vm3, %v1030_v19  ;;  %v12790_v19 = vld [vmem:[#allocation15_spill] sm:$0xff] }
 0x15a   : > { %1403 = vrot.lane.b32.xlu0 %v8965_v44, %s8274_s15 }
 0x15b   : > { %v1028_v22 = vpop.permute.xlu1 %1027 }
 0x15c   : > { %1099 = vst.msk [vmem:[#allocation4 + $0xc8] sm:$0xff] %vm1073_vm3, %v1028_v22  ;;  %v1034_v31 = vpop.permute.xlu0 %1033 }
 0x15d   : > { %1401 = vrot.lane.b32.xlu1 %v8983_v49, %s8274_s15  ;;  %1102 = vst.msk [vmem:[#allocation4 + $0xe0] sm:$0xff] %vm1073_vm3, %v1034_v31 }
 0x15e   : > { %1407 = vrot.lane.b32.xlu0 %v8991_v50, %s8274_s15 }
 0x15f   : > { %v1032_v35 = vpop.permute.xlu1 %1031 }
 0x160   : > { %1101 = vst.msk [vmem:[#allocation4 + $0xd8] sm:$0xff] %vm1073_vm3, %v1032_v35  ;;  %v1038_v43 = vpop.permute.xlu0 %1037  ;;  %v12791_v35 = vld [vmem:[#allocation16_spill] sm:$0xff] }
 0x161   : > { %1405 = vrot.lane.b32.xlu1 %v8999_v53, %s8274_s15  ;;  %1104 = vst.msk [vmem:[#allocation4 + $0xf0] sm:$0xff] %vm1073_vm3, %v1038_v43  ;;  %v12792_v43 = vld [vmem:[#allocation17_spill] sm:$0xff] }
 0x162   : > { %1411 = vrot.lane.b32.xlu0 %v9007_v54, %s8274_s15  ;;  %v12782_v54 = vld [vmem:[#allocation7_spill] sm:$0xff] }
 0x163   : > { %v1036_v44 = vpop.permute.xlu1 %1035 }
 0x164   : > { %1103 = vst.msk [vmem:[#allocation4 + $0xe8] sm:$0xff] %vm1073_vm3, %v1036_v44  ;;  %v1171_v49 = vpop.permute.xlu0 %1170 }
 0x165   : > { %1409 = vrot.lane.b32.xlu1 %v9015_v58, %s8274_s15  ;;  %1267 = vst.msk [vmem:[#allocation4] sm:$0xff] %vm1266_vm4, %v1171_v49 }
 0x166   : > { %1415 = vrot.lane.b32.xlu0 %v9023_v59, %s8274_s15  ;;  %v12783_v59 = vld [vmem:[#allocation8_spill] sm:$0xff] }
 0x167   : > { %v1040_v50 = vpop.permute.xlu1 %1039 }
 0x168   : > { %1105 = vst.msk [vmem:[#allocation4 + $0xf8] sm:$0xff] %vm1073_vm3, %v1040_v50  ;;  %v1175_v53 = vpop.permute.xlu0 %1174  ;;  %v12793_v50 = vld [vmem:[#allocation18_spill] sm:$0xff] }
 0x169   : > { %1413 = vrot.lane.b32.xlu1 %v12781_v6, %s8274_s15  ;;  %1269 = vst.msk [vmem:[#allocation4 + $0x10] sm:$0xff] %vm1266_vm4, %v1175_v53  ;;  %v12794_v53 = vld [vmem:[#allocation19_spill] sm:$0xff] }
 0x16a   : > { %1419 = vrot.lane.b32.xlu0 %v12782_v54, %s8274_s15 }
 0x16b   : > { %v1173_v18 = vpop.permute.xlu1 %1172 }
 0x16c   : > { %1268 = vst.msk [vmem:[#allocation4 + $0x8] sm:$0xff] %vm1266_vm4, %v1173_v18  ;;  %v1179_v58 = vpop.permute.xlu0 %1178  ;;  %v12795_v18 = vld [vmem:[#allocation20_spill] sm:$0xff] }
 0x16d   : > { %1417 = vrot.lane.b32.xlu1 %v12783_v59, %s8274_s15  ;;  %1271 = vst.msk [vmem:[#allocation4 + $0x20] sm:$0xff] %vm1266_vm4, %v1179_v58  ;;  %v12796_v58 = vld [vmem:[#allocation21_spill] sm:$0xff] }
 0x16e   : > { %1423 = vrot.lane.b32.xlu0 %v9361_v4, %s8274_s15 }
 0x16f   : > { %v1177_v57 = vpop.permute.xlu1 %1176 }
 0x170   : > { %1270 = vst.msk [vmem:[#allocation4 + $0x18] sm:$0xff] %vm1266_vm4, %v1177_v57  ;;  %v1183_v14 = vpop.permute.xlu0 %1182 }
 0x171   : > { %1421 = vrot.lane.b32.xlu1 %v12784_v60, %s8274_s15  ;;  %1273 = vst.msk [vmem:[#allocation4 + $0x30] sm:$0xff] %vm1266_vm4, %v1183_v14  ;;  %v12797_v14 = vld [vmem:[#allocation22_spill] sm:$0xff]  ;;  %v12798_v60 = vld [vmem:[#allocation23_spill] sm:$0xff] }
 0x172   : > { %1556 = vrot.lane.b32.xlu0 %v12785_v62, %s8275_s16 }
 0x173   : > { %v1181_v63 = vpop.permute.xlu1 %1180 }
 0x174   : > { %1272 = vst.msk [vmem:[#allocation4 + $0x28] sm:$0xff] %vm1266_vm4, %v1181_v63  ;;  %v1187_v0 = vpop.permute.xlu0 %1186 }
 0x175   : > { %1425 = vrot.lane.b32.xlu1 %v9373_v61, %s8274_s15  ;;  %1275 = vst.msk [vmem:[#allocation4 + $0x40] sm:$0xff] %vm1266_vm4, %v1187_v0  ;;  %v12799_v0 = vld [vmem:[#allocation24_spill] sm:$0xff] }
 0x176   : > { %1560 = vrot.lane.b32.xlu0 %v12786_v5, %s8275_s16  ;;  %v12800_v5 = vld [vmem:[#allocation25_spill] sm:$0xff] }
 0x177   : > { %v1185_v8 = vpop.permute.xlu1 %1184 }
 0x178   : > { %1274 = vst.msk [vmem:[#allocation4 + $0x38] sm:$0xff] %vm1266_vm4, %v1185_v8  ;;  %v1191_v9 = vpop.permute.xlu0 %1190 }
 0x179   : > { %1558 = vrot.lane.b32.xlu1 %v12787_v10, %s8275_s16  ;;  %1277 = vst.msk [vmem:[#allocation4 + $0x50] sm:$0xff] %vm1266_vm4, %v1191_v9  ;;  %v12801_v10 = vld [vmem:[#allocation26_spill] sm:$0xff] }
 0x17a   : > { %1564 = vrot.lane.b32.xlu0 %v12788_v11, %s8275_s16  ;;  %v12802_v11 = vld [vmem:[#allocation27_spill] sm:$0xff] }
 0x17b   : > { %v1189_v12 = vpop.permute.xlu1 %1188 }
 0x17c   : > { %1276 = vst.msk [vmem:[#allocation4 + $0x48] sm:$0xff] %vm1266_vm4, %v1189_v12  ;;  %v1195_v15 = vpop.permute.xlu0 %1194 }
 0x17d   : > { %1562 = vrot.lane.b32.xlu1 %v12789_v17, %s8275_s16  ;;  %1279 = vst.msk [vmem:[#allocation4 + $0x60] sm:$0xff] %vm1266_vm4, %v1195_v15  ;;  %v12803_v17 = vld [vmem:[#allocation28_spill] sm:$0xff] }
 0x17e   : > { %1568 = vrot.lane.b32.xlu0 %v12790_v19, %s8275_s16  ;;  %v12804_v19 = vld [vmem:[#allocation29_spill] sm:$0xff] }
 0x17f   : > { %v1193_v22 = vpop.permute.xlu1 %1192 }
 0x180   : > { %1278 = vst.msk [vmem:[#allocation4 + $0x58] sm:$0xff] %vm1266_vm4, %v1193_v22  ;;  %v1199_v31 = vpop.permute.xlu0 %1198 }
 0x181   : > { %1566 = vrot.lane.b32.xlu1 %v12791_v35, %s8275_s16  ;;  %1281 = vst.msk [vmem:[#allocation4 + $0x70] sm:$0xff] %vm1266_vm4, %v1199_v31  ;;  %v12805_v35 = vld [vmem:[#allocation30_spill] sm:$0xff] }
 0x182   : > { %1572 = vrot.lane.b32.xlu0 %v12792_v43, %s8275_s16  ;;  %v12806_v43 = vld [vmem:[#allocation31_spill] sm:$0xff] }
 0x183   : > { %v1197_v44 = vpop.permute.xlu1 %1196 }
 0x184   : > { %1280 = vst.msk [vmem:[#allocation4 + $0x68] sm:$0xff] %vm1266_vm4, %v1197_v44  ;;  %v1203_v49 = vpop.permute.xlu0 %1202 }
 0x185   : > { %1570 = vrot.lane.b32.xlu1 %v12793_v50, %s8275_s16  ;;  %1283 = vst.msk [vmem:[#allocation4 + $0x80] sm:$0xff] %vm1266_vm4, %v1203_v49  ;;  %v12807_v50 = vld [vmem:[#allocation32_spill] sm:$0xff] }
 0x186   : > { %1576 = vrot.lane.b32.xlu0 %v12794_v53, %s8275_s16 }
 0x187   : > { %v1201_v6 = vpop.permute.xlu1 %1200 }
 0x188   : > { %1282 = vst.msk [vmem:[#allocation4 + $0x78] sm:$0xff] %vm1266_vm4, %v1201_v6  ;;  %v1207_v54 = vpop.permute.xlu0 %1206 }
 0x189   : > { %1574 = vrot.lane.b32.xlu1 %v12795_v18, %s8275_s16  ;;  %1285 = vst.msk [vmem:[#allocation4 + $0x90] sm:$0xff] %vm1266_vm4, %v1207_v54  ;;  %v12808_v54 = vld [vmem:[#allocation33_spill] sm:$0xff]  ;;  %v12809_v18 = vld [vmem:[#allocation34_spill] sm:$0xff] }
 0x18a   : > { %1580 = vrot.lane.b32.xlu0 %v12796_v58, %s8275_s16 }
 0x18b   : > { %v1205_v59 = vpop.permute.xlu1 %1204 }
 0x18c   : > { %1284 = vst.msk [vmem:[#allocation4 + $0x88] sm:$0xff] %vm1266_vm4, %v1205_v59  ;;  %v1211_v57 = vpop.permute.xlu0 %1210 }
 0x18d   : > { %1578 = vrot.lane.b32.xlu1 %v12797_v14, %s8275_s16  ;;  %1287 = vst.msk [vmem:[#allocation4 + $0xa0] sm:$0xff] %vm1266_vm4, %v1211_v57  ;;  %v12810_v57 = vld [vmem:[#allocation35_spill] sm:$0xff] }
 0x18e   : > { %1584 = vrot.lane.b32.xlu0 %v12798_v60, %s8275_s16  ;;  %v9461_v14 = vld [vmem:[#allocation3 + $0x209] sm:$0xff] }
 0x18f   : > { %v1209_v62 = vpop.permute.xlu1 %1208 }
 0x190   : > { %1286 = vst.msk [vmem:[#allocation4 + $0x98] sm:$0xff] %vm1266_vm4, %v1209_v62  ;;  %v1215_v63 = vpop.permute.xlu0 %1214 }
 0x191   : > { %1582 = vrot.lane.b32.xlu1 %v12799_v0, %s8275_s16  ;;  %1289 = vst.msk [vmem:[#allocation4 + $0xb0] sm:$0xff] %vm1266_vm4, %v1215_v63 }
 0x192   : > { %1588 = vrot.lane.b32.xlu0 %v12800_v5, %s8275_s16 }
 0x193   : > { %v1213_v8 = vpop.permute.xlu1 %1212 }
 0x194   : > { %1288 = vst.msk [vmem:[#allocation4 + $0xa8] sm:$0xff] %vm1266_vm4, %v1213_v8  ;;  %v1219_v9 = vpop.permute.xlu0 %1218 }
 0x195   : > { %1586 = vrot.lane.b32.xlu1 %v12801_v10, %s8275_s16  ;;  %1291 = vst.msk [vmem:[#allocation4 + $0xc0] sm:$0xff] %vm1266_vm4, %v1219_v9  ;;  %v1716_v9 = vld [vmem:[#allocation3 + $0x227] sm:$0xff] }
 0x196   : > { %1592 = vrot.lane.b32.xlu0 %v12802_v11, %s8275_s16  ;;  %v1879_v10 = vld [vmem:[#allocation3 + $0x48] sm:$0xff] }
 0x197   : > { %v1217_v12 = vpop.permute.xlu1 %1216 }
 0x198   : > { %1290 = vst.msk [vmem:[#allocation4 + $0xb8] sm:$0xff] %vm1266_vm4, %v1217_v12  ;;  %v1223_v15 = vpop.permute.xlu0 %1222 }
 0x199   : > { %1590 = vrot.lane.b32.xlu1 %v12803_v17, %s8275_s16  ;;  %1293 = vst.msk [vmem:[#allocation4 + $0xd0] sm:$0xff] %vm1266_vm4, %v1223_v15  ;;  %v1880_v15 = vld [vmem:[#allocation3 + $0x50] sm:$0xff] }
 0x19a   : > { %1596 = vrot.lane.b32.xlu0 %v12804_v19, %s8275_s16 }
 0x19b   : > { %v1221_v22 = vpop.permute.xlu1 %1220 }
 0x19c   : > { %1292 = vst.msk [vmem:[#allocation4 + $0xc8] sm:$0xff] %vm1266_vm4, %v1221_v22  ;;  %v1227_v31 = vpop.permute.xlu0 %1226  ;;  %v1882_v22 = vld [vmem:[#allocation3 + $0x70] sm:$0xff] }
 0x19d   : > { %1594 = vrot.lane.b32.xlu1 %v12805_v35, %s8275_s16  ;;  %1295 = vst.msk [vmem:[#allocation4 + $0xe0] sm:$0xff] %vm1266_vm4, %v1227_v31  ;;  %v1885_v35 = vld [vmem:[#allocation3 + $0xa8] sm:$0xff] }
 0x19e   : > { %1600 = vrot.lane.b32.xlu0 %v12806_v43, %s8275_s16 }
 0x19f   : > { %v1225_v44 = vpop.permute.xlu1 %1224 }
 0x1a0   : > { %1294 = vst.msk [vmem:[#allocation4 + $0xd8] sm:$0xff] %vm1266_vm4, %v1225_v44  ;;  %v1231_v49 = vpop.permute.xlu0 %1230  ;;  %v1884_v44 = vld [vmem:[#allocation3 + $0x90] sm:$0xff] }
 0x1a1   : > { %1598 = vrot.lane.b32.xlu1 %v12807_v50, %s8275_s16  ;;  %1297 = vst.msk [vmem:[#allocation4 + $0xf0] sm:$0xff] %vm1266_vm4, %v1231_v49  ;;  %v1887_v50 = vld [vmem:[#allocation3 + $0xc8] sm:$0xff] }
 0x1a2   : > { %1604 = vrot.lane.b32.xlu0 %v9141_v13, %s8275_s16 }
 0x1a3   : > { %v1229_v53 = vpop.permute.xlu1 %1228 }
 0x1a4   : > { %1296 = vst.msk [vmem:[#allocation4 + $0xe8] sm:$0xff] %vm1266_vm4, %v1229_v53  ;;  %v1364_v6 = vpop.permute.xlu0 %1363 }
 0x1a5   : > { %1602 = vrot.lane.b32.xlu1 %v12808_v54, %s8275_s16  ;;  %1460 = vst.msk [vmem:[#allocation4] sm:$0xff] %vm1459_vm5, %v1364_v6  ;;  %v1886_v6 = vld [vmem:[#allocation3 + $0xb0] sm:$0xff] }
 0x1a6   : > { %1608 = vrot.lane.b32.xlu0 %v12809_v18, %s8275_s16  ;;  %v1889_v18 = vld [vmem:[#allocation3 + $0xe8] sm:$0xff] }
 0x1a7   : > { %v1233_v58 = vpop.permute.xlu1 %1232 }
 0x1a8   : > { %1298 = vst.msk [vmem:[#allocation4 + $0xf8] sm:$0xff] %vm1266_vm4, %v1233_v58  ;;  %v1368_v59 = vpop.permute.xlu0 %1367 }
 0x1a9   : > { %1606 = vrot.lane.b32.xlu1 %v12810_v57, %s8275_s16  ;;  %1462 = vst.msk [vmem:[#allocation4 + $0x10] sm:$0xff] %vm1459_vm5, %v1368_v59  ;;  %v1888_v59 = vld [vmem:[#allocation3 + $0xd0] sm:$0xff] }
 0x1aa   : > { %1612 = vrot.lane.b32.xlu0 %v9159_v7, %s8275_s16  ;;  %v9473_v7 = vld [vmem:[#allocation3 + $0x211] sm:$0xff] }
 0x1ab   : > { %v1366_v13 = vpop.permute.xlu1 %1365 }
 0x1ac   : > { %1461 = vst.msk [vmem:[#allocation4 + $0x8] sm:$0xff] %vm1459_vm5, %v1366_v13  ;;  %v1372_v60 = vpop.permute.xlu0 %1371  ;;  %v1891_v13 = vld [vmem:[#allocation3 + $0x108] sm:$0xff] }
 0x1ad   : > { %1610 = vrot.lane.b32.xlu1 %v9165_v2, %s8275_s16  ;;  %1464 = vst.msk [vmem:[#allocation4 + $0x20] sm:$0xff] %vm1459_vm5, %v1372_v60 }
 0x1ae   : > { %1616 = vrot.lane.b32.xlu0 %v9461_v14, %s8275_s16 }
 0x1af   : > { %v1370_v62 = vpop.permute.xlu1 %1369 }
 0x1b0   : > { %1463 = vst.msk [vmem:[#allocation4 + $0x18] sm:$0xff] %vm1459_vm5, %v1370_v62  ;;  %v1376_v63 = vpop.permute.xlu0 %1375  ;;  %v1890_v62 = vld [vmem:[#allocation3 + $0xf0] sm:$0xff] }
 0x1b1   : > { %1614 = vrot.lane.b32.xlu1 %v9173_v16, %s8275_s16  ;;  %1466 = vst.msk [vmem:[#allocation4 + $0x30] sm:$0xff] %vm1459_vm5, %v1376_v63 }
 0x1b2   : > { %1750 = vrot.lane.b32.xlu0 %v8867_v20, %s8276_s17 }
 0x1b3   : > { %v1374_v2 = vpop.permute.xlu1 %1373 }
 0x1b4   : > { %1465 = vst.msk [vmem:[#allocation4 + $0x28] sm:$0xff] %vm1459_vm5, %v1374_v2  ;;  %v1380_v0 = vpop.permute.xlu0 %1379  ;;  %v1893_v2 = vld [vmem:[#allocation3 + $0x128] sm:$0xff] }
 0x1b5   : > { %1618 = vrot.lane.b32.xlu1 %v9473_v7, %s8275_s16  ;;  %1468 = vst.msk [vmem:[#allocation4 + $0x40] sm:$0xff] %vm1459_vm5, %v1380_v0 }
 0x1b6   : > { %1754 = vrot.lane.b32.xlu0 %v8879_v23, %s8276_s17 }
 0x1b7   : > { %v1378_v16 = vpop.permute.xlu1 %1377 }
 0x1b8   : > { %1467 = vst.msk [vmem:[#allocation4 + $0x38] sm:$0xff] %vm1459_vm5, %v1378_v16  ;;  %v1384_v5 = vpop.permute.xlu0 %1383  ;;  %v1892_v16 = vld [vmem:[#allocation3 + $0x110] sm:$0xff] }
 0x1b9   : > { %1752 = vrot.lane.b32.xlu1 %v8869_v21, %s8276_s17  ;;  %1470 = vst.msk [vmem:[#allocation4 + $0x50] sm:$0xff] %vm1459_vm5, %v1384_v5 }
 0x1ba   : > { %1758 = vrot.lane.b32.xlu0 %v8889_v25, %s8276_s17 }
 0x1bb   : > { %v1382_v20 = vpop.permute.xlu1 %1381 }
 0x1bc   : > { %1469 = vst.msk [vmem:[#allocation4 + $0x48] sm:$0xff] %vm1459_vm5, %v1382_v20  ;;  %v1388_v8 = vpop.permute.xlu0 %1387  ;;  %v1895_v20 = vld [vmem:[#allocation3 + $0x148] sm:$0xff] }
 0x1bd   : > { %1756 = vrot.lane.b32.xlu1 %v8881_v24, %s8276_s17  ;;  %1472 = vst.msk [vmem:[#allocation4 + $0x60] sm:$0xff] %vm1459_vm5, %v1388_v8 }
 0x1be   : > { %1762 = vrot.lane.b32.xlu0 %v8893_v27, %s8276_s17 }
 0x1bf   : > { %v1386_v23 = vpop.permute.xlu1 %1385 }
 0x1c0   : > { %1471 = vst.msk [vmem:[#allocation4 + $0x58] sm:$0xff] %vm1459_vm5, %v1386_v23  ;;  %v1392_v21 = vpop.permute.xlu0 %1391  ;;  %v1894_v23 = vld [vmem:[#allocation3 + $0x130] sm:$0xff] }
 0x1c1   : > { %1760 = vrot.lane.b32.xlu1 %v8891_v26, %s8276_s17  ;;  %1474 = vst.msk [vmem:[#allocation4 + $0x70] sm:$0xff] %vm1459_vm5, %v1392_v21 }
 0x1c2   : > { %1766 = vrot.lane.b32.xlu0 %v8903_v29, %s8276_s17 }
 0x1c3   : > { %v1390_v25 = vpop.permute.xlu1 %1389 }
 0x1c4   : > { %1473 = vst.msk [vmem:[#allocation4 + $0x68] sm:$0xff] %vm1459_vm5, %v1390_v25  ;;  %v1396_v24 = vpop.permute.xlu0 %1395  ;;  %v1897_v25 = vld [vmem:[#allocation3 + $0x168] sm:$0xff] }
 0x1c5   : > { %1764 = vrot.lane.b32.xlu1 %v8901_v28, %s8276_s17  ;;  %1476 = vst.msk [vmem:[#allocation4 + $0x80] sm:$0xff] %vm1459_vm5, %v1396_v24 }
 0x1c6   : > { %1770 = vrot.lane.b32.xlu0 %v8915_v32, %s8276_s17 }
 0x1c7   : > { %v1394_v27 = vpop.permute.xlu1 %1393 }
 0x1c8   : > { %1475 = vst.msk [vmem:[#allocation4 + $0x78] sm:$0xff] %vm1459_vm5, %v1394_v27  ;;  %v1400_v26 = vpop.permute.xlu0 %1399  ;;  %v1896_v27 = vld [vmem:[#allocation3 + $0x150] sm:$0xff] }
 0x1c9   : > { %1768 = vrot.lane.b32.xlu1 %v8905_v30, %s8276_s17  ;;  %1478 = vst.msk [vmem:[#allocation4 + $0x90] sm:$0xff] %vm1459_vm5, %v1400_v26 }
 0x1ca   : > { %1774 = vrot.lane.b32.xlu0 %v8919_v34, %s8276_s17 }
 0x1cb   : > { %v1398_v29 = vpop.permute.xlu1 %1397 }
 0x1cc   : > { %1477 = vst.msk [vmem:[#allocation4 + $0x88] sm:$0xff] %vm1459_vm5, %v1398_v29  ;;  %v1404_v28 = vpop.permute.xlu0 %1403  ;;  %v1899_v29 = vld [vmem:[#allocation3 + $0x188] sm:$0xff] }
 0x1cd   : > { %1772 = vrot.lane.b32.xlu1 %v8917_v33, %s8276_s17  ;;  %1480 = vst.msk [vmem:[#allocation4 + $0xa0] sm:$0xff] %vm1459_vm5, %v1404_v28 }
 0x1ce   : > { %1778 = vrot.lane.b32.xlu0 %v8933_v37, %s8276_s17 }
 0x1cf   : > { %v1402_v32 = vpop.permute.xlu1 %1401 }
 0x1d0   : > { %1479 = vst.msk [vmem:[#allocation4 + $0x98] sm:$0xff] %vm1459_vm5, %v1402_v32  ;;  %v1408_v30 = vpop.permute.xlu0 %1407  ;;  %v1898_v32 = vld [vmem:[#allocation3 + $0x170] sm:$0xff] }
 0x1d1   : > { %1776 = vrot.lane.b32.xlu1 %v8931_v36, %s8276_s17  ;;  %1482 = vst.msk [vmem:[#allocation4 + $0xb0] sm:$0xff] %vm1459_vm5, %v1408_v30 }
 0x1d2   : > { %1782 = vrot.lane.b32.xlu0 %v8945_v39, %s8276_s17 }
 0x1d3   : > { %v1406_v34 = vpop.permute.xlu1 %1405 }
 0x1d4   : > { %1481 = vst.msk [vmem:[#allocation4 + $0xa8] sm:$0xff] %vm1459_vm5, %v1406_v34  ;;  %v1412_v33 = vpop.permute.xlu0 %1411  ;;  %v1901_v34 = vld [vmem:[#allocation3 + $0x1a8] sm:$0xff] }
 0x1d5   : > { %1780 = vrot.lane.b32.xlu1 %v8935_v38, %s8276_s17  ;;  %1484 = vst.msk [vmem:[#allocation4 + $0xc0] sm:$0xff] %vm1459_vm5, %v1412_v33 }
 0x1d6   : > { %1786 = vrot.lane.b32.xlu0 %v8949_v41, %s8276_s17 }
 0x1d7   : > { %v1410_v37 = vpop.permute.xlu1 %1409 }
 0x1d8   : > { %1483 = vst.msk [vmem:[#allocation4 + $0xb8] sm:$0xff] %vm1459_vm5, %v1410_v37  ;;  %v1416_v36 = vpop.permute.xlu0 %1415  ;;  %v1900_v37 = vld [vmem:[#allocation3 + $0x190] sm:$0xff] }
 0x1d9   : > { %1784 = vrot.lane.b32.xlu1 %v8947_v40, %s8276_s17  ;;  %1486 = vst.msk [vmem:[#allocation4 + $0xd0] sm:$0xff] %vm1459_vm5, %v1416_v36 }
 0x1da   : > { %1790 = vrot.lane.b32.xlu0 %v8967_v45, %s8276_s17 }
 0x1db   : > { %v1414_v39 = vpop.permute.xlu1 %1413 }
 0x1dc   : > { %1485 = vst.msk [vmem:[#allocation4 + $0xc8] sm:$0xff] %vm1459_vm5, %v1414_v39  ;;  %v1420_v38 = vpop.permute.xlu0 %1419  ;;  %v1903_v39 = vld [vmem:[#allocation3 + $0x1c8] sm:$0xff] }
 0x1dd   : > { %1788 = vrot.lane.b32.xlu1 %v8957_v42, %s8276_s17  ;;  %1488 = vst.msk [vmem:[#allocation4 + $0xe0] sm:$0xff] %vm1459_vm5, %v1420_v38 }
 0x1de   : > { %1794 = vrot.lane.b32.xlu0 %v8979_v47, %s8276_s17 }
 0x1df   : > { %v1418_v41 = vpop.permute.xlu1 %1417 }
 0x1e0   : > { %1487 = vst.msk [vmem:[#allocation4 + $0xd8] sm:$0xff] %vm1459_vm5, %v1418_v41  ;;  %v1424_v40 = vpop.permute.xlu0 %1423  ;;  %v1902_v41 = vld [vmem:[#allocation3 + $0x1b0] sm:$0xff] }
 0x1e1   : > { %1792 = vrot.lane.b32.xlu1 %v8969_v46, %s8276_s17  ;;  %1490 = vst.msk [vmem:[#allocation4 + $0xf0] sm:$0xff] %vm1459_vm5, %v1424_v40 }
 0x1e2   : > { %1798 = vrot.lane.b32.xlu0 %v8995_v51, %s8276_s17 }
 0x1e3   : > { %v1422_v45 = vpop.permute.xlu1 %1421 }
 0x1e4   : > { %1489 = vst.msk [vmem:[#allocation4 + $0xe8] sm:$0xff] %vm1459_vm5, %v1422_v45  ;;  %v1557_v42 = vpop.permute.xlu0 %1556  ;;  %v1905_v45 = vld [vmem:[#allocation3 + $0x1e8] sm:$0xff] }
 0x1e5   : > { %1796 = vrot.lane.b32.xlu1 %v8981_v48, %s8276_s17  ;;  %1653 = vst.msk [vmem:[#allocation4] sm:$0xff] %vm1652_vm6, %v1557_v42 }
 0x1e6   : > { %1802 = vrot.lane.b32.xlu0 %v9011_v55, %s8276_s17 }
 0x1e7   : > { %v1426_v47 = vpop.permute.xlu1 %1425 }
 0x1e8   : > { %1491 = vst.msk [vmem:[#allocation4 + $0xf8] sm:$0xff] %vm1459_vm5, %v1426_v47  ;;  %v1561_v46 = vpop.permute.xlu0 %1560  ;;  %v1904_v47 = vld [vmem:[#allocation3 + $0x1d0] sm:$0xff] }
 0x1e9   : > { %1800 = vrot.lane.b32.xlu1 %v8997_v52, %s8276_s17  ;;  %1655 = vst.msk [vmem:[#allocation4 + $0x10] sm:$0xff] %vm1652_vm6, %v1561_v46 }
 0x1ea   : > { %1806 = vrot.lane.b32.xlu0 %v9261_v1, %s8276_s17  ;;  %v1717_v1 = vld [vmem:[#allocation3 + $0x22f] sm:$0xff] }
 0x1eb   : > { %v1559_v51 = vpop.permute.xlu1 %1558 }
 0x1ec   : > { %1654 = vst.msk [vmem:[#allocation4 + $0x8] sm:$0xff] %vm1652_vm6, %v1559_v51  ;;  %v1565_v48 = vpop.permute.xlu0 %1564 }
 0x1ed   : > { %1804 = vrot.lane.b32.xlu1 %v9013_v56, %s8276_s17  ;;  %1657 = vst.msk [vmem:[#allocation4 + $0x20] sm:$0xff] %vm1652_vm6, %v1565_v48  ;;  %v1881_v56 = vld [vmem:[#allocation3 + $0x68] sm:$0xff] }
 0x1ee   : > { %1810 = vrot.lane.b32.xlu0 %v1716_v9, %s8276_s17  ;;  %v1906_v9 = vld [vmem:[#allocation3 + $0x1f0] sm:$0xff] }
 0x1ef   : > { %v1563_v55 = vpop.permute.xlu1 %1562 }
 0x1f0   : > { %1656 = vst.msk [vmem:[#allocation4 + $0x18] sm:$0xff] %vm1652_vm6, %v1563_v55  ;;  %v1569_v52 = vpop.permute.xlu0 %1568  ;;  %v1909_v55 = vld [vmem:[#allocation3 + $0x228] sm:$0xff] }
 0x1f1   : > { %1808 = vrot.lane.b32.xlu1 %v9273_v3, %s8276_s17  ;;  %1659 = vst.msk [vmem:[#allocation4 + $0x30] sm:$0xff] %vm1652_vm6, %v1569_v52  ;;  %v1883_v3 = vld [vmem:[#allocation3 + $0x88] sm:$0xff]  ;;  %v7995_v52 = vld [vmem:[%s12571_s2] sm:$0xff]  }
 0x1f2   : > { %1943 = vrot.lane.b32.xlu0 %v1879_v10, %s8277_s18  ;;  %7820 = vmatprep.subr.bf16.mxu0 %v7995_v52 }
 0x1f3   : > { %v1567_v11 = vpop.permute.xlu1 %1566  ;;  %7821 = vmatpush3.bf16.msra.mxu0 %v7995_v52  ;;  %7934 = vmatprep.subr.bf16.mxu1 %v7995_v52 }
 0x1f4   : > { %1658 = vst.msk [vmem:[#allocation4 + $0x28] sm:$0xff] %vm1652_vm6, %v1567_v11  ;;  %v1573_v12 = vpop.permute.xlu0 %1572  ;;  %v2072_v11 = vld [vmem:[#allocation3 + $0x49] sm:$0xff]  ;;  %7937 = vmatpush3.bf16.msra.mxu1 %v7995_v52  ;;  %v2099_v52 = vld [vmem:[#allocation3 + $0x1f1] sm:$0xff] }
 0x1f5   : > { %1812 = vrot.lane.b32.xlu1 %v1717_v1, %s8276_s17  ;;  %1661 = vst.msk [vmem:[#allocation4 + $0x40] sm:$0xff] %vm1652_vm6, %v1573_v12  ;;  %v1910_v12 = vld [vmem:[#allocation3 + $0x230] sm:$0xff] }
 0x1f6   : > { %1947 = vrot.lane.b32.xlu0 %v1881_v56, %s8277_s18  ;;  %v7996_v56 = vld [vmem:[%s12571_s2 + $0x8] sm:$0xff]  }
 0x1f7   : > { %v1571_v17 = vpop.permute.xlu1 %1570  ;;  %7822 = vmatprep.subr.bf16.mxu0 %v7996_v56  ;;  %7935 = vmatprep.subr.bf16.mxu1 %v7996_v56 }
 0x1f8   : > { %1660 = vst.msk [vmem:[#allocation4 + $0x38] sm:$0xff] %vm1652_vm6, %v1571_v17  ;;  %v1577_v19 = vpop.permute.xlu0 %1576  ;;  %v2074_v17 = vld [vmem:[#allocation3 + $0x69] sm:$0xff]  ;;  %7823 = vmatpush3.bf16.msra.mxu0 %v7996_v56  ;;  %7938 = vmatpush3.bf16.msra.mxu1 %v7996_v56 }
 0x1f9   : > { %1945 = vrot.lane.b32.xlu1 %v1880_v15, %s8277_s18  ;;  %1663 = vst.msk [vmem:[#allocation4 + $0x50] sm:$0xff] %vm1652_vm6, %v1577_v19  ;;  %v7997_v19 = vld [vmem:[%s12571_s2 + $0x10] ss:$0 sps:$4 sm:$0x33]  }
 0x1fa   : > { %1951 = vrot.lane.b32.xlu0 %v1883_v3, %s8277_s18  ;;  %7940 = vmatprep.subr.msk.bf16.mxu0 %vm2382_vm8, %v7997_v19 }
 0x1fb   : > { %v1575_v31 = vpop.permute.xlu1 %1574  ;;  %7941 = vmatprep.subr.msk.bf16.mxu1 %vm2382_vm8, %v7997_v19 }
 0x1fc   : > { %1662 = vst.msk [vmem:[#allocation4 + $0x48] sm:$0xff] %vm1652_vm6, %v1575_v31  ;;  %v1581_v43 = vpop.permute.xlu0 %1580 }
 0x1fd   : > { %1949 = vrot.lane.b32.xlu1 %v1882_v22, %s8277_s18  ;;  %1665 = vst.msk [vmem:[#allocation4 + $0x60] sm:$0xff] %vm1652_vm6, %v1581_v43  ;;  %v2384_v22 = vsel %vm2382_vm8, %v7997_v19, 0 }
 0x1fe   : > { %1955 = vrot.lane.b32.xlu0 %v1885_v35, %s8277_s18  ;;  %v2076_v35 = vld [vmem:[#allocation3 + $0x89] sm:$0xff]  ;;  %7825 = vmatpush3.bf16.msra.mxu0 %v2384_v22 }
 0x1ff   : > { %v1579_v49 = vpop.permute.xlu1 %1578  ;;  %7939 = vmatpush3.bf16.msra.mxu1 %v2384_v22 }
 0x200   : > { %1664 = vst.msk [vmem:[#allocation4 + $0x58] sm:$0xff] %vm1652_vm6, %v1579_v49  ;;  %v1585_v53 = vpop.permute.xlu0 %1584 }
 0x201   : > { %1953 = vrot.lane.b32.xlu1 %v1884_v44, %s8277_s18  ;;  %1667 = vst.msk [vmem:[#allocation4 + $0x70] sm:$0xff] %vm1652_vm6, %v1585_v53  ;;  %v2075_v44 = vld [vmem:[#allocation3 + $0x71] sm:$0xff] }
 0x202   : > { %1959 = vrot.lane.b32.xlu0 %v1887_v50, %s8277_s18  ;;  %v2078_v50 = vld [vmem:[#allocation3 + $0xa9] sm:$0xff] }
 0x203   : > { %v1583_v54 = vpop.permute.xlu1 %1582 }
 0x204   : > { %1666 = vst.msk [vmem:[#allocation4 + $0x68] sm:$0xff] %vm1652_vm6, %v1583_v54  ;;  %v1589_v58 = vpop.permute.xlu0 %1588 }
 0x205   : > { %1957 = vrot.lane.b32.xlu1 %v1886_v6, %s8277_s18  ;;  %1669 = vst.msk [vmem:[#allocation4 + $0x80] sm:$0xff] %vm1652_vm6, %v1589_v58  ;;  %v2077_v6 = vld [vmem:[#allocation3 + $0x91] sm:$0xff] }
 0x206   : > { %1963 = vrot.lane.b32.xlu0 %v1889_v18, %s8277_s18  ;;  %v2080_v18 = vld [vmem:[#allocation3 + $0xc9] sm:$0xff] }
 0x207   : > { %v1587_v57 = vpop.permute.xlu1 %1586 }
 0x208   : > { %1668 = vst.msk [vmem:[#allocation4 + $0x78] sm:$0xff] %vm1652_vm6, %v1587_v57  ;;  %v1593_v60 = vpop.permute.xlu0 %1592 }
 0x209   : > { %1961 = vrot.lane.b32.xlu1 %v1888_v59, %s8277_s18  ;;  %1671 = vst.msk [vmem:[#allocation4 + $0x90] sm:$0xff] %vm1652_vm6, %v1593_v60  ;;  %v2079_v59 = vld [vmem:[#allocation3 + $0xb1] sm:$0xff] }
 0x20a   : > { %1967 = vrot.lane.b32.xlu0 %v1891_v13, %s8277_s18  ;;  %v2082_v13 = vld [vmem:[#allocation3 + $0xe9] sm:$0xff] }
 0x20b   : > { %v1591_v63 = vpop.permute.xlu1 %1590 }
 0x20c   : > { %1670 = vst.msk [vmem:[#allocation4 + $0x88] sm:$0xff] %vm1652_vm6, %v1591_v63  ;;  %v1597_v0 = vpop.permute.xlu0 %1596 }
 0x20d   : > { %1965 = vrot.lane.b32.xlu1 %v1890_v62, %s8277_s18  ;;  %1673 = vst.msk [vmem:[#allocation4 + $0xa0] sm:$0xff] %vm1652_vm6, %v1597_v0  ;;  %v2081_v62 = vld [vmem:[#allocation3 + $0xd1] sm:$0xff] }
 0x20e   : > { %1971 = vrot.lane.b32.xlu0 %v1893_v2, %s8277_s18  ;;  %v2084_v2 = vld [vmem:[#allocation3 + $0x109] sm:$0xff] }
 0x20f   : > { %v1595_v5 = vpop.permute.xlu1 %1594 }
 0x210   : > { %1672 = vst.msk [vmem:[#allocation4 + $0x98] sm:$0xff] %vm1652_vm6, %v1595_v5  ;;  %v1601_v8 = vpop.permute.xlu0 %1600 }
 0x211   : > { %1969 = vrot.lane.b32.xlu1 %v1892_v16, %s8277_s18  ;;  %1675 = vst.msk [vmem:[#allocation4 + $0xb0] sm:$0xff] %vm1652_vm6, %v1601_v8  ;;  %v2083_v16 = vld [vmem:[#allocation3 + $0xf1] sm:$0xff] }
 0x212   : > { %1975 = vrot.lane.b32.xlu0 %v1895_v20, %s8277_s18  ;;  %v2086_v20 = vld [vmem:[#allocation3 + $0x129] sm:$0xff] }
 0x213   : > { %v1599_v21 = vpop.permute.xlu1 %1598 }
 0x214   : > { %1674 = vst.msk [vmem:[#allocation4 + $0xa8] sm:$0xff] %vm1652_vm6, %v1599_v21  ;;  %v1605_v24 = vpop.permute.xlu0 %1604 }
 0x215   : > { %1973 = vrot.lane.b32.xlu1 %v1894_v23, %s8277_s18  ;;  %1677 = vst.msk [vmem:[#allocation4 + $0xc0] sm:$0xff] %vm1652_vm6, %v1605_v24  ;;  %v2085_v23 = vld [vmem:[#allocation3 + $0x111] sm:$0xff] }
 0x216   : > { %1979 = vrot.lane.b32.xlu0 %v1897_v25, %s8277_s18  ;;  %v2088_v25 = vld [vmem:[#allocation3 + $0x149] sm:$0xff] }
 0x217   : > { %v1603_v26 = vpop.permute.xlu1 %1602 }
 0x218   : > { %1676 = vst.msk [vmem:[#allocation4 + $0xb8] sm:$0xff] %vm1652_vm6, %v1603_v26  ;;  %v1609_v28 = vpop.permute.xlu0 %1608 }
 0x219   : > { %1977 = vrot.lane.b32.xlu1 %v1896_v27, %s8277_s18  ;;  %1679 = vst.msk [vmem:[#allocation4 + $0xd0] sm:$0xff] %vm1652_vm6, %v1609_v28  ;;  %v2087_v27 = vld [vmem:[#allocation3 + $0x131] sm:$0xff] }
 0x21a   : > { %1983 = vrot.lane.b32.xlu0 %v1899_v29, %s8277_s18  ;;  %v2090_v29 = vld [vmem:[#allocation3 + $0x169] sm:$0xff] }
 0x21b   : > { %v1607_v30 = vpop.permute.xlu1 %1606 }
 0x21c   : > { %1678 = vst.msk [vmem:[#allocation4 + $0xc8] sm:$0xff] %vm1652_vm6, %v1607_v30  ;;  %v1613_v33 = vpop.permute.xlu0 %1612 }
 0x21d   : > { %1981 = vrot.lane.b32.xlu1 %v1898_v32, %s8277_s18  ;;  %1681 = vst.msk [vmem:[#allocation4 + $0xe0] sm:$0xff] %vm1652_vm6, %v1613_v33  ;;  %v2089_v32 = vld [vmem:[#allocation3 + $0x151] sm:$0xff] }
 0x21e   : > { %1987 = vrot.lane.b32.xlu0 %v1901_v34, %s8277_s18  ;;  %v2092_v34 = vld [vmem:[#allocation3 + $0x189] sm:$0xff] }
 0x21f   : > { %v1611_v36 = vpop.permute.xlu1 %1610 }
 0x220   : > { %1680 = vst.msk [vmem:[#allocation4 + $0xd8] sm:$0xff] %vm1652_vm6, %v1611_v36  ;;  %v1617_v38 = vpop.permute.xlu0 %1616 }
 0x221   : > { %1985 = vrot.lane.b32.xlu1 %v1900_v37, %s8277_s18  ;;  %1683 = vst.msk [vmem:[#allocation4 + $0xf0] sm:$0xff] %vm1652_vm6, %v1617_v38  ;;  %v2091_v37 = vld [vmem:[#allocation3 + $0x171] sm:$0xff] }
 0x222   : > { %1991 = vrot.lane.b32.xlu0 %v1903_v39, %s8277_s18  ;;  %v2094_v39 = vld [vmem:[#allocation3 + $0x1a9] sm:$0xff] }
 0x223   : > { %v1615_v40 = vpop.permute.xlu1 %1614 }
 0x224   : > { %1682 = vst.msk [vmem:[#allocation4 + $0xe8] sm:$0xff] %vm1652_vm6, %v1615_v40  ;;  %v1751_v42 = vpop.permute.xlu0 %1750 }
 0x225   : > { %1989 = vrot.lane.b32.xlu1 %v1902_v41, %s8277_s18  ;;  %1847 = vst.msk [vmem:[#allocation4] sm:$0xff] %vm1846_vm7, %v1751_v42  ;;  %v2093_v41 = vld [vmem:[#allocation3 + $0x191] sm:$0xff] }
 0x226   : > { %1995 = vrot.lane.b32.xlu0 %v1905_v45, %s8277_s18  ;;  %v2096_v45 = vld [vmem:[#allocation3 + $0x1c9] sm:$0xff] }
 0x227   : > { %v1619_v46 = vpop.permute.xlu1 %1618 }
 0x228   : > { %1684 = vst.msk [vmem:[#allocation4 + $0xf8] sm:$0xff] %vm1652_vm6, %v1619_v46  ;;  %v1755_v51 = vpop.permute.xlu0 %1754 }
 0x229   : > { %1993 = vrot.lane.b32.xlu1 %v1904_v47, %s8277_s18  ;;  %1849 = vst.msk [vmem:[#allocation4 + $0x10] sm:$0xff] %vm1846_vm7, %v1755_v51  ;;  %v2095_v47 = vld [vmem:[#allocation3 + $0x1b1] sm:$0xff]  ;;  %v2098_v51 = vld [vmem:[#allocation3 + $0x1e9] sm:$0xff] }
 0x22a   : > { %1999 = vrot.lane.b32.xlu0 %v9361_v4, %s8277_s18 }
 0x22b   : > { %v1753_v48 = vpop.permute.xlu1 %1752 }
 0x22c   : > { %1848 = vst.msk [vmem:[#allocation4 + $0x8] sm:$0xff] %vm1846_vm7, %v1753_v48  ;;  %v1759_v10 = vpop.permute.xlu0 %1758  ;;  %v2097_v48 = vld [vmem:[#allocation3 + $0x1d1] sm:$0xff] }
 0x22d   : > { %1997 = vrot.lane.b32.xlu1 %v1906_v9, %s8277_s18  ;;  %1851 = vst.msk [vmem:[#allocation4 + $0x20] sm:$0xff] %vm1846_vm7, %v1759_v10 }
 0x22e   : > { %2003 = vrot.lane.b32.xlu0 %v1909_v55, %s8277_s18 }
 0x22f   : > { %v1757_v1 = vpop.permute.xlu1 %1756 }
 0x230   : > { %1850 = vst.msk [vmem:[#allocation4 + $0x18] sm:$0xff] %vm1846_vm7, %v1757_v1  ;;  %v1763_v4 = vpop.permute.xlu0 %1762 }
 0x231   : > { %2001 = vrot.lane.b32.xlu1 %v9373_v61, %s8277_s18  ;;  %1853 = vst.msk [vmem:[#allocation4 + $0x30] sm:$0xff] %vm1846_vm7, %v1763_v4  ;;  %v2073_v61 = vld [vmem:[#allocation3 + $0x51] sm:$0xff] }
 0x232   : > { %2136 = vrot.lane.b32.xlu0 %v2072_v11, %s8278_s24  ;;  %v2102_v11 = vld [vmem:[#allocation3 + $0x229] sm:$0xff] }
 0x233   : > { %v1761_v15 = vpop.permute.xlu1 %1760 }
 0x234   : > { %1852 = vst.msk [vmem:[#allocation4 + $0x28] sm:$0xff] %vm1846_vm7, %v1761_v15  ;;  %v1767_v3 = vpop.permute.xlu0 %1766 }
 0x235   : > { %2005 = vrot.lane.b32.xlu1 %v1910_v12, %s8277_s18  ;;  %1855 = vst.msk [vmem:[#allocation4 + $0x40] sm:$0xff] %vm1846_vm7, %v1767_v3  ;;  %v2611_v12 = vld [vmem:[#allocation2 + $0x8] sm:$0xff] }
 0x236   : > { %2140 = vrot.lane.b32.xlu0 %v2074_v17, %s8278_s24  ;;  %v2613_v3 = vld [vmem:[#allocation2 + $0x28] sm:$0xff] }
 0x237   : > { %v1765_v31 = vpop.permute.xlu1 %1764 }
 0x238   : > { %1854 = vst.msk [vmem:[#allocation4 + $0x38] sm:$0xff] %vm1846_vm7, %v1765_v31  ;;  %v1771_v43 = vpop.permute.xlu0 %1770  ;;  %v2615_v31 = vld [vmem:[#allocation2 + $0x48] sm:$0xff] }
 0x239   : > { %2138 = vrot.lane.b32.xlu1 %v2073_v61, %s8278_s24  ;;  %1857 = vst.msk [vmem:[#allocation4 + $0x50] sm:$0xff] %vm1846_vm7, %v1771_v43  ;;  %v2612_v61 = vld [vmem:[#allocation2 + $0x10] sm:$0xff] }
 0x23a   : > { %2144 = vrot.lane.b32.xlu0 %v2076_v35, %s8278_s24  ;;  %v2614_v35 = vld [vmem:[#allocation2 + $0x30] sm:$0xff] }
 0x23b   : > { %v1769_v49 = vpop.permute.xlu1 %1768 }
 0x23c   : > { %1856 = vst.msk [vmem:[#allocation4 + $0x48] sm:$0xff] %vm1846_vm7, %v1769_v49  ;;  %v1775_v53 = vpop.permute.xlu0 %1774 }
 0x23d   : > { %2142 = vrot.lane.b32.xlu1 %v2075_v44, %s8278_s24  ;;  %1859 = vst.msk [vmem:[#allocation4 + $0x60] sm:$0xff] %vm1846_vm7, %v1775_v53  ;;  %v2617_v44 = vld [vmem:[#allocation2 + $0x68] sm:$0xff] }
 0x23e   : > { %2148 = vrot.lane.b32.xlu0 %v2078_v50, %s8278_s24  ;;  %v2616_v50 = vld [vmem:[#allocation2 + $0x50] sm:$0xff] }
 0x23f   : > { %v1773_v54 = vpop.permute.xlu1 %1772 }
 0x240   : > { %1858 = vst.msk [vmem:[#allocation4 + $0x58] sm:$0xff] %vm1846_vm7, %v1773_v54  ;;  %v1779_v58 = vpop.permute.xlu0 %1778 }
 0x241   : > { %2146 = vrot.lane.b32.xlu1 %v2077_v6, %s8278_s24  ;;  %1861 = vst.msk [vmem:[#allocation4 + $0x70] sm:$0xff] %vm1846_vm7, %v1779_v58  ;;  %v2619_v6 = vld [vmem:[#allocation2 + $0x88] sm:$0xff] }
 0x242   : > { %2152 = vrot.lane.b32.xlu0 %v2080_v18, %s8278_s24  ;;  %v2618_v18 = vld [vmem:[#allocation2 + $0x70] sm:$0xff] }
 0x243   : > { %v1777_v57 = vpop.permute.xlu1 %1776 }
 0x244   : > { %1860 = vst.msk [vmem:[#allocation4 + $0x68] sm:$0xff] %vm1846_vm7, %v1777_v57  ;;  %v1783_v60 = vpop.permute.xlu0 %1782 }
 0x245   : > { %2150 = vrot.lane.b32.xlu1 %v2079_v59, %s8278_s24  ;;  %1863 = vst.msk [vmem:[#allocation4 + $0x80] sm:$0xff] %vm1846_vm7, %v1783_v60  ;;  %v2621_v59 = vld [vmem:[#allocation2 + $0xa8] sm:$0xff] }
 0x246   : > { %2156 = vrot.lane.b32.xlu0 %v2082_v13, %s8278_s24  ;;  %v2620_v13 = vld [vmem:[#allocation2 + $0x90] sm:$0xff] }
 0x247   : > { %v1781_v63 = vpop.permute.xlu1 %1780 }
 0x248   : > { %1862 = vst.msk [vmem:[#allocation4 + $0x78] sm:$0xff] %vm1846_vm7, %v1781_v63  ;;  %v1787_v0 = vpop.permute.xlu0 %1786 }
 0x249   : > { %2154 = vrot.lane.b32.xlu1 %v2081_v62, %s8278_s24  ;;  %1865 = vst.msk [vmem:[#allocation4 + $0x90] sm:$0xff] %vm1846_vm7, %v1787_v0  ;;  %v2623_v62 = vld [vmem:[#allocation2 + $0xc8] sm:$0xff] }
 0x24a   : > { %2160 = vrot.lane.b32.xlu0 %v2084_v2, %s8278_s24  ;;  %v2622_v2 = vld [vmem:[#allocation2 + $0xb0] sm:$0xff] }
 0x24b   : > { %v1785_v5 = vpop.permute.xlu1 %1784 }
 0x24c   : > { %1864 = vst.msk [vmem:[#allocation4 + $0x88] sm:$0xff] %vm1846_vm7, %v1785_v5  ;;  %v1791_v8 = vpop.permute.xlu0 %1790 }
 0x24d   : > { %2158 = vrot.lane.b32.xlu1 %v2083_v16, %s8278_s24  ;;  %1867 = vst.msk [vmem:[#allocation4 + $0xa0] sm:$0xff] %vm1846_vm7, %v1791_v8  ;;  %v2625_v16 = vld [vmem:[#allocation2 + $0xe8] sm:$0xff] }
 0x24e   : > { %2164 = vrot.lane.b32.xlu0 %v2086_v20, %s8278_s24  ;;  %v2624_v20 = vld [vmem:[#allocation2 + $0xd0] sm:$0xff] }
 0x24f   : > { %v1789_v21 = vpop.permute.xlu1 %1788 }
 0x250   : > { %1866 = vst.msk [vmem:[#allocation4 + $0x98] sm:$0xff] %vm1846_vm7, %v1789_v21  ;;  %v1795_v24 = vpop.permute.xlu0 %1794 }
 0x251   : > { %2162 = vrot.lane.b32.xlu1 %v2085_v23, %s8278_s24  ;;  %1869 = vst.msk [vmem:[#allocation4 + $0xb0] sm:$0xff] %vm1846_vm7, %v1795_v24  ;;  %v2627_v23 = vld [vmem:[#allocation2 + $0x108] sm:$0xff] }
 0x252   : > { %2168 = vrot.lane.b32.xlu0 %v2088_v25, %s8278_s24  ;;  %v2626_v25 = vld [vmem:[#allocation2 + $0xf0] sm:$0xff] }
 0x253   : > { %v1793_v26 = vpop.permute.xlu1 %1792 }
 0x254   : > { %1868 = vst.msk [vmem:[#allocation4 + $0xa8] sm:$0xff] %vm1846_vm7, %v1793_v26  ;;  %v1799_v28 = vpop.permute.xlu0 %1798 }
 0x255   : > { %2166 = vrot.lane.b32.xlu1 %v2087_v27, %s8278_s24  ;;  %1871 = vst.msk [vmem:[#allocation4 + $0xc0] sm:$0xff] %vm1846_vm7, %v1799_v28  ;;  %v2629_v27 = vld [vmem:[#allocation2 + $0x128] sm:$0xff] }
 0x256   : > { %2172 = vrot.lane.b32.xlu0 %v2090_v29, %s8278_s24  ;;  %v2628_v29 = vld [vmem:[#allocation2 + $0x110] sm:$0xff] }
 0x257   : > { %v1797_v30 = vpop.permute.xlu1 %1796 }
 0x258   : > { %1870 = vst.msk [vmem:[#allocation4 + $0xb8] sm:$0xff] %vm1846_vm7, %v1797_v30  ;;  %v1803_v33 = vpop.permute.xlu0 %1802 }
 0x259   : > { %2170 = vrot.lane.b32.xlu1 %v2089_v32, %s8278_s24  ;;  %1873 = vst.msk [vmem:[#allocation4 + $0xd0] sm:$0xff] %vm1846_vm7, %v1803_v33  ;;  %v2631_v32 = vld [vmem:[#allocation2 + $0x148] sm:$0xff] }
 0x25a   : > { %2176 = vrot.lane.b32.xlu0 %v2092_v34, %s8278_s24  ;;  %v2630_v34 = vld [vmem:[#allocation2 + $0x130] sm:$0xff] }
 0x25b   : > { %v1801_v36 = vpop.permute.xlu1 %1800 }
 0x25c   : > { %1872 = vst.msk [vmem:[#allocation4 + $0xc8] sm:$0xff] %vm1846_vm7, %v1801_v36  ;;  %v1807_v38 = vpop.permute.xlu0 %1806 }
 0x25d   : > { %2174 = vrot.lane.b32.xlu1 %v2091_v37, %s8278_s24  ;;  %1875 = vst.msk [vmem:[#allocation4 + $0xe0] sm:$0xff] %vm1846_vm7, %v1807_v38  ;;  %v2633_v37 = vld [vmem:[#allocation2 + $0x168] sm:$0xff] }
 0x25e   : > { %2180 = vrot.lane.b32.xlu0 %v2094_v39, %s8278_s24  ;;  %v2632_v39 = vld [vmem:[#allocation2 + $0x150] sm:$0xff] }
 0x25f   : > { %v1805_v40 = vpop.permute.xlu1 %1804 }
 0x260   : > { %1874 = vst.msk [vmem:[#allocation4 + $0xd8] sm:$0xff] %vm1846_vm7, %v1805_v40  ;;  %v1811_v42 = vpop.permute.xlu0 %1810 }
 0x261   : > { %2178 = vrot.lane.b32.xlu1 %v2093_v41, %s8278_s24  ;;  %1877 = vst.msk [vmem:[#allocation4 + $0xf0] sm:$0xff] %vm1846_vm7, %v1811_v42  ;;  %v2635_v41 = vld [vmem:[#allocation2 + $0x188] sm:$0xff] }
 0x262   : > { %2184 = vrot.lane.b32.xlu0 %v2096_v45, %s8278_s24  ;;  %v2634_v45 = vld [vmem:[#allocation2 + $0x170] sm:$0xff] }
 0x263   : > { %v1809_v46 = vpop.permute.xlu1 %1808 }
 0x264   : > { %1876 = vst.msk [vmem:[#allocation4 + $0xe8] sm:$0xff] %vm1846_vm7, %v1809_v46  ;;  %v1944_v9 = vpop.permute.xlu0 %1943 }
 0x265   : > { %2182 = vrot.lane.b32.xlu1 %v2095_v47, %s8278_s24  ;;  %2040 = vst.msk [vmem:[#allocation4] sm:$0xff] %vm2039_vm9, %v1944_v9  ;;  %v2637_v47 = vld [vmem:[#allocation2 + $0x1a8] sm:$0xff] }
 0x266   : > { %2188 = vrot.lane.b32.xlu0 %v2098_v51, %s8278_s24  ;;  %v2636_v51 = vld [vmem:[#allocation2 + $0x190] sm:$0xff] }
 0x267   : > { %v1813_v55 = vpop.permute.xlu1 %1812 }
 0x268   : > { %1878 = vst.msk [vmem:[#allocation4 + $0xf8] sm:$0xff] %vm1846_vm7, %v1813_v55  ;;  %v1948_v10 = vpop.permute.xlu0 %1947 }
 0x269   : > { %2186 = vrot.lane.b32.xlu1 %v2097_v48, %s8278_s24  ;;  %2042 = vst.msk [vmem:[#allocation4 + $0x10] sm:$0xff] %vm2039_vm9, %v1948_v10  ;;  %v2639_v48 = vld [vmem:[#allocation2 + $0x1c8] sm:$0xff]  ;;  %v2638_v10 = vld [vmem:[#allocation2 + $0x1b0] sm:$0xff] }
 0x26a   : > { %2192 = vrot.lane.b32.xlu0 %v9461_v14, %s8278_s24  ;;  %v2103_v14 = vld [vmem:[#allocation3 + $0x231] sm:$0xff] }
 0x26b   : > { %v1946_v1 = vpop.permute.xlu1 %1945 }
 0x26c   : > { %2041 = vst.msk [vmem:[#allocation4 + $0x8] sm:$0xff] %vm2039_vm9, %v1946_v1  ;;  %v1952_v4 = vpop.permute.xlu0 %1951 }
 0x26d   : > { %2190 = vrot.lane.b32.xlu1 %v2099_v52, %s8278_s24  ;;  %2044 = vst.msk [vmem:[#allocation4 + $0x20] sm:$0xff] %vm2039_vm9, %v1952_v4  ;;  %v2547_v52 = vld [vmem:[#allocation2 + $0x7] sm:$0xff] }
 0x26e   : > { %2196 = vrot.lane.b32.xlu0 %v2102_v11, %s8278_s24  ;;  %v2641_v11 = vld [vmem:[#allocation2 + $0x1e8] sm:$0xff] }
 0x26f   : > { %v1950_v56 = vpop.permute.xlu1 %1949 }
 0x270   : > { %2043 = vst.msk [vmem:[#allocation4 + $0x18] sm:$0xff] %vm2039_vm9, %v1950_v56  ;;  %v1956_v15 = vpop.permute.xlu0 %1955 }
 0x271   : > { %2194 = vrot.lane.b32.xlu1 %v9473_v7, %s8278_s24  ;;  %2046 = vst.msk [vmem:[#allocation4 + $0x30] sm:$0xff] %vm2039_vm9, %v1956_v15  ;;  %v9776_v15 = vld [vmem:[#allocation2 + $0x27] sm:$0xff] }
 0x272   : > { %2675 = vrot.lane.b32.xlu0 %v2611_v12, %s8271_s11  ;;  %v2640_v12 = vld [vmem:[#allocation2 + $0x1d0] sm:$0xff] }
 0x273   : > { %v1954_v17 = vpop.permute.xlu1 %1953 }
 0x274   : > { %2045 = vst.msk [vmem:[#allocation4 + $0x28] sm:$0xff] %vm2039_vm9, %v1954_v17  ;;  %v1960_v19 = vpop.permute.xlu0 %1959  ;;  %v2803_v17 = vld [vmem:[#allocation2 + $0x9] sm:$0xff] }
 0x275   : > { %2198 = vrot.lane.b32.xlu1 %v2103_v14, %s8278_s24  ;;  %2048 = vst.msk [vmem:[#allocation4 + $0x40] sm:$0xff] %vm2039_vm9, %v1960_v19 }
 0x276   : > { %2679 = vrot.lane.b32.xlu0 %v2613_v3, %s8271_s11 }
 0x277   : > { %v1958_v22 = vpop.permute.xlu1 %1957 }
 0x278   : > { %2047 = vst.msk [vmem:[#allocation4 + $0x38] sm:$0xff] %vm2039_vm9, %v1958_v22  ;;  %v1964_v7 = vpop.permute.xlu0 %1963  ;;  %v2642_v22 = vld [vmem:[#allocation2 + $0x1f0] sm:$0xff] }
 0x279   : > { %2677 = vrot.lane.b32.xlu1 %v2612_v61, %s8271_s11  ;;  %2050 = vst.msk [vmem:[#allocation4 + $0x50] sm:$0xff] %vm2039_vm9, %v1964_v7  ;;  %v2548_v61 = vld [vmem:[#allocation2 + $0xf] sm:$0xff] }
 0x27a   : > { %2683 = vrot.lane.b32.xlu0 %v2615_v31, %s8271_s11  ;;  %v9784_v31 = vld [vmem:[#allocation2 + $0x47] sm:$0xff] }
 0x27b   : > { %v1962_v43 = vpop.permute.xlu1 %1961 }
 0x27c   : > { %2049 = vst.msk [vmem:[#allocation4 + $0x48] sm:$0xff] %vm2039_vm9, %v1962_v43  ;;  %v1968_v49 = vpop.permute.xlu0 %1967  ;;  %v9786_v43 = vld [vmem:[#allocation2 + $0x29] sm:$0xff] }
 0x27d   : > { %2681 = vrot.lane.b32.xlu1 %v2614_v35, %s8271_s11  ;;  %2052 = vst.msk [vmem:[#allocation4 + $0x60] sm:$0xff] %vm2039_vm9, %v1968_v49 }
 0x27e   : > { %2687 = vrot.lane.b32.xlu0 %v2617_v44, %s8271_s11 }
 0x27f   : > { %v1966_v53 = vpop.permute.xlu1 %1965 }
 0x280   : > { %2051 = vst.msk [vmem:[#allocation4 + $0x58] sm:$0xff] %vm2039_vm9, %v1966_v53  ;;  %v1972_v54 = vpop.permute.xlu0 %1971  ;;  %v9792_v53 = vld [vmem:[#allocation2 + $0x2f] sm:$0xff] }
 0x281   : > { %2685 = vrot.lane.b32.xlu1 %v2616_v50, %s8271_s11  ;;  %2054 = vst.msk [vmem:[#allocation4 + $0x70] sm:$0xff] %vm2039_vm9, %v1972_v54  ;;  %v9799_v54 = vld [vmem:[#allocation2 + $0x67] sm:$0xff] }
 0x282   : > { %2691 = vrot.lane.b32.xlu0 %v2619_v6, %s8271_s11  ;;  %v2804_v6 = vld [vmem:[#allocation2 + $0x11] sm:$0xff] }
 0x283   : > { %v1970_v58 = vpop.permute.xlu1 %1969 }
 0x284   : > { %2053 = vst.msk [vmem:[#allocation4 + $0x68] sm:$0xff] %vm2039_vm9, %v1970_v58  ;;  %v1976_v57 = vpop.permute.xlu0 %1975 }
 0x285   : > { %2689 = vrot.lane.b32.xlu1 %v2618_v18, %s8271_s11  ;;  %2056 = vst.msk [vmem:[#allocation4 + $0x80] sm:$0xff] %vm2039_vm9, %v1976_v57 }
 0x286   : > { %2695 = vrot.lane.b32.xlu0 %v2621_v59, %s8271_s11  ;;  %v9801_v59 = vld [vmem:[#allocation2 + $0x49] sm:$0xff] }
 0x287   : > { %v1974_v60 = vpop.permute.xlu1 %1973 }
 0x288   : > { %2055 = vst.msk [vmem:[#allocation4 + $0x78] sm:$0xff] %vm2039_vm9, %v1974_v60  ;;  %v1980_v63 = vpop.permute.xlu0 %1979 }
 0x289   : > { %2693 = vrot.lane.b32.xlu1 %v2620_v13, %s8271_s11  ;;  %2058 = vst.msk [vmem:[#allocation4 + $0x90] sm:$0xff] %vm2039_vm9, %v1980_v63  ;;  %v9813_v63 = vld [vmem:[#allocation2 + $0x31] sm:$0xff] }
 0x28a   : > { %2699 = vrot.lane.b32.xlu0 %v2623_v62, %s8271_s11  ;;  %v9808_v62 = vld [vmem:[#allocation2 + $0x4f] sm:$0xff] }
 0x28b   : > { %v1978_v0 = vpop.permute.xlu1 %1977 }
 0x28c   : > { %2057 = vst.msk [vmem:[#allocation4 + $0x88] sm:$0xff] %vm2039_vm9, %v1978_v0  ;;  %v1984_v5 = vpop.permute.xlu0 %1983 }
 0x28d   : > { %2697 = vrot.lane.b32.xlu1 %v2622_v2, %s8271_s11  ;;  %2060 = vst.msk [vmem:[#allocation4 + $0xa0] sm:$0xff] %vm2039_vm9, %v1984_v5  ;;  %v9817_v2 = vld [vmem:[#allocation2 + $0x87] sm:$0xff] }
 0x28e   : > { %2703 = vrot.lane.b32.xlu0 %v2625_v16, %s8271_s11  ;;  %v9819_v5 = vld [vmem:[#allocation2 + $0x69] sm:$0xff] }
 0x28f   : > { %v1982_v8 = vpop.permute.xlu1 %1981 }
 0x290   : > { %2059 = vst.msk [vmem:[#allocation4 + $0x98] sm:$0xff] %vm2039_vm9, %v1982_v8  ;;  %v1988_v21 = vpop.permute.xlu0 %1987 }
 0x291   : > { %2701 = vrot.lane.b32.xlu1 %v2624_v20, %s8271_s11  ;;  %2062 = vst.msk [vmem:[#allocation4 + $0xb0] sm:$0xff] %vm2039_vm9, %v1988_v21  ;;  %v9827_v21 = vld [vmem:[#allocation2 + $0x6f] sm:$0xff] }
 0x292   : > { %2707 = vrot.lane.b32.xlu0 %v2627_v23, %s8271_s11 }
 0x293   : > { %v1986_v24 = vpop.permute.xlu1 %1985 }
 0x294   : > { %2061 = vst.msk [vmem:[#allocation4 + $0xa8] sm:$0xff] %vm2039_vm9, %v1986_v24  ;;  %v1992_v26 = vpop.permute.xlu0 %1991  ;;  %v9836_v24 = vld [vmem:[#allocation2 + $0xa7] sm:$0xff] }
 0x295   : > { %2705 = vrot.lane.b32.xlu1 %v2626_v25, %s8271_s11  ;;  %2064 = vst.msk [vmem:[#allocation4 + $0xc0] sm:$0xff] %vm2039_vm9, %v1992_v26  ;;  %v9832_v25 = vld [vmem:[#allocation2 + $0x51] sm:$0xff] }
 0x296   : > { %2711 = vrot.lane.b32.xlu0 %v2629_v27, %s8271_s11 }
 0x297   : > { %v1990_v28 = vpop.permute.xlu1 %1989 }
 0x298   : > { %2063 = vst.msk [vmem:[#allocation4 + $0xb8] sm:$0xff] %vm2039_vm9, %v1990_v28  ;;  %v1996_v30 = vpop.permute.xlu0 %1995 }
 0x299   : > { %2709 = vrot.lane.b32.xlu1 %v2628_v29, %s8271_s11  ;;  %2066 = vst.msk [vmem:[#allocation4 + $0xd0] sm:$0xff] %vm2039_vm9, %v1996_v30  ;;  %v9838_v29 = vld [vmem:[#allocation2 + $0x89] sm:$0xff] }
 0x29a   : > { %2715 = vrot.lane.b32.xlu0 %v2631_v32, %s8271_s11 }
 0x29b   : > { %v1994_v33 = vpop.permute.xlu1 %1993 }
 0x29c   : > { %2065 = vst.msk [vmem:[#allocation4 + $0xc8] sm:$0xff] %vm2039_vm9, %v1994_v33  ;;  %v2000_v36 = vpop.permute.xlu0 %1999  ;;  %v9851_v33 = vld [vmem:[#allocation2 + $0x71] sm:$0xff] }
 0x29d   : > { %2713 = vrot.lane.b32.xlu1 %v2630_v34, %s8271_s11  ;;  %2068 = vst.msk [vmem:[#allocation4 + $0xe0] sm:$0xff] %vm2039_vm9, %v2000_v36  ;;  %v9846_v34 = vld [vmem:[#allocation2 + $0x8f] sm:$0xff] }
 0x29e   : > { %2719 = vrot.lane.b32.xlu0 %v2633_v37, %s8271_s11  ;;  %v9855_v37 = vld [vmem:[#allocation2 + $0xc7] sm:$0xff] }
 0x29f   : > { %v1998_v38 = vpop.permute.xlu1 %1997 }
 0x2a0   : > { %2067 = vst.msk [vmem:[#allocation4 + $0xd8] sm:$0xff] %vm2039_vm9, %v1998_v38  ;;  %v2004_v40 = vpop.permute.xlu0 %2003  ;;  %v9857_v38 = vld [vmem:[#allocation2 + $0xa9] sm:$0xff] }
 0x2a1   : > { %2717 = vrot.lane.b32.xlu1 %v2632_v39, %s8271_s11  ;;  %2070 = vst.msk [vmem:[#allocation4 + $0xf0] sm:$0xff] %vm2039_vm9, %v2004_v40 }
 0x2a2   : > { %2723 = vrot.lane.b32.xlu0 %v2635_v41, %s8271_s11 }
 0x2a3   : > { %v2002_v42 = vpop.permute.xlu1 %2001 }
 0x2a4   : > { %2069 = vst.msk [vmem:[#allocation4 + $0xe8] sm:$0xff] %vm2039_vm9, %v2002_v42  ;;  %v2137_v46 = vpop.permute.xlu0 %2136  ;;  %v9865_v42 = vld [vmem:[#allocation2 + $0xaf] sm:$0xff] }
 0x2a5   : > { %2721 = vrot.lane.b32.xlu1 %v2634_v45, %s8271_s11  ;;  %2233 = vst.msk [vmem:[#allocation4] sm:$0xff] %vm2232_vm10, %v2137_v46  ;;  %v9874_v46 = vld [vmem:[#allocation2 + $0xe7] sm:$0xff] }
 0x2a6   : > { %2727 = vrot.lane.b32.xlu0 %v2637_v47, %s8271_s11  ;;  %v9870_v47 = vld [vmem:[#allocation2 + $0x91] sm:$0xff] }
 0x2a7   : > { %v2006_v9 = vpop.permute.xlu1 %2005 }
 0x2a8   : > { %2071 = vst.msk [vmem:[#allocation4 + $0xf8] sm:$0xff] %vm2039_vm9, %v2006_v9  ;;  %v2141_v55 = vpop.permute.xlu0 %2140 }
 0x2a9   : > { %2725 = vrot.lane.b32.xlu1 %v2636_v51, %s8271_s11  ;;  %2235 = vst.msk [vmem:[#allocation4 + $0x10] sm:$0xff] %vm2232_vm10, %v2141_v55 }
 0x2aa   : > { %2731 = vrot.lane.b32.xlu0 %v2639_v48, %s8271_s11  ;;  %v9876_v48 = vld [vmem:[#allocation2 + $0xc9] sm:$0xff] }
 0x2ab   : > { %v2139_v1 = vpop.permute.xlu1 %2138 }
 0x2ac   : > { %2234 = vst.msk [vmem:[#allocation4 + $0x8] sm:$0xff] %vm2232_vm10, %v2139_v1  ;;  %v2145_v4 = vpop.permute.xlu0 %2144  ;;  %v2265_v56 = vld [vmem:[#allocation4] sm:$0xff]  ;;  %v9884_v1 = vld [vmem:[#allocation2 + $0xcf] sm:$0xff] }
 0x2ad   : > { %2729 = vrot.lane.b32.xlu1 %v2638_v10, %s8271_s11  ;;  %2237 = vst.msk [vmem:[#allocation4 + $0x20] sm:$0xff] %vm2232_vm10, %v2145_v4  ;;  %v9893_v4 = vld [vmem:[#allocation2 + $0x107] sm:$0xff] }
 0x2ae   : > { %2579 = vst.msk [vmem:[#allocation4] sm:$0xff] %vm623_vm1, %v2547_v52  ;;  %2735 = vrot.lane.b32.xlu0 %v2641_v11, %s8271_s11  ;;  %v9889_v11 = vld [vmem:[#allocation2 + $0xb1] sm:$0xff] }
 0x2af   : > { %v2143_v14 = vpop.permute.xlu1 %2142 }
 0x2b0   : > { %2236 = vst.msk [vmem:[#allocation4 + $0x18] sm:$0xff] %vm2232_vm10, %v2143_v14  ;;  %v2149_v3 = vpop.permute.xlu0 %2148  ;;  %v2267_v19 = vld [vmem:[#allocation4 + $0x10] sm:$0xff] }
 0x2b1   : > { %2733 = vrot.lane.b32.xlu1 %v2640_v12, %s8271_s11  ;;  %2239 = vst.msk [vmem:[#allocation4 + $0x30] sm:$0xff] %vm2232_vm10, %v2149_v3  ;;  %v9895_v14 = vld [vmem:[#allocation2 + $0xe9] sm:$0xff] }
 0x2b2   : > { %2581 = vst.msk [vmem:[#allocation4 + $0x10] sm:$0xff] %vm623_vm1, %v9776_v15  ;;  %2867 = vrot.lane.b32.xlu0 %v2803_v17, %s8272_s13 }
 0x2b3   : > { %v2147_v7 = vpop.permute.xlu1 %2146  ;;  %v2266_v35 = vld [vmem:[#allocation4 + $0x8] sm:$0xff] }
 0x2b4   : > { %2238 = vst.msk [vmem:[#allocation4 + $0x28] sm:$0xff] %vm2232_vm10, %v2147_v7  ;;  %v2297_v44 = vpack.c.bf16 %v2266_v35, %v2265_v56  ;;  %v2153_v49 = vpop.permute.xlu0 %2152  ;;  %v2269_v50 = vld [vmem:[#allocation4 + $0x20] sm:$0xff] }
 0x2b5   : > { %2580 = vst.msk [vmem:[#allocation4 + $0x8] sm:$0xff] %vm623_vm1, %v2548_v61  ;;  %2737 = vrot.lane.b32.xlu1 %v2642_v22, %s8271_s11  ;;  %2583 = vst.msk [vmem:[#allocation4 + $0x20] sm:$0xff] %vm623_vm1, %v9784_v31  ;;  %v9903_v61 = vld [vmem:[#allocation2 + $0xef] sm:$0xff]  ;;  %v9912_v7 = vld [vmem:[#allocation2 + $0x127] sm:$0xff] }
 0x2b6   : > { %2241 = vst.msk [vmem:[#allocation4 + $0x40] sm:$0xff] %vm2232_vm10, %v2153_v49  ;;  %7826 = vmatprep.mubr.msk.bf16.mxu0 %vm2333_vm11, %v2297_v44  ;;  %2871 = vrot.lane.b32.xlu0 %v9786_v43, %s8272_s13  ;;  %v9908_v22 = vld [vmem:[#allocation2 + $0xd1] sm:$0xff]  ;;  %v9914_v49 = vld [vmem:[#allocation2 + $0x109] sm:$0xff] }
 0x2b7   : > { %v2151_v18 = vpop.permute.xlu1 %2150  ;;  %v2268_v58 = vld [vmem:[#allocation4 + $0x18] sm:$0xff] }
 0x2b8   : > { %2240 = vst.msk [vmem:[#allocation4 + $0x38] sm:$0xff] %vm2232_vm10, %v2151_v18  ;;  %v2298_v57 = vpack.c.bf16 %v2268_v58, %v2267_v19  ;;  %v2157_v13 = vpop.permute.xlu0 %2156  ;;  %v2271_v60 = vld [vmem:[#allocation4 + $0x30] sm:$0xff] }
 0x2b9   : > { %2582 = vst.msk [vmem:[#allocation4 + $0x18] sm:$0xff] %vm623_vm1, %v9792_v53  ;;  %2869 = vrot.lane.b32.xlu1 %v2804_v6, %s8272_s13  ;;  %2585 = vst.msk [vmem:[#allocation4 + $0x30] sm:$0xff] %vm623_vm1, %v9799_v54  ;;  %v9922_v58 = vld [vmem:[#allocation2 + $0x10f] sm:$0xff] }
 0x2ba   : > { %2243 = vst.msk [vmem:[#allocation4 + $0x50] sm:$0xff] %vm2232_vm10, %v2157_v13  ;;  %7827 = vmatmul.mubr.msk.bf16.vlgmr.msra.gmra.mrb[0].mxu0 %vm2333_vm11, %v2298_v57  ;;  %2875 = vrot.lane.b32.xlu0 %v9801_v59, %s8272_s13  ;;  %v9927_v57 = vld [vmem:[#allocation2 + $0xf1] sm:$0xff]  ;;  %v9931_v13 = vld [vmem:[#allocation2 + $0x147] sm:$0xff] }
 0x2bb   : > { %v2155_v0 = vpop.permute.xlu1 %2154  ;;  %v2270_v16 = vld [vmem:[#allocation4 + $0x28] sm:$0xff] }
 0x2bc   : > { %2242 = vst.msk [vmem:[#allocation4 + $0x48] sm:$0xff] %vm2232_vm10, %v2155_v0  ;;  %v2299_v20 = vpack.c.bf16 %v2270_v16, %v2269_v50  ;;  %v2161_v8 = vpop.permute.xlu0 %2160  ;;  %v9933_v16 = vld [vmem:[#allocation2 + $0x129] sm:$0xff] }
 0x2bd   : > { %v2273_v23 = vld [vmem:[#allocation4 + $0x40] sm:$0xff]  ;;  %2584 = vst.msk [vmem:[#allocation4 + $0x28] sm:$0xff] %vm623_vm1, %v9808_v62  ;;  %2873 = vrot.lane.b32.xlu1 %v9813_v63, %s8272_s13 }
 0x2be   : > { %2245 = vst.msk [vmem:[#allocation4 + $0x60] sm:$0xff] %vm2232_vm10, %v2161_v8  ;;  %7830 = vmatprep.mubr.msk.bf16.mxu0 %vm2333_vm11, %v2299_v20  ;;  %2879 = vrot.lane.b32.xlu0 %v9819_v5, %s8272_s13 }
 0x2bf   : > { %2587 = vst.msk [vmem:[#allocation4 + $0x40] sm:$0xff] %vm623_vm1, %v9817_v2  ;;  %v2159_v27 = vpop.permute.xlu1 %2158  ;;  %v2272_v26 = vld [vmem:[#allocation4 + $0x38] sm:$0xff] }
 0x2c0   : > { %2244 = vst.msk [vmem:[#allocation4 + $0x58] sm:$0xff] %vm2232_vm10, %v2159_v27  ;;  %v2300_v28 = vpack.c.bf16 %v2272_v26, %v2271_v60  ;;  %v2165_v32 = vpop.permute.xlu0 %2164  ;;  %v9941_v27 = vld [vmem:[#allocation2 + $0x12f] sm:$0xff] }
 0x2c1   : > { %v2275_v30 = vld [vmem:[#allocation4 + $0x50] sm:$0xff]  ;;  %2586 = vst.msk [vmem:[#allocation4 + $0x38] sm:$0xff] %vm623_vm1, %v9827_v21  ;;  %2877 = vrot.lane.b32.xlu1 %v9832_v25, %s8272_s13 }
 0x2c2   : > { %2247 = vst.msk [vmem:[#allocation4 + $0x70] sm:$0xff] %vm2232_vm10, %v2165_v32  ;;  %7831 = vmatmul.mubr.msk.bf16.gmra.mrb[4].mxu0 %vm2333_vm11, %v2300_v28  ;;  %2883 = vrot.lane.b32.xlu0 %v9838_v29, %s8272_s13  ;;  %v9946_v26 = vld [vmem:[#allocation2 + $0x111] sm:$0xff]  ;;  %v9950_v28 = vld [vmem:[#allocation2 + $0x167] sm:$0xff] }
 0x2c3   : > { %2589 = vst.msk [vmem:[#allocation4 + $0x50] sm:$0xff] %vm623_vm1, %v9836_v24  ;;  %v2163_v36 = vpop.permute.xlu1 %2162  ;;  %v2274_v39 = vld [vmem:[#allocation4 + $0x48] sm:$0xff] }
 0x2c4   : > { %2246 = vst.msk [vmem:[#allocation4 + $0x68] sm:$0xff] %vm2232_vm10, %v2163_v36  ;;  %v2301_v41 = vpack.c.bf16 %v2274_v39, %v2273_v23  ;;  %v2169_v40 = vpop.permute.xlu0 %2168  ;;  %v9952_v36 = vld [vmem:[#allocation2 + $0x149] sm:$0xff] }
 0x2c5   : > { %v2277_v45 = vld [vmem:[#allocation4 + $0x60] sm:$0xff]  ;;  %2588 = vst.msk [vmem:[#allocation4 + $0x48] sm:$0xff] %vm623_vm1, %v9846_v34  ;;  %2881 = vrot.lane.b32.xlu1 %v9851_v33, %s8272_s13 }
 0x2c6   : > { %2249 = vst.msk [vmem:[#allocation4 + $0x80] sm:$0xff] %vm2232_vm10, %v2169_v40  ;;  %7834 = vmatprep.mubr.msk.bf16.mxu0 %vm2333_vm11, %v2301_v41  ;;  %2887 = vrot.lane.b32.xlu0 %v9857_v38, %s8272_s13 }
 0x2c7   : > { %2591 = vst.msk [vmem:[#allocation4 + $0x60] sm:$0xff] %vm623_vm1, %v9855_v37  ;;  %v2167_v51 = vpop.permute.xlu1 %2166  ;;  %v2276_v9 = vld [vmem:[#allocation4 + $0x58] sm:$0xff] }
 0x2c8   : > { %2248 = vst.msk [vmem:[#allocation4 + $0x78] sm:$0xff] %vm2232_vm10, %v2167_v51  ;;  %v2302_v55 = vpack.c.bf16 %v2276_v9, %v2275_v30  ;;  %v2173_v10 = vpop.permute.xlu0 %2172  ;;  %v9965_v51 = vld [vmem:[#allocation2 + $0x131] sm:$0xff]  ;;  %v9969_v9 = vld [vmem:[#allocation2 + $0x187] sm:$0xff] }
 0x2c9   : > { %v2279_v52 = vld [vmem:[#allocation4 + $0x70] sm:$0xff]  ;;  %2590 = vst.msk [vmem:[#allocation4 + $0x58] sm:$0xff] %vm623_vm1, %v9865_v42  ;;  %2885 = vrot.lane.b32.xlu1 %v9870_v47, %s8272_s13 }
 0x2ca   : > { %2251 = vst.msk [vmem:[#allocation4 + $0x90] sm:$0xff] %vm2232_vm10, %v2173_v10  ;;  %7835 = vmatmul.mubr.msk.bf16.gmra.mrb[8].mxu0 %vm2333_vm11, %v2302_v55  ;;  %2891 = vrot.lane.b32.xlu0 %v9876_v48, %s8272_s13 }
 0x2cb   : > { %2593 = vst.msk [vmem:[#allocation4 + $0x70] sm:$0xff] %vm623_vm1, %v9874_v46  ;;  %v2171_v56 = vpop.permute.xlu1 %2170  ;;  %v2278_v12 = vld [vmem:[#allocation4 + $0x68] sm:$0xff] }
 0x2cc   : > { %2250 = vst.msk [vmem:[#allocation4 + $0x88] sm:$0xff] %vm2232_vm10, %v2171_v56  ;;  %v2303_v17 = vpack.c.bf16 %v2278_v12, %v2277_v45  ;;  %v2177_v3 = vpop.permute.xlu0 %2176  ;;  %v9960_v45 = vld [vmem:[#allocation2 + $0x14f] sm:$0xff] }
 0x2cd   : > { %v2281_v19 = vld [vmem:[#allocation4 + $0x80] sm:$0xff]  ;;  %2592 = vst.msk [vmem:[#allocation4 + $0x68] sm:$0xff] %vm623_vm1, %v9884_v1  ;;  %2889 = vrot.lane.b32.xlu1 %v9889_v11, %s8272_s13 }
 0x2ce   : > { %2253 = vst.msk [vmem:[#allocation4 + $0xa0] sm:$0xff] %vm2232_vm10, %v2177_v3  ;;  %7838 = vmatprep.mubr.msk.bf16.mxu0 %vm2333_vm11, %v2303_v17  ;;  %2895 = vrot.lane.b32.xlu0 %v9895_v14, %s8272_s13  ;;  %v9979_v3 = vld [vmem:[#allocation2 + $0x16f] sm:$0xff] }
 0x2cf   : > { %2595 = vst.msk [vmem:[#allocation4 + $0x80] sm:$0xff] %vm623_vm1, %v9893_v4  ;;  %v2175_v35 = vpop.permute.xlu1 %2174  ;;  %v2280_v44 = vld [vmem:[#allocation4 + $0x78] sm:$0xff] }
 0x2d0   : > { %2252 = vst.msk [vmem:[#allocation4 + $0x98] sm:$0xff] %vm2232_vm10, %v2175_v35  ;;  %v2304_v50 = vpack.c.bf16 %v2280_v44, %v2279_v52  ;;  %v2181_v6 = vpop.permute.xlu0 %2180  ;;  %v9971_v52 = vld [vmem:[#allocation2 + $0x169] sm:$0xff] }
 0x2d1   : > { %v2283_v18 = vld [vmem:[#allocation4 + $0x90] sm:$0xff]  ;;  %2594 = vst.msk [vmem:[#allocation4 + $0x78] sm:$0xff] %vm623_vm1, %v9903_v61  ;;  %2893 = vrot.lane.b32.xlu1 %v9908_v22, %s8272_s13  ;;  %v9988_v35 = vld [vmem:[#allocation2 + $0x1a7] sm:$0xff] }
 0x2d2   : > { %2255 = vst.msk [vmem:[#allocation4 + $0xb0] sm:$0xff] %vm2232_vm10, %v2181_v6  ;;  %7839 = vmatmul.mubr.msk.bf16.gmra.mrb[12].mxu0 %vm2333_vm11, %v2304_v50  ;;  %2899 = vrot.lane.b32.xlu0 %v9914_v49, %s8272_s13  ;;  %v9990_v6 = vld [vmem:[#allocation2 + $0x189] sm:$0xff] }
 0x2d3   : > { %2597 = vst.msk [vmem:[#allocation4 + $0x90] sm:$0xff] %vm623_vm1, %v9912_v7  ;;  %v2179_v60 = vpop.permute.xlu1 %2178  ;;  %v2282_v0 = vld [vmem:[#allocation4 + $0x88] sm:$0xff] }
 0x2d4   : > { %2254 = vst.msk [vmem:[#allocation4 + $0xa8] sm:$0xff] %vm2232_vm10, %v2179_v60  ;;  %v2305_v20 = vpack.c.bf16 %v2282_v0, %v2281_v19  ;;  %v2185_v8 = vpop.permute.xlu0 %2184  ;;  %v9984_v19 = vld [vmem:[#allocation2 + $0x151] sm:$0xff] }
 0x2d5   : > { %v2285_v23 = vld [vmem:[#allocation4 + $0xa0] sm:$0xff]  ;;  %2596 = vst.msk [vmem:[#allocation4 + $0x88] sm:$0xff] %vm623_vm1, %v9922_v58  ;;  %2897 = vrot.lane.b32.xlu1 %v9927_v57, %s8272_s13 }
 0x2d6   : > { %2257 = vst.msk [vmem:[#allocation4 + $0xc0] sm:$0xff] %vm2232_vm10, %v2185_v8  ;;  %7842 = vmatprep.mubr.msk.bf16.mxu1 %vm2333_vm11, %v2305_v20  ;;  %2903 = vrot.lane.b32.xlu0 %v9933_v16, %s8272_s13  ;;  %v9998_v20 = vld [vmem:[#allocation2 + $0x18f] sm:$0xff] }
 0x2d7   : > { %2599 = vst.msk [vmem:[#allocation4 + $0xa0] sm:$0xff] %vm623_vm1, %v9931_v13  ;;  %v2183_v32 = vpop.permute.xlu1 %2182  ;;  %v2284_v30 = vld [vmem:[#allocation4 + $0x98] sm:$0xff] }
 0x2d8   : > { %2256 = vst.msk [vmem:[#allocation4 + $0xb8] sm:$0xff] %vm2232_vm10, %v2183_v32  ;;  %v2306_v39 = vpack.c.bf16 %v2284_v30, %v2283_v18  ;;  %v2189_v41 = vpop.permute.xlu0 %2188  ;;  %v10003_v8 = vld [vmem:[#allocation2 + $0x171] sm:$0xff] }
 0x2d9   : > { %v2287_v40 = vld [vmem:[#allocation4 + $0xb0] sm:$0xff]  ;;  %2598 = vst.msk [vmem:[#allocation4 + $0x98] sm:$0xff] %vm623_vm1, %v9941_v27  ;;  %2901 = vrot.lane.b32.xlu1 %v9946_v26, %s8272_s13 }
 0x2da   : > { %2259 = vst.msk [vmem:[#allocation4 + $0xd0] sm:$0xff] %vm2232_vm10, %v2189_v41  ;;  %7843 = vmatmul.mubr.msk.bf16.vlgmr.msra.gmra.mrb[0].mxu1 %vm2333_vm11, %v2306_v39  ;;  %2907 = vrot.lane.b32.xlu0 %v9952_v36, %s8272_s13  ;;  %v10009_v39 = vld [vmem:[#allocation2 + $0x1a9] sm:$0xff] }
 0x2db   : > { %2601 = vst.msk [vmem:[#allocation4 + $0xb0] sm:$0xff] %vm623_vm1, %v9950_v28  ;;  %v2187_v55 = vpop.permute.xlu1 %2186  ;;  %v2286_v10 = vld [vmem:[#allocation4 + $0xa8] sm:$0xff] }
 0x2dc   : > { %2258 = vst.msk [vmem:[#allocation4 + $0xc8] sm:$0xff] %vm2232_vm10, %v2187_v55  ;;  %v2307_v56 = vpack.c.bf16 %v2286_v10, %v2285_v23  ;;  %v2193_v12 = vpop.permute.xlu0 %2192  ;;  %v10007_v23 = vld [vmem:[#allocation2 + $0x1c7] sm:$0xff]  ;;  %v10017_v10 = vld [vmem:[#allocation2 + $0x1af] sm:$0xff] }
 0x2dd   : > { %v2289_v17 = vld [vmem:[#allocation4 + $0xc0] sm:$0xff]  ;;  %2600 = vst.msk [vmem:[#allocation4 + $0xa8] sm:$0xff] %vm623_vm1, %v9960_v45  ;;  %2905 = vrot.lane.b32.xlu1 %v9965_v51, %s8272_s13 }
 0x2de   : > { %2261 = vst.msk [vmem:[#allocation4 + $0xe0] sm:$0xff] %vm2232_vm10, %v2193_v12  ;;  %7846 = vmatprep.mubr.msk.bf16.mxu1 %vm2333_vm11, %v2307_v56  ;;  %2911 = vrot.lane.b32.xlu0 %v9971_v52, %s8272_s13  ;;  %v10022_v56 = vld [vmem:[#allocation2 + $0x191] sm:$0xff]  ;;  %v10026_v12 = vld [vmem:[#allocation2 + $0x1e7] sm:$0xff] }
 0x2df   : > { %2603 = vst.msk [vmem:[#allocation4 + $0xc0] sm:$0xff] %vm623_vm1, %v9969_v9  ;;  %v2191_v44 = vpop.permute.xlu1 %2190  ;;  %v2288_v50 = vld [vmem:[#allocation4 + $0xb8] sm:$0xff]  ;;  %12811 = vst [vmem:[#allocation6_spill] sm:$0xff] %v10022_v56 }
 0x2e0   : > { %2260 = vst.msk [vmem:[#allocation4 + $0xd8] sm:$0xff] %vm2232_vm10, %v2191_v44  ;;  %v2308_v18 = vpack.c.bf16 %v2288_v50, %v2287_v40  ;;  %v2197_v60 = vpop.permute.xlu0 %2196  ;;  %v10028_v50 = vld [vmem:[#allocation2 + $0x1c9] sm:$0xff] }
 0x2e1   : > { %v2291_v0 = vld [vmem:[#allocation4 + $0xd0] sm:$0xff]  ;;  %2602 = vst.msk [vmem:[#allocation4 + $0xb8] sm:$0xff] %vm623_vm1, %v9979_v3  ;;  %2909 = vrot.lane.b32.xlu1 %v9984_v19, %s8272_s13  ;;  %12812 = vst [vmem:[#allocation7_spill] sm:$0xff] %v10028_v50 }
 0x2e2   : > { %2263 = vst.msk [vmem:[#allocation4 + $0xf0] sm:$0xff] %vm2232_vm10, %v2197_v60  ;;  %7847 = vmatmul.mubr.msk.bf16.gmra.mrb[4].mxu1 %vm2333_vm11, %v2308_v18  ;;  %2915 = vrot.lane.b32.xlu0 %v9990_v6, %s8272_s13 }
 0x2e3   : > { %2605 = vst.msk [vmem:[#allocation4 + $0xd0] sm:$0xff] %vm623_vm1, %v9988_v35  ;;  %v2195_v32 = vpop.permute.xlu1 %2194  ;;  %v2290_v30 = vld [vmem:[#allocation4 + $0xc8] sm:$0xff] }
 0x2e4   : > { %2262 = vst.msk [vmem:[#allocation4 + $0xe8] sm:$0xff] %vm2232_vm10, %v2195_v32  ;;  %v2309_v41 = vpack.c.bf16 %v2290_v30, %v2289_v17  ;;  %v2676_v40 = vpop.permute.xlu0 %2675  ;;  %v10036_v30 = vld [vmem:[#allocation2 + $0x1cf] sm:$0xff] }
 0x2e5   : > { %v2293_v55 = vld [vmem:[#allocation4 + $0xe0] sm:$0xff]  ;;  %2604 = vst.msk [vmem:[#allocation4 + $0xc8] sm:$0xff] %vm623_vm1, %v9998_v20  ;;  %2913 = vrot.lane.b32.xlu1 %v10003_v8, %s8272_s13 }
 0x2e6   : > { %2771 = vst.msk [vmem:[#allocation4] sm:$0xff] %vm880_vm2, %v2676_v40  ;;  %7850 = vmatprep.mubr.msk.bf16.mxu1 %vm2333_vm11, %v2309_v41  ;;  %2919 = vrot.lane.b32.xlu0 %v10009_v39, %s8272_s13  ;;  %v10041_v41 = vld [vmem:[#allocation2 + $0x1b1] sm:$0xff] }
 0x2e7   : > { %2607 = vst.msk [vmem:[#allocation4 + $0xe0] sm:$0xff] %vm623_vm1, %v10007_v23  ;;  %v2199_v17 = vpop.permute.xlu1 %2198  ;;  %v2292_v44 = vld [vmem:[#allocation4 + $0xd8] sm:$0xff] }
 0x2e8   : > { %2264 = vst.msk [vmem:[#allocation4 + $0xf8] sm:$0xff] %vm2232_vm10, %v2199_v17  ;;  %v2310_v18 = vpack.c.bf16 %v2292_v44, %v2291_v0  ;;  %v2680_v60 = vpop.permute.xlu0 %2679  ;;  %v10045_v17 = vld [vmem:[#allocation2 + $0x1e9] sm:$0xff] }
 0x2e9   : > { %v2295_v32 = vld [vmem:[#allocation4 + $0xf0] sm:$0xff]  ;;  %2606 = vst.msk [vmem:[#allocation4 + $0xd8] sm:$0xff] %vm623_vm1, %v10017_v10  ;;  %2917 = vrot.lane.b32.xlu1 %v10022_v56, %s8272_s13 }
 0x2ea   : > { %2773 = vst.msk [vmem:[#allocation4 + $0x10] sm:$0xff] %vm880_vm2, %v2680_v60  ;;  %7851 = vmatmul.mubr.msk.bf16.gmra.mrb[8].mxu1 %vm2333_vm11, %v2310_v18  ;;  %2923 = vrot.lane.b32.xlu0 %v10028_v50, %s8272_s13  ;;  %v10053_v18 = vld [vmem:[#allocation2 + $0x1ef] sm:$0xff] }
 0x2eb   : > { %2609 = vst.msk [vmem:[#allocation4 + $0xf0] sm:$0xff] %vm623_vm1, %v10026_v12  ;;  %v2678_v0 = vpop.permute.xlu1 %2677  ;;  %v2294_v40 = vld [vmem:[#allocation4 + $0xe8] sm:$0xff]  ;;  %12813 = vst [vmem:[#allocation8_spill] sm:$0xff] %v10053_v18  ;;  %v10056_v50 = vld [vmem:[#allocation2 + $0x1d1] sm:$0xff] }
 0x2ec   : > { %2772 = vst.msk [vmem:[#allocation4 + $0x8] sm:$0xff] %vm880_vm2, %v2678_v0  ;;  %v2311_v44 = vpack.c.bf16 %v2294_v40, %v2293_v55  ;;  %v2684_v60 = vpop.permute.xlu0 %2683 }
 0x2ed   : > { %2608 = vst.msk [vmem:[#allocation4 + $0xe8] sm:$0xff] %vm623_vm1, %v10036_v30  ;;  %2921 = vrot.lane.b32.xlu1 %v10041_v41, %s8272_s13 }
 0x2ee   : > { %2775 = vst.msk [vmem:[#allocation4 + $0x20] sm:$0xff] %vm880_vm2, %v2684_v60  ;;  %7854 = vmatprep.mubr.msk.bf16.mxu1 %vm2333_vm11, %v2311_v44  ;;  %2927 = vrot.lane.b32.xlu0 %v10045_v17, %s8272_s13  ;;  %v10067_v44 = vld [vmem:[#allocation2 + $0x1f1] sm:$0xff] }
 0x2ef   : > { %v2682_v0 = vpop.permute.xlu1 %2681  ;;  %v2296_v55 = vld [vmem:[#allocation4 + $0xf8] sm:$0xff] }
 0x2f0   : > { %2774 = vst.msk [vmem:[#allocation4 + $0x18] sm:$0xff] %vm880_vm2, %v2682_v0  ;;  %v2312_v40 = vpack.c.bf16 %v2296_v55, %v2295_v32  ;;  %v2688_v56 = vpop.permute.xlu0 %2687 }
 0x2f1   : > { %2610 = vst.msk [vmem:[#allocation4 + $0xf8] sm:$0xff] %vm623_vm1, %v10053_v18  ;;  %2925 = vrot.lane.b32.xlu1 %v10056_v50, %s8272_s13 }
 0x2f2   : > { %2777 = vst.msk [vmem:[#allocation4 + $0x30] sm:$0xff] %vm880_vm2, %v2688_v56  ;;  %7855 = vmatmul.mubr.msk.bf16.gmra.mrb[12].mxu1 %vm2333_vm11, %v2312_v40  ;;  %3060 = vrot.lane.b32.xlu0 %v9776_v15, %s8273_s14 }
 0x2f3   : > { %v2686_v60 = vpop.permute.xlu1 %2685 }
 0x2f4   : > { %2776 = vst.msk [vmem:[#allocation4 + $0x28] sm:$0xff] %vm880_vm2, %v2686_v60  ;;  %v2692_v32 = vpop.permute.xlu0 %2691 }
 0x2f5   : > { %2929 = vrot.lane.b32.xlu1 %v10067_v44, %s8272_s13  ;;  %2779 = vst.msk [vmem:[#allocation4 + $0x40] sm:$0xff] %vm880_vm2, %v2692_v32 }
 0x2f6   : > { %3064 = vrot.lane.b32.xlu0 %v9784_v31, %s8273_s14 }
 0x2f7   : > { %v2690_v56 = vpop.permute.xlu1 %2689 }
 0x2f8   : > { %2778 = vst.msk [vmem:[#allocation4 + $0x38] sm:$0xff] %vm880_vm2, %v2690_v56  ;;  %v2696_v0 = vpop.permute.xlu0 %2695 }
 0x2f9   : > { %3062 = vrot.lane.b32.xlu1 %v9792_v53, %s8273_s14  ;;  %2781 = vst.msk [vmem:[#allocation4 + $0x50] sm:$0xff] %vm880_vm2, %v2696_v0 }
 0x2fa   : > { %3068 = vrot.lane.b32.xlu0 %v9799_v54, %s8273_s14 }
 0x2fb   : > { %v2694_v15 = vpop.permute.xlu1 %2693 }
 0x2fc   : > { %2780 = vst.msk [vmem:[#allocation4 + $0x48] sm:$0xff] %vm880_vm2, %v2694_v15  ;;  %v2700_v55 = vpop.permute.xlu0 %2699 }
 0x2fd   : > { %3066 = vrot.lane.b32.xlu1 %v9808_v62, %s8273_s14  ;;  %2783 = vst.msk [vmem:[#allocation4 + $0x60] sm:$0xff] %vm880_vm2, %v2700_v55 }
 0x2fe   : > { %3072 = vrot.lane.b32.xlu0 %v9817_v2, %s8273_s14 }
 0x2ff   : > { %v2698_v40 = vpop.permute.xlu1 %2697 }
 0x300   : > { %2782 = vst.msk [vmem:[#allocation4 + $0x58] sm:$0xff] %vm880_vm2, %v2698_v40  ;;  %v2704_v53 = vpop.permute.xlu0 %2703 }
 0x301   : > { %3070 = vrot.lane.b32.xlu1 %v9827_v21, %s8273_s14  ;;  %2785 = vst.msk [vmem:[#allocation4 + $0x70] sm:$0xff] %vm880_vm2, %v2704_v53 }
 0x302   : > { %3076 = vrot.lane.b32.xlu0 %v9836_v24, %s8273_s14 }
 0x303   : > { %v2702_v60 = vpop.permute.xlu1 %2701 }
 0x304   : > { %2784 = vst.msk [vmem:[#allocation4 + $0x68] sm:$0xff] %vm880_vm2, %v2702_v60  ;;  %v2708_v32 = vpop.permute.xlu0 %2707 }
 0x305   : > { %3074 = vrot.lane.b32.xlu1 %v9846_v34, %s8273_s14  ;;  %2787 = vst.msk [vmem:[#allocation4 + $0x80] sm:$0xff] %vm880_vm2, %v2708_v32 }
 0x306   : > { %3080 = vrot.lane.b32.xlu0 %v9855_v37, %s8273_s14 }
 0x307   : > { %v2706_v56 = vpop.permute.xlu1 %2705 }
 0x308   : > { %2786 = vst.msk [vmem:[#allocation4 + $0x78] sm:$0xff] %vm880_vm2, %v2706_v56  ;;  %v2712_v0 = vpop.permute.xlu0 %2711 }
 0x309   : > { %3078 = vrot.lane.b32.xlu1 %v9865_v42, %s8273_s14  ;;  %2789 = vst.msk [vmem:[#allocation4 + $0x90] sm:$0xff] %vm880_vm2, %v2712_v0 }
 0x30a   : > { %3084 = vrot.lane.b32.xlu0 %v9874_v46, %s8273_s14 }
 0x30b   : > { %v2710_v15 = vpop.permute.xlu1 %2709 }
 0x30c   : > { %2788 = vst.msk [vmem:[#allocation4 + $0x88] sm:$0xff] %vm880_vm2, %v2710_v15  ;;  %v2716_v55 = vpop.permute.xlu0 %2715 }
 0x30d   : > { %3082 = vrot.lane.b32.xlu1 %v9884_v1, %s8273_s14  ;;  %2791 = vst.msk [vmem:[#allocation4 + $0xa0] sm:$0xff] %vm880_vm2, %v2716_v55 }
 0x30e   : > { %3088 = vrot.lane.b32.xlu0 %v9893_v4, %s8273_s14 }
 0x30f   : > { %v2714_v40 = vpop.permute.xlu1 %2713 }
 0x310   : > { %2790 = vst.msk [vmem:[#allocation4 + $0x98] sm:$0xff] %vm880_vm2, %v2714_v40  ;;  %v2720_v53 = vpop.permute.xlu0 %2719 }
 0x311   : > { %3086 = vrot.lane.b32.xlu1 %v9903_v61, %s8273_s14  ;;  %2793 = vst.msk [vmem:[#allocation4 + $0xb0] sm:$0xff] %vm880_vm2, %v2720_v53 }
 0x312   : > { %3092 = vrot.lane.b32.xlu0 %v9912_v7, %s8273_s14 }
 0x313   : > { %v2718_v60 = vpop.permute.xlu1 %2717 }
 0x314   : > { %2792 = vst.msk [vmem:[#allocation4 + $0xa8] sm:$0xff] %vm880_vm2, %v2718_v60  ;;  %v2724_v32 = vpop.permute.xlu0 %2723 }
 0x315   : > { %3090 = vrot.lane.b32.xlu1 %v9922_v58, %s8273_s14  ;;  %2795 = vst.msk [vmem:[#allocation4 + $0xc0] sm:$0xff] %vm880_vm2, %v2724_v32 }
 0x316   : > { %3096 = vrot.lane.b32.xlu0 %v9931_v13, %s8273_s14 }
 0x317   : > { %v2722_v56 = vpop.permute.xlu1 %2721 }
 0x318   : > { %2794 = vst.msk [vmem:[#allocation4 + $0xb8] sm:$0xff] %vm880_vm2, %v2722_v56  ;;  %v2728_v0 = vpop.permute.xlu0 %2727 }
 0x319   : > { %3094 = vrot.lane.b32.xlu1 %v9941_v27, %s8273_s14  ;;  %2797 = vst.msk [vmem:[#allocation4 + $0xd0] sm:$0xff] %vm880_vm2, %v2728_v0 }
 0x31a   : > { %3100 = vrot.lane.b32.xlu0 %v9950_v28, %s8273_s14 }
 0x31b   : > { %v2726_v15 = vpop.permute.xlu1 %2725 }
 0x31c   : > { %2796 = vst.msk [vmem:[#allocation4 + $0xc8] sm:$0xff] %vm880_vm2, %v2726_v15  ;;  %v2732_v55 = vpop.permute.xlu0 %2731 }
 0x31d   : > { %3098 = vrot.lane.b32.xlu1 %v9960_v45, %s8273_s14  ;;  %2799 = vst.msk [vmem:[#allocation4 + $0xe0] sm:$0xff] %vm880_vm2, %v2732_v55  ;;  %v10155_v55 = vld [vmem:[#allocation2 + $0x207] sm:$0xff] }
 0x31e   : > { %3104 = vrot.lane.b32.xlu0 %v9969_v9, %s8273_s14 }
 0x31f   : > { %v2730_v40 = vpop.permute.xlu1 %2729 }
 0x320   : > { %2798 = vst.msk [vmem:[#allocation4 + $0xd8] sm:$0xff] %vm880_vm2, %v2730_v40  ;;  %v2736_v53 = vpop.permute.xlu0 %2735 }
 0x321   : > { %3102 = vrot.lane.b32.xlu1 %v9979_v3, %s8273_s14  ;;  %2801 = vst.msk [vmem:[#allocation4 + $0xf0] sm:$0xff] %vm880_vm2, %v2736_v53 }
 0x322   : > { %3108 = vrot.lane.b32.xlu0 %v9988_v35, %s8273_s14 }
 0x323   : > { %v2734_v60 = vpop.permute.xlu1 %2733 }
 0x324   : > { %2800 = vst.msk [vmem:[#allocation4 + $0xe8] sm:$0xff] %vm880_vm2, %v2734_v60  ;;  %v2868_v32 = vpop.permute.xlu0 %2867  ;;  %v3188_v60 = vld [vmem:[#allocation2 + $0x28] sm:$0xff] }
 0x325   : > { %3106 = vrot.lane.b32.xlu1 %v9998_v20, %s8273_s14  ;;  %2963 = vst.msk [vmem:[#allocation4] sm:$0xff] %vm1073_vm3, %v2868_v32 }
 0x326   : > { %3112 = vrot.lane.b32.xlu0 %v10007_v23, %s8273_s14 }
 0x327   : > { %v2738_v56 = vpop.permute.xlu1 %2737 }
 0x328   : > { %2802 = vst.msk [vmem:[#allocation4 + $0xf8] sm:$0xff] %vm880_vm2, %v2738_v56  ;;  %v2872_v0 = vpop.permute.xlu0 %2871  ;;  %v10167_v56 = vld [vmem:[#allocation2 + $0x20f] sm:$0xff] }
 0x329   : > { %3110 = vrot.lane.b32.xlu1 %v10017_v10, %s8273_s14  ;;  %2965 = vst.msk [vmem:[#allocation4 + $0x10] sm:$0xff] %vm1073_vm3, %v2872_v0  ;;  %12814 = vst [vmem:[#allocation9_spill] sm:$0xff] %v10167_v56 }
 0x32a   : > { %3116 = vrot.lane.b32.xlu0 %v10026_v12, %s8273_s14 }
 0x32b   : > { %v2870_v15 = vpop.permute.xlu1 %2869 }
 0x32c   : > { %2964 = vst.msk [vmem:[#allocation4 + $0x8] sm:$0xff] %vm1073_vm3, %v2870_v15  ;;  %v2876_v40 = vpop.permute.xlu0 %2875  ;;  %v10170_v15 = vld [vmem:[#allocation2 + $0x48] sm:$0xff] }
 0x32d   : > { %3114 = vrot.lane.b32.xlu1 %v10036_v30, %s8273_s14  ;;  %2967 = vst.msk [vmem:[#allocation4 + $0x20] sm:$0xff] %vm1073_vm3, %v2876_v40  ;;  %12815 = vst [vmem:[#allocation10_spill] sm:$0xff] %v10170_v15 }
 0x32e   : > { %3120 = vrot.lane.b32.xlu0 %v10155_v55, %s8273_s14 }
 0x32f   : > { %v2874_v53 = vpop.permute.xlu1 %2873 }
 0x330   : > { %2966 = vst.msk [vmem:[#allocation4 + $0x18] sm:$0xff] %vm1073_vm3, %v2874_v53  ;;  %v2880_v32 = vpop.permute.xlu0 %2879  ;;  %v3189_v53 = vld [vmem:[#allocation2 + $0x30] sm:$0xff] }
 0x331   : > { %3118 = vrot.lane.b32.xlu1 %v10053_v18, %s8273_s14  ;;  %2969 = vst.msk [vmem:[#allocation4 + $0x30] sm:$0xff] %vm1073_vm3, %v2880_v32  ;;  %v10178_v18 = vld [vmem:[#allocation2 + $0x68] sm:$0xff] }
 0x332   : > { %3252 = vrot.lane.b32.xlu0 %v3188_v60, %s8274_s15  ;;  %12816 = vst [vmem:[#allocation11_spill] sm:$0xff] %v10178_v18 }
 0x333   : > { %v2878_v0 = vpop.permute.xlu1 %2877 }
 0x334   : > { %2968 = vst.msk [vmem:[#allocation4 + $0x28] sm:$0xff] %vm1073_vm3, %v2878_v0  ;;  %v2884_v40 = vpop.permute.xlu0 %2883  ;;  %v10183_v0 = vld [vmem:[#allocation2 + $0x50] sm:$0xff] }
 0x335   : > { %3122 = vrot.lane.b32.xlu1 %v10167_v56, %s8273_s14  ;;  %2971 = vst.msk [vmem:[#allocation4 + $0x40] sm:$0xff] %vm1073_vm3, %v2884_v40  ;;  %12817 = vst [vmem:[#allocation12_spill] sm:$0xff] %v10183_v0  ;;  %v10187_v56 = vld [vmem:[#allocation2 + $0x88] sm:$0xff] }
 0x336   : > { %3256 = vrot.lane.b32.xlu0 %v10170_v15, %s8274_s15  ;;  %12818 = vst [vmem:[#allocation13_spill] sm:$0xff] %v10187_v56 }
 0x337   : > { %v2882_v32 = vpop.permute.xlu1 %2881 }
 0x338   : > { %2970 = vst.msk [vmem:[#allocation4 + $0x38] sm:$0xff] %vm1073_vm3, %v2882_v32  ;;  %v2888_v60 = vpop.permute.xlu0 %2887  ;;  %v10193_v32 = vld [vmem:[#allocation2 + $0x70] sm:$0xff] }
 0x339   : > { %3254 = vrot.lane.b32.xlu1 %v3189_v53, %s8274_s15  ;;  %2973 = vst.msk [vmem:[#allocation4 + $0x50] sm:$0xff] %vm1073_vm3, %v2888_v60  ;;  %12819 = vst [vmem:[#allocation14_spill] sm:$0xff] %v10193_v32  ;;  %v10197_v60 = vld [vmem:[#allocation2 + $0xa8] sm:$0xff] }
 0x33a   : > { %3260 = vrot.lane.b32.xlu0 %v10178_v18, %s8274_s15  ;;  %12820 = vst [vmem:[#allocation15_spill] sm:$0xff] %v10197_v60 }
 0x33b   : > { %v2886_v40 = vpop.permute.xlu1 %2885 }
 0x33c   : > { %2972 = vst.msk [vmem:[#allocation4 + $0x48] sm:$0xff] %vm1073_vm3, %v2886_v40  ;;  %v2892_v15 = vpop.permute.xlu0 %2891  ;;  %v10203_v40 = vld [vmem:[#allocation2 + $0x90] sm:$0xff] }
 0x33d   : > { %3258 = vrot.lane.b32.xlu1 %v10183_v0, %s8274_s15  ;;  %2975 = vst.msk [vmem:[#allocation4 + $0x60] sm:$0xff] %vm1073_vm3, %v2892_v15  ;;  %12821 = vst [vmem:[#allocation16_spill] sm:$0xff] %v10203_v40  ;;  %v10207_v0 = vld [vmem:[#allocation2 + $0xc8] sm:$0xff] }
 0x33e   : > { %3264 = vrot.lane.b32.xlu0 %v10187_v56, %s8274_s15  ;;  %12822 = vst [vmem:[#allocation17_spill] sm:$0xff] %v10207_v0 }
 0x33f   : > { %v2890_v53 = vpop.permute.xlu1 %2889 }
 0x340   : > { %2974 = vst.msk [vmem:[#allocation4 + $0x58] sm:$0xff] %vm1073_vm3, %v2890_v53  ;;  %v2896_v18 = vpop.permute.xlu0 %2895  ;;  %v10213_v53 = vld [vmem:[#allocation2 + $0xb0] sm:$0xff] }
 0x341   : > { %3262 = vrot.lane.b32.xlu1 %v10193_v32, %s8274_s15  ;;  %2977 = vst.msk [vmem:[#allocation4 + $0x70] sm:$0xff] %vm1073_vm3, %v2896_v18  ;;  %12823 = vst [vmem:[#allocation18_spill] sm:$0xff] %v10213_v53  ;;  %v10217_v32 = vld [vmem:[#allocation2 + $0xe8] sm:$0xff] }
 0x342   : > { %3268 = vrot.lane.b32.xlu0 %v10197_v60, %s8274_s15  ;;  %12824 = vst [vmem:[#allocation19_spill] sm:$0xff] %v10217_v32 }
 0x343   : > { %v2894_v15 = vpop.permute.xlu1 %2893 }
 0x344   : > { %2976 = vst.msk [vmem:[#allocation4 + $0x68] sm:$0xff] %vm1073_vm3, %v2894_v15  ;;  %v2900_v56 = vpop.permute.xlu0 %2899  ;;  %v10223_v15 = vld [vmem:[#allocation2 + $0xd0] sm:$0xff] }
 0x345   : > { %3266 = vrot.lane.b32.xlu1 %v10203_v40, %s8274_s15  ;;  %2979 = vst.msk [vmem:[#allocation4 + $0x80] sm:$0xff] %vm1073_vm3, %v2900_v56  ;;  %12825 = vst [vmem:[#allocation20_spill] sm:$0xff] %v10223_v15  ;;  %v10227_v40 = vld [vmem:[#allocation2 + $0x108] sm:$0xff] }
 0x346   : > { %3272 = vrot.lane.b32.xlu0 %v10207_v0, %s8274_s15  ;;  %12826 = vst [vmem:[#allocation21_spill] sm:$0xff] %v10227_v40 }
 0x347   : > { %v2898_v18 = vpop.permute.xlu1 %2897 }
 0x348   : > { %2978 = vst.msk [vmem:[#allocation4 + $0x78] sm:$0xff] %vm1073_vm3, %v2898_v18  ;;  %v2904_v60 = vpop.permute.xlu0 %2903  ;;  %v10233_v18 = vld [vmem:[#allocation2 + $0xf0] sm:$0xff] }
 0x349   : > { %3270 = vrot.lane.b32.xlu1 %v10213_v53, %s8274_s15  ;;  %2981 = vst.msk [vmem:[#allocation4 + $0x90] sm:$0xff] %vm1073_vm3, %v2904_v60  ;;  %12827 = vst [vmem:[#allocation22_spill] sm:$0xff] %v10233_v18  ;;  %v10237_v53 = vld [vmem:[#allocation2 + $0x128] sm:$0xff] }
 0x34a   : > { %3276 = vrot.lane.b32.xlu0 %v10217_v32, %s8274_s15  ;;  %12828 = vst [vmem:[#allocation23_spill] sm:$0xff] %v10237_v53 }
 0x34b   : > { %v2902_v56 = vpop.permute.xlu1 %2901 }
 0x34c   : > { %2980 = vst.msk [vmem:[#allocation4 + $0x88] sm:$0xff] %vm1073_vm3, %v2902_v56  ;;  %v2908_v0 = vpop.permute.xlu0 %2907  ;;  %v10243_v56 = vld [vmem:[#allocation2 + $0x110] sm:$0xff] }
 0x34d   : > { %3274 = vrot.lane.b32.xlu1 %v10223_v15, %s8274_s15  ;;  %2983 = vst.msk [vmem:[#allocation4 + $0xa0] sm:$0xff] %vm1073_vm3, %v2908_v0  ;;  %12829 = vst [vmem:[#allocation24_spill] sm:$0xff] %v10243_v56  ;;  %v10247_v15 = vld [vmem:[#allocation2 + $0x148] sm:$0xff] }
 0x34e   : > { %3280 = vrot.lane.b32.xlu0 %v10227_v40, %s8274_s15  ;;  %12830 = vst [vmem:[#allocation25_spill] sm:$0xff] %v10247_v15 }
 0x34f   : > { %v2906_v60 = vpop.permute.xlu1 %2905 }
 0x350   : > { %2982 = vst.msk [vmem:[#allocation4 + $0x98] sm:$0xff] %vm1073_vm3, %v2906_v60  ;;  %v2912_v32 = vpop.permute.xlu0 %2911  ;;  %v10253_v60 = vld [vmem:[#allocation2 + $0x130] sm:$0xff] }
 0x351   : > { %3278 = vrot.lane.b32.xlu1 %v10233_v18, %s8274_s15  ;;  %2985 = vst.msk [vmem:[#allocation4 + $0xb0] sm:$0xff] %vm1073_vm3, %v2912_v32  ;;  %12831 = vst [vmem:[#allocation26_spill] sm:$0xff] %v10253_v60  ;;  %v10257_v18 = vld [vmem:[#allocation2 + $0x168] sm:$0xff] }
 0x352   : > { %3284 = vrot.lane.b32.xlu0 %v10237_v53, %s8274_s15  ;;  %12832 = vst [vmem:[#allocation27_spill] sm:$0xff] %v10257_v18 }
 0x353   : > { %v2910_v0 = vpop.permute.xlu1 %2909 }
 0x354   : > { %2984 = vst.msk [vmem:[#allocation4 + $0xa8] sm:$0xff] %vm1073_vm3, %v2910_v0  ;;  %v2916_v40 = vpop.permute.xlu0 %2915  ;;  %v10263_v0 = vld [vmem:[#allocation2 + $0x150] sm:$0xff] }
 0x355   : > { %3282 = vrot.lane.b32.xlu1 %v10243_v56, %s8274_s15  ;;  %2987 = vst.msk [vmem:[#allocation4 + $0xc0] sm:$0xff] %vm1073_vm3, %v2916_v40  ;;  %12833 = vst [vmem:[#allocation28_spill] sm:$0xff] %v10263_v0  ;;  %v10267_v56 = vld [vmem:[#allocation2 + $0x188] sm:$0xff] }
 0x356   : > { %3288 = vrot.lane.b32.xlu0 %v10247_v15, %s8274_s15  ;;  %12834 = vst [vmem:[#allocation29_spill] sm:$0xff] %v10267_v56 }
 0x357   : > { %v2914_v32 = vpop.permute.xlu1 %2913 }
 0x358   : > { %2986 = vst.msk [vmem:[#allocation4 + $0xb8] sm:$0xff] %vm1073_vm3, %v2914_v32  ;;  %v2920_v53 = vpop.permute.xlu0 %2919  ;;  %v10273_v32 = vld [vmem:[#allocation2 + $0x170] sm:$0xff] }
 0x359   : > { %3286 = vrot.lane.b32.xlu1 %v10253_v60, %s8274_s15  ;;  %2989 = vst.msk [vmem:[#allocation4 + $0xd0] sm:$0xff] %vm1073_vm3, %v2920_v53  ;;  %12835 = vst [vmem:[#allocation30_spill] sm:$0xff] %v10273_v32  ;;  %v10277_v60 = vld [vmem:[#allocation2 + $0x1a8] sm:$0xff] }
 0x35a   : > { %3292 = vrot.lane.b32.xlu0 %v10257_v18, %s8274_s15  ;;  %12836 = vst [vmem:[#allocation31_spill] sm:$0xff] %v10277_v60 }
 0x35b   : > { %v2918_v40 = vpop.permute.xlu1 %2917 }
 0x35c   : > { %2988 = vst.msk [vmem:[#allocation4 + $0xc8] sm:$0xff] %vm1073_vm3, %v2918_v40  ;;  %v2924_v15 = vpop.permute.xlu0 %2923  ;;  %v10283_v40 = vld [vmem:[#allocation2 + $0x190] sm:$0xff] }
 0x35d   : > { %3290 = vrot.lane.b32.xlu1 %v10263_v0, %s8274_s15  ;;  %2991 = vst.msk [vmem:[#allocation4 + $0xe0] sm:$0xff] %vm1073_vm3, %v2924_v15  ;;  %12837 = vst [vmem:[#allocation32_spill] sm:$0xff] %v10283_v40  ;;  %v10287_v0 = vld [vmem:[#allocation2 + $0x1c8] sm:$0xff] }
 0x35e   : > { %3296 = vrot.lane.b32.xlu0 %v10267_v56, %s8274_s15  ;;  %12838 = vst [vmem:[#allocation33_spill] sm:$0xff] %v10287_v0 }
 0x35f   : > { %v2922_v53 = vpop.permute.xlu1 %2921 }
 0x360   : > { %2990 = vst.msk [vmem:[#allocation4 + $0xd8] sm:$0xff] %vm1073_vm3, %v2922_v53  ;;  %v2928_v18 = vpop.permute.xlu0 %2927  ;;  %v10293_v53 = vld [vmem:[#allocation2 + $0x1b0] sm:$0xff] }
 0x361   : > { %3294 = vrot.lane.b32.xlu1 %v10273_v32, %s8274_s15  ;;  %2993 = vst.msk [vmem:[#allocation4 + $0xf0] sm:$0xff] %vm1073_vm3, %v2928_v18  ;;  %12839 = vst [vmem:[#allocation34_spill] sm:$0xff] %v10293_v53  ;;  %v10297_v32 = vld [vmem:[#allocation2 + $0x1e8] sm:$0xff] }
 0x362   : > { %3300 = vrot.lane.b32.xlu0 %v10277_v60, %s8274_s15 }
 0x363   : > { %v2926_v15 = vpop.permute.xlu1 %2925 }
 0x364   : > { %2992 = vst.msk [vmem:[#allocation4 + $0xe8] sm:$0xff] %vm1073_vm3, %v2926_v15  ;;  %v3061_v56 = vpop.permute.xlu0 %3060  ;;  %v10303_v15 = vld [vmem:[#allocation2 + $0x1d0] sm:$0xff] }
 0x365   : > { %3298 = vrot.lane.b32.xlu1 %v10283_v40, %s8274_s15  ;;  %3156 = vst.msk [vmem:[#allocation4] sm:$0xff] %vm1266_vm4, %v3061_v56  ;;  %12840 = vst [vmem:[#allocation35_spill] sm:$0xff] %v10303_v15  ;;  %v3218_v40 = vld [vmem:[#allocation2 + $0x208] sm:$0xff] }
 0x366   : > { %3304 = vrot.lane.b32.xlu0 %v10287_v0, %s8274_s15 }
 0x367   : > { %v2930_v18 = vpop.permute.xlu1 %2929 }
 0x368   : > { %2994 = vst.msk [vmem:[#allocation4 + $0xf8] sm:$0xff] %vm1073_vm3, %v2930_v18  ;;  %v3065_v60 = vpop.permute.xlu0 %3064  ;;  %v10311_v18 = vld [vmem:[#allocation2 + $0x1f0] sm:$0xff] }
 0x369   : > { %3302 = vrot.lane.b32.xlu1 %v10293_v53, %s8274_s15  ;;  %3158 = vst.msk [vmem:[#allocation4 + $0x10] sm:$0xff] %vm1266_vm4, %v3065_v60 }
 0x36a   : > { %3308 = vrot.lane.b32.xlu0 %v10297_v32, %s8274_s15 }
 0x36b   : > { %v3063_v56 = vpop.permute.xlu1 %3062 }
 0x36c   : > { %3157 = vst.msk [vmem:[#allocation4 + $0x8] sm:$0xff] %vm1266_vm4, %v3063_v56  ;;  %v3069_v0 = vpop.permute.xlu0 %3068  ;;  %v3219_v56 = vld [vmem:[#allocation2 + $0x210] sm:$0xff] }
 0x36d   : > { %3306 = vrot.lane.b32.xlu1 %v10303_v15, %s8274_s15  ;;  %3160 = vst.msk [vmem:[#allocation4 + $0x20] sm:$0xff] %vm1266_vm4, %v3069_v0 }
 0x36e   : > { %3312 = vrot.lane.b32.xlu0 %v3218_v40, %s8274_s15 }
 0x36f   : > { %v3067_v60 = vpop.permute.xlu1 %3066 }
 0x370   : > { %3159 = vst.msk [vmem:[#allocation4 + $0x18] sm:$0xff] %vm1266_vm4, %v3067_v60  ;;  %v3073_v53 = vpop.permute.xlu0 %3072 }
 0x371   : > { %3310 = vrot.lane.b32.xlu1 %v10311_v18, %s8274_s15  ;;  %3162 = vst.msk [vmem:[#allocation4 + $0x30] sm:$0xff] %vm1266_vm4, %v3073_v53 }
 0x372   : > { %3444 = vrot.lane.b32.xlu0 %v9786_v43, %s8275_s16 }
 0x373   : > { %v3071_v15 = vpop.permute.xlu1 %3070 }
 0x374   : > { %3161 = vst.msk [vmem:[#allocation4 + $0x28] sm:$0xff] %vm1266_vm4, %v3071_v15  ;;  %v3077_v0 = vpop.permute.xlu0 %3076 }
 0x375   : > { %3314 = vrot.lane.b32.xlu1 %v3219_v56, %s8274_s15  ;;  %3164 = vst.msk [vmem:[#allocation4 + $0x40] sm:$0xff] %vm1266_vm4, %v3077_v0 }
 0x376   : > { %3448 = vrot.lane.b32.xlu0 %v9801_v59, %s8275_s16 }
 0x377   : > { %v3075_v40 = vpop.permute.xlu1 %3074 }
 0x378   : > { %3163 = vst.msk [vmem:[#allocation4 + $0x38] sm:$0xff] %vm1266_vm4, %v3075_v40  ;;  %v3081_v60 = vpop.permute.xlu0 %3080 }
 0x379   : > { %3446 = vrot.lane.b32.xlu1 %v9813_v63, %s8275_s16  ;;  %3166 = vst.msk [vmem:[#allocation4 + $0x50] sm:$0xff] %vm1266_vm4, %v3081_v60 }
 0x37a   : > { %3452 = vrot.lane.b32.xlu0 %v9819_v5, %s8275_s16 }
 0x37b   : > { %v3079_v43 = vpop.permute.xlu1 %3078 }
 0x37c   : > { %3165 = vst.msk [vmem:[#allocation4 + $0x48] sm:$0xff] %vm1266_vm4, %v3079_v43  ;;  %v3085_v53 = vpop.permute.xlu0 %3084 }
 0x37d   : > { %3450 = vrot.lane.b32.xlu1 %v9832_v25, %s8275_s16  ;;  %3168 = vst.msk [vmem:[#allocation4 + $0x60] sm:$0xff] %vm1266_vm4, %v3085_v53 }
 0x37e   : > { %3456 = vrot.lane.b32.xlu0 %v9838_v29, %s8275_s16 }
 0x37f   : > { %v3083_v59 = vpop.permute.xlu1 %3082 }
 0x380   : > { %3167 = vst.msk [vmem:[#allocation4 + $0x58] sm:$0xff] %vm1266_vm4, %v3083_v59  ;;  %v3089_v63 = vpop.permute.xlu0 %3088 }
 0x381   : > { %3454 = vrot.lane.b32.xlu1 %v9851_v33, %s8275_s16  ;;  %3170 = vst.msk [vmem:[#allocation4 + $0x70] sm:$0xff] %vm1266_vm4, %v3089_v63 }
 0x382   : > { %3460 = vrot.lane.b32.xlu0 %v9857_v38, %s8275_s16 }
 0x383   : > { %v3087_v5 = vpop.permute.xlu1 %3086 }
 0x384   : > { %3169 = vst.msk [vmem:[#allocation4 + $0x68] sm:$0xff] %vm1266_vm4, %v3087_v5  ;;  %v3093_v25 = vpop.permute.xlu0 %3092 }
 0x385   : > { %3458 = vrot.lane.b32.xlu1 %v9870_v47, %s8275_s16  ;;  %3172 = vst.msk [vmem:[#allocation4 + $0x80] sm:$0xff] %vm1266_vm4, %v3093_v25 }
 0x386   : > { %3464 = vrot.lane.b32.xlu0 %v9876_v48, %s8275_s16 }
 0x387   : > { %v3091_v29 = vpop.permute.xlu1 %3090 }
 0x388   : > { %3171 = vst.msk [vmem:[#allocation4 + $0x78] sm:$0xff] %vm1266_vm4, %v3091_v29  ;;  %v3097_v33 = vpop.permute.xlu0 %3096  ;;  %v12853_v29 = vld [vmem:[#allocation6_spill] sm:$0xff] }
 0x389   : > { %3462 = vrot.lane.b32.xlu1 %v9889_v11, %s8275_s16  ;;  %3174 = vst.msk [vmem:[#allocation4 + $0x90] sm:$0xff] %vm1266_vm4, %v3097_v33 }
 0x38a   : > { %3468 = vrot.lane.b32.xlu0 %v9895_v14, %s8275_s16 }
 0x38b   : > { %v3095_v38 = vpop.permute.xlu1 %3094 }
 0x38c   : > { %3173 = vst.msk [vmem:[#allocation4 + $0x88] sm:$0xff] %vm1266_vm4, %v3095_v38  ;;  %v3101_v47 = vpop.permute.xlu0 %3100 }
 0x38d   : > { %3466 = vrot.lane.b32.xlu1 %v9908_v22, %s8275_s16  ;;  %v10358_v48 = vpop.f32.mrb[0].mxu0  ;;  %3176 = vst.msk [vmem:[#allocation4 + $0xa0] sm:$0xff] %vm1266_vm4, %v3101_v47 }
 0x38e   : > { %12841 = vst [vmem:[#allocation36_spill] sm:$0xff] %v10358_v48  ;;  %v10361_v15 = vpop.f32.mrb[1].mxu0  ;;  %3472 = vrot.lane.b32.xlu0 %v9914_v49, %s8275_s16 }
 0x38f   : > { %12842 = vst [vmem:[#allocation37_spill] sm:$0xff] %v10361_v15  ;;  %v3099_v11 = vpop.permute.xlu1 %3098  ;;  %v10365_v56 = vpop.f32.mrb[2].mxu0 }
 0x390   : > { %12843 = vst [vmem:[#allocation38_spill] sm:$0xff] %v10365_v56  ;;  %3175 = vst.msk [vmem:[#allocation4 + $0x98] sm:$0xff] %vm1266_vm4, %v3099_v11  ;;  %v10368_v14 = vpop.f32.mrb[3].mxu0  ;;  %v3105_v0 = vpop.permute.xlu0 %3104 }
 0x391   : > { %12844 = vst [vmem:[#allocation39_spill] sm:$0xff] %v10368_v14  ;;  %3470 = vrot.lane.b32.xlu1 %v9927_v57, %s8275_s16  ;;  %3178 = vst.msk [vmem:[#allocation4 + $0xb0] sm:$0xff] %vm1266_vm4, %v3105_v0 }
 0x392   : > { %3476 = vrot.lane.b32.xlu0 %v9933_v16, %s8275_s16 }
 0x393   : > { %v3103_v22 = vpop.permute.xlu1 %3102 }
 0x394   : > { %3177 = vst.msk [vmem:[#allocation4 + $0xa8] sm:$0xff] %vm1266_vm4, %v3103_v22  ;;  %v3109_v49 = vpop.permute.xlu0 %3108 }
 0x395   : > { %3474 = vrot.lane.b32.xlu1 %v9946_v26, %s8275_s16  ;;  %v10378_v40 = vpop.f32.mrb[4].mxu0  ;;  %3180 = vst.msk [vmem:[#allocation4 + $0xc0] sm:$0xff] %vm1266_vm4, %v3109_v49  ;;  %v10435_v49 = vld [vmem:[#allocation2 + $0x209] sm:$0xff] }
 0x396   : > { %12845 = vst [vmem:[#allocation40_spill] sm:$0xff] %v10378_v40  ;;  %v10381_v60 = vpop.f32.mrb[5].mxu0  ;;  %3480 = vrot.lane.b32.xlu0 %v9952_v36, %s8275_s16 }
 0x397   : > { %12846 = vst [vmem:[#allocation41_spill] sm:$0xff] %v10381_v60  ;;  %v3107_v57 = vpop.permute.xlu1 %3106  ;;  %v10385_v43 = vpop.f32.mrb[6].mxu0 }
 0x398   : > { %12847 = vst [vmem:[#allocation42_spill] sm:$0xff] %v10385_v43  ;;  %3179 = vst.msk [vmem:[#allocation4 + $0xb8] sm:$0xff] %vm1266_vm4, %v3107_v57  ;;  %v10388_v16 = vpop.f32.mrb[7].mxu0  ;;  %v3113_v53 = vpop.permute.xlu0 %3112 }
 0x399   : > { %12848 = vst [vmem:[#allocation43_spill] sm:$0xff] %v10388_v16  ;;  %3478 = vrot.lane.b32.xlu1 %v9965_v51, %s8275_s16  ;;  %3182 = vst.msk [vmem:[#allocation4 + $0xd0] sm:$0xff] %vm1266_vm4, %v3113_v53 }
 0x39a   : > { %3484 = vrot.lane.b32.xlu0 %v9971_v52, %s8275_s16 }
 0x39b   : > { %v3111_v26 = vpop.permute.xlu1 %3110 }
 0x39c   : > { %3181 = vst.msk [vmem:[#allocation4 + $0xc8] sm:$0xff] %vm1266_vm4, %v3111_v26  ;;  %v3117_v36 = vpop.permute.xlu0 %3116 }
 0x39d   : > { %3482 = vrot.lane.b32.xlu1 %v9984_v19, %s8275_s16  ;;  %v10398_v59 = vpop.f32.mrb[8].mxu0  ;;  %3184 = vst.msk [vmem:[#allocation4 + $0xe0] sm:$0xff] %vm1266_vm4, %v3117_v36 }
 0x39e   : > { %12849 = vst [vmem:[#allocation44_spill] sm:$0xff] %v10398_v59  ;;  %v10401_v63 = vpop.f32.mrb[9].mxu0  ;;  %3488 = vrot.lane.b32.xlu0 %v9990_v6, %s8275_s16 }
 0x39f   : > { %12850 = vst [vmem:[#allocation45_spill] sm:$0xff] %v10401_v63  ;;  %v3115_v51 = vpop.permute.xlu1 %3114  ;;  %v10405_v5 = vpop.f32.mrb[10].mxu0 }
 0x3a0   : > { %12851 = vst [vmem:[#allocation46_spill] sm:$0xff] %v10405_v5  ;;  %3183 = vst.msk [vmem:[#allocation4 + $0xd8] sm:$0xff] %vm1266_vm4, %v3115_v51  ;;  %v10408_v52 = vpop.f32.mrb[11].mxu0  ;;  %v3121_v25 = vpop.permute.xlu0 %3120 }
 0x3a1   : > { %12852 = vst [vmem:[#allocation47_spill] sm:$0xff] %v10408_v52  ;;  %3486 = vrot.lane.b32.xlu1 %v10003_v8, %s8275_s16  ;;  %3186 = vst.msk [vmem:[#allocation4 + $0xf0] sm:$0xff] %vm1266_vm4, %v3121_v25  ;;  %v12856_v8 = vld [vmem:[#allocation7_spill] sm:$0xff] }
 0x3a2   : > { %3492 = vrot.lane.b32.xlu0 %v10009_v39, %s8275_s16 }
 0x3a3   : > { %v3119_v19 = vpop.permute.xlu1 %3118 }
 0x3a4   : > { %3185 = vst.msk [vmem:[#allocation4 + $0xe8] sm:$0xff] %vm1266_vm4, %v3119_v19  ;;  %v3253_v6 = vpop.permute.xlu0 %3252 }
 0x3a5   : > { %3490 = vrot.lane.b32.xlu1 %v12853_v29, %s8275_s16  ;;  %v10418_v33 = vpop.f32.mrb[12].mxu0  ;;  %3348 = vst.msk [vmem:[#allocation4] sm:$0xff] %vm1459_vm5, %v3253_v6 }
 0x3a6   : > { %12854 = vst [vmem:[#allocation6_spill] sm:$0xff] %v10418_v33  ;;  %v10421_v38 = vpop.f32.mrb[13].mxu0  ;;  %3496 = vrot.lane.b32.xlu0 %v12856_v8, %s8275_s16 }
 0x3a7   : > { %12855 = vst [vmem:[#allocation48_spill] sm:$0xff] %v10421_v38  ;;  %v3123_v47 = vpop.permute.xlu1 %3122  ;;  %v10425_v11 = vpop.f32.mrb[14].mxu0 }
 0x3a8   : > { %12857 = vst [vmem:[#allocation7_spill] sm:$0xff] %v10425_v11  ;;  %3187 = vst.msk [vmem:[#allocation4 + $0xf8] sm:$0xff] %vm1266_vm4, %v3123_v47  ;;  %v10428_v39 = vpop.f32.mrb[15].mxu0  ;;  %v3257_v0 = vpop.permute.xlu0 %3256 }
 0x3a9   : > { %12858 = vst [vmem:[#allocation49_spill] sm:$0xff] %v10428_v39  ;;  %3494 = vrot.lane.b32.xlu1 %v10041_v41, %s8275_s16  ;;  %3350 = vst.msk [vmem:[#allocation4 + $0x10] sm:$0xff] %vm1459_vm5, %v3257_v0 }
 0x3aa   : > { %3500 = vrot.lane.b32.xlu0 %v10045_v17, %s8275_s16 }
 0x3ab   : > { %v3255_v22 = vpop.permute.xlu1 %3254 }
 0x3ac   : > { %3349 = vst.msk [vmem:[#allocation4 + $0x8] sm:$0xff] %vm1459_vm5, %v3255_v22  ;;  %v3261_v57 = vpop.permute.xlu0 %3260 }
 0x3ad   : > { %v10438_v53 = vpop.f32.mrb[0].mxu1  ;;  %3498 = vrot.lane.b32.xlu1 %v10056_v50, %s8275_s16  ;;  %3352 = vst.msk [vmem:[#allocation4 + $0x20] sm:$0xff] %vm1459_vm5, %v3261_v57  ;;  %v10455_v50 = vld [vmem:[#allocation2 + $0x211] sm:$0xff] }
 0x3ae   : > { %12859 = vst [vmem:[#allocation50_spill] sm:$0xff] %v10438_v53  ;;  %v10443_v26 = vpop.f32.mrb[1].mxu1  ;;  %3504 = vrot.lane.b32.xlu0 %v10435_v49, %s8275_s16 }
 0x3af   : > { %12860 = vst [vmem:[#allocation51_spill] sm:$0xff] %v10443_v26  ;;  %v10447_v41 = vpop.f32.mrb[2].mxu1  ;;  %v3259_v17 = vpop.permute.xlu1 %3258 }
 0x3b0   : > { %12861 = vst [vmem:[#allocation52_spill] sm:$0xff] %v10447_v41  ;;  %3351 = vst.msk [vmem:[#allocation4 + $0x18] sm:$0xff] %vm1459_vm5, %v3259_v17  ;;  %v10450_v36 = vpop.f32.mrb[3].mxu1  ;;  %v3265_v51 = vpop.permute.xlu0 %3264 }
 0x3b1   : > { %12862 = vst [vmem:[#allocation53_spill] sm:$0xff] %v10450_v36  ;;  %3502 = vrot.lane.b32.xlu1 %v10067_v44, %s8275_s16  ;;  %3354 = vst.msk [vmem:[#allocation4 + $0x30] sm:$0xff] %vm1459_vm5, %v3265_v51 }
 0x3b2   : > { %3637 = vrot.lane.b32.xlu0 %v9784_v31, %s8276_s17 }
 0x3b3   : > { %v3263_v25 = vpop.permute.xlu1 %3262 }
 0x3b4   : > { %3353 = vst.msk [vmem:[#allocation4 + $0x28] sm:$0xff] %vm1459_vm5, %v3263_v25  ;;  %v3269_v19 = vpop.permute.xlu0 %3268 }
 0x3b5   : > { %v10460_v6 = vpop.f32.mrb[4].mxu1  ;;  %3506 = vrot.lane.b32.xlu1 %v10455_v50, %s8275_s16  ;;  %3356 = vst.msk [vmem:[#allocation4 + $0x40] sm:$0xff] %vm1459_vm5, %v3269_v19 }
 0x3b6   : > { %12863 = vst [vmem:[#allocation54_spill] sm:$0xff] %v10460_v6  ;;  %v10465_v29 = vpop.f32.mrb[5].mxu1  ;;  %3641 = vrot.lane.b32.xlu0 %v9799_v54, %s8276_s17 }
 0x3b7   : > { %12864 = vst [vmem:[#allocation55_spill] sm:$0xff] %v10465_v29  ;;  %v10469_v44 = vpop.f32.mrb[6].mxu1  ;;  %v3267_v8 = vpop.permute.xlu1 %3266 }
 0x3b8   : > { %12865 = vst [vmem:[#allocation56_spill] sm:$0xff] %v10469_v44  ;;  %3355 = vst.msk [vmem:[#allocation4 + $0x38] sm:$0xff] %vm1459_vm5, %v3267_v8  ;;  %v10472_v31 = vpop.f32.mrb[7].mxu1  ;;  %v3273_v47 = vpop.permute.xlu0 %3272 }
 0x3b9   : > { %12866 = vst [vmem:[#allocation57_spill] sm:$0xff] %v10472_v31  ;;  %3639 = vrot.lane.b32.xlu1 %v9808_v62, %s8276_s17  ;;  %3358 = vst.msk [vmem:[#allocation4 + $0x50] sm:$0xff] %vm1459_vm5, %v3273_v47 }
 0x3ba   : > { %3645 = vrot.lane.b32.xlu0 %v9817_v2, %s8276_s17 }
 0x3bb   : > { %v3271_v0 = vpop.permute.xlu1 %3270 }
 0x3bc   : > { %3357 = vst.msk [vmem:[#allocation4 + $0x48] sm:$0xff] %vm1459_vm5, %v3271_v0  ;;  %v3277_v54 = vpop.permute.xlu0 %3276 }
 0x3bd   : > { %v10480_v22 = vpop.f32.mrb[8].mxu1  ;;  %3643 = vrot.lane.b32.xlu1 %v9827_v21, %s8276_s17  ;;  %3360 = vst.msk [vmem:[#allocation4 + $0x60] sm:$0xff] %vm1459_vm5, %v3277_v54  ;;  %v3603_v54 = vld [vmem:[#allocation2 + $0x227] sm:$0xff] }
 0x3be   : > { %12867 = vst [vmem:[#allocation58_spill] sm:$0xff] %v10480_v22  ;;  %v10485_v57 = vpop.f32.mrb[9].mxu1  ;;  %3649 = vrot.lane.b32.xlu0 %v9836_v24, %s8276_s17 }
 0x3bf   : > { %12868 = vst [vmem:[#allocation59_spill] sm:$0xff] %v10485_v57  ;;  %v10489_v62 = vpop.f32.mrb[10].mxu1  ;;  %v3275_v17 = vpop.permute.xlu1 %3274 }
 0x3c0   : > { %12869 = vst [vmem:[#allocation60_spill] sm:$0xff] %v10489_v62  ;;  %3359 = vst.msk [vmem:[#allocation4 + $0x58] sm:$0xff] %vm1459_vm5, %v3275_v17  ;;  %v10492_v2 = vpop.f32.mrb[11].mxu1  ;;  %v3281_v51 = vpop.permute.xlu0 %3280  ;;  %v12875_v17 = vld [vmem:[#allocation8_spill] sm:$0xff] }
 0x3c1   : > { %12870 = vst [vmem:[#allocation61_spill] sm:$0xff] %v10492_v2  ;;  %3647 = vrot.lane.b32.xlu1 %v9846_v34, %s8276_s17  ;;  %3362 = vst.msk [vmem:[#allocation4 + $0x70] sm:$0xff] %vm1459_vm5, %v3281_v51  ;;  %v12876_v51 = vld [vmem:[#allocation9_spill] sm:$0xff] }
 0x3c2   : > { %3653 = vrot.lane.b32.xlu0 %v9855_v37, %s8276_s17 }
 0x3c3   : > { %v3279_v21 = vpop.permute.xlu1 %3278 }
 0x3c4   : > { %3361 = vst.msk [vmem:[#allocation4 + $0x68] sm:$0xff] %vm1459_vm5, %v3279_v21  ;;  %v3285_v24 = vpop.permute.xlu0 %3284  ;;  %v12877_v21 = vld [vmem:[#allocation10_spill] sm:$0xff] }
 0x3c5   : > { %v10500_v25 = vpop.f32.mrb[12].mxu1  ;;  %3651 = vrot.lane.b32.xlu1 %v9865_v42, %s8276_s17  ;;  %3364 = vst.msk [vmem:[#allocation4 + $0x80] sm:$0xff] %vm1459_vm5, %v3285_v24 }
 0x3c6   : > { %12871 = vst [vmem:[#allocation62_spill] sm:$0xff] %v10500_v25  ;;  %v10505_v19 = vpop.f32.mrb[13].mxu1  ;;  %3657 = vrot.lane.b32.xlu0 %v9874_v46, %s8276_s17 }
 0x3c7   : > { %12872 = vst [vmem:[#allocation63_spill] sm:$0xff] %v10505_v19  ;;  %v10509_v34 = vpop.f32.mrb[14].mxu1  ;;  %v3283_v8 = vpop.permute.xlu1 %3282 }
 0x3c8   : > { %12873 = vst [vmem:[#allocation64_spill] sm:$0xff] %v10509_v34  ;;  %3363 = vst.msk [vmem:[#allocation4 + $0x78] sm:$0xff] %vm1459_vm5, %v3283_v8  ;;  %v10512_v37 = vpop.f32.mrb[15].mxu1  ;;  %v3289_v47 = vpop.permute.xlu0 %3288 }
 0x3c9   : > { %12874 = vst [vmem:[#allocation65_spill] sm:$0xff] %v10512_v37  ;;  %3655 = vrot.lane.b32.xlu1 %v9884_v1, %s8276_s17  ;;  %3366 = vst.msk [vmem:[#allocation4 + $0x90] sm:$0xff] %vm1459_vm5, %v3289_v47  ;;  %v12878_v47 = vld [vmem:[#allocation11_spill] sm:$0xff] }
 0x3ca   : > { %3661 = vrot.lane.b32.xlu0 %v9893_v4, %s8276_s17 }
 0x3cb   : > { %v3287_v42 = vpop.permute.xlu1 %3286 }
 0x3cc   : > { %3365 = vst.msk [vmem:[#allocation4 + $0x88] sm:$0xff] %vm1459_vm5, %v3287_v42  ;;  %v3293_v46 = vpop.permute.xlu0 %3292 }
 0x3cd   : > { %3659 = vrot.lane.b32.xlu1 %v9903_v61, %s8276_s17  ;;  %3368 = vst.msk [vmem:[#allocation4 + $0xa0] sm:$0xff] %vm1459_vm5, %v3293_v46 }
 0x3ce   : > { %3665 = vrot.lane.b32.xlu0 %v9912_v7, %s8276_s17 }
 0x3cf   : > { %v3291_v0 = vpop.permute.xlu1 %3290 }
 0x3d0   : > { %3367 = vst.msk [vmem:[#allocation4 + $0x98] sm:$0xff] %vm1459_vm5, %v3291_v0  ;;  %v3297_v1 = vpop.permute.xlu0 %3296  ;;  %v12879_v0 = vld [vmem:[#allocation12_spill] sm:$0xff] }
 0x3d1   : > { %3663 = vrot.lane.b32.xlu1 %v9922_v58, %s8276_s17  ;;  %3370 = vst.msk [vmem:[#allocation4 + $0xb0] sm:$0xff] %vm1459_vm5, %v3297_v1  ;;  %v12880_v1 = vld [vmem:[#allocation13_spill] sm:$0xff] }
 0x3d2   : > { %3669 = vrot.lane.b32.xlu0 %v9931_v13, %s8276_s17 }
 0x3d3   : > { %v3295_v4 = vpop.permute.xlu1 %3294 }
 0x3d4   : > { %3369 = vst.msk [vmem:[#allocation4 + $0xa8] sm:$0xff] %vm1459_vm5, %v3295_v4  ;;  %v3301_v61 = vpop.permute.xlu0 %3300 }
 0x3d5   : > { %3667 = vrot.lane.b32.xlu1 %v9941_v27, %s8276_s17  ;;  %3372 = vst.msk [vmem:[#allocation4 + $0xc0] sm:$0xff] %vm1459_vm5, %v3301_v61 }
 0x3d6   : > { %3673 = vrot.lane.b32.xlu0 %v9950_v28, %s8276_s17 }
 0x3d7   : > { %v3299_v7 = vpop.permute.xlu1 %3298 }
 0x3d8   : > { %3371 = vst.msk [vmem:[#allocation4 + $0xb8] sm:$0xff] %vm1459_vm5, %v3299_v7  ;;  %v3305_v58 = vpop.permute.xlu0 %3304  ;;  %v12881_v7 = vld [vmem:[#allocation14_spill] sm:$0xff] }
 0x3d9   : > { %3671 = vrot.lane.b32.xlu1 %v9960_v45, %s8276_s17  ;;  %3374 = vst.msk [vmem:[#allocation4 + $0xd0] sm:$0xff] %vm1459_vm5, %v3305_v58  ;;  %v12882_v58 = vld [vmem:[#allocation15_spill] sm:$0xff] }
 0x3da   : > { %3677 = vrot.lane.b32.xlu0 %v9969_v9, %s8276_s17 }
 0x3db   : > { %v3303_v13 = vpop.permute.xlu1 %3302 }
 0x3dc   : > { %3373 = vst.msk [vmem:[#allocation4 + $0xc8] sm:$0xff] %vm1459_vm5, %v3303_v13  ;;  %v3309_v27 = vpop.permute.xlu0 %3308 }
 0x3dd   : > { %3675 = vrot.lane.b32.xlu1 %v9979_v3, %s8276_s17  ;;  %3376 = vst.msk [vmem:[#allocation4 + $0xe0] sm:$0xff] %vm1459_vm5, %v3309_v27 }
 0x3de   : > { %3681 = vrot.lane.b32.xlu0 %v9988_v35, %s8276_s17 }
 0x3df   : > { %v3307_v28 = vpop.permute.xlu1 %3306 }
 0x3e0   : > { %3375 = vst.msk [vmem:[#allocation4 + $0xd8] sm:$0xff] %vm1459_vm5, %v3307_v28  ;;  %v3313_v45 = vpop.permute.xlu0 %3312  ;;  %v12883_v28 = vld [vmem:[#allocation16_spill] sm:$0xff] }
 0x3e1   : > { %3679 = vrot.lane.b32.xlu1 %v9998_v20, %s8276_s17  ;;  %3378 = vst.msk [vmem:[#allocation4 + $0xf0] sm:$0xff] %vm1459_vm5, %v3313_v45  ;;  %v12884_v45 = vld [vmem:[#allocation17_spill] sm:$0xff] }
 0x3e2   : > { %3685 = vrot.lane.b32.xlu0 %v10007_v23, %s8276_s17 }
 0x3e3   : > { %v3311_v9 = vpop.permute.xlu1 %3310 }
 0x3e4   : > { %3377 = vst.msk [vmem:[#allocation4 + $0xe8] sm:$0xff] %vm1459_vm5, %v3311_v9  ;;  %v3445_v3 = vpop.permute.xlu0 %3444 }
 0x3e5   : > { %3683 = vrot.lane.b32.xlu1 %v10017_v10, %s8276_s17  ;;  %3540 = vst.msk [vmem:[#allocation4] sm:$0xff] %vm1652_vm6, %v3445_v3 }
 0x3e6   : > { %3689 = vrot.lane.b32.xlu0 %v10026_v12, %s8276_s17 }
 0x3e7   : > { %v3315_v35 = vpop.permute.xlu1 %3314 }
 0x3e8   : > { %3379 = vst.msk [vmem:[#allocation4 + $0xf8] sm:$0xff] %vm1459_vm5, %v3315_v35  ;;  %v3449_v20 = vpop.permute.xlu0 %3448  ;;  %v12885_v35 = vld [vmem:[#allocation18_spill] sm:$0xff] }
 0x3e9   : > { %3687 = vrot.lane.b32.xlu1 %v10036_v30, %s8276_s17  ;;  %3542 = vst.msk [vmem:[#allocation4 + $0x10] sm:$0xff] %vm1652_vm6, %v3449_v20  ;;  %v12886_v20 = vld [vmem:[#allocation19_spill] sm:$0xff] }
 0x3ea   : > { %3693 = vrot.lane.b32.xlu0 %v10155_v55, %s8276_s17  ;;  %v3604_v55 = vld [vmem:[#allocation2 + $0x22f] sm:$0xff] }
 0x3eb   : > { %v3447_v23 = vpop.permute.xlu1 %3446 }
 0x3ec   : > { %3541 = vst.msk [vmem:[#allocation4 + $0x8] sm:$0xff] %vm1652_vm6, %v3447_v23  ;;  %v3453_v10 = vpop.permute.xlu0 %3452 }
 0x3ed   : > { %3691 = vrot.lane.b32.xlu1 %v12875_v17, %s8276_s17  ;;  %3544 = vst.msk [vmem:[#allocation4 + $0x20] sm:$0xff] %vm1652_vm6, %v3453_v10  ;;  %v12887_v10 = vld [vmem:[#allocation20_spill] sm:$0xff]  ;;  %v12888_v17 = vld [vmem:[#allocation21_spill] sm:$0xff] }
 0x3ee   : > { %3697 = vrot.lane.b32.xlu0 %v3603_v54, %s8276_s17 }
 0x3ef   : > { %v3451_v12 = vpop.permute.xlu1 %3450 }
 0x3f0   : > { %3543 = vst.msk [vmem:[#allocation4 + $0x18] sm:$0xff] %vm1652_vm6, %v3451_v12  ;;  %v3457_v30 = vpop.permute.xlu0 %3456 }
 0x3f1   : > { %3695 = vrot.lane.b32.xlu1 %v12876_v51, %s8276_s17  ;;  %3546 = vst.msk [vmem:[#allocation4 + $0x30] sm:$0xff] %vm1652_vm6, %v3457_v30  ;;  %v7998_v51 = vld [vmem:[%s12572_s3] sm:$0xff]  }
 0x3f2   : > { %3829 = vrot.lane.b32.xlu0 %v12877_v21, %s8277_s18  ;;  %v12890_v21 = vld [vmem:[#allocation23_spill] sm:$0xff]  ;;  %7858 = vmatprep.subr.bf16.mxu1 %v7998_v51 }
 0x3f3   : > { %v3455_v24 = vpop.permute.xlu1 %3454  ;;  %7859 = vmatpush3.bf16.msra.mxu1 %v7998_v51  ;;  %v3967_v51 = vld [vmem:[#allocation2 + $0xe9] sm:$0xff] }
 0x3f4   : > { %3545 = vst.msk [vmem:[#allocation4 + $0x28] sm:$0xff] %vm1652_vm6, %v3455_v24  ;;  %v3461_v8 = vpop.permute.xlu0 %3460 }
 0x3f5   : > { %3699 = vrot.lane.b32.xlu1 %v3604_v55, %s8276_s17  ;;  %3548 = vst.msk [vmem:[#allocation4 + $0x40] sm:$0xff] %vm1652_vm6, %v3461_v8  ;;  %v12889_v55 = vld [vmem:[#allocation22_spill] sm:$0xff]  ;;  %v3957_v8 = vld [vmem:[#allocation2 + $0x49] sm:$0xff] }
 0x3f6   : > { %3833 = vrot.lane.b32.xlu0 %v12878_v47, %s8277_s18 }
 0x3f7   : > { %v3459_v42 = vpop.permute.xlu1 %3458 }
 0x3f8   : > { %3547 = vst.msk [vmem:[#allocation4 + $0x38] sm:$0xff] %vm1652_vm6, %v3459_v42  ;;  %v3465_v46 = vpop.permute.xlu0 %3464  ;;  %v7999_v42 = vld [vmem:[%s12572_s3 + $0x8] sm:$0xff]  }
 0x3f9   : > { %3831 = vrot.lane.b32.xlu1 %v12879_v0, %s8277_s18  ;;  %3550 = vst.msk [vmem:[#allocation4 + $0x50] sm:$0xff] %vm1652_vm6, %v3465_v46  ;;  %v12891_v46 = vld [vmem:[#allocation24_spill] sm:$0xff]  ;;  %7860 = vmatprep.subr.bf16.mxu1 %v7999_v42 }
 0x3fa   : > { %3837 = vrot.lane.b32.xlu0 %v12880_v1, %s8277_s18  ;;  %v3959_v1 = vld [vmem:[#allocation2 + $0x69] sm:$0xff]  ;;  %7861 = vmatpush3.bf16.msra.mxu1 %v7999_v42  ;;  %v3968_v42 = vld [vmem:[#allocation2 + $0xf1] sm:$0xff] }
 0x3fb   : > { %v3463_v4 = vpop.permute.xlu1 %3462 }
 0x3fc   : > { %3549 = vst.msk [vmem:[#allocation4 + $0x48] sm:$0xff] %vm1652_vm6, %v3463_v4  ;;  %v3469_v61 = vpop.permute.xlu0 %3468 }
 0x3fd   : > { %3835 = vrot.lane.b32.xlu1 %v12881_v7, %s8277_s18  ;;  %3552 = vst.msk [vmem:[#allocation4 + $0x60] sm:$0xff] %vm1652_vm6, %v3469_v61  ;;  %v8000_v61 = vld [vmem:[%s12572_s3 + $0x10] ss:$0 sps:$4 sm:$0x33]   ;;  %v12892_v7 = vld [vmem:[#allocation26_spill] sm:$0xff] }
 0x3fe   : > { %3841 = vrot.lane.b32.xlu0 %v12882_v58, %s8277_s18  ;;  %v3958_v58 = vld [vmem:[#allocation2 + $0x51] sm:$0xff]  ;;  %7942 = vmatprep.subr.msk.bf16.mxu1 %vm2382_vm8, %v8000_v61 }
 0x3ff   : > { %v3467_v13 = vpop.permute.xlu1 %3466 }
 0x400   : > { %3551 = vst.msk [vmem:[#allocation4 + $0x58] sm:$0xff] %vm1652_vm6, %v3467_v13  ;;  %v3473_v27 = vpop.permute.xlu0 %3472  ;;  %v4266_v13 = vsel %vm2382_vm8, %v8000_v61, 0 }
 0x401   : > { %3839 = vrot.lane.b32.xlu1 %v12883_v28, %s8277_s18  ;;  %3554 = vst.msk [vmem:[#allocation4 + $0x70] sm:$0xff] %vm1652_vm6, %v3473_v27  ;;  %v3961_v28 = vld [vmem:[#allocation2 + $0x89] sm:$0xff]  ;;  %7863 = vmatpush3.bf16.msra.mxu1 %v4266_v13  ;;  %v12893_v13 = vld [vmem:[#allocation25_spill] sm:$0xff] }
 0x402   : > { %3845 = vrot.lane.b32.xlu0 %v12884_v45, %s8277_s18 }
 0x403   : > { %v3471_v9 = vpop.permute.xlu1 %3470 }
 0x404   : > { %3553 = vst.msk [vmem:[#allocation4 + $0x68] sm:$0xff] %vm1652_vm6, %v3471_v9  ;;  %v3477_v3 = vpop.permute.xlu0 %3476  ;;  %v3960_v9 = vld [vmem:[#allocation2 + $0x71] sm:$0xff] }
 0x405   : > { %3843 = vrot.lane.b32.xlu1 %v12885_v35, %s8277_s18  ;;  %3556 = vst.msk [vmem:[#allocation4 + $0x80] sm:$0xff] %vm1652_vm6, %v3477_v3  ;;  %v3963_v35 = vld [vmem:[#allocation2 + $0xa9] sm:$0xff] }
 0x406   : > { %3849 = vrot.lane.b32.xlu0 %v12886_v20, %s8277_s18 }
 0x407   : > { %v3475_v23 = vpop.permute.xlu1 %3474 }
 0x408   : > { %3555 = vst.msk [vmem:[#allocation4 + $0x78] sm:$0xff] %vm1652_vm6, %v3475_v23  ;;  %v3481_v54 = vpop.permute.xlu0 %3480  ;;  %v3962_v23 = vld [vmem:[#allocation2 + $0x91] sm:$0xff] }
 0x409   : > { %3847 = vrot.lane.b32.xlu1 %v12887_v10, %s8277_s18  ;;  %3558 = vst.msk [vmem:[#allocation4 + $0x90] sm:$0xff] %vm1652_vm6, %v3481_v54  ;;  %v3965_v10 = vld [vmem:[#allocation2 + $0xc9] sm:$0xff] }
 0x40a   : > { %3853 = vrot.lane.b32.xlu0 %v12888_v17, %s8277_s18 }
 0x40b   : > { %v3479_v12 = vpop.permute.xlu1 %3478 }
 0x40c   : > { %3557 = vst.msk [vmem:[#allocation4 + $0x88] sm:$0xff] %vm1652_vm6, %v3479_v12  ;;  %v3485_v30 = vpop.permute.xlu0 %3484  ;;  %v3964_v12 = vld [vmem:[#allocation2 + $0xb1] sm:$0xff] }
 0x40d   : > { %3851 = vrot.lane.b32.xlu1 %v12889_v55, %s8277_s18  ;;  %3560 = vst.msk [vmem:[#allocation4 + $0xa0] sm:$0xff] %vm1652_vm6, %v3485_v30 }
 0x40e   : > { %3857 = vrot.lane.b32.xlu0 %v12890_v21, %s8277_s18  ;;  %v3966_v21 = vld [vmem:[#allocation2 + $0xd1] sm:$0xff] }
 0x40f   : > { %v3483_v24 = vpop.permute.xlu1 %3482 }
 0x410   : > { %3559 = vst.msk [vmem:[#allocation4 + $0x98] sm:$0xff] %vm1652_vm6, %v3483_v24  ;;  %v3489_v47 = vpop.permute.xlu0 %3488 }
 0x411   : > { %3855 = vrot.lane.b32.xlu1 %v12891_v46, %s8277_s18  ;;  %3562 = vst.msk [vmem:[#allocation4 + $0xb0] sm:$0xff] %vm1652_vm6, %v3489_v47 }
 0x412   : > { %4021 = vrot.lane.b32.xlu0 %v3957_v8, %s8278_s24  ;;  %v3969_v8 = vld [vmem:[#allocation2 + $0x109] sm:$0xff] }
 0x413   : > { %v3487_v0 = vpop.permute.xlu1 %3486 }
 0x414   : > { %3561 = vst.msk [vmem:[#allocation4 + $0xa8] sm:$0xff] %vm1652_vm6, %v3487_v0  ;;  %v3493_v4 = vpop.permute.xlu0 %3492  ;;  %v3971_v0 = vld [vmem:[#allocation2 + $0x129] sm:$0xff] }
 0x415   : > { %3859 = vrot.lane.b32.xlu1 %v12892_v7, %s8277_s18  ;;  %3564 = vst.msk [vmem:[#allocation4 + $0xc0] sm:$0xff] %vm1652_vm6, %v3493_v4  ;;  %v3970_v4 = vld [vmem:[#allocation2 + $0x111] sm:$0xff] }
 0x416   : > { %4025 = vrot.lane.b32.xlu0 %v3959_v1, %s8278_s24 }
 0x417   : > { %v3491_v27 = vpop.permute.xlu1 %3490 }
 0x418   : > { %3563 = vst.msk [vmem:[#allocation4 + $0xb8] sm:$0xff] %vm1652_vm6, %v3491_v27  ;;  %v3497_v45 = vpop.permute.xlu0 %3496 }
 0x419   : > { %4023 = vrot.lane.b32.xlu1 %v3958_v58, %s8278_s24  ;;  %3566 = vst.msk [vmem:[#allocation4 + $0xd0] sm:$0xff] %vm1652_vm6, %v3497_v45  ;;  %v3972_v58 = vld [vmem:[#allocation2 + $0x131] sm:$0xff]  ;;  %v12894_v45 = vld [vmem:[#allocation27_spill] sm:$0xff] }
 0x41a   : > { %4029 = vrot.lane.b32.xlu0 %v3961_v28, %s8278_s24 }
 0x41b   : > { %v3495_v3 = vpop.permute.xlu1 %3494 }
 0x41c   : > { %3565 = vst.msk [vmem:[#allocation4 + $0xc8] sm:$0xff] %vm1652_vm6, %v3495_v3  ;;  %v3501_v20 = vpop.permute.xlu0 %3500  ;;  %v3973_v3 = vld [vmem:[#allocation2 + $0x149] sm:$0xff] }
 0x41d   : > { %4027 = vrot.lane.b32.xlu1 %v3960_v9, %s8278_s24  ;;  %3568 = vst.msk [vmem:[#allocation4 + $0xe0] sm:$0xff] %vm1652_vm6, %v3501_v20  ;;  %v12895_v20 = vld [vmem:[#allocation28_spill] sm:$0xff] }
 0x41e   : > { %4033 = vrot.lane.b32.xlu0 %v3963_v35, %s8278_s24 }
 0x41f   : > { %v3499_v54 = vpop.permute.xlu1 %3498 }
 0x420   : > { %3567 = vst.msk [vmem:[#allocation4 + $0xd8] sm:$0xff] %vm1652_vm6, %v3499_v54  ;;  %v3505_v17 = vpop.permute.xlu0 %3504  ;;  %v3975_v54 = vld [vmem:[#allocation2 + $0x169] sm:$0xff] }
 0x421   : > { %4031 = vrot.lane.b32.xlu1 %v3962_v23, %s8278_s24  ;;  %3570 = vst.msk [vmem:[#allocation4 + $0xf0] sm:$0xff] %vm1652_vm6, %v3505_v17  ;;  %v12896_v17 = vld [vmem:[#allocation30_spill] sm:$0xff] }
 0x422   : > { %4037 = vrot.lane.b32.xlu0 %v3965_v10, %s8278_s24 }
 0x423   : > { %v3503_v30 = vpop.permute.xlu1 %3502 }
 0x424   : > { %3569 = vst.msk [vmem:[#allocation4 + $0xe8] sm:$0xff] %vm1652_vm6, %v3503_v30  ;;  %v3638_v55 = vpop.permute.xlu0 %3637 }
 0x425   : > { %4035 = vrot.lane.b32.xlu1 %v3964_v12, %s8278_s24  ;;  %3733 = vst.msk [vmem:[#allocation4] sm:$0xff] %vm1846_vm7, %v3638_v55  ;;  %v3974_v12 = vld [vmem:[#allocation2 + $0x151] sm:$0xff] }
 0x426   : > { %4041 = vrot.lane.b32.xlu0 %v3967_v51, %s8278_s24  ;;  %v3976_v55 = vld [vmem:[#allocation2 + $0x171] sm:$0xff] }
 0x427   : > { %v3507_v24 = vpop.permute.xlu1 %3506 }
 0x428   : > { %3571 = vst.msk [vmem:[#allocation4 + $0xf8] sm:$0xff] %vm1652_vm6, %v3507_v24  ;;  %v3642_v47 = vpop.permute.xlu0 %3641 }
 0x429   : > { %4039 = vrot.lane.b32.xlu1 %v3966_v21, %s8278_s24  ;;  %3735 = vst.msk [vmem:[#allocation4 + $0x10] sm:$0xff] %vm1846_vm7, %v3642_v47  ;;  %v12897_v21 = vld [vmem:[#allocation29_spill] sm:$0xff]  ;;  %v12898_v47 = vld [vmem:[#allocation31_spill] sm:$0xff] }
 0x42a   : > { %4045 = vrot.lane.b32.xlu0 %v3969_v8, %s8278_s24 }
 0x42b   : > { %v3640_v46 = vpop.permute.xlu1 %3639 }
 0x42c   : > { %3734 = vst.msk [vmem:[#allocation4 + $0x8] sm:$0xff] %vm1846_vm7, %v3640_v46  ;;  %v3646_v1 = vpop.permute.xlu0 %3645  ;;  %v3977_v46 = vld [vmem:[#allocation2 + $0x189] sm:$0xff] }
 0x42d   : > { %4043 = vrot.lane.b32.xlu1 %v3968_v42, %s8278_s24  ;;  %3737 = vst.msk [vmem:[#allocation4 + $0x20] sm:$0xff] %vm1846_vm7, %v3646_v1  ;;  %v12899_v1 = vld [vmem:[#allocation32_spill] sm:$0xff] }
 0x42e   : > { %4049 = vrot.lane.b32.xlu0 %v3971_v0, %s8278_s24 }
 0x42f   : > { %v3644_v61 = vpop.permute.xlu1 %3643 }
 0x430   : > { %3736 = vst.msk [vmem:[#allocation4 + $0x18] sm:$0xff] %vm1846_vm7, %v3644_v61  ;;  %v3650_v7 = vpop.permute.xlu0 %3649  ;;  %v3979_v61 = vld [vmem:[#allocation2 + $0x1a9] sm:$0xff] }
 0x431   : > { %4047 = vrot.lane.b32.xlu1 %v3970_v4, %s8278_s24  ;;  %3739 = vst.msk [vmem:[#allocation4 + $0x30] sm:$0xff] %vm1846_vm7, %v3650_v7 }
 0x432   : > { %3861 = vrot.lane.b32.xlu0 %v12893_v13, %s8277_s18  ;;  %v3978_v13 = vld [vmem:[#allocation2 + $0x191] sm:$0xff] }
 0x433   : > { %v3648_v27 = vpop.permute.xlu1 %3647 }
 0x434   : > { %3738 = vst.msk [vmem:[#allocation4 + $0x28] sm:$0xff] %vm1846_vm7, %v3648_v27  ;;  %v3654_v28 = vpop.permute.xlu0 %3653 }
 0x435   : > { %4051 = vrot.lane.b32.xlu1 %v3972_v58, %s8278_s24  ;;  %3741 = vst.msk [vmem:[#allocation4 + $0x40] sm:$0xff] %vm1846_vm7, %v3654_v28  ;;  %v12900_v58 = vld [vmem:[#allocation34_spill] sm:$0xff] }
 0x436   : > { %3865 = vrot.lane.b32.xlu0 %v12894_v45, %s8277_s18  ;;  %v3980_v45 = vld [vmem:[#allocation2 + $0x1b1] sm:$0xff] }
 0x437   : > { %v3652_v9 = vpop.permute.xlu1 %3651 }
 0x438   : > { %3740 = vst.msk [vmem:[#allocation4 + $0x38] sm:$0xff] %vm1846_vm7, %v3652_v9  ;;  %v3658_v35 = vpop.permute.xlu0 %3657  ;;  %v12901_v9 = vld [vmem:[#allocation33_spill] sm:$0xff] }
 0x439   : > { %3863 = vrot.lane.b32.xlu1 %v12895_v20, %s8277_s18  ;;  %3743 = vst.msk [vmem:[#allocation4 + $0x50] sm:$0xff] %vm1846_vm7, %v3658_v35 }
 0x43a   : > { %4053 = vrot.lane.b32.xlu0 %v3973_v3, %s8278_s24 }
 0x43b   : > { %v3656_v23 = vpop.permute.xlu1 %3655 }
 0x43c   : > { %3742 = vst.msk [vmem:[#allocation4 + $0x48] sm:$0xff] %vm1846_vm7, %v3656_v23  ;;  %v3662_v10 = vpop.permute.xlu0 %3661  ;;  %v3981_v23 = vld [vmem:[#allocation2 + $0x1c9] sm:$0xff] }
 0x43d   : > { %3867 = vrot.lane.b32.xlu1 %v12896_v17, %s8277_s18  ;;  %3745 = vst.msk [vmem:[#allocation4 + $0x60] sm:$0xff] %vm1846_vm7, %v3662_v10  ;;  %v12902_v10 = vld [vmem:[#allocation35_spill] sm:$0xff] }
 0x43e   : > { %4057 = vrot.lane.b32.xlu0 %v3975_v54, %s8278_s24 }
 0x43f   : > { %v3660_v30 = vpop.permute.xlu1 %3659 }
 0x440   : > { %3744 = vst.msk [vmem:[#allocation4 + $0x58] sm:$0xff] %vm1846_vm7, %v3660_v30  ;;  %v3666_v51 = vpop.permute.xlu0 %3665 }
 0x441   : > { %4055 = vrot.lane.b32.xlu1 %v3974_v12, %s8278_s24  ;;  %3747 = vst.msk [vmem:[#allocation4 + $0x70] sm:$0xff] %vm1846_vm7, %v3666_v51  ;;  %v3983_v12 = vld [vmem:[#allocation2 + $0x1e9] sm:$0xff] }
 0x442   : > { %3869 = vrot.lane.b32.xlu0 %v12897_v21, %s8277_s18 }
 0x443   : > { %v3664_v24 = vpop.permute.xlu1 %3663 }
 0x444   : > { %3746 = vst.msk [vmem:[#allocation4 + $0x68] sm:$0xff] %vm1846_vm7, %v3664_v24  ;;  %v3670_v8 = vpop.permute.xlu0 %3669  ;;  %v3984_v24 = vld [vmem:[#allocation2 + $0x1f1] sm:$0xff] }
 0x445   : > { %4059 = vrot.lane.b32.xlu1 %v3976_v55, %s8278_s24  ;;  %3749 = vst.msk [vmem:[#allocation4 + $0x80] sm:$0xff] %vm1846_vm7, %v3670_v8  ;;  %v3793_v55 = vld [vmem:[#allocation2 + $0x208] sm:$0xff] }
 0x446   : > { %3873 = vrot.lane.b32.xlu0 %v12898_v47, %s8277_s18  ;;  %v3795_v47 = vld [vmem:[#allocation2 + $0x228] sm:$0xff] }
 0x447   : > { %v3668_v42 = vpop.permute.xlu1 %3667 }
 0x448   : > { %3748 = vst.msk [vmem:[#allocation4 + $0x78] sm:$0xff] %vm1846_vm7, %v3668_v42  ;;  %v3674_v0 = vpop.permute.xlu0 %3673  ;;  %v3794_v42 = vld [vmem:[#allocation2 + $0x210] sm:$0xff] }
 0x449   : > { %3871 = vrot.lane.b32.xlu1 %v12899_v1, %s8277_s18  ;;  %3751 = vst.msk [vmem:[#allocation4 + $0x90] sm:$0xff] %vm1846_vm7, %v3674_v0  ;;  %v3796_v1 = vld [vmem:[#allocation2 + $0x230] sm:$0xff] }
 0x44a   : > { %4061 = vrot.lane.b32.xlu0 %v3977_v46, %s8278_s24 }
 0x44b   : > { %v3672_v4 = vpop.permute.xlu1 %3671 }
 0x44c   : > { %3750 = vst.msk [vmem:[#allocation4 + $0x88] sm:$0xff] %vm1846_vm7, %v3672_v4  ;;  %v3678_v7 = vpop.permute.xlu0 %3677 }
 0x44d   : > { %3875 = vrot.lane.b32.xlu1 %v12900_v58, %s8277_s18  ;;  %3753 = vst.msk [vmem:[#allocation4 + $0xa0] sm:$0xff] %vm1846_vm7, %v3678_v7 }
 0x44e   : > { %4065 = vrot.lane.b32.xlu0 %v3979_v61, %s8278_s24  ;;  %v3987_v61 = vld [vmem:[#allocation2 + $0x229] sm:$0xff] }
 0x44f   : > { %v3676_v27 = vpop.permute.xlu1 %3675 }
 0x450   : > { %3752 = vst.msk [vmem:[#allocation4 + $0x98] sm:$0xff] %vm1846_vm7, %v3676_v27  ;;  %v3682_v28 = vpop.permute.xlu0 %3681 }
 0x451   : > { %4063 = vrot.lane.b32.xlu1 %v3978_v13, %s8278_s24  ;;  %3755 = vst.msk [vmem:[#allocation4 + $0xb0] sm:$0xff] %vm1846_vm7, %v3682_v28 }
 0x452   : > { %3877 = vrot.lane.b32.xlu0 %v12901_v9, %s8277_s18 }
 0x453   : > { %v3680_v3 = vpop.permute.xlu1 %3679 }
 0x454   : > { %3754 = vst.msk [vmem:[#allocation4 + $0xa8] sm:$0xff] %vm1846_vm7, %v3680_v3  ;;  %v3686_v35 = vpop.permute.xlu0 %3685 }
 0x455   : > { %4067 = vrot.lane.b32.xlu1 %v3980_v45, %s8278_s24  ;;  %3757 = vst.msk [vmem:[#allocation4 + $0xc0] sm:$0xff] %vm1846_vm7, %v3686_v35 }
 0x456   : > { %3881 = vrot.lane.b32.xlu0 %v10297_v32, %s8277_s18  ;;  %v3982_v32 = vld [vmem:[#allocation2 + $0x1d1] sm:$0xff] }
 0x457   : > { %v3684_v20 = vpop.permute.xlu1 %3683 }
 0x458   : > { %3756 = vst.msk [vmem:[#allocation4 + $0xb8] sm:$0xff] %vm1846_vm7, %v3684_v20  ;;  %v3690_v54 = vpop.permute.xlu0 %3689 }
 0x459   : > { %3879 = vrot.lane.b32.xlu1 %v12902_v10, %s8277_s18  ;;  %3759 = vst.msk [vmem:[#allocation4 + $0xd0] sm:$0xff] %vm1846_vm7, %v3690_v54 }
 0x45a   : > { %4069 = vrot.lane.b32.xlu0 %v3981_v23, %s8278_s24 }
 0x45b   : > { %v3688_v17 = vpop.permute.xlu1 %3687 }
 0x45c   : > { %3758 = vst.msk [vmem:[#allocation4 + $0xc8] sm:$0xff] %vm1846_vm7, %v3688_v17  ;;  %v3694_v30 = vpop.permute.xlu0 %3693 }
 0x45d   : > { %3883 = vrot.lane.b32.xlu1 %v10311_v18, %s8277_s18  ;;  %3761 = vst.msk [vmem:[#allocation4 + $0xe0] sm:$0xff] %vm1846_vm7, %v3694_v30 }
 0x45e   : > { %4073 = vrot.lane.b32.xlu0 %v3983_v12, %s8278_s24 }
 0x45f   : > { %v3692_v51 = vpop.permute.xlu1 %3691 }
 0x460   : > { %3760 = vst.msk [vmem:[#allocation4 + $0xd8] sm:$0xff] %vm1846_vm7, %v3692_v51  ;;  %v3698_v21 = vpop.permute.xlu0 %3697 }
 0x461   : > { %4071 = vrot.lane.b32.xlu1 %v3982_v32, %s8278_s24  ;;  %3763 = vst.msk [vmem:[#allocation4 + $0xf0] sm:$0xff] %vm1846_vm7, %v3698_v21 }
 0x462   : > { %3885 = vrot.lane.b32.xlu0 %v3793_v55, %s8277_s18 }
 0x463   : > { %v3696_v8 = vpop.permute.xlu1 %3695 }
 0x464   : > { %3762 = vst.msk [vmem:[#allocation4 + $0xe8] sm:$0xff] %vm1846_vm7, %v3696_v8  ;;  %v3830_v18 = vpop.permute.xlu0 %3829 }
 0x465   : > { %4075 = vrot.lane.b32.xlu1 %v3984_v24, %s8278_s24  ;;  %3925 = vst.msk [vmem:[#allocation4] sm:$0xff] %vm2039_vm9, %v3830_v18 }
 0x466   : > { %3889 = vrot.lane.b32.xlu0 %v3795_v47, %s8277_s18 }
 0x467   : > { %v3700_v46 = vpop.permute.xlu1 %3699 }
 0x468   : > { %3764 = vst.msk [vmem:[#allocation4 + $0xf8] sm:$0xff] %vm1846_vm7, %v3700_v46  ;;  %v3834_v0 = vpop.permute.xlu0 %3833 }
 0x469   : > { %3887 = vrot.lane.b32.xlu1 %v3794_v42, %s8277_s18  ;;  %3927 = vst.msk [vmem:[#allocation4 + $0x10] sm:$0xff] %vm2039_vm9, %v3834_v0 }
 0x46a   : > { %4077 = vrot.lane.b32.xlu0 %v10435_v49, %s8278_s24  ;;  %v3988_v49 = vld [vmem:[#allocation2 + $0x231] sm:$0xff] }
 0x46b   : > { %v3832_v4 = vpop.permute.xlu1 %3831 }
 0x46c   : > { %3926 = vst.msk [vmem:[#allocation4 + $0x8] sm:$0xff] %vm2039_vm9, %v3832_v4  ;;  %v3838_v7 = vpop.permute.xlu0 %3837 }
 0x46d   : > { %3891 = vrot.lane.b32.xlu1 %v3796_v1, %s8277_s18  ;;  %3929 = vst.msk [vmem:[#allocation4 + $0x20] sm:$0xff] %vm2039_vm9, %v3838_v7 }
 0x46e   : > { %4081 = vrot.lane.b32.xlu0 %v3987_v61, %s8278_s24 }
 0x46f   : > { %v3836_v58 = vpop.permute.xlu1 %3835 }
 0x470   : > { %3928 = vst.msk [vmem:[#allocation4 + $0x18] sm:$0xff] %vm2039_vm9, %v3836_v58  ;;  %v3842_v13 = vpop.permute.xlu0 %3841 }
 0x471   : > { %4079 = vrot.lane.b32.xlu1 %v10455_v50, %s8278_s24  ;;  %3931 = vst.msk [vmem:[#allocation4 + $0x30] sm:$0xff] %vm2039_vm9, %v3842_v13 }
 0x473   : > { %v3840_v27 = vpop.permute.xlu1 %3839 }
 0x474   : > { %3930 = vst.msk [vmem:[#allocation4 + $0x28] sm:$0xff] %vm2039_vm9, %v3840_v27  ;;  %v3846_v28 = vpop.permute.xlu0 %3845 }
 0x475   : > { %4083 = vrot.lane.b32.xlu1 %v3988_v49, %s8278_s24  ;;  %3933 = vst.msk [vmem:[#allocation4 + $0x40] sm:$0xff] %vm2039_vm9, %v3846_v28 }
 0x477   : > { %v3844_v45 = vpop.permute.xlu1 %3843 }
 0x478   : > { %3932 = vst.msk [vmem:[#allocation4 + $0x38] sm:$0xff] %vm2039_vm9, %v3844_v45  ;;  %v3850_v9 = vpop.permute.xlu0 %3849 }
 0x479   : > { %3935 = vst.msk [vmem:[#allocation4 + $0x50] sm:$0xff] %vm2039_vm9, %v3850_v9 }
 0x47b   : > { %v3848_v3 = vpop.permute.xlu1 %3847 }
 0x47c   : > { %3934 = vst.msk [vmem:[#allocation4 + $0x48] sm:$0xff] %vm2039_vm9, %v3848_v3  ;;  %v3854_v50 = vpop.permute.xlu0 %3853 }
 0x47d   : > { %3937 = vst.msk [vmem:[#allocation4 + $0x60] sm:$0xff] %vm2039_vm9, %v3854_v50 }
 0x47f   : > { %v3852_v35 = vpop.permute.xlu1 %3851 }
 0x480   : > { %3936 = vst.msk [vmem:[#allocation4 + $0x58] sm:$0xff] %vm2039_vm9, %v3852_v35  ;;  %v3858_v20 = vpop.permute.xlu0 %3857 }
 0x481   : > { %3939 = vst.msk [vmem:[#allocation4 + $0x70] sm:$0xff] %vm2039_vm9, %v3858_v20 }
 0x483   : > { %v3856_v23 = vpop.permute.xlu1 %3855 }
 0x484   : > { %3938 = vst.msk [vmem:[#allocation4 + $0x68] sm:$0xff] %vm2039_vm9, %v3856_v23  ;;  %v4022_v54 = vpop.permute.xlu0 %4021 }
 0x485   : > { %4117 = vst.msk [vmem:[#allocation4] sm:$0xff] %vm2232_vm10, %v4022_v54 }
 0x487   : > { %v3860_v10 = vpop.permute.xlu1 %3859 }
 0x488   : > { %3940 = vst.msk [vmem:[#allocation4 + $0x78] sm:$0xff] %vm2039_vm9, %v3860_v10  ;;  %v4026_v17 = vpop.permute.xlu0 %4025 }
 0x489   : > { %4119 = vst.msk [vmem:[#allocation4 + $0x10] sm:$0xff] %vm2232_vm10, %v4026_v17 }
 0x48b   : > { %v4024_v12 = vpop.permute.xlu1 %4023 }
 0x48c   : > { %4118 = vst.msk [vmem:[#allocation4 + $0x8] sm:$0xff] %vm2232_vm10, %v4024_v12  ;;  %v4030_v30 = vpop.permute.xlu0 %4029  ;;  %v4149_v55 = vld [vmem:[#allocation4] sm:$0xff] }
 0x48d   : > { %4121 = vst.msk [vmem:[#allocation4 + $0x20] sm:$0xff] %vm2232_vm10, %v4030_v30 }
 0x48f   : > { %v4028_v32 = vpop.permute.xlu1 %4027 }
 0x490   : > { %4120 = vst.msk [vmem:[#allocation4 + $0x18] sm:$0xff] %vm2232_vm10, %v4028_v32  ;;  %v4034_v51 = vpop.permute.xlu0 %4033  ;;  %v4151_v18 = vld [vmem:[#allocation4 + $0x10] sm:$0xff] }
 0x491   : > { %4123 = vst.msk [vmem:[#allocation4 + $0x30] sm:$0xff] %vm2232_vm10, %v4034_v51 }
 0x493   : > { %v4032_v21 = vpop.permute.xlu1 %4031  ;;  %v4150_v24 = vld [vmem:[#allocation4 + $0x8] sm:$0xff] }
 0x494   : > { %4122 = vst.msk [vmem:[#allocation4 + $0x28] sm:$0xff] %vm2232_vm10, %v4032_v21  ;;  %v4181_v8 = vpack.c.bf16 %v4150_v24, %v4149_v55  ;;  %v4038_v47 = vpop.permute.xlu0 %4037  ;;  %v4153_v4 = vld [vmem:[#allocation4 + $0x20] sm:$0xff] }
 0x495   : > { %4125 = vst.msk [vmem:[#allocation4 + $0x40] sm:$0xff] %vm2232_vm10, %v4038_v47 }
 0x496   : > { %7864 = vmatprep.mubr.msk.bf16.mxu1 %vm2333_vm11, %v4181_v8 }
 0x497   : > { %v4036_v42 = vpop.permute.xlu1 %4035  ;;  %v4152_v46 = vld [vmem:[#allocation4 + $0x18] sm:$0xff] }
 0x498   : > { %4124 = vst.msk [vmem:[#allocation4 + $0x38] sm:$0xff] %vm2232_vm10, %v4036_v42  ;;  %v4182_v0 = vpack.c.bf16 %v4152_v46, %v4151_v18  ;;  %v4042_v1 = vpop.permute.xlu0 %4041  ;;  %v4155_v49 = vld [vmem:[#allocation4 + $0x30] sm:$0xff] }
 0x499   : > { %4127 = vst.msk [vmem:[#allocation4 + $0x50] sm:$0xff] %vm2232_vm10, %v4042_v1 }
 0x49a   : > { %7865 = vmatmul.mubr.msk.bf16.vlgmr.msra.gmra.mrb[16].mxu1 %vm2333_vm11, %v4182_v0 }
 0x49b   : > { %v4040_v61 = vpop.permute.xlu1 %4039  ;;  %v4154_v7 = vld [vmem:[#allocation4 + $0x28] sm:$0xff] }
 0x49c   : > { %4126 = vst.msk [vmem:[#allocation4 + $0x48] sm:$0xff] %vm2232_vm10, %v4040_v61  ;;  %v4183_v58 = vpack.c.bf16 %v4154_v7, %v4153_v4  ;;  %v4046_v13 = vpop.permute.xlu0 %4045  ;;  %v4157_v3 = vld [vmem:[#allocation4 + $0x40] sm:$0xff] }
 0x49d   : > { %4129 = vst.msk [vmem:[#allocation4 + $0x60] sm:$0xff] %vm2232_vm10, %v4046_v13 }
 0x49e   : > { %7868 = vmatprep.mubr.msk.bf16.mxu1 %vm2333_vm11, %v4183_v58 }
 0x49f   : > { %v4044_v27 = vpop.permute.xlu1 %4043  ;;  %v4156_v28 = vld [vmem:[#allocation4 + $0x38] sm:$0xff] }
 0x4a0   : > { %4128 = vst.msk [vmem:[#allocation4 + $0x58] sm:$0xff] %vm2232_vm10, %v4044_v27  ;;  %v4184_v45 = vpack.c.bf16 %v4156_v28, %v4155_v49  ;;  %v4050_v9 = vpop.permute.xlu0 %4049  ;;  %v4159_v54 = vld [vmem:[#allocation4 + $0x50] sm:$0xff] }
 0x4a1   : > { %4131 = vst.msk [vmem:[#allocation4 + $0x70] sm:$0xff] %vm2232_vm10, %v4050_v9 }
 0x4a2   : > { %7869 = vmatmul.mubr.msk.bf16.gmra.mrb[20].mxu1 %vm2333_vm11, %v4184_v45 }
 0x4a3   : > { %v4048_v50 = vpop.permute.xlu1 %4047  ;;  %v4158_v35 = vld [vmem:[#allocation4 + $0x48] sm:$0xff] }
 0x4a4   : > { %4130 = vst.msk [vmem:[#allocation4 + $0x68] sm:$0xff] %vm2232_vm10, %v4048_v50  ;;  %v4185_v20 = vpack.c.bf16 %v4158_v35, %v4157_v3  ;;  %v3862_v23 = vpop.permute.xlu0 %3861  ;;  %v4161_v32 = vld [vmem:[#allocation4 + $0x60] sm:$0xff] }
 0x4a5   : > { %3941 = vst.msk [vmem:[#allocation4 + $0x80] sm:$0xff] %vm2039_vm9, %v3862_v23 }
 0x4a6   : > { %7872 = vmatprep.mubr.msk.bf16.mxu1 %vm2333_vm11, %v4185_v20 }
 0x4a7   : > { %v4052_v10 = vpop.permute.xlu1 %4051  ;;  %v4160_v17 = vld [vmem:[#allocation4 + $0x58] sm:$0xff] }
 0x4a8   : > { %4132 = vst.msk [vmem:[#allocation4 + $0x78] sm:$0xff] %vm2232_vm10, %v4052_v10  ;;  %v4186_v12 = vpack.c.bf16 %v4160_v17, %v4159_v54  ;;  %v3866_v30 = vpop.permute.xlu0 %3865  ;;  %v4163_v8 = vld [vmem:[#allocation4 + $0x70] sm:$0xff] }
 0x4a9   : > { %3943 = vst.msk [vmem:[#allocation4 + $0x90] sm:$0xff] %vm2039_vm9, %v3866_v30 }
 0x4aa   : > { %7873 = vmatmul.mubr.msk.bf16.gmra.mrb[24].mxu1 %vm2333_vm11, %v4186_v12 }
 0x4ab   : > { %v3864_v51 = vpop.permute.xlu1 %3863  ;;  %v4162_v55 = vld [vmem:[#allocation4 + $0x68] sm:$0xff] }
 0x4ac   : > { %3942 = vst.msk [vmem:[#allocation4 + $0x88] sm:$0xff] %vm2039_vm9, %v3864_v51  ;;  %v4187_v21 = vpack.c.bf16 %v4162_v55, %v4161_v32  ;;  %v4054_v24 = vpop.permute.xlu0 %4053 }
 0x4ad   : > { %4133 = vst.msk [vmem:[#allocation4 + $0x80] sm:$0xff] %vm2232_vm10, %v4054_v24 }
 0x4ae   : > { %7876 = vmatprep.mubr.msk.bf16.mxu1 %vm2333_vm11, %v4187_v21 }
 0x4af   : > { %v3868_v47 = vpop.permute.xlu1 %3867  ;;  %v4164_v18 = vld [vmem:[#allocation4 + $0x78] sm:$0xff] }
 0x4b0   : > { %3944 = vst.msk [vmem:[#allocation4 + $0x98] sm:$0xff] %vm2039_vm9, %v3868_v47  ;;  %v4188_v42 = vpack.c.bf16 %v4164_v18, %v4163_v8  ;;  %v4058_v46 = vpop.permute.xlu0 %4057 }
 0x4b1   : > { %4135 = vst.msk [vmem:[#allocation4 + $0x90] sm:$0xff] %vm2232_vm10, %v4058_v46 }
 0x4b2   : > { %7877 = vmatmul.mubr.msk.bf16.gmra.mrb[28].mxu1 %vm2333_vm11, %v4188_v42 }
 0x4b3   : > { %v4056_v0 = vpop.permute.xlu1 %4055 }
 0x4b4   : > { %4134 = vst.msk [vmem:[#allocation4 + $0x88] sm:$0xff] %vm2232_vm10, %v4056_v0  ;;  %v3870_v1 = vpop.permute.xlu0 %3869  ;;  %v4165_v7 = vld [vmem:[#allocation4 + $0x80] sm:$0xff] }
 0x4b5   : > { %3945 = vst.msk [vmem:[#allocation4 + $0xa0] sm:$0xff] %vm2039_vm9, %v3870_v1 }
 0x4b7   : > { %v4060_v4 = vpop.permute.xlu1 %4059 }
 0x4b8   : > { %4136 = vst.msk [vmem:[#allocation4 + $0x98] sm:$0xff] %vm2232_vm10, %v4060_v4  ;;  %v3874_v61 = vpop.permute.xlu0 %3873  ;;  %v4167_v28 = vld [vmem:[#allocation4 + $0x90] sm:$0xff] }
 0x4b9   : > { %3947 = vst.msk [vmem:[#allocation4 + $0xb0] sm:$0xff] %vm2039_vm9, %v3874_v61 }
 0x4bb   : > { %v3872_v58 = vpop.permute.xlu1 %3871  ;;  %v4166_v13 = vld [vmem:[#allocation4 + $0x88] sm:$0xff] }
 0x4bc   : > { %3946 = vst.msk [vmem:[#allocation4 + $0xa8] sm:$0xff] %vm2039_vm9, %v3872_v58  ;;  %v4189_v49 = vpack.c.bf16 %v4166_v13, %v4165_v7  ;;  %v4062_v27 = vpop.permute.xlu0 %4061 }
 0x4bd   : > { %4137 = vst.msk [vmem:[#allocation4 + $0xa0] sm:$0xff] %vm2232_vm10, %v4062_v27 }
 0x4be   : > { %7880 = vmatprep.mubr.msk.bf16.mxu1 %vm2333_vm11, %v4189_v49 }
 0x4bf   : > { %v3876_v45 = vpop.permute.xlu1 %3875  ;;  %v4168_v9 = vld [vmem:[#allocation4 + $0x98] sm:$0xff] }
 0x4c0   : > { %3948 = vst.msk [vmem:[#allocation4 + $0xb8] sm:$0xff] %vm2039_vm9, %v3876_v45  ;;  %v4190_v3 = vpack.c.bf16 %v4168_v9, %v4167_v28  ;;  %v4066_v50 = vpop.permute.xlu0 %4065 }
 0x4c1   : > { %4139 = vst.msk [vmem:[#allocation4 + $0xb0] sm:$0xff] %vm2232_vm10, %v4066_v50 }
 0x4c2   : > { %7881 = vmatmul.mubr.msk.bf16.gmra.mrb[32].mxu1 %vm2333_vm11, %v4190_v3 }
 0x4c3   : > { %v4064_v35 = vpop.permute.xlu1 %4063 }
 0x4c4   : > { %4138 = vst.msk [vmem:[#allocation4 + $0xa8] sm:$0xff] %vm2232_vm10, %v4064_v35  ;;  %v3878_v20 = vpop.permute.xlu0 %3877  ;;  %v4169_v10 = vld [vmem:[#allocation4 + $0xa0] sm:$0xff] }
 0x4c5   : > { %3949 = vst.msk [vmem:[#allocation4 + $0xc0] sm:$0xff] %vm2039_vm9, %v3878_v20 }
 0x4c7   : > { %v4068_v23 = vpop.permute.xlu1 %4067 }
 0x4c8   : > { %4140 = vst.msk [vmem:[#allocation4 + $0xb8] sm:$0xff] %vm2232_vm10, %v4068_v23  ;;  %v3882_v54 = vpop.permute.xlu0 %3881  ;;  %v4171_v51 = vld [vmem:[#allocation4 + $0xb0] sm:$0xff] }
 0x4c9   : > { %3951 = vst.msk [vmem:[#allocation4 + $0xd0] sm:$0xff] %vm2039_vm9, %v3882_v54 }
 0x4cb   : > { %v3880_v17 = vpop.permute.xlu1 %3879  ;;  %v4170_v12 = vld [vmem:[#allocation4 + $0xa8] sm:$0xff] }
 0x4cc   : > { %3950 = vst.msk [vmem:[#allocation4 + $0xc8] sm:$0xff] %vm2039_vm9, %v3880_v17  ;;  %v4191_v30 = vpack.c.bf16 %v4170_v12, %v4169_v10  ;;  %v4070_v32 = vpop.permute.xlu0 %4069  ;;  %v4852_v10 = vld [vmem:[#allocation3 + $0x8] sm:$0xff]  ;;  %v4853_v17 = vld [vmem:[#allocation3 + $0x10] sm:$0xff] }
 0x4cd   : > { %4141 = vst.msk [vmem:[#allocation4 + $0xc0] sm:$0xff] %vm2232_vm10, %v4070_v32  ;;  %4916 = vrot.lane.b32.xlu0 %v4852_v10, %s8271_s11  ;;  %4918 = vrot.lane.b32.xlu1 %v4853_v17, %s8271_s11 }
 0x4ce   : > { %7884 = vmatprep.mubr.msk.bf16.mxu1 %vm2333_vm11, %v4191_v30  ;;  %v10825_v30 = vld [vmem:[%s12574_s5] ss:$0 sm:$0xff] }
 0x4cf   : > { %v3884_v55 = vpop.permute.xlu1 %3883  ;;  %v4172_v21 = vld [vmem:[#allocation4 + $0xb8] sm:$0xff] }
 0x4d0   : > { %3952 = vst.msk [vmem:[#allocation4 + $0xd8] sm:$0xff] %vm2039_vm9, %v3884_v55  ;;  %v4192_v24 = vpack.c.bf16 %v4172_v21, %v4171_v51  ;;  %v4074_v8 = vpop.permute.xlu0 %4073 }
 0x4d1   : > { %4143 = vst.msk [vmem:[#allocation4 + $0xd0] sm:$0xff] %vm2232_vm10, %v4074_v8 }
 0x4d2   : > { %7885 = vmatmul.mubr.msk.bf16.gmra.mrb[36].mxu1 %vm2333_vm11, %v4192_v24 }
 0x4d3   : > { %v4072_v47 = vpop.permute.xlu1 %4071 }
 0x4d4   : > { %4142 = vst.msk [vmem:[#allocation4 + $0xc8] sm:$0xff] %vm2232_vm10, %v4072_v47  ;;  %v3886_v18 = vpop.permute.xlu0 %3885  ;;  %v4173_v0 = vld [vmem:[#allocation4 + $0xc0] sm:$0xff] }
 0x4d5   : > { %3953 = vst.msk [vmem:[#allocation4 + $0xe0] sm:$0xff] %vm2039_vm9, %v3886_v18 }
 0x4d7   : > { %v4076_v42 = vpop.permute.xlu1 %4075 }
 0x4d8   : > { %4144 = vst.msk [vmem:[#allocation4 + $0xd8] sm:$0xff] %vm2232_vm10, %v4076_v42  ;;  %v3890_v46 = vpop.permute.xlu0 %3889  ;;  %v4175_v58 = vld [vmem:[#allocation4 + $0xd0] sm:$0xff] }
 0x4d9   : > { %3955 = vst.msk [vmem:[#allocation4 + $0xf0] sm:$0xff] %vm2039_vm9, %v3890_v46 }
 0x4db   : > { %v3888_v1 = vpop.permute.xlu1 %3887  ;;  %v4174_v4 = vld [vmem:[#allocation4 + $0xc8] sm:$0xff] }
 0x4dc   : > { %3954 = vst.msk [vmem:[#allocation4 + $0xe8] sm:$0xff] %vm2039_vm9, %v3888_v1  ;;  %v4193_v61 = vpack.c.bf16 %v4174_v4, %v4173_v0  ;;  %v4078_v7 = vpop.permute.xlu0 %4077 }
 0x4dd   : > { %4145 = vst.msk [vmem:[#allocation4 + $0xe0] sm:$0xff] %vm2232_vm10, %v4078_v7 }
 0x4de   : > { %7888 = vmatprep.mubr.msk.bf16.mxu1 %vm2333_vm11, %v4193_v61 }
 0x4df   : > { %v3892_v13 = vpop.permute.xlu1 %3891  ;;  %v4176_v49 = vld [vmem:[#allocation4 + $0xd8] sm:$0xff] }
 0x4e0   : > { %3956 = vst.msk [vmem:[#allocation4 + $0xf8] sm:$0xff] %vm2039_vm9, %v3892_v13  ;;  %v4194_v27 = vpack.c.bf16 %v4176_v49, %v4175_v58  ;;  %v4082_v28 = vpop.permute.xlu0 %4081 }
 0x4e1   : > { %4147 = vst.msk [vmem:[#allocation4 + $0xf0] sm:$0xff] %vm2232_vm10, %v4082_v28 }
 0x4e2   : > { %7889 = vmatmul.mubr.msk.bf16.gmra.mrb[40].mxu1 %vm2333_vm11, %v4194_v27 }
 0x4e3   : > { %v4080_v45 = vpop.permute.xlu1 %4079 }
 0x4e4   : > { %4146 = vst.msk [vmem:[#allocation4 + $0xe8] sm:$0xff] %vm2232_vm10, %v4080_v45  ;;  %v4177_v3 = vld [vmem:[#allocation4 + $0xe0] sm:$0xff] }
 0x4e7   : > { %v4084_v9 = vpop.permute.xlu1 %4083 }
 0x4e8   : > { %4148 = vst.msk [vmem:[#allocation4 + $0xf8] sm:$0xff] %vm2232_vm10, %v4084_v9  ;;  %v4179_v20 = vld [vmem:[#allocation4 + $0xf0] sm:$0xff] }
 0x4eb   : > { %v4178_v50 = vld [vmem:[#allocation4 + $0xe8] sm:$0xff] }
 0x4ec   : > { %v4195_v35 = vpack.c.bf16 %v4178_v50, %v4177_v3 }
 0x4ee   : > { %7892 = vmatprep.mubr.msk.bf16.mxu1 %vm2333_vm11, %v4195_v35 }
 0x4ef   : > { %v4180_v23 = vld [vmem:[#allocation4 + $0xf8] sm:$0xff] }
 0x4f0   : > { %v4196_v54 = vpack.c.bf16 %v4180_v23, %v4179_v20 }
 0x4f2   : > { %7893 = vmatmul.mubr.msk.bf16.gmra.mrb[44].mxu1 %vm2333_vm11, %v4196_v54 }
 0x56d   : > { %v7866_v12 = vpop.f32.mrb[16].mxu1 }
 0x56e   : > { %v4463_v32 = vadd.f32 %v7866_v12, %v10358_v48  ;;  %v4302_v51 = vpop.f32.mrb[17].mxu1 }
 0x56f   : > { %v4461_v55 = vadd.f32 %v4302_v51, %v10361_v15  ;;  %v7867_v21 = vpop.f32.mrb[18].mxu1 }
 0x570   : > { %v4502_v24 = vadd.f32 %v10825_v30, %v4463_v32  ;;  %v4464_v8 = vadd.f32 %v7867_v21, %v10365_v56  ;;  %v4305_v47 = vpop.f32.mrb[19].mxu1 }
 0x571   : > { %v4500_v18 = vadd.f32 %v10825_v30, %v4461_v55  ;;  %v4462_v42 = vadd.f32 %v4305_v47, %v10368_v14 }
 0x572   : > { %v7708_v46 = vmul.f32 -1.442695, %v4502_v24  ;;  %v4503_v0 = vadd.f32 %v10825_v30, %v4464_v8 }
 0x573   : > { %v7706_v1 = vmul.f32 -1.442695, %v4500_v18  ;;  %v4501_v4 = vadd.f32 %v10825_v30, %v4462_v42 }
 0x574   : > { %8004 = vpow2.f32 %v7708_v46  ;;  %v7709_v61 = vmul.f32 -1.442695, %v4503_v0 }
 0x575   : > { %8006 = vpow2.f32 %v7706_v1  ;;  %v7707_v7 = vmul.f32 -1.442695, %v4501_v4  ;;  %v7870_v58 = vpop.f32.mrb[20].mxu1 }
 0x576   : > { %8008 = vpow2.f32 %v7709_v61  ;;  %v4467_v13 = vadd.f32 %v7870_v58, %v10378_v40  ;;  %v4318_v49 = vpop.f32.mrb[21].mxu1 }
 0x577   : > { %8010 = vpow2.f32 %v7707_v7  ;;  %v4465_v27 = vadd.f32 %v4318_v49, %v10381_v60  ;;  %v7871_v28 = vpop.f32.mrb[22].mxu1 }
 0x578   : > { %v4506_v45 = vadd.f32 %v10825_v30, %v4467_v13  ;;  %v4468_v9 = vadd.f32 %v7871_v28, %v10385_v43  ;;  %v4321_v3 = vpop.f32.mrb[23].mxu1 }
 0x579   : > { %v4504_v50 = vadd.f32 %v10825_v30, %v4465_v27  ;;  %v4466_v35 = vadd.f32 %v4321_v3, %v10388_v16 }
 0x57a   : > { %v7712_v20 = vmul.f32 -1.442695, %v4506_v45  ;;  %v4507_v23 = vadd.f32 %v10825_v30, %v4468_v9 }
 0x57b   : > { %v7710_v54 = vmul.f32 -1.442695, %v4504_v50  ;;  %v4505_v10 = vadd.f32 %v10825_v30, %v4466_v35 }
 0x57c   : > { %8012 = vpow2.f32 %v7712_v20  ;;  %v7713_v17 = vmul.f32 -1.442695, %v4507_v23 }
 0x57d   : > { %8014 = vpow2.f32 %v7710_v54  ;;  %v7711_v12 = vmul.f32 -1.442695, %v4505_v10  ;;  %v7874_v32 = vpop.f32.mrb[24].mxu1 }
 0x57e   : > { %v8005_v51 = vpop.eup %8004  ;;  %8016 = vpow2.f32 %v7713_v17  ;;  %v4471_v55 = vadd.f32 %v7874_v32, %v10398_v59  ;;  %v4334_v21 = vpop.f32.mrb[25].mxu1 }
 0x57f   : > { %v8007_v24 = vpop.eup %8006  ;;  %v4630_v8 = vadd.f32 1.0, %v8005_v51  ;;  %8018 = vpow2.f32 %v7711_v12  ;;  %v4469_v47 = vadd.f32 %v4334_v21, %v10401_v63  ;;  %v7875_v18 = vpop.f32.mrb[26].mxu1  ;;  %v4788_v51 = vld [vmem:[#allocation3 + $0x7] sm:$0xff] }
 0x580   : > { %v8009_v42 = vpop.eup %8008  ;;  %v4628_v46 = vadd.f32 1.0, %v8007_v24  ;;  %v4510_v0 = vadd.f32 %v10825_v30, %v4471_v55  ;;  %v4472_v1 = vadd.f32 %v7875_v18, %v10405_v5  ;;  %v4337_v4 = vpop.f32.mrb[27].mxu1  ;;  %4820 = vst.msk [vmem:[#allocation4] sm:$0xff] %vm623_vm1, %v4788_v51 }
 0x581   : > { %v8011_v61 = vpop.eup %8010  ;;  %8020 = vrcp.f32 %v4630_v8  ;;  %v4631_v7 = vadd.f32 1.0, %v8009_v42  ;;  %v4508_v58 = vadd.f32 %v10825_v30, %v4469_v47  ;;  %v4470_v13 = vadd.f32 %v4337_v4, %v10408_v52  ;;  %v4917_v18 = vpop.permute.xlu0 %4916 }
 0x582   : > { %8022 = vrcp.f32 %v4628_v46  ;;  %v4629_v49 = vadd.f32 1.0, %v8011_v61  ;;  %v7716_v27 = vmul.f32 -1.442695, %v4510_v0  ;;  %v4511_v28 = vadd.f32 %v10825_v30, %v4472_v1  ;;  %v4431_v46 = vld [vmem:[#allocation2 + $0x48] sm:$0xff]  ;;  %5012 = vst.msk [vmem:[#allocation4] sm:$0xff] %vm880_vm2, %v4917_v18 }
 0x583   : > { %8024 = vrcp.f32 %v4631_v7  ;;  %v7714_v45 = vmul.f32 -1.442695, %v4508_v58  ;;  %v4509_v9 = vadd.f32 %v10825_v30, %v4470_v13  ;;  %v4789_v61 = vld [vmem:[#allocation3 + $0xf] sm:$0xff] }
 0x584   : > { %8026 = vrcp.f32 %v4629_v49  ;;  %v7717_v3 = vmul.f32 -1.442695, %v4511_v28  ;;  %v4429_v7 = vld [vmem:[#allocation2 + $0x28] sm:$0xff]  ;;  %4821 = vst.msk [vmem:[#allocation4 + $0x8] sm:$0xff] %vm623_vm1, %v4789_v61 }
 0x585   : > { %8028 = vpow2.f32 %v7716_v27  ;;  %v7715_v50 = vmul.f32 -1.442695, %v4509_v9  ;;  %v7878_v35 = vpop.f32.mrb[28].mxu1  ;;  %v4919_v27 = vpop.permute.xlu1 %4918 }
 0x586   : > { %v8013_v20 = vpop.eup %8012  ;;  %8030 = vpow2.f32 %v7714_v45  ;;  %v4475_v23 = vadd.f32 %v7878_v35, %v10418_v33  ;;  %v4350_v54 = vpop.f32.mrb[29].mxu1  ;;  %v4432_v45 = vld [vmem:[#allocation2 + $0x50] sm:$0xff]  ;;  %5013 = vst.msk [vmem:[#allocation4 + $0x8] sm:$0xff] %vm880_vm2, %v4919_v27 }
 0x587   : > { %v8015_v10 = vpop.eup %8014  ;;  %v4634_v17 = vadd.f32 1.0, %v8013_v20  ;;  %8032 = vpow2.f32 %v7717_v3  ;;  %v4473_v12 = vadd.f32 %v4350_v54, %v10421_v38  ;;  %v7879_v32 = vpop.f32.mrb[30].mxu1  ;;  %v4430_v20 = vld [vmem:[#allocation2 + $0x30] sm:$0xff] }
 0x588   : > { %v8017_v55 = vpop.eup %8016  ;;  %v4632_v21 = vadd.f32 1.0, %v8015_v10  ;;  %8034 = vpow2.f32 %v7715_v50  ;;  %v4514_v24 = vadd.f32 %v10825_v30, %v4475_v23  ;;  %v4476_v8 = vadd.f32 %v7879_v32, %v10425_v11  ;;  %v4353_v47 = vpop.f32.mrb[31].mxu1 }
 0x589   : > { %v8019_v42 = vpop.eup %8018  ;;  %8036 = vrcp.f32 %v4634_v17  ;;  %v4635_v0 = vadd.f32 1.0, %v8017_v55  ;;  %v4512_v1 = vadd.f32 %v10825_v30, %v4473_v12  ;;  %v4474_v4 = vadd.f32 %v4353_v47, %v10428_v39  ;;  %v4435_v47 = vld [vmem:[#allocation2 + $0x88] sm:$0xff] }
 0x58a   : > { %8038 = vrcp.f32 %v4632_v21  ;;  %v4633_v58 = vadd.f32 1.0, %v8019_v42  ;;  %v7720_v13 = vmul.f32 -1.442695, %v4514_v24  ;;  %v4515_v49 = vadd.f32 %v10825_v30, %v4476_v8 }
 0x58b   : > { %v10861_v28 = vpop.eup %8020  ;;  %8040 = vrcp.f32 %v4635_v0  ;;  %v7718_v9 = vmul.f32 -1.442695, %v4512_v1  ;;  %v4513_v3 = vadd.f32 %v10825_v30, %v4474_v4  ;;  %v4436_v4 = vld [vmem:[#allocation2 + $0x90] sm:$0xff] }
 0x58c   : > { %12903 = vst [vmem:[#allocation8_spill] sm:$0xff] %v10861_v28  ;;  %v10865_v50 = vpop.eup %8022  ;;  %v4726_v35 = vmul.f32 %v10861_v28, %v4431_v46  ;;  %8042 = vrcp.f32 %v4633_v58  ;;  %v7721_v23 = vmul.f32 -1.442695, %v4515_v49  ;;  %v4433_v46 = vld [vmem:[#allocation2 + $0x68] sm:$0xff] }
 0x58d   : > { %12904 = vst [vmem:[#allocation9_spill] sm:$0xff] %v10865_v50  ;;  %v10868_v54 = vpop.eup %8024  ;;  %v4724_v10 = vmul.f32 %v10865_v50, %v4429_v7  ;;  %8044 = vpow2.f32 %v7720_v13  ;;  %v7719_v17 = vmul.f32 -1.442695, %v4513_v3  ;;  %v4434_v13 = vld [vmem:[#allocation2 + $0x70] sm:$0xff] }
 0x58e   : > { %12905 = vst [vmem:[#allocation10_spill] sm:$0xff] %v10868_v54  ;;  %v10871_v12 = vpop.eup %8026  ;;  %4758 = vst.msk [vmem:[#allocation3 + $0x48] sm:$0xff] %vm623_vm1, %v4726_v35  ;;  %v4727_v32 = vmul.f32 %v10868_v54, %v4432_v45  ;;  %8046 = vpow2.f32 %v7718_v9 }
 0x58f   : > { %12906 = vst [vmem:[#allocation11_spill] sm:$0xff] %v10871_v12  ;;  %v8029_v51 = vpop.eup %8028  ;;  %4756 = vst.msk [vmem:[#allocation3 + $0x28] sm:$0xff] %vm623_vm1, %v4724_v10  ;;  %v4725_v55 = vmul.f32 %v10871_v12, %v4430_v20  ;;  %8048 = vpow2.f32 %v7721_v23 }
 0x590   : > { %v8031_v21 = vpop.eup %8030  ;;  %4759 = vst.msk [vmem:[#allocation3 + $0x50] sm:$0xff] %vm623_vm1, %v4727_v32  ;;  %v4638_v24 = vadd.f32 1.0, %v8029_v51  ;;  %8050 = vpow2.f32 %v7719_v17 }
 0x591   : > { %v8033_v8 = vpop.eup %8032  ;;  %4757 = vst.msk [vmem:[#allocation3 + $0x30] sm:$0xff] %vm623_vm1, %v4725_v55  ;;  %v4636_v18 = vadd.f32 1.0, %v8031_v21 }
 0x592   : > { %v8035_v42 = vpop.eup %8034  ;;  %8052 = vrcp.f32 %v4638_v24  ;;  %v4639_v0 = vadd.f32 1.0, %v8033_v8 }
 0x593   : > { %v10879_v1 = vpop.eup %8036  ;;  %8054 = vrcp.f32 %v4636_v18  ;;  %v4637_v61 = vadd.f32 1.0, %v8035_v42 }
 0x594   : > { %12907 = vst [vmem:[#allocation12_spill] sm:$0xff] %v10879_v1  ;;  %v10881_v7 = vpop.eup %8038  ;;  %v4730_v58 = vmul.f32 %v10879_v1, %v4435_v47  ;;  %8056 = vrcp.f32 %v4639_v0  ;;  %v4438_v1 = vld [vmem:[#allocation2 + $0xb0] sm:$0xff] }
 0x595   : > { %12908 = vst [vmem:[#allocation13_spill] sm:$0xff] %v10881_v7  ;;  %v10884_v49 = vpop.eup %8040  ;;  %v4728_v27 = vmul.f32 %v10881_v7, %v4433_v46  ;;  %8058 = vrcp.f32 %v4637_v61  ;;  %v7882_v45 = vpop.f32.mrb[32].mxu1  ;;  %v10887_v9 = vld [vmem:[#allocation3 + $0x47] sm:$0xff] }
 0x596   : > { %12909 = vst [vmem:[#allocation14_spill] sm:$0xff] %v10884_v49  ;;  %v10889_v3 = vpop.eup %8042  ;;  %4762 = vst.msk [vmem:[#allocation3 + $0x88] sm:$0xff] %vm623_vm1, %v4730_v58  ;;  %v4731_v35 = vmul.f32 %v10884_v49, %v4436_v4  ;;  %v4479_v20 = vadd.f32 %v7882_v45, %v10438_v53  ;;  %v4366_v23 = vpop.f32.mrb[33].mxu1  ;;  %v4854_v10 = vld [vmem:[#allocation3 + $0x28] sm:$0xff] }
 0x597   : > { %12910 = vst [vmem:[#allocation15_spill] sm:$0xff] %v10889_v3  ;;  %v10894_v17 = vld [vmem:[#allocation3 + $0x27] sm:$0xff]  ;;  %4824 = vst.msk [vmem:[#allocation4 + $0x20] sm:$0xff] %vm623_vm1, %v10887_v9  ;;  %v8045_v32 = vpop.eup %8044  ;;  %v4729_v51 = vmul.f32 %v10889_v3, %v4434_v13  ;;  %v4477_v55 = vadd.f32 %v4366_v23, %v10443_v26  ;;  %v7883_v21 = vpop.f32.mrb[34].mxu1  ;;  %4920 = vrot.lane.b32.xlu0 %v4854_v10, %s8271_s11  ;;  %v4446_v26 = vld [vmem:[#allocation2 + $0x130] sm:$0xff] }
 0x598   : > { %4760 = vst.msk [vmem:[#allocation3 + $0x68] sm:$0xff] %vm623_vm1, %v4728_v27  ;;  %4822 = vst.msk [vmem:[#allocation4 + $0x10] sm:$0xff] %vm623_vm1, %v10894_v17  ;;  %v8047_v24 = vpop.eup %8046  ;;  %v4642_v8 = vadd.f32 1.0, %v8045_v32  ;;  %v4518_v47 = vadd.f32 %v10825_v30, %v4479_v20  ;;  %v4480_v18 = vadd.f32 %v7883_v21, %v10447_v41  ;;  %v4369_v42 = vpop.f32.mrb[35].mxu1  ;;  %v4855_v46 = vld [vmem:[#allocation3 + $0x30] sm:$0xff]  ;;  %v10916_v32 = vld [vmem:[#allocation3 + $0x48] sm:$0xff] }
 0x599   : > { %4763 = vst.msk [vmem:[#allocation3 + $0x90] sm:$0xff] %vm623_vm1, %v4731_v35  ;;  %v8049_v0 = vpop.eup %8048  ;;  %4761 = vst.msk [vmem:[#allocation3 + $0x70] sm:$0xff] %vm623_vm1, %v4729_v51  ;;  %v4640_v4 = vadd.f32 1.0, %v8047_v24  ;;  %v4516_v61 = vadd.f32 %v10825_v30, %v4477_v55  ;;  %v4478_v58 = vadd.f32 %v4369_v42, %v10450_v36  ;;  %4922 = vrot.lane.b32.xlu1 %v4855_v46, %s8271_s11  ;;  %v10911_v13 = vld [vmem:[#allocation3 + $0x2f] sm:$0xff] }
 0x59a   : > { %v10913_v27 = vld [vmem:[#allocation3 + $0x4f] sm:$0xff]  ;;  %v8051_v45 = vpop.eup %8050  ;;  %8060 = vrcp.f32 %v4642_v8  ;;  %v4643_v20 = vadd.f32 1.0, %v8049_v0  ;;  %v7724_v23 = vmul.f32 -1.442695, %v4518_v47  ;;  %v4519_v10 = vadd.f32 %v10825_v30, %v4480_v18  ;;  %4823 = vst.msk [vmem:[#allocation4 + $0x18] sm:$0xff] %vm623_vm1, %v10911_v13 }
 0x59b   : > { %v4439_v35 = vld [vmem:[#allocation2 + $0xc8] sm:$0xff]  ;;  %4825 = vst.msk [vmem:[#allocation4 + $0x28] sm:$0xff] %vm623_vm1, %v10913_v27  ;;  %8062 = vrcp.f32 %v4640_v4  ;;  %v4641_v55 = vadd.f32 1.0, %v8051_v45  ;;  %v7722_v21 = vmul.f32 -1.442695, %v4516_v61  ;;  %v4517_v24 = vadd.f32 %v10825_v30, %v4478_v58  ;;  %4924 = vrot.lane.b32.xlu0 %v10916_v32, %s8271_s11  ;;  %v4440_v47 = vld [vmem:[#allocation2 + $0xd0] sm:$0xff] }
 0x59c   : > { %v4437_v51 = vld [vmem:[#allocation2 + $0xa8] sm:$0xff]  ;;  %v10925_v8 = vpop.eup %8052  ;;  %8064 = vrcp.f32 %v4643_v20  ;;  %v7725_v18 = vmul.f32 -1.442695, %v4519_v10  ;;  %v10927_v42 = vld [vmem:[#allocation3 + $0x50] sm:$0xff] }
 0x59d   : > { %12911 = vst [vmem:[#allocation16_spill] sm:$0xff] %v10925_v8  ;;  %v10929_v46 = vpop.eup %8054  ;;  %v4734_v0 = vmul.f32 %v10925_v8, %v4439_v35  ;;  %8066 = vrcp.f32 %v4641_v55  ;;  %v7723_v4 = vmul.f32 -1.442695, %v4517_v24  ;;  %4926 = vrot.lane.b32.xlu1 %v10927_v42, %s8271_s11  ;;  %v10934_v61 = vld [vmem:[#allocation3 + $0x87] sm:$0xff]  ;;  %v4442_v8 = vld [vmem:[#allocation2 + $0xf0] sm:$0xff] }
 0x59e   : > { %12912 = vst [vmem:[#allocation17_spill] sm:$0xff] %v10929_v46  ;;  %v10936_v58 = vpop.eup %8056  ;;  %v4732_v45 = vmul.f32 %v10929_v46, %v4437_v51  ;;  %8068 = vpow2.f32 %v7724_v23  ;;  %4828 = vst.msk [vmem:[#allocation4 + $0x40] sm:$0xff] %vm623_vm1, %v10934_v61 }
 0x59f   : > { %12913 = vst [vmem:[#allocation18_spill] sm:$0xff] %v10936_v58  ;;  %v10939_v20 = vld [vmem:[#allocation3 + $0x68] sm:$0xff]  ;;  %v10945_v35 = vpop.eup %8058  ;;  %4766 = vst.msk [vmem:[#allocation3 + $0xc8] sm:$0xff] %vm623_vm1, %v4734_v0  ;;  %v4735_v55 = vmul.f32 %v10936_v58, %v4440_v47  ;;  %8070 = vpow2.f32 %v7722_v21 }
 0x5a0   : > { %v10941_v10 = vld [vmem:[#allocation3 + $0x67] sm:$0xff]  ;;  %12914 = vst [vmem:[#allocation19_spill] sm:$0xff] %v10945_v35  ;;  %4928 = vrot.lane.b32.xlu0 %v10939_v20, %s8271_s11  ;;  %4764 = vst.msk [vmem:[#allocation3 + $0xa8] sm:$0xff] %vm623_vm1, %v4732_v45  ;;  %v4733_v23 = vmul.f32 %v10945_v35, %v4438_v1  ;;  %8072 = vpow2.f32 %v7725_v18  ;;  %v10955_v51 = vld [vmem:[#allocation3 + $0x70] sm:$0xff] }
 0x5a1   : > { %4826 = vst.msk [vmem:[#allocation4 + $0x30] sm:$0xff] %vm623_vm1, %v10941_v10  ;;  %4767 = vst.msk [vmem:[#allocation3 + $0xd0] sm:$0xff] %vm623_vm1, %v4735_v55  ;;  %8074 = vpow2.f32 %v7723_v4  ;;  %4930 = vrot.lane.b32.xlu1 %v10955_v51, %s8271_s11  ;;  %v10960_v21 = vld [vmem:[#allocation3 + $0x6f] sm:$0xff] }
 0x5a2   : > { %v10962_v24 = vld [vmem:[#allocation3 + $0x8f] sm:$0xff]  ;;  %4765 = vst.msk [vmem:[#allocation3 + $0xb0] sm:$0xff] %vm623_vm1, %v4733_v23  ;;  %4827 = vst.msk [vmem:[#allocation4 + $0x38] sm:$0xff] %vm623_vm1, %v10960_v21 }
 0x5a3   : > { %v4443_v47 = vld [vmem:[#allocation2 + $0x108] sm:$0xff]  ;;  %4829 = vst.msk [vmem:[#allocation4 + $0x48] sm:$0xff] %vm623_vm1, %v10962_v24  ;;  %v4444_v4 = vld [vmem:[#allocation2 + $0x110] sm:$0xff] }
 0x5a4   : > { %v10965_v0 = vld [vmem:[#allocation3 + $0x88] sm:$0xff]  ;;  %v10973_v18 = vpop.eup %8060  ;;  %v10975_v45 = vld [vmem:[#allocation3 + $0x90] sm:$0xff] }
 0x5a5   : > { %v4441_v1 = vld [vmem:[#allocation2 + $0xe8] sm:$0xff]  ;;  %4932 = vrot.lane.b32.xlu0 %v10965_v0, %s8271_s11  ;;  %12915 = vst [vmem:[#allocation20_spill] sm:$0xff] %v10973_v18  ;;  %v10977_v55 = vpop.eup %8062  ;;  %v4738_v23 = vmul.f32 %v10973_v18, %v4443_v47  ;;  %v7886_v58 = vpop.f32.mrb[36].mxu1  ;;  %4934 = vrot.lane.b32.xlu1 %v10975_v45, %s8271_s11 }
 0x5a6   : > { %12916 = vst [vmem:[#allocation21_spill] sm:$0xff] %v10977_v55  ;;  %v10982_v46 = vpop.eup %8064  ;;  %v4736_v35 = vmul.f32 %v10977_v55, %v4441_v1  ;;  %v4483_v49 = vadd.f32 %v7886_v58, %v10460_v6  ;;  %v4382_v7 = vpop.f32.mrb[37].mxu1  ;;  %v10986_v3 = vld [vmem:[#allocation3 + $0xc7] sm:$0xff] }
 0x5a7   : > { %12917 = vst [vmem:[#allocation22_spill] sm:$0xff] %v10982_v46  ;;  %v10988_v28 = vpop.eup %8066  ;;  %4770 = vst.msk [vmem:[#allocation3 + $0x108] sm:$0xff] %vm623_vm1, %v4738_v23  ;;  %v4739_v47 = vmul.f32 %v10982_v46, %v4444_v4  ;;  %v4481_v18 = vadd.f32 %v4382_v7, %v10465_v29  ;;  %v7887_v54 = vpop.f32.mrb[38].mxu1  ;;  %v10993_v50 = vld [vmem:[#allocation3 + $0xa8] sm:$0xff] }
 0x5a8   : > { %12918 = vst [vmem:[#allocation23_spill] sm:$0xff] %v10988_v28  ;;  %v10995_v12 = vld [vmem:[#allocation3 + $0xa7] sm:$0xff]  ;;  %4832 = vst.msk [vmem:[#allocation4 + $0x60] sm:$0xff] %vm623_vm1, %v10986_v3  ;;  %v8069_v58 = vpop.eup %8068  ;;  %v4737_v1 = vmul.f32 %v10988_v28, %v4442_v8  ;;  %v4522_v55 = vadd.f32 %v10825_v30, %v4483_v49  ;;  %v4484_v23 = vadd.f32 %v7887_v54, %v10469_v44  ;;  %v4385_v7 = vpop.f32.mrb[39].mxu1  ;;  %v11018_v29 = vld [vmem:[#allocation3 + $0xcf] sm:$0xff] }
 0x5a9   : > { %4768 = vst.msk [vmem:[#allocation3 + $0xe8] sm:$0xff] %vm623_vm1, %v4736_v35  ;;  %4936 = vrot.lane.b32.xlu0 %v10993_v50, %s8271_s11  ;;  %4830 = vst.msk [vmem:[#allocation4 + $0x50] sm:$0xff] %vm623_vm1, %v10995_v12  ;;  %v8071_v4 = vpop.eup %8070  ;;  %v4646_v46 = vadd.f32 1.0, %v8069_v58  ;;  %v4520_v6 = vadd.f32 %v10825_v30, %v4481_v18  ;;  %v4482_v35 = vadd.f32 %v4385_v7, %v10472_v31  ;;  %v11010_v8 = vld [vmem:[#allocation3 + $0xb0] sm:$0xff]  ;;  %v11021_v31 = vld [vmem:[#allocation3 + $0xc8] sm:$0xff] }
 0x5aa   : > { %4771 = vst.msk [vmem:[#allocation3 + $0x110] sm:$0xff] %vm623_vm1, %v4739_v47  ;;  %v8073_v49 = vpop.eup %8072  ;;  %4769 = vst.msk [vmem:[#allocation3 + $0xf0] sm:$0xff] %vm623_vm1, %v4737_v1  ;;  %v4644_v54 = vadd.f32 1.0, %v8071_v4  ;;  %v4523_v28 = vadd.f32 %v10825_v30, %v4484_v23  ;;  %4938 = vrot.lane.b32.xlu1 %v11010_v8, %s8271_s11  ;;  %v11016_v44 = vld [vmem:[#allocation3 + $0xaf] sm:$0xff]  ;;  %v7728_v58 = vmul.f32 -1.442695, %v4522_v55 }
 0x5ab   : > { %v8075_v47 = vpop.eup %8074  ;;  %8076 = vrcp.f32 %v4646_v46  ;;  %v4647_v18 = vadd.f32 1.0, %v8073_v49  ;;  %v4521_v7 = vadd.f32 %v10825_v30, %v4482_v35  ;;  %4831 = vst.msk [vmem:[#allocation4 + $0x58] sm:$0xff] %vm623_vm1, %v11016_v44  ;;  %4833 = vst.msk [vmem:[#allocation4 + $0x68] sm:$0xff] %vm623_vm1, %v11018_v29  ;;  %v7726_v23 = vmul.f32 -1.442695, %v4520_v6  ;;  %v11029_v4 = vld [vmem:[#allocation3 + $0xd0] sm:$0xff] }
 0x5ac   : > { %8078 = vrcp.f32 %v4644_v54  ;;  %v4645_v1 = vadd.f32 1.0, %v8075_v47  ;;  %v7729_v46 = vmul.f32 -1.442695, %v4523_v28  ;;  %v11269_v48 = vld [vmem:[#allocation3 + $0xb1] sm:$0xff]  ;;  %v11274_v14 = vld [vmem:[#allocation3 + $0xc9] sm:$0xff] }
 0x5ad   : > { %4940 = vrot.lane.b32.xlu0 %v11021_v31, %s8271_s11  ;;  %8080 = vrcp.f32 %v4647_v18  ;;  %v7727_v55 = vmul.f32 -1.442695, %v4521_v7  ;;  %v4447_v18 = vld [vmem:[#allocation2 + $0x148] sm:$0xff]  ;;  %12937 = vst [vmem:[#allocation72_spill] sm:$0xff] %v11269_v48  ;;  %12938 = vst [vmem:[#allocation73_spill] sm:$0xff] %v11274_v14  ;;  %v11279_v15 = vld [vmem:[#allocation3 + $0xd1] sm:$0xff] }
 0x5ae   : > { %8082 = vrcp.f32 %v4645_v1  ;;  %4942 = vrot.lane.b32.xlu1 %v11029_v4, %s8271_s11  ;;  %v11033_v35 = vld [vmem:[#allocation3 + $0x107] sm:$0xff]  ;;  %12939 = vst [vmem:[#allocation74_spill] sm:$0xff] %v11279_v15 }
 0x5af   : > { %8084 = vpow2.f32 %v7728_v58  ;;  %4836 = vst.msk [vmem:[#allocation4 + $0x80] sm:$0xff] %vm623_vm1, %v11033_v35  ;;  %v11053_v58 = vld [vmem:[#allocation3 + $0x108] sm:$0xff] }
 0x5b0   : > { %v11035_v49 = vld [vmem:[#allocation3 + $0xe8] sm:$0xff]  ;;  %8086 = vpow2.f32 %v7726_v23  ;;  %v4448_v23 = vld [vmem:[#allocation2 + $0x150] sm:$0xff] }
 0x5b1   : > { %v11037_v54 = vld [vmem:[#allocation3 + $0xe7] sm:$0xff]  ;;  %4944 = vrot.lane.b32.xlu0 %v11035_v49, %s8271_s11  ;;  %8088 = vpow2.f32 %v7729_v46  ;;  %v11045_v6 = vld [vmem:[#allocation3 + $0xf0] sm:$0xff] }
 0x5b2   : > { %4834 = vst.msk [vmem:[#allocation4 + $0x70] sm:$0xff] %vm623_vm1, %v11037_v54  ;;  %8090 = vpow2.f32 %v7727_v55  ;;  %4946 = vrot.lane.b32.xlu1 %v11045_v6, %s8271_s11  ;;  %v11049_v28 = vld [vmem:[#allocation3 + $0xef] sm:$0xff] }
 0x5b3   : > { %v11051_v47 = vld [vmem:[#allocation3 + $0x10f] sm:$0xff]  ;;  %4835 = vst.msk [vmem:[#allocation4 + $0x78] sm:$0xff] %vm623_vm1, %v11049_v28 }
 0x5b4   : > { %4837 = vst.msk [vmem:[#allocation4 + $0x88] sm:$0xff] %vm623_vm1, %v11051_v47  ;;  %v4445_v7 = vld [vmem:[#allocation2 + $0x128] sm:$0xff]  ;;  %v11063_v55 = vld [vmem:[#allocation3 + $0x110] sm:$0xff] }
 0x5b5   : > { %4948 = vrot.lane.b32.xlu0 %v11053_v58, %s8271_s11  ;;  %v11061_v1 = vpop.eup %8076  ;;  %v7890_v46 = vpop.f32.mrb[40].mxu1 }
 0x5b6   : > { %12919 = vst [vmem:[#allocation24_spill] sm:$0xff] %v11061_v1  ;;  %v11065_v53 = vpop.eup %8078  ;;  %v4742_v41 = vmul.f32 %v11061_v1, %v4447_v18  ;;  %v4487_v36 = vadd.f32 %v7890_v46, %v10480_v22  ;;  %4950 = vrot.lane.b32.xlu1 %v11063_v55, %s8271_s11  ;;  %v4398_v33 = vpop.f32.mrb[41].mxu1 }
 0x5b7   : > { %12920 = vst [vmem:[#allocation26_spill] sm:$0xff] %v11065_v53  ;;  %v11071_v11 = vpop.eup %8080  ;;  %v4740_v38 = vmul.f32 %v11065_v53, %v4445_v7  ;;  %v4485_v39 = vadd.f32 %v4398_v33, %v10485_v57  ;;  %v7891_v59 = vpop.f32.mrb[42].mxu1 }
 0x5b8   : > { %12921 = vst [vmem:[#allocation25_spill] sm:$0xff] %v11071_v11  ;;  %v11075_v5 = vpop.eup %8082  ;;  %4774 = vst.msk [vmem:[#allocation3 + $0x148] sm:$0xff] %vm623_vm1, %v4742_v41  ;;  %v4743_v18 = vmul.f32 %v11071_v11, %v4448_v23  ;;  %v4526_v1 = vadd.f32 %v10825_v30, %v4487_v36  ;;  %v4488_v46 = vadd.f32 %v7891_v59, %v10489_v62  ;;  %v4401_v22 = vpop.f32.mrb[43].mxu1 }
 0x5b9   : > { %12922 = vst [vmem:[#allocation27_spill] sm:$0xff] %v11075_v5  ;;  %v8085_v63 = vpop.eup %8084  ;;  %4772 = vst.msk [vmem:[#allocation3 + $0x128] sm:$0xff] %vm623_vm1, %v4740_v38  ;;  %v4741_v52 = vmul.f32 %v11075_v5, %v4446_v26  ;;  %v4524_v7 = vadd.f32 %v10825_v30, %v4485_v39  ;;  %v4486_v33 = vadd.f32 %v4401_v22, %v10492_v2 }
 0x5ba   : > { %v8087_v53 = vpop.eup %8086  ;;  %4775 = vst.msk [vmem:[#allocation3 + $0x150] sm:$0xff] %vm623_vm1, %v4743_v18  ;;  %v4650_v41 = vadd.f32 1.0, %v8085_v63  ;;  %v4527_v23 = vadd.f32 %v10825_v30, %v4488_v46  ;;  %v7732_v26 = vmul.f32 -1.442695, %v4526_v1  ;;  %v4451_v1 = vld [vmem:[#allocation2 + $0x188] sm:$0xff] }
 0x5bb   : > { %v8089_v11 = vpop.eup %8088  ;;  %4773 = vst.msk [vmem:[#allocation3 + $0x130] sm:$0xff] %vm623_vm1, %v4741_v52  ;;  %v4648_v59 = vadd.f32 1.0, %v8087_v53  ;;  %v4525_v36 = vadd.f32 %v10825_v30, %v4486_v33  ;;  %v7730_v5 = vmul.f32 -1.442695, %v4524_v7 }
 0x5bc   : > { %v8091_v62 = vpop.eup %8090  ;;  %8092 = vrcp.f32 %v4650_v41  ;;  %v4651_v38 = vadd.f32 1.0, %v8089_v11  ;;  %v7733_v22 = vmul.f32 -1.442695, %v4527_v23  ;;  %v4452_v23 = vld [vmem:[#allocation2 + $0x190] sm:$0xff] }
 0x5bd   : > { %8094 = vrcp.f32 %v4648_v59  ;;  %v4649_v39 = vadd.f32 1.0, %v8091_v62  ;;  %v7731_v18 = vmul.f32 -1.442695, %v4525_v36 }
 0x5be   : > { %8096 = vrcp.f32 %v4651_v38 }
 0x5bf   : > { %8098 = vrcp.f32 %v4649_v39  ;;  %v11089_v63 = vld [vmem:[#allocation3 + $0x147] sm:$0xff] }
 0x5c0   : > { %8100 = vpow2.f32 %v7732_v26  ;;  %v11091_v46 = vld [vmem:[#allocation3 + $0x128] sm:$0xff]  ;;  %4840 = vst.msk [vmem:[#allocation4 + $0xa0] sm:$0xff] %vm623_vm1, %v11089_v63 }
 0x5c1   : > { %v11093_v52 = vld [vmem:[#allocation3 + $0x127] sm:$0xff]  ;;  %8102 = vpow2.f32 %v7730_v5  ;;  %4952 = vrot.lane.b32.xlu0 %v11091_v46, %s8271_s11  ;;  %v11107_v62 = vld [vmem:[#allocation3 + $0x14f] sm:$0xff] }
 0x5c2   : > { %4838 = vst.msk [vmem:[#allocation4 + $0x90] sm:$0xff] %vm623_vm1, %v11093_v52  ;;  %8104 = vpow2.f32 %v7733_v22  ;;  %v11101_v11 = vld [vmem:[#allocation3 + $0x130] sm:$0xff]  ;;  %v11109_v7 = vld [vmem:[#allocation3 + $0x148] sm:$0xff]  ;;  %4841 = vst.msk [vmem:[#allocation4 + $0xa8] sm:$0xff] %vm623_vm1, %v11107_v62 }
 0x5c3   : > { %8106 = vpow2.f32 %v7731_v18  ;;  %4954 = vrot.lane.b32.xlu1 %v11101_v11, %s8271_s11  ;;  %v11105_v53 = vld [vmem:[#allocation3 + $0x12f] sm:$0xff] }
 0x5c4   : > { %4839 = vst.msk [vmem:[#allocation4 + $0x98] sm:$0xff] %vm623_vm1, %v11105_v53  ;;  %v4449_v5 = vld [vmem:[#allocation2 + $0x168] sm:$0xff]  ;;  %v11120_v36 = vld [vmem:[#allocation3 + $0x150] sm:$0xff] }
 0x5c5   : > { %4956 = vrot.lane.b32.xlu0 %v11109_v7, %s8271_s11  ;;  %v7894_v33 = vpop.f32.mrb[44].mxu1  ;;  %v4450_v22 = vld [vmem:[#allocation2 + $0x170] sm:$0xff] }
 0x5c6   : > { %v11117_v41 = vpop.eup %8092  ;;  %v4491_v59 = vadd.f32 %v7894_v33, %v10500_v25  ;;  %v4414_v38 = vpop.f32.mrb[45].mxu1 }
 0x5c7   : > { %12923 = vst [vmem:[#allocation28_spill] sm:$0xff] %v11117_v41  ;;  %v11122_v26 = vpop.eup %8094  ;;  %v4746_v39 = vmul.f32 %v11117_v41, %v4451_v1  ;;  %4958 = vrot.lane.b32.xlu1 %v11120_v36, %s8271_s11  ;;  %v4489_v18 = vadd.f32 %v4414_v38, %v10505_v19  ;;  %v7895_v57 = vpop.f32.mrb[46].mxu1 }
 0x5c8   : > { %12924 = vst [vmem:[#allocation30_spill] sm:$0xff] %v11122_v26  ;;  %v11128_v2 = vpop.eup %8096  ;;  %v4744_v40 = vmul.f32 %v11122_v26, %v4449_v5  ;;  %v4530_v33 = vadd.f32 %v10825_v30, %v4491_v59  ;;  %v4492_v25 = vadd.f32 %v7895_v57, %v10509_v34  ;;  %v4417_v43 = vpop.f32.mrb[47].mxu1 }
 0x5c9   : > { %12925 = vst [vmem:[#allocation29_spill] sm:$0xff] %v11128_v2  ;;  %v11133_v60 = vpop.eup %8098  ;;  %4778 = vst.msk [vmem:[#allocation3 + $0x188] sm:$0xff] %vm623_vm1, %v4746_v39  ;;  %v4747_v1 = vmul.f32 %v11128_v2, %v4452_v23  ;;  %v4528_v41 = vadd.f32 %v10825_v30, %v4489_v18  ;;  %v4490_v38 = vadd.f32 %v4417_v43, %v10512_v37 }
 0x5ca   : > { %12926 = vst [vmem:[#allocation31_spill] sm:$0xff] %v11133_v60  ;;  %v8101_v19 = vpop.eup %8100  ;;  %4776 = vst.msk [vmem:[#allocation3 + $0x168] sm:$0xff] %vm623_vm1, %v4744_v40  ;;  %v4745_v5 = vmul.f32 %v11133_v60, %v4450_v22  ;;  %v7736_v26 = vmul.f32 -1.442695, %v4530_v33  ;;  %v4531_v59 = vadd.f32 %v10825_v30, %v4492_v25 }
 0x5cb   : > { %v8103_v57 = vpop.eup %8102  ;;  %4779 = vst.msk [vmem:[#allocation3 + $0x190] sm:$0xff] %vm623_vm1, %v4747_v1  ;;  %v4654_v34 = vadd.f32 1.0, %v8101_v19  ;;  %v4529_v39 = vadd.f32 %v10825_v30, %v4490_v38  ;;  %v7734_v40 = vmul.f32 -1.442695, %v4528_v41 }
 0x5cc   : > { %v8105_v16 = vpop.eup %8104  ;;  %4777 = vst.msk [vmem:[#allocation3 + $0x170] sm:$0xff] %vm623_vm1, %v4745_v5  ;;  %v4652_v23 = vadd.f32 1.0, %v8103_v57  ;;  %8108 = vpow2.f32 %v7736_v26  ;;  %v7737_v33 = vmul.f32 -1.442695, %v4531_v59  ;;  %v4455_v26 = vld [vmem:[#allocation2 + $0x1c8] sm:$0xff]  ;;  %v4456_v57 = vld [vmem:[#allocation2 + $0x1d0] sm:$0xff] }
 0x5cd   : > { %v8107_v43 = vpop.eup %8106  ;;  %8110 = vrcp.f32 %v4654_v34  ;;  %v4655_v18 = vadd.f32 1.0, %v8105_v16  ;;  %v7735_v25 = vmul.f32 -1.442695, %v4529_v39  ;;  %v4453_v5 = vld [vmem:[#allocation2 + $0x1a8] sm:$0xff] }
 0x5ce   : > { %8112 = vrcp.f32 %v4652_v23  ;;  %v4653_v22 = vadd.f32 1.0, %v8107_v43 }
 0x5cf   : > { %8114 = vrcp.f32 %v4655_v18 }
 0x5d0   : > { %8116 = vrcp.f32 %v4653_v22  ;;  %v11145_v2 = vld [vmem:[#allocation3 + $0x187] sm:$0xff] }
 0x5d1   : > { %8118 = vpow2.f32 %v7734_v40  ;;  %v11147_v19 = vld [vmem:[#allocation3 + $0x168] sm:$0xff]  ;;  %4844 = vst.msk [vmem:[#allocation4 + $0xc0] sm:$0xff] %vm623_vm1, %v11145_v2  ;;  %v4454_v40 = vld [vmem:[#allocation2 + $0x1b0] sm:$0xff] }
 0x5d2   : > { %v11149_v30 = vld [vmem:[#allocation3 + $0x167] sm:$0xff]  ;;  %8120 = vpow2.f32 %v7737_v33  ;;  %4960 = vrot.lane.b32.xlu0 %v11147_v19, %s8271_s11  ;;  %v11160_v41 = vld [vmem:[#allocation3 + $0x18f] sm:$0xff] }
 0x5d3   : > { %4842 = vst.msk [vmem:[#allocation4 + $0xb0] sm:$0xff] %vm623_vm1, %v11149_v30  ;;  %8122 = vpow2.f32 %v7735_v25  ;;  %v4875_v16 = vld [vmem:[#allocation3 + $0x170] sm:$0xff]  ;;  %v4876_v1 = vld [vmem:[#allocation3 + $0x188] sm:$0xff]  ;;  %4845 = vst.msk [vmem:[#allocation4 + $0xc8] sm:$0xff] %vm623_vm1, %v11160_v41 }
 0x5d4   : > { %4962 = vrot.lane.b32.xlu1 %v4875_v16, %s8271_s11  ;;  %v11158_v34 = vld [vmem:[#allocation3 + $0x16f] sm:$0xff] }
 0x5d5   : > { %4843 = vst.msk [vmem:[#allocation4 + $0xb8] sm:$0xff] %vm623_vm1, %v11158_v34  ;;  %v4877_v23 = vld [vmem:[#allocation3 + $0x190] sm:$0xff] }
 0x5d6   : > { %v8109_v38 = vpop.eup %8108  ;;  %4964 = vrot.lane.b32.xlu0 %v4876_v1, %s8271_s11 }
 0x5d7   : > { %v11167_v59 = vpop.eup %8110  ;;  %v4658_v39 = vadd.f32 1.0, %v8109_v38 }
 0x5d8   : > { %12927 = vst [vmem:[#allocation32_spill] sm:$0xff] %v11167_v59  ;;  %v11169_v43 = vpop.eup %8112  ;;  %v4750_v18 = vmul.f32 %v11167_v59, %v4455_v26  ;;  %4966 = vrot.lane.b32.xlu1 %v4877_v23, %s8271_s11 }
 0x5d9   : > { %12928 = vst [vmem:[#allocation34_spill] sm:$0xff] %v11169_v43  ;;  %v11173_v22 = vpop.eup %8114  ;;  %v4748_v33 = vmul.f32 %v11169_v43, %v4453_v5  ;;  %8124 = vrcp.f32 %v4658_v39 }
 0x5da   : > { %12929 = vst [vmem:[#allocation33_spill] sm:$0xff] %v11173_v22  ;;  %v11176_v25 = vpop.eup %8116  ;;  %4782 = vst.msk [vmem:[#allocation3 + $0x1c8] sm:$0xff] %vm623_vm1, %v4750_v18  ;;  %v4751_v16 = vmul.f32 %v11173_v22, %v4456_v57  ;;  %v4459_v18 = vld [vmem:[#allocation2 + $0x208] sm:$0xff] }
 0x5db   : > { %12930 = vst [vmem:[#allocation35_spill] sm:$0xff] %v11176_v25  ;;  %v8119_v1 = vpop.eup %8118  ;;  %4780 = vst.msk [vmem:[#allocation3 + $0x1a8] sm:$0xff] %vm623_vm1, %v4748_v33  ;;  %v4749_v38 = vmul.f32 %v11176_v25, %v4454_v40 }
 0x5dc   : > { %v8121_v26 = vpop.eup %8120  ;;  %4783 = vst.msk [vmem:[#allocation3 + $0x1d0] sm:$0xff] %vm623_vm1, %v4751_v16  ;;  %v4656_v23 = vadd.f32 1.0, %v8119_v1 }
 0x5dd   : > { %v8123_v59 = vpop.eup %8122  ;;  %4781 = vst.msk [vmem:[#allocation3 + $0x1b0] sm:$0xff] %vm623_vm1, %v4749_v38  ;;  %v4659_v5 = vadd.f32 1.0, %v8121_v26  ;;  %v4457_v38 = vld [vmem:[#allocation2 + $0x1e8] sm:$0xff] }
 0x5de   : > { %8126 = vrcp.f32 %v4656_v23  ;;  %v4657_v39 = vadd.f32 1.0, %v8123_v59  ;;  %v4460_v23 = vld [vmem:[#allocation2 + $0x210] sm:$0xff] }
 0x5df   : > { %8128 = vrcp.f32 %v4659_v5 }
 0x5e0   : > { %8130 = vrcp.f32 %v4657_v39  ;;  %v4458_v39 = vld [vmem:[#allocation2 + $0x1f0] sm:$0xff] }
 0x5e1   : > { %v11184_v43 = vld [vmem:[#allocation3 + $0x1c7] sm:$0xff] }
 0x5e2   : > { %v4878_v57 = vld [vmem:[#allocation3 + $0x1a8] sm:$0xff]  ;;  %4848 = vst.msk [vmem:[#allocation4 + $0xe0] sm:$0xff] %vm623_vm1, %v11184_v43 }
 0x5e3   : > { %v11186_v22 = vld [vmem:[#allocation3 + $0x1a7] sm:$0xff]  ;;  %v11190_v40 = vpop.eup %8124  ;;  %4968 = vrot.lane.b32.xlu0 %v4878_v57, %s8271_s11  ;;  %v11199_v1 = vld [vmem:[#allocation3 + $0x1cf] sm:$0xff] }
 0x5e4   : > { %12931 = vst [vmem:[#allocation66_spill] sm:$0xff] %v11190_v40  ;;  %4846 = vst.msk [vmem:[#allocation4 + $0xd0] sm:$0xff] %vm623_vm1, %v11186_v22  ;;  %v4754_v59 = vmul.f32 %v11190_v40, %v4459_v18  ;;  %v4879_v33 = vld [vmem:[#allocation3 + $0x1b0] sm:$0xff]  ;;  %v4880_v26 = vld [vmem:[#allocation3 + $0x1c8] sm:$0xff] }
 0x5e5   : > { %4970 = vrot.lane.b32.xlu1 %v4879_v33, %s8271_s11  ;;  %v11197_v16 = vld [vmem:[#allocation3 + $0x1af] sm:$0xff]  ;;  %4849 = vst.msk [vmem:[#allocation4 + $0xe8] sm:$0xff] %vm623_vm1, %v11199_v1 }
 0x5e6   : > { %4786 = vst.msk [vmem:[#allocation3 + $0x208] sm:$0xff] %vm623_vm1, %v4754_v59  ;;  %4847 = vst.msk [vmem:[#allocation4 + $0xd8] sm:$0xff] %vm623_vm1, %v11197_v16  ;;  %v4881_v18 = vld [vmem:[#allocation3 + $0x1d0] sm:$0xff] }
 0x5e7   : > { %4972 = vrot.lane.b32.xlu0 %v4880_v26, %s8271_s11 }
 0x5e8   : > { %v11207_v5 = vpop.eup %8126 }
 0x5e9   : > { %12932 = vst [vmem:[#allocation67_spill] sm:$0xff] %v11207_v5  ;;  %v11209_v57 = vpop.eup %8128  ;;  %v4752_v33 = vmul.f32 %v11207_v5, %v4457_v38  ;;  %4974 = vrot.lane.b32.xlu1 %v4881_v18, %s8271_s11  ;;  %v5044_v18 = vld [vmem:[#allocation3 + $0x9] sm:$0xff] }
 0x5ea   : > { %12933 = vst [vmem:[#allocation68_spill] sm:$0xff] %v11209_v57  ;;  %v11213_v59 = vpop.eup %8130  ;;  %v4755_v40 = vmul.f32 %v11209_v57, %v4460_v23  ;;  %v11260_v57 = vld [vmem:[#allocation3 + $0x91] sm:$0xff] }
 0x5eb   : > { %12934 = vst [vmem:[#allocation69_spill] sm:$0xff] %v11213_v59  ;;  %4784 = vst.msk [vmem:[#allocation3 + $0x1e8] sm:$0xff] %vm623_vm1, %v4752_v33  ;;  %v4753_v25 = vmul.f32 %v11213_v59, %v4458_v39  ;;  %v5045_v33 = vld [vmem:[#allocation3 + $0x11] sm:$0xff]  ;;  %v11240_v39 = vld [vmem:[#allocation3 + $0x49] sm:$0xff] }
 0x5ec   : > { %4787 = vst.msk [vmem:[#allocation3 + $0x210] sm:$0xff] %vm623_vm1, %v4755_v40  ;;  %v11236_v40 = vld [vmem:[#allocation3 + $0x31] sm:$0xff]  ;;  %12935 = vst [vmem:[#allocation70_spill] sm:$0xff] %v11260_v57  ;;  %v11264_v59 = vld [vmem:[#allocation3 + $0xa9] sm:$0xff] }
 0x5ed   : > { %4785 = vst.msk [vmem:[#allocation3 + $0x1f0] sm:$0xff] %vm623_vm1, %v4753_v25  ;;  %v11232_v25 = vld [vmem:[#allocation3 + $0x29] sm:$0xff]  ;;  %12936 = vst [vmem:[#allocation71_spill] sm:$0xff] %v11264_v59 }
 0x5f2   : > { %v4882_v26 = vld [vmem:[#allocation3 + $0x1e8] sm:$0xff] }
 0x5f3   : > { %v11220_v60 = vld [vmem:[#allocation3 + $0x1e7] sm:$0xff]  ;;  %4976 = vrot.lane.b32.xlu0 %v4882_v26, %s8271_s11  ;;  %v11244_v26 = vld [vmem:[#allocation3 + $0x51] sm:$0xff] }
 0x5f4   : > { %4850 = vst.msk [vmem:[#allocation4 + $0xf0] sm:$0xff] %vm623_vm1, %v11220_v60  ;;  %v4883_v38 = vld [vmem:[#allocation3 + $0x1f0] sm:$0xff] }
 0x5f5   : > { %4978 = vrot.lane.b32.xlu1 %v4883_v38, %s8271_s11  ;;  %v11226_v23 = vld [vmem:[#allocation3 + $0x1ef] sm:$0xff] }
 0x5f6   : > { %4851 = vst.msk [vmem:[#allocation4 + $0xf8] sm:$0xff] %vm623_vm1, %v11226_v23  ;;  %v11248_v38 = vld [vmem:[#allocation3 + $0x69] sm:$0xff] }
 0x5f7   : > { %5108 = vrot.lane.b32.xlu0 %v5044_v18, %s8272_s13  ;;  %v11252_v18 = vld [vmem:[#allocation3 + $0x71] sm:$0xff] }
 0x5f9   : > { %5110 = vrot.lane.b32.xlu1 %v5045_v33, %s8272_s13  ;;  %v11256_v33 = vld [vmem:[#allocation3 + $0x89] sm:$0xff] }
 0x5fb   : > { %5112 = vrot.lane.b32.xlu0 %v11232_v25, %s8272_s13 }
 0x5fd   : > { %5114 = vrot.lane.b32.xlu1 %v11236_v40, %s8272_s13 }
 0x5ff   : > { %5116 = vrot.lane.b32.xlu0 %v11240_v39, %s8272_s13 }
 0x601   : > { %5118 = vrot.lane.b32.xlu1 %v11244_v26, %s8272_s13 }
 0x603   : > { %5120 = vrot.lane.b32.xlu0 %v11248_v38, %s8272_s13 }
 0x605   : > { %5122 = vrot.lane.b32.xlu1 %v11252_v18, %s8272_s13 }
 0x607   : > { %5124 = vrot.lane.b32.xlu0 %v11256_v33, %s8272_s13 }
 0x609   : > { %5126 = vrot.lane.b32.xlu1 %v11260_v57, %s8272_s13  ;;  %v4921_v5 = vpop.permute.xlu0 %4920 }
 0x60a   : > { %5014 = vst.msk [vmem:[#allocation4 + $0x10] sm:$0xff] %vm880_vm2, %v4921_v5 }
 0x60b   : > { %5128 = vrot.lane.b32.xlu0 %v11264_v59, %s8272_s13  ;;  %v4923_v37 = vpop.permute.xlu1 %4922  ;;  %v11284_v59 = vld [vmem:[#allocation3 + $0xe9] sm:$0xff] }
 0x60c   : > { %5015 = vst.msk [vmem:[#allocation4 + $0x18] sm:$0xff] %vm880_vm2, %v4923_v37  ;;  %12940 = vst [vmem:[#allocation75_spill] sm:$0xff] %v11284_v59 }
 0x60d   : > { %5130 = vrot.lane.b32.xlu1 %v11269_v48, %s8272_s13  ;;  %v4925_v56 = vpop.permute.xlu0 %4924  ;;  %v11289_v48 = vld [vmem:[#allocation3 + $0xf1] sm:$0xff] }
 0x60e   : > { %5016 = vst.msk [vmem:[#allocation4 + $0x20] sm:$0xff] %vm880_vm2, %v4925_v56  ;;  %12941 = vst [vmem:[#allocation76_spill] sm:$0xff] %v11289_v48 }
 0x60f   : > { %5132 = vrot.lane.b32.xlu0 %v11274_v14, %s8272_s13  ;;  %v4927_v5 = vpop.permute.xlu1 %4926  ;;  %v11294_v14 = vld [vmem:[#allocation3 + $0x109] sm:$0xff] }
 0x610   : > { %5017 = vst.msk [vmem:[#allocation4 + $0x28] sm:$0xff] %vm880_vm2, %v4927_v5  ;;  %12942 = vst [vmem:[#allocation77_spill] sm:$0xff] %v11294_v14 }
 0x611   : > { %5134 = vrot.lane.b32.xlu1 %v11279_v15, %s8272_s13  ;;  %v11299_v15 = vld [vmem:[#allocation3 + $0x111] sm:$0xff] }
 0x612   : > { %v4929_v37 = vpop.permute.xlu0 %4928  ;;  %12943 = vst [vmem:[#allocation78_spill] sm:$0xff] %v11299_v15 }
 0x613   : > { %5018 = vst.msk [vmem:[#allocation4 + $0x30] sm:$0xff] %vm880_vm2, %v4929_v37  ;;  %5136 = vrot.lane.b32.xlu0 %v11284_v59, %s8272_s13  ;;  %v4931_v56 = vpop.permute.xlu1 %4930 }
 0x614   : > { %5019 = vst.msk [vmem:[#allocation4 + $0x38] sm:$0xff] %vm880_vm2, %v4931_v56  ;;  %v5062_v56 = vld [vmem:[#allocation3 + $0x129] sm:$0xff] }
 0x615   : > { %5138 = vrot.lane.b32.xlu1 %v11289_v48, %s8272_s13  ;;  %v5063_v48 = vld [vmem:[#allocation3 + $0x131] sm:$0xff] }
 0x617   : > { %v4933_v5 = vpop.permute.xlu0 %4932  ;;  %5140 = vrot.lane.b32.xlu0 %v11294_v14, %s8272_s13  ;;  %v4935_v37 = vpop.permute.xlu1 %4934 }
 0x618   : > { %5020 = vst.msk [vmem:[#allocation4 + $0x40] sm:$0xff] %vm880_vm2, %v4933_v5  ;;  %5021 = vst.msk [vmem:[#allocation4 + $0x48] sm:$0xff] %vm880_vm2, %v4935_v37  ;;  %v5064_v5 = vld [vmem:[#allocation3 + $0x149] sm:$0xff]  ;;  %v5065_v37 = vld [vmem:[#allocation3 + $0x151] sm:$0xff] }
 0x619   : > { %5142 = vrot.lane.b32.xlu1 %v11299_v15, %s8272_s13 }
 0x61b   : > { %v4937_v59 = vpop.permute.xlu0 %4936  ;;  %5144 = vrot.lane.b32.xlu0 %v5062_v56, %s8272_s13  ;;  %v5066_v56 = vld [vmem:[#allocation3 + $0x169] sm:$0xff] }
 0x61c   : > { %5022 = vst.msk [vmem:[#allocation4 + $0x50] sm:$0xff] %vm880_vm2, %v4937_v59  ;;  %v4939_v57 = vpop.permute.xlu1 %4938 }
 0x61d   : > { %5146 = vrot.lane.b32.xlu1 %v5063_v48, %s8272_s13  ;;  %5023 = vst.msk [vmem:[#allocation4 + $0x58] sm:$0xff] %vm880_vm2, %v4939_v57  ;;  %v5067_v48 = vld [vmem:[#allocation3 + $0x171] sm:$0xff] }
 0x61f   : > { %v4941_v14 = vpop.permute.xlu0 %4940  ;;  %5148 = vrot.lane.b32.xlu0 %v5064_v5, %s8272_s13  ;;  %v5068_v5 = vld [vmem:[#allocation3 + $0x189] sm:$0xff] }
 0x620   : > { %5024 = vst.msk [vmem:[#allocation4 + $0x60] sm:$0xff] %vm880_vm2, %v4941_v14  ;;  %v4943_v15 = vpop.permute.xlu1 %4942 }
 0x621   : > { %5150 = vrot.lane.b32.xlu1 %v5065_v37, %s8272_s13  ;;  %5025 = vst.msk [vmem:[#allocation4 + $0x68] sm:$0xff] %vm880_vm2, %v4943_v15  ;;  %v5069_v37 = vld [vmem:[#allocation3 + $0x191] sm:$0xff] }
 0x623   : > { %v4945_v59 = vpop.permute.xlu0 %4944  ;;  %5152 = vrot.lane.b32.xlu0 %v5066_v56, %s8272_s13  ;;  %v5070_v56 = vld [vmem:[#allocation3 + $0x1a9] sm:$0xff] }
 0x624   : > { %5026 = vst.msk [vmem:[#allocation4 + $0x70] sm:$0xff] %vm880_vm2, %v4945_v59  ;;  %v4947_v57 = vpop.permute.xlu1 %4946  ;;  %v5071_v59 = vld [vmem:[#allocation3 + $0x1b1] sm:$0xff] }
 0x625   : > { %5154 = vrot.lane.b32.xlu1 %v5067_v48, %s8272_s13  ;;  %5027 = vst.msk [vmem:[#allocation4 + $0x78] sm:$0xff] %vm880_vm2, %v4947_v57  ;;  %v5072_v48 = vld [vmem:[#allocation3 + $0x1c9] sm:$0xff]  ;;  %v5073_v57 = vld [vmem:[#allocation3 + $0x1d1] sm:$0xff] }
 0x627   : > { %v4949_v14 = vpop.permute.xlu0 %4948  ;;  %5156 = vrot.lane.b32.xlu0 %v5068_v5, %s8272_s13  ;;  %v5074_v5 = vld [vmem:[#allocation3 + $0x1e9] sm:$0xff] }
 0x628   : > { %5028 = vst.msk [vmem:[#allocation4 + $0x80] sm:$0xff] %vm880_vm2, %v4949_v14  ;;  %v4951_v15 = vpop.permute.xlu1 %4950 }
 0x629   : > { %5158 = vrot.lane.b32.xlu1 %v5069_v37, %s8272_s13  ;;  %5029 = vst.msk [vmem:[#allocation4 + $0x88] sm:$0xff] %vm880_vm2, %v4951_v15  ;;  %v5075_v37 = vld [vmem:[#allocation3 + $0x1f1] sm:$0xff] }
 0x62b   : > { %5160 = vrot.lane.b32.xlu0 %v5070_v56, %s8272_s13 }
 0x62d   : > { %5162 = vrot.lane.b32.xlu1 %v5071_v59, %s8272_s13 }
 0x62f   : > { %5164 = vrot.lane.b32.xlu0 %v5072_v48, %s8272_s13 }
 0x631   : > { %5166 = vrot.lane.b32.xlu1 %v5073_v57, %s8272_s13 }
 0x633   : > { %5168 = vrot.lane.b32.xlu0 %v5074_v5, %s8272_s13  ;;  %v4953_v14 = vpop.permute.xlu0 %4952 }
 0x634   : > { %5030 = vst.msk [vmem:[#allocation4 + $0x90] sm:$0xff] %vm880_vm2, %v4953_v14 }
 0x635   : > { %5170 = vrot.lane.b32.xlu1 %v5075_v37, %s8272_s13  ;;  %v4955_v15 = vpop.permute.xlu1 %4954 }
 0x636   : > { %5031 = vst.msk [vmem:[#allocation4 + $0x98] sm:$0xff] %vm880_vm2, %v4955_v15 }
 0x637   : > { %5300 = vrot.lane.b32.xlu0 %v10894_v17, %s8273_s14  ;;  %v4957_v56 = vpop.permute.xlu0 %4956 }
 0x638   : > { %5032 = vst.msk [vmem:[#allocation4 + $0xa0] sm:$0xff] %vm880_vm2, %v4957_v56 }
 0x639   : > { %5302 = vrot.lane.b32.xlu1 %v10911_v13, %s8273_s14  ;;  %v4959_v59 = vpop.permute.xlu1 %4958 }
 0x63a   : > { %5033 = vst.msk [vmem:[#allocation4 + $0xa8] sm:$0xff] %vm880_vm2, %v4959_v59 }
 0x63b   : > { %5304 = vrot.lane.b32.xlu0 %v10887_v9, %s8273_s14 }
 0x63d   : > { %5306 = vrot.lane.b32.xlu1 %v10913_v27, %s8273_s14 }
 0x63f   : > { %5308 = vrot.lane.b32.xlu0 %v10941_v10, %s8273_s14 }
 0x641   : > { %5310 = vrot.lane.b32.xlu1 %v10960_v21, %s8273_s14 }
 0x643   : > { %5312 = vrot.lane.b32.xlu0 %v10934_v61, %s8273_s14 }
 0x644   : > { %v4961_v17 = vpop.permute.xlu0 %4960 }
 0x645   : > { %5034 = vst.msk [vmem:[#allocation4 + $0xb0] sm:$0xff] %vm880_vm2, %v4961_v17  ;;  %5314 = vrot.lane.b32.xlu1 %v10962_v24, %s8273_s14 }
 0x646   : > { %v4963_v13 = vpop.permute.xlu1 %4962 }
 0x647   : > { %5316 = vrot.lane.b32.xlu0 %v10995_v12, %s8273_s14  ;;  %5035 = vst.msk [vmem:[#allocation4 + $0xb8] sm:$0xff] %vm880_vm2, %v4963_v13 }
 0x648   : > { %v4965_v48 = vpop.permute.xlu0 %4964 }
 0x649   : > { %5036 = vst.msk [vmem:[#allocation4 + $0xc0] sm:$0xff] %vm880_vm2, %v4965_v48  ;;  %5318 = vrot.lane.b32.xlu1 %v11016_v44, %s8273_s14 }
 0x64a   : > { %v4967_v57 = vpop.permute.xlu1 %4966 }
 0x64b   : > { %5320 = vrot.lane.b32.xlu0 %v10986_v3, %s8273_s14  ;;  %5037 = vst.msk [vmem:[#allocation4 + $0xc8] sm:$0xff] %vm880_vm2, %v4967_v57 }
 0x64d   : > { %5322 = vrot.lane.b32.xlu1 %v11018_v29, %s8273_s14 }
 0x64f   : > { %5324 = vrot.lane.b32.xlu0 %v11037_v54, %s8273_s14 }
 0x651   : > { %5326 = vrot.lane.b32.xlu1 %v11049_v28, %s8273_s14 }
 0x653   : > { %5328 = vrot.lane.b32.xlu0 %v11033_v35, %s8273_s14 }
 0x655   : > { %v4969_v5 = vpop.permute.xlu0 %4968  ;;  %5330 = vrot.lane.b32.xlu1 %v11051_v47, %s8273_s14 }
 0x656   : > { %5038 = vst.msk [vmem:[#allocation4 + $0xd0] sm:$0xff] %vm880_vm2, %v4969_v5  ;;  %v8197_v5 = vld [vmem:[#allocation3 + $0x30] sm:$0xff] }
 0x657   : > { %5332 = vrot.lane.b32.xlu0 %v11093_v52, %s8273_s14  ;;  %v4971_v14 = vpop.permute.xlu1 %4970 }
 0x658   : > { %5039 = vst.msk [vmem:[#allocation4 + $0xd8] sm:$0xff] %vm880_vm2, %v4971_v14 }
 0x659   : > { %v4973_v37 = vpop.permute.xlu0 %4972  ;;  %5334 = vrot.lane.b32.xlu1 %v11105_v53, %s8273_s14 }
 0x65a   : > { %5040 = vst.msk [vmem:[#allocation4 + $0xe0] sm:$0xff] %vm880_vm2, %v4973_v37 }
 0x65b   : > { %5336 = vrot.lane.b32.xlu0 %v11089_v63, %s8273_s14  ;;  %v4975_v15 = vpop.permute.xlu1 %4974 }
 0x65c   : > { %5041 = vst.msk [vmem:[#allocation4 + $0xe8] sm:$0xff] %vm880_vm2, %v4975_v15 }
 0x65d   : > { %5338 = vrot.lane.b32.xlu1 %v11107_v62, %s8273_s14 }
 0x65f   : > { %5340 = vrot.lane.b32.xlu0 %v11149_v30, %s8273_s14 }
 0x661   : > { %5342 = vrot.lane.b32.xlu1 %v11158_v34, %s8273_s14 }
 0x663   : > { %5344 = vrot.lane.b32.xlu0 %v11145_v2, %s8273_s14 }
 0x665   : > { %v4977_v56 = vpop.permute.xlu0 %4976  ;;  %5346 = vrot.lane.b32.xlu1 %v11160_v41, %s8273_s14 }
 0x666   : > { %5042 = vst.msk [vmem:[#allocation4 + $0xf0] sm:$0xff] %vm880_vm2, %v4977_v56 }
 0x667   : > { %5348 = vrot.lane.b32.xlu0 %v11186_v22, %s8273_s14  ;;  %v4979_v59 = vpop.permute.xlu1 %4978 }
 0x668   : > { %5043 = vst.msk [vmem:[#allocation4 + $0xf8] sm:$0xff] %vm880_vm2, %v4979_v59 }
 0x669   : > { %v5109_v17 = vpop.permute.xlu0 %5108  ;;  %5350 = vrot.lane.b32.xlu1 %v11197_v16, %s8273_s14 }
 0x66a   : > { %5204 = vst.msk [vmem:[#allocation4] sm:$0xff] %vm1073_vm3, %v5109_v17 }
 0x66b   : > { %5352 = vrot.lane.b32.xlu0 %v11184_v43, %s8273_s14  ;;  %v5111_v2 = vpop.permute.xlu1 %5110  ;;  %v5266_v43 = vld [vmem:[#allocation3 + $0x207] sm:$0xff] }
 0x66c   : > { %5205 = vst.msk [vmem:[#allocation4 + $0x8] sm:$0xff] %vm1073_vm3, %v5111_v2 }
 0x66d   : > { %v5113_v41 = vpop.permute.xlu0 %5112  ;;  %5354 = vrot.lane.b32.xlu1 %v11199_v1, %s8273_s14  ;;  %v5267_v1 = vld [vmem:[#allocation3 + $0x20f] sm:$0xff] }
 0x66e   : > { %5206 = vst.msk [vmem:[#allocation4 + $0x10] sm:$0xff] %vm1073_vm3, %v5113_v41  ;;  %v6005_v41 = vld [vmem:[#allocation3 + $0x50] sm:$0xff] }
 0x66f   : > { %5356 = vrot.lane.b32.xlu0 %v11220_v60, %s8273_s14  ;;  %v5115_v22 = vpop.permute.xlu1 %5114  ;;  %v8196_v60 = vld [vmem:[#allocation3 + $0x28] sm:$0xff] }
 0x670   : > { %5207 = vst.msk [vmem:[#allocation4 + $0x18] sm:$0xff] %vm1073_vm3, %v5115_v22  ;;  %v8002_v22 = vld [vmem:[%s12573_s4 + $0x8] sm:$0xff]  }
 0x671   : > { %v5117_v16 = vpop.permute.xlu0 %5116  ;;  %5358 = vrot.lane.b32.xlu1 %v11226_v23, %s8273_s14 }
 0x672   : > { %5208 = vst.msk [vmem:[#allocation4 + $0x20] sm:$0xff] %vm1073_vm3, %v5117_v16 }
 0x673   : > { %5360 = vrot.lane.b32.xlu0 %v5266_v43, %s8273_s14  ;;  %v5119_v13 = vpop.permute.xlu1 %5118  ;;  %v6007_v43 = vld [vmem:[#allocation3 + $0x70] sm:$0xff] }
 0x674   : > { %5209 = vst.msk [vmem:[#allocation4 + $0x28] sm:$0xff] %vm1073_vm3, %v5119_v13 }
 0x675   : > { %v5121_v48 = vpop.permute.xlu0 %5120  ;;  %5362 = vrot.lane.b32.xlu1 %v5267_v1, %s8273_s14  ;;  %v8003_v1 = vld [vmem:[%s12573_s4 + $0x10] ss:$0 sps:$4 sm:$0x33]  }
 0x676   : > { %5210 = vst.msk [vmem:[#allocation4 + $0x30] sm:$0xff] %vm1073_vm3, %v5121_v48 }
 0x677   : > { %5492 = vrot.lane.b32.xlu0 %v8196_v60, %s8274_s15  ;;  %v5123_v57 = vpop.permute.xlu1 %5122  ;;  %v6505_v60 = vsel %vm2382_vm8, %v8003_v1, 0 }
 0x678   : > { %5211 = vst.msk [vmem:[#allocation4 + $0x38] sm:$0xff] %vm1073_vm3, %v5123_v57 }
 0x679   : > { %v5125_v23 = vpop.permute.xlu0 %5124  ;;  %5494 = vrot.lane.b32.xlu1 %v8197_v5, %s8274_s15 }
 0x67a   : > { %5212 = vst.msk [vmem:[#allocation4 + $0x40] sm:$0xff] %vm1073_vm3, %v5125_v23 }
 0x67b   : > { %5496 = vrot.lane.b32.xlu0 %v10916_v32, %s8274_s15  ;;  %v5127_v14 = vpop.permute.xlu1 %5126 }
 0x67c   : > { %5213 = vst.msk [vmem:[#allocation4 + $0x48] sm:$0xff] %vm1073_vm3, %v5127_v14 }
 0x67d   : > { %v5129_v37 = vpop.permute.xlu0 %5128  ;;  %5498 = vrot.lane.b32.xlu1 %v10927_v42, %s8274_s15 }
 0x67e   : > { %5214 = vst.msk [vmem:[#allocation4 + $0x50] sm:$0xff] %vm1073_vm3, %v5129_v37  ;;  %v12944_v37 = vld [vmem:[#allocation70_spill] sm:$0xff] }
 0x67f   : > { %5500 = vrot.lane.b32.xlu0 %v10939_v20, %s8274_s15  ;;  %v5131_v15 = vpop.permute.xlu1 %5130 }
 0x680   : > { %5215 = vst.msk [vmem:[#allocation4 + $0x58] sm:$0xff] %vm1073_vm3, %v5131_v15 }
 0x681   : > { %v5133_v56 = vpop.permute.xlu0 %5132  ;;  %5502 = vrot.lane.b32.xlu1 %v10955_v51, %s8274_s15 }
 0x682   : > { %5216 = vst.msk [vmem:[#allocation4 + $0x60] sm:$0xff] %vm1073_vm3, %v5133_v56 }
 0x683   : > { %5504 = vrot.lane.b32.xlu0 %v10965_v0, %s8274_s15  ;;  %v5135_v32 = vpop.permute.xlu1 %5134 }
 0x684   : > { %5217 = vst.msk [vmem:[#allocation4 + $0x68] sm:$0xff] %vm1073_vm3, %v5135_v32 }
 0x685   : > { %v5137_v42 = vpop.permute.xlu0 %5136  ;;  %5506 = vrot.lane.b32.xlu1 %v10975_v45, %s8274_s15 }
 0x686   : > { %5218 = vst.msk [vmem:[#allocation4 + $0x70] sm:$0xff] %vm1073_vm3, %v5137_v42 }
 0x687   : > { %5508 = vrot.lane.b32.xlu0 %v10993_v50, %s8274_s15  ;;  %v5139_v20 = vpop.permute.xlu1 %5138 }
 0x688   : > { %5219 = vst.msk [vmem:[#allocation4 + $0x78] sm:$0xff] %vm1073_vm3, %v5139_v20 }
 0x689   : > { %v5141_v51 = vpop.permute.xlu0 %5140  ;;  %5510 = vrot.lane.b32.xlu1 %v11010_v8, %s8274_s15 }
 0x68a   : > { %5220 = vst.msk [vmem:[#allocation4 + $0x80] sm:$0xff] %vm1073_vm3, %v5141_v51 }
 0x68b   : > { %5512 = vrot.lane.b32.xlu0 %v11021_v31, %s8274_s15  ;;  %v5143_v0 = vpop.permute.xlu1 %5142 }
 0x68c   : > { %5221 = vst.msk [vmem:[#allocation4 + $0x88] sm:$0xff] %vm1073_vm3, %v5143_v0 }
 0x68d   : > { %v5145_v45 = vpop.permute.xlu0 %5144  ;;  %5514 = vrot.lane.b32.xlu1 %v11029_v4, %s8274_s15 }
 0x68e   : > { %5222 = vst.msk [vmem:[#allocation4 + $0x90] sm:$0xff] %vm1073_vm3, %v5145_v45 }
 0x68f   : > { %5516 = vrot.lane.b32.xlu0 %v11035_v49, %s8274_s15  ;;  %v5147_v50 = vpop.permute.xlu1 %5146 }
 0x690   : > { %5223 = vst.msk [vmem:[#allocation4 + $0x98] sm:$0xff] %vm1073_vm3, %v5147_v50 }
 0x691   : > { %v5149_v8 = vpop.permute.xlu0 %5148  ;;  %5518 = vrot.lane.b32.xlu1 %v11045_v6, %s8274_s15 }
 0x692   : > { %5224 = vst.msk [vmem:[#allocation4 + $0xa0] sm:$0xff] %vm1073_vm3, %v5149_v8 }
 0x693   : > { %5520 = vrot.lane.b32.xlu0 %v11053_v58, %s8274_s15  ;;  %v5151_v31 = vpop.permute.xlu1 %5150 }
 0x694   : > { %5225 = vst.msk [vmem:[#allocation4 + $0xa8] sm:$0xff] %vm1073_vm3, %v5151_v31  ;;  %v12945_v31 = vld [vmem:[#allocation71_spill] sm:$0xff] }
 0x695   : > { %v5153_v4 = vpop.permute.xlu0 %5152  ;;  %5522 = vrot.lane.b32.xlu1 %v11063_v55, %s8274_s15 }
 0x696   : > { %5226 = vst.msk [vmem:[#allocation4 + $0xb0] sm:$0xff] %vm1073_vm3, %v5153_v4  ;;  %v12946_v4 = vld [vmem:[#allocation72_spill] sm:$0xff] }
 0x697   : > { %5524 = vrot.lane.b32.xlu0 %v11091_v46, %s8274_s15  ;;  %v5155_v49 = vpop.permute.xlu1 %5154 }
 0x698   : > { %5227 = vst.msk [vmem:[#allocation4 + $0xb8] sm:$0xff] %vm1073_vm3, %v5155_v49 }
 0x699   : > { %v5157_v6 = vpop.permute.xlu0 %5156  ;;  %5526 = vrot.lane.b32.xlu1 %v11101_v11, %s8274_s15 }
 0x69a   : > { %5228 = vst.msk [vmem:[#allocation4 + $0xc0] sm:$0xff] %vm1073_vm3, %v5157_v6 }
 0x69b   : > { %5528 = vrot.lane.b32.xlu0 %v11109_v7, %s8274_s15  ;;  %v5159_v58 = vpop.permute.xlu1 %5158 }
 0x69c   : > { %5229 = vst.msk [vmem:[#allocation4 + $0xc8] sm:$0xff] %vm1073_vm3, %v5159_v58 }
 0x69d   : > { %v5161_v55 = vpop.permute.xlu0 %5160  ;;  %5530 = vrot.lane.b32.xlu1 %v11120_v36, %s8274_s15 }
 0x69e   : > { %5230 = vst.msk [vmem:[#allocation4 + $0xd0] sm:$0xff] %vm1073_vm3, %v5161_v55  ;;  %v12947_v55 = vld [vmem:[#allocation73_spill] sm:$0xff] }
 0x69f   : > { %5532 = vrot.lane.b32.xlu0 %v11147_v19, %s8274_s15  ;;  %v5163_v46 = vpop.permute.xlu1 %5162 }
 0x6a0   : > { %5231 = vst.msk [vmem:[#allocation4 + $0xd8] sm:$0xff] %vm1073_vm3, %v5163_v46  ;;  %v12948_v46 = vld [vmem:[#allocation74_spill] sm:$0xff] }
 0x6a1   : > { %v5165_v11 = vpop.permute.xlu0 %5164  ;;  %5684 = vrot.lane.b32.xlu1 %v11232_v25, %s8275_s16 }
 0x6a2   : > { %5232 = vst.msk [vmem:[#allocation4 + $0xe0] sm:$0xff] %vm1073_vm3, %v5165_v11 }
 0x6a3   : > { %5686 = vrot.lane.b32.xlu0 %v11236_v40, %s8275_s16  ;;  %v5167_v7 = vpop.permute.xlu1 %5166 }
 0x6a4   : > { %5233 = vst.msk [vmem:[#allocation4 + $0xe8] sm:$0xff] %vm1073_vm3, %v5167_v7 }
 0x6a5   : > { %v5169_v36 = vpop.permute.xlu0 %5168  ;;  %5688 = vrot.lane.b32.xlu1 %v11240_v39, %s8275_s16 }
 0x6a6   : > { %5234 = vst.msk [vmem:[#allocation4 + $0xf0] sm:$0xff] %vm1073_vm3, %v5169_v36 }
 0x6a7   : > { %5690 = vrot.lane.b32.xlu0 %v11244_v26, %s8275_s16  ;;  %v5171_v19 = vpop.permute.xlu1 %5170 }
 0x6a8   : > { %5235 = vst.msk [vmem:[#allocation4 + $0xf8] sm:$0xff] %vm1073_vm3, %v5171_v19 }
 0x6a9   : > { %v5301_v25 = vpop.permute.xlu0 %5300  ;;  %5876 = vrot.lane.b32.xlu1 %v10887_v9, %s8276_s17  ;;  %v6004_v9 = vld [vmem:[#allocation3 + $0x48] sm:$0xff] }
 0x6aa   : > { %5396 = vst.msk [vmem:[#allocation4] sm:$0xff] %vm1266_vm4, %v5301_v25 }
 0x6ab   : > { %5878 = vrot.lane.b32.xlu0 %v10913_v27, %s8276_s17  ;;  %v5303_v40 = vpop.permute.xlu1 %5302  ;;  %v8001_v27 = vld [vmem:[%s12573_s4] sm:$0xff]  }
 0x6ac   : > { %5397 = vst.msk [vmem:[#allocation4 + $0x8] sm:$0xff] %vm1266_vm4, %v5303_v40  ;;  %7896 = vmatprep.subr.bf16.mxu0 %v8001_v27 }
 0x6ad   : > { %v5305_v59 = vpop.permute.xlu0 %5304  ;;  %5880 = vrot.lane.b32.xlu1 %v10941_v10, %s8276_s17  ;;  %7897 = vmatpush3.bf16.msra.mxu0 %v8001_v27 }
 0x6ae   : > { %5398 = vst.msk [vmem:[#allocation4 + $0x10] sm:$0xff] %vm1266_vm4, %v5305_v59  ;;  %7898 = vmatprep.subr.bf16.mxu0 %v8002_v22 }
 0x6af   : > { %5882 = vrot.lane.b32.xlu0 %v10960_v21, %s8276_s17  ;;  %v5307_v17 = vpop.permute.xlu1 %5306  ;;  %v6006_v21 = vld [vmem:[#allocation3 + $0x68] sm:$0xff] }
 0x6b0   : > { %5399 = vst.msk [vmem:[#allocation4 + $0x18] sm:$0xff] %vm1266_vm4, %v5307_v17 }
 0x6b1   : > { %v5309_v2 = vpop.permute.xlu0 %5308  ;;  %6068 = vrot.lane.b32.xlu1 %v6004_v9, %s8277_s18  ;;  %7899 = vmatpush3.bf16.msra.mxu0 %v8002_v22 }
 0x6b2   : > { %5400 = vst.msk [vmem:[#allocation4 + $0x20] sm:$0xff] %vm1266_vm4, %v5309_v2  ;;  %7943 = vmatprep.subr.msk.bf16.mxu0 %vm2382_vm8, %v8003_v1  ;;  %v12951_v1 = vld [vmem:[#allocation77_spill] sm:$0xff] }
 0x6b3   : > { %6070 = vrot.lane.b32.xlu0 %v6005_v41, %s8277_s18  ;;  %v5311_v10 = vpop.permute.xlu1 %5310 }
 0x6b4   : > { %5401 = vst.msk [vmem:[#allocation4 + $0x28] sm:$0xff] %vm1266_vm4, %v5311_v10  ;;  %v12949_v10 = vld [vmem:[#allocation75_spill] sm:$0xff] }
 0x6b5   : > { %v5313_v16 = vpop.permute.xlu0 %5312  ;;  %6072 = vrot.lane.b32.xlu1 %v6006_v21, %s8277_s18  ;;  %7901 = vmatpush3.bf16.msra.mxu0 %v6505_v60  ;;  %v12950_v21 = vld [vmem:[#allocation76_spill] sm:$0xff] }
 0x6b6   : > { %5402 = vst.msk [vmem:[#allocation4 + $0x30] sm:$0xff] %vm1266_vm4, %v5313_v16 }
 0x6b7   : > { %6074 = vrot.lane.b32.xlu0 %v6007_v43, %s8277_s18  ;;  %v5315_v13 = vpop.permute.xlu1 %5314 }
 0x6b8   : > { %5403 = vst.msk [vmem:[#allocation4 + $0x38] sm:$0xff] %vm1266_vm4, %v5315_v13 }
 0x6b9   : > { %v5317_v48 = vpop.permute.xlu0 %5316  ;;  %6260 = vrot.lane.b32.xlu1 %v11240_v39, %s8278_s24 }
 0x6ba   : > { %5404 = vst.msk [vmem:[#allocation4 + $0x40] sm:$0xff] %vm1266_vm4, %v5317_v48  ;;  %v12952_v48 = vld [vmem:[#allocation78_spill] sm:$0xff] }
 0x6bb   : > { %6262 = vrot.lane.b32.xlu0 %v11244_v26, %s8278_s24  ;;  %v5319_v57 = vpop.permute.xlu1 %5318 }
 0x6bc   : > { %5405 = vst.msk [vmem:[#allocation4 + $0x48] sm:$0xff] %vm1266_vm4, %v5319_v57 }
 0x6bd   : > { %v5321_v23 = vpop.permute.xlu0 %5320  ;;  %6264 = vrot.lane.b32.xlu1 %v11248_v38, %s8278_s24 }
 0x6be   : > { %5406 = vst.msk [vmem:[#allocation4 + $0x50] sm:$0xff] %vm1266_vm4, %v5321_v23 }
 0x6bf   : > { %6266 = vrot.lane.b32.xlu0 %v11252_v18, %s8278_s24  ;;  %v5323_v39 = vpop.permute.xlu1 %5322 }
 0x6c0   : > { %5407 = vst.msk [vmem:[#allocation4 + $0x58] sm:$0xff] %vm1266_vm4, %v5323_v39 }
 0x6c1   : > { %v5325_v5 = vpop.permute.xlu0 %5324  ;;  %5692 = vrot.lane.b32.xlu1 %v11248_v38, %s8275_s16 }
 0x6c2   : > { %5408 = vst.msk [vmem:[#allocation4 + $0x60] sm:$0xff] %vm1266_vm4, %v5325_v5 }
 0x6c3   : > { %5694 = vrot.lane.b32.xlu0 %v11252_v18, %s8275_s16  ;;  %v5327_v26 = vpop.permute.xlu1 %5326 }
 0x6c4   : > { %5409 = vst.msk [vmem:[#allocation4 + $0x68] sm:$0xff] %vm1266_vm4, %v5327_v26 }
 0x6c5   : > { %v5329_v14 = vpop.permute.xlu0 %5328  ;;  %5696 = vrot.lane.b32.xlu1 %v11256_v33, %s8275_s16 }
 0x6c6   : > { %5410 = vst.msk [vmem:[#allocation4 + $0x70] sm:$0xff] %vm1266_vm4, %v5329_v14 }
 0x6c7   : > { %5698 = vrot.lane.b32.xlu0 %v12944_v37, %s8275_s16  ;;  %v5331_v15 = vpop.permute.xlu1 %5330 }
 0x6c8   : > { %5411 = vst.msk [vmem:[#allocation4 + $0x78] sm:$0xff] %vm1266_vm4, %v5331_v15 }
 0x6c9   : > { %v5333_v38 = vpop.permute.xlu0 %5332  ;;  %5884 = vrot.lane.b32.xlu1 %v10934_v61, %s8276_s17  ;;  %v6008_v61 = vld [vmem:[#allocation3 + $0x88] sm:$0xff] }
 0x6ca   : > { %5412 = vst.msk [vmem:[#allocation4 + $0x80] sm:$0xff] %vm1266_vm4, %v5333_v38  ;;  %v6208_v38 = vld [vmem:[#allocation3 + $0x109] sm:$0xff] }
 0x6cb   : > { %5886 = vrot.lane.b32.xlu0 %v10962_v24, %s8276_s17  ;;  %v5335_v18 = vpop.permute.xlu1 %5334  ;;  %v6009_v24 = vld [vmem:[#allocation3 + $0x90] sm:$0xff] }
 0x6cc   : > { %5413 = vst.msk [vmem:[#allocation4 + $0x88] sm:$0xff] %vm1266_vm4, %v5335_v18 }
 0x6cd   : > { %v5337_v56 = vpop.permute.xlu0 %5336  ;;  %5888 = vrot.lane.b32.xlu1 %v10995_v12, %s8276_s17  ;;  %v6010_v12 = vld [vmem:[#allocation3 + $0xa8] sm:$0xff] }
 0x6ce   : > { %5414 = vst.msk [vmem:[#allocation4 + $0x90] sm:$0xff] %vm1266_vm4, %v5337_v56  ;;  %v6209_v56 = vld [vmem:[#allocation3 + $0x111] sm:$0xff] }
 0x6cf   : > { %5890 = vrot.lane.b32.xlu0 %v11016_v44, %s8276_s17  ;;  %v5339_v32 = vpop.permute.xlu1 %5338  ;;  %v6011_v44 = vld [vmem:[#allocation3 + $0xb0] sm:$0xff] }
 0x6d0   : > { %5415 = vst.msk [vmem:[#allocation4 + $0x98] sm:$0xff] %vm1266_vm4, %v5339_v32 }
 0x6d1   : > { %v5341_v42 = vpop.permute.xlu0 %5340  ;;  %6076 = vrot.lane.b32.xlu1 %v6008_v61, %s8277_s18  ;;  %v6210_v61 = vld [vmem:[#allocation3 + $0x129] sm:$0xff] }
 0x6d2   : > { %5416 = vst.msk [vmem:[#allocation4 + $0xa0] sm:$0xff] %vm1266_vm4, %v5341_v42 }
 0x6d3   : > { %6078 = vrot.lane.b32.xlu0 %v6009_v24, %s8277_s18  ;;  %v5343_v20 = vpop.permute.xlu1 %5342  ;;  %v6211_v24 = vld [vmem:[#allocation3 + $0x131] sm:$0xff] }
 0x6d4   : > { %5417 = vst.msk [vmem:[#allocation4 + $0xa8] sm:$0xff] %vm1266_vm4, %v5343_v20 }
 0x6d5   : > { %v5345_v51 = vpop.permute.xlu0 %5344  ;;  %6080 = vrot.lane.b32.xlu1 %v6010_v12, %s8277_s18 }
 0x6d6   : > { %5418 = vst.msk [vmem:[#allocation4 + $0xb0] sm:$0xff] %vm1266_vm4, %v5345_v51 }
 0x6d7   : > { %6082 = vrot.lane.b32.xlu0 %v6011_v44, %s8277_s18  ;;  %v5347_v0 = vpop.permute.xlu1 %5346  ;;  %v5638_v44 = vld [vmem:[#allocation3 + $0x149] sm:$0xff] }
 0x6d8   : > { %5419 = vst.msk [vmem:[#allocation4 + $0xb8] sm:$0xff] %vm1266_vm4, %v5347_v0 }
 0x6d9   : > { %v5349_v45 = vpop.permute.xlu0 %5348  ;;  %6268 = vrot.lane.b32.xlu1 %v11256_v33, %s8278_s24 }
 0x6da   : > { %5420 = vst.msk [vmem:[#allocation4 + $0xc0] sm:$0xff] %vm1266_vm4, %v5349_v45  ;;  %v5639_v45 = vld [vmem:[#allocation3 + $0x151] sm:$0xff] }
 0x6db   : > { %6270 = vrot.lane.b32.xlu0 %v12944_v37, %s8278_s24  ;;  %v5351_v50 = vpop.permute.xlu1 %5350 }
 0x6dc   : > { %5421 = vst.msk [vmem:[#allocation4 + $0xc8] sm:$0xff] %vm1266_vm4, %v5351_v50 }
 0x6dd   : > { %v5353_v8 = vpop.permute.xlu0 %5352  ;;  %6272 = vrot.lane.b32.xlu1 %v12945_v31, %s8278_s24 }
 0x6de   : > { %5422 = vst.msk [vmem:[#allocation4 + $0xd0] sm:$0xff] %vm1266_vm4, %v5353_v8 }
 0x6df   : > { %6274 = vrot.lane.b32.xlu0 %v12946_v4, %s8278_s24  ;;  %v5355_v49 = vpop.permute.xlu1 %5354 }
 0x6e0   : > { %5423 = vst.msk [vmem:[#allocation4 + $0xd8] sm:$0xff] %vm1266_vm4, %v5355_v49 }
 0x6e1   : > { %v5357_v33 = vpop.permute.xlu0 %5356  ;;  %5700 = vrot.lane.b32.xlu1 %v12945_v31, %s8275_s16 }
 0x6e2   : > { %5424 = vst.msk [vmem:[#allocation4 + $0xe0] sm:$0xff] %vm1266_vm4, %v5357_v33 }
 0x6e3   : > { %5702 = vrot.lane.b32.xlu0 %v12946_v4, %s8275_s16  ;;  %v5359_v6 = vpop.permute.xlu1 %5358 }
 0x6e4   : > { %5425 = vst.msk [vmem:[#allocation4 + $0xe8] sm:$0xff] %vm1266_vm4, %v5359_v6 }
 0x6e5   : > { %v5361_v58 = vpop.permute.xlu0 %5360  ;;  %5704 = vrot.lane.b32.xlu1 %v12947_v55, %s8275_s16 }
 0x6e6   : > { %5426 = vst.msk [vmem:[#allocation4 + $0xf0] sm:$0xff] %vm1266_vm4, %v5361_v58 }
 0x6e7   : > { %5706 = vrot.lane.b32.xlu0 %v12948_v46, %s8275_s16  ;;  %v5363_v11 = vpop.permute.xlu1 %5362 }
 0x6e8   : > { %5427 = vst.msk [vmem:[#allocation4 + $0xf8] sm:$0xff] %vm1266_vm4, %v5363_v11 }
 0x6e9   : > { %v5493_v7 = vpop.permute.xlu0 %5492  ;;  %5892 = vrot.lane.b32.xlu1 %v10986_v3, %s8276_s17  ;;  %v6012_v3 = vld [vmem:[#allocation3 + $0xc8] sm:$0xff] }
 0x6ea   : > { %5588 = vst.msk [vmem:[#allocation4] sm:$0xff] %vm1459_vm5, %v5493_v7 }
 0x6eb   : > { %5894 = vrot.lane.b32.xlu0 %v11018_v29, %s8276_s17  ;;  %v5495_v36 = vpop.permute.xlu1 %5494  ;;  %v6013_v29 = vld [vmem:[#allocation3 + $0xd0] sm:$0xff] }
 0x6ec   : > { %5589 = vst.msk [vmem:[#allocation4 + $0x8] sm:$0xff] %vm1459_vm5, %v5495_v36 }
 0x6ed   : > { %v5497_v19 = vpop.permute.xlu0 %5496  ;;  %5896 = vrot.lane.b32.xlu1 %v11037_v54, %s8276_s17  ;;  %v6014_v54 = vld [vmem:[#allocation3 + $0xe8] sm:$0xff] }
 0x6ee   : > { %5590 = vst.msk [vmem:[#allocation4 + $0x10] sm:$0xff] %vm1459_vm5, %v5497_v19 }
 0x6ef   : > { %5898 = vrot.lane.b32.xlu0 %v11049_v28, %s8276_s17  ;;  %v5499_v25 = vpop.permute.xlu1 %5498  ;;  %v6015_v28 = vld [vmem:[#allocation3 + $0xf0] sm:$0xff] }
 0x6f0   : > { %5591 = vst.msk [vmem:[#allocation4 + $0x18] sm:$0xff] %vm1459_vm5, %v5499_v25 }
 0x6f1   : > { %v5501_v40 = vpop.permute.xlu0 %5500  ;;  %6084 = vrot.lane.b32.xlu1 %v6012_v3, %s8277_s18 }
 0x6f2   : > { %5592 = vst.msk [vmem:[#allocation4 + $0x20] sm:$0xff] %vm1459_vm5, %v5501_v40 }
 0x6f3   : > { %6086 = vrot.lane.b32.xlu0 %v6013_v29, %s8277_s18  ;;  %v5503_v59 = vpop.permute.xlu1 %5502  ;;  %v6214_v29 = vld [vmem:[#allocation3 + $0x169] sm:$0xff] }
 0x6f4   : > { %5593 = vst.msk [vmem:[#allocation4 + $0x28] sm:$0xff] %vm1459_vm5, %v5503_v59 }
 0x6f5   : > { %v5505_v17 = vpop.permute.xlu0 %5504  ;;  %6088 = vrot.lane.b32.xlu1 %v6014_v54, %s8277_s18  ;;  %v6215_v54 = vld [vmem:[#allocation3 + $0x171] sm:$0xff] }
 0x6f6   : > { %5594 = vst.msk [vmem:[#allocation4 + $0x30] sm:$0xff] %vm1459_vm5, %v5505_v17 }
 0x6f7   : > { %6090 = vrot.lane.b32.xlu0 %v6015_v28, %s8277_s18  ;;  %v5507_v9 = vpop.permute.xlu1 %5506 }
 0x6f8   : > { %5595 = vst.msk [vmem:[#allocation4 + $0x38] sm:$0xff] %vm1459_vm5, %v5507_v9  ;;  %v5450_v9 = vld [vmem:[#allocation3 + $0x188] sm:$0xff] }
 0x6f9   : > { %v5509_v27 = vpop.permute.xlu0 %5508  ;;  %6276 = vrot.lane.b32.xlu1 %v12947_v55, %s8278_s24 }
 0x6fa   : > { %5596 = vst.msk [vmem:[#allocation4 + $0x40] sm:$0xff] %vm1459_vm5, %v5509_v27 }
 0x6fb   : > { %6278 = vrot.lane.b32.xlu0 %v12948_v46, %s8278_s24  ;;  %v5511_v2 = vpop.permute.xlu1 %5510  ;;  %v6023_v46 = vld [vmem:[#allocation3 + $0x170] sm:$0xff] }
 0x6fc   : > { %5597 = vst.msk [vmem:[#allocation4 + $0x48] sm:$0xff] %vm1459_vm5, %v5511_v2  ;;  %v5451_v2 = vld [vmem:[#allocation3 + $0x190] sm:$0xff] }
 0x6fd   : > { %v5513_v41 = vpop.permute.xlu0 %5512  ;;  %6280 = vrot.lane.b32.xlu1 %v12949_v10, %s8278_s24 }
 0x6fe   : > { %5598 = vst.msk [vmem:[#allocation4 + $0x50] sm:$0xff] %vm1459_vm5, %v5513_v41 }
 0x6ff   : > { %6282 = vrot.lane.b32.xlu0 %v12950_v21, %s8278_s24  ;;  %v5515_v22 = vpop.permute.xlu1 %5514 }
 0x700   : > { %5599 = vst.msk [vmem:[#allocation4 + $0x58] sm:$0xff] %vm1459_vm5, %v5515_v22  ;;  %v5642_v22 = vld [vmem:[#allocation3 + $0x189] sm:$0xff] }
 0x701   : > { %v5517_v16 = vpop.permute.xlu0 %5516  ;;  %5708 = vrot.lane.b32.xlu1 %v12949_v10, %s8275_s16 }
 0x702   : > { %5600 = vst.msk [vmem:[#allocation4 + $0x60] sm:$0xff] %vm1459_vm5, %v5517_v16 }
 0x703   : > { %5710 = vrot.lane.b32.xlu0 %v12950_v21, %s8275_s16  ;;  %v5519_v43 = vpop.permute.xlu1 %5518 }
 0x704   : > { %5601 = vst.msk [vmem:[#allocation4 + $0x68] sm:$0xff] %vm1459_vm5, %v5519_v43  ;;  %v5643_v43 = vld [vmem:[#allocation3 + $0x191] sm:$0xff] }
 0x705   : > { %v5521_v13 = vpop.permute.xlu0 %5520  ;;  %5712 = vrot.lane.b32.xlu1 %v12951_v1, %s8275_s16  ;;  %v5832_v1 = vld [vmem:[#allocation3 + $0x187] sm:$0xff] }
 0x706   : > { %5602 = vst.msk [vmem:[#allocation4 + $0x70] sm:$0xff] %vm1459_vm5, %v5521_v13 }
 0x707   : > { %5714 = vrot.lane.b32.xlu0 %v12952_v48, %s8275_s16  ;;  %v5523_v60 = vpop.permute.xlu1 %5522 }
 0x708   : > { %5603 = vst.msk [vmem:[#allocation4 + $0x78] sm:$0xff] %vm1459_vm5, %v5523_v60  ;;  %v5833_v60 = vld [vmem:[#allocation3 + $0x18f] sm:$0xff] }
 0x709   : > { %v5525_v57 = vpop.permute.xlu0 %5524  ;;  %5900 = vrot.lane.b32.xlu1 %v11033_v35, %s8276_s17  ;;  %v6016_v35 = vld [vmem:[#allocation3 + $0x108] sm:$0xff] }
 0x70a   : > { %5604 = vst.msk [vmem:[#allocation4 + $0x80] sm:$0xff] %vm1459_vm5, %v5525_v57 }
 0x70b   : > { %5902 = vrot.lane.b32.xlu0 %v11051_v47, %s8276_s17  ;;  %v5527_v23 = vpop.permute.xlu1 %5526  ;;  %v6017_v47 = vld [vmem:[#allocation3 + $0x110] sm:$0xff] }
 0x70c   : > { %5605 = vst.msk [vmem:[#allocation4 + $0x88] sm:$0xff] %vm1459_vm5, %v5527_v23  ;;  %v5834_v23 = vld [vmem:[#allocation3 + $0x1a7] sm:$0xff] }
 0x70d   : > { %v5529_v39 = vpop.permute.xlu0 %5528  ;;  %5904 = vrot.lane.b32.xlu1 %v11093_v52, %s8276_s17  ;;  %v6018_v52 = vld [vmem:[#allocation3 + $0x128] sm:$0xff] }
 0x70e   : > { %5606 = vst.msk [vmem:[#allocation4 + $0x90] sm:$0xff] %vm1459_vm5, %v5529_v39 }
 0x70f   : > { %5906 = vrot.lane.b32.xlu0 %v11105_v53, %s8276_s17  ;;  %v5531_v5 = vpop.permute.xlu1 %5530  ;;  %v6019_v53 = vld [vmem:[#allocation3 + $0x130] sm:$0xff] }
 0x710   : > { %5607 = vst.msk [vmem:[#allocation4 + $0x98] sm:$0xff] %vm1459_vm5, %v5531_v5  ;;  %v5835_v5 = vld [vmem:[#allocation3 + $0x1af] sm:$0xff] }
 0x711   : > { %v5533_v26 = vpop.permute.xlu0 %5532  ;;  %6092 = vrot.lane.b32.xlu1 %v6016_v35, %s8277_s18 }
 0x712   : > { %5608 = vst.msk [vmem:[#allocation4 + $0xa0] sm:$0xff] %vm1459_vm5, %v5533_v26 }
 0x713   : > { %6094 = vrot.lane.b32.xlu0 %v6017_v47, %s8277_s18  ;;  %v5685_v14 = vpop.permute.xlu1 %5684 }
 0x714   : > { %5780 = vst.msk [vmem:[#allocation4] sm:$0xff] %vm1652_vm6, %v5685_v14 }
 0x715   : > { %v5687_v37 = vpop.permute.xlu0 %5686  ;;  %6096 = vrot.lane.b32.xlu1 %v6018_v52, %s8277_s18 }
 0x716   : > { %5781 = vst.msk [vmem:[#allocation4 + $0x8] sm:$0xff] %vm1652_vm6, %v5687_v37 }
 0x717   : > { %6098 = vrot.lane.b32.xlu0 %v6019_v53, %s8277_s18  ;;  %v5689_v15 = vpop.permute.xlu1 %5688 }
 0x718   : > { %5782 = vst.msk [vmem:[#allocation4 + $0x10] sm:$0xff] %vm1652_vm6, %v5689_v15 }
 0x719   : > { %v5691_v18 = vpop.permute.xlu0 %5690  ;;  %6284 = vrot.lane.b32.xlu1 %v6208_v38, %s8278_s24  ;;  %v6026_v38 = vld [vmem:[#allocation3 + $0x1a8] sm:$0xff] }
 0x71a   : > { %5783 = vst.msk [vmem:[#allocation4 + $0x18] sm:$0xff] %vm1652_vm6, %v5691_v18 }
 0x71b   : > { %6286 = vrot.lane.b32.xlu0 %v6209_v56, %s8278_s24  ;;  %v5877_v32 = vpop.permute.xlu1 %5876 }
 0x71c   : > { %5972 = vst.msk [vmem:[#allocation4] sm:$0xff] %vm1846_vm7, %v5877_v32  ;;  %v6027_v32 = vld [vmem:[#allocation3 + $0x1b0] sm:$0xff] }
 0x71d   : > { %v5879_v42 = vpop.permute.xlu0 %5878  ;;  %6288 = vrot.lane.b32.xlu1 %v6210_v61, %s8278_s24 }
 0x71e   : > { %5973 = vst.msk [vmem:[#allocation4 + $0x8] sm:$0xff] %vm1846_vm7, %v5879_v42 }
 0x71f   : > { %6290 = vrot.lane.b32.xlu0 %v6211_v24, %s8278_s24  ;;  %v5881_v20 = vpop.permute.xlu1 %5880 }
 0x720   : > { %5974 = vst.msk [vmem:[#allocation4 + $0x10] sm:$0xff] %vm1846_vm7, %v5881_v20  ;;  %v6218_v20 = vld [vmem:[#allocation3 + $0x1a9] sm:$0xff] }
 0x721   : > { %v5883_v12 = vpop.permute.xlu0 %5882  ;;  %5716 = vrot.lane.b32.xlu1 %v6210_v61, %s8275_s16 }
 0x722   : > { %5975 = vst.msk [vmem:[#allocation4 + $0x18] sm:$0xff] %vm1846_vm7, %v5883_v12 }
 0x723   : > { %5718 = vrot.lane.b32.xlu0 %v6211_v24, %s8275_s16  ;;  %v6069_v51 = vpop.permute.xlu1 %6068 }
 0x724   : > { %6164 = vst.msk [vmem:[#allocation4] sm:$0xff] %vm2039_vm9, %v6069_v51  ;;  %v6219_v51 = vld [vmem:[#allocation3 + $0x1b1] sm:$0xff] }
 0x725   : > { %v6071_v0 = vpop.permute.xlu0 %6070  ;;  %5720 = vrot.lane.b32.xlu1 %v5638_v44, %s8275_s16 }
 0x726   : > { %6165 = vst.msk [vmem:[#allocation4 + $0x8] sm:$0xff] %vm2039_vm9, %v6071_v0 }
 0x727   : > { %5722 = vrot.lane.b32.xlu0 %v5639_v45, %s8275_s16  ;;  %v6073_v50 = vpop.permute.xlu1 %6072 }
 0x728   : > { %6166 = vst.msk [vmem:[#allocation4 + $0x10] sm:$0xff] %vm2039_vm9, %v6073_v50  ;;  %v5454_v50 = vld [vmem:[#allocation3 + $0x1c8] sm:$0xff] }
 0x729   : > { %v6075_v8 = vpop.permute.xlu0 %6074  ;;  %5908 = vrot.lane.b32.xlu1 %v11089_v63, %s8276_s17  ;;  %v6020_v63 = vld [vmem:[#allocation3 + $0x148] sm:$0xff] }
 0x72a   : > { %6167 = vst.msk [vmem:[#allocation4 + $0x18] sm:$0xff] %vm2039_vm9, %v6075_v8 }
 0x72b   : > { %5910 = vrot.lane.b32.xlu0 %v11107_v62, %s8276_s17  ;;  %v6261_v31 = vpop.permute.xlu1 %6260  ;;  %v6021_v62 = vld [vmem:[#allocation3 + $0x150] sm:$0xff] }
 0x72c   : > { %6356 = vst.msk [vmem:[#allocation4] sm:$0xff] %vm2232_vm10, %v6261_v31  ;;  %v5455_v31 = vld [vmem:[#allocation3 + $0x1d0] sm:$0xff] }
 0x72d   : > { %v6263_v4 = vpop.permute.xlu0 %6262  ;;  %5912 = vrot.lane.b32.xlu1 %v11149_v30, %s8276_s17  ;;  %v6022_v30 = vld [vmem:[#allocation3 + $0x168] sm:$0xff] }
 0x72e   : > { %6357 = vst.msk [vmem:[#allocation4 + $0x8] sm:$0xff] %vm2232_vm10, %v6263_v4 }
 0x72f   : > { %5914 = vrot.lane.b32.xlu0 %v11158_v34, %s8276_s17  ;;  %v6265_v49 = vpop.permute.xlu1 %6264 }
 0x730   : > { %6358 = vst.msk [vmem:[#allocation4 + $0x10] sm:$0xff] %vm2232_vm10, %v6265_v49 }
 0x731   : > { %v6267_v33 = vpop.permute.xlu0 %6266  ;;  %6100 = vrot.lane.b32.xlu1 %v6020_v63, %s8277_s18 }
 0x732   : > { %6359 = vst.msk [vmem:[#allocation4 + $0x18] sm:$0xff] %vm2232_vm10, %v6267_v33  ;;  %v5646_v33 = vld [vmem:[#allocation3 + $0x1c9] sm:$0xff] }
 0x733   : > { %6102 = vrot.lane.b32.xlu0 %v6021_v62, %s8277_s18  ;;  %v5693_v6 = vpop.permute.xlu1 %5692  ;;  %v6388_v34 = vld [vmem:[#allocation4] sm:$0xff] }
 0x734   : > { %5784 = vst.msk [vmem:[#allocation4 + $0x20] sm:$0xff] %vm1652_vm6, %v5693_v6  ;;  %v5647_v6 = vld [vmem:[#allocation3 + $0x1d1] sm:$0xff] }
 0x735   : > { %v5695_v58 = vpop.permute.xlu0 %5694  ;;  %6104 = vrot.lane.b32.xlu1 %v6022_v30, %s8277_s18  ;;  %v6389_v55 = vld [vmem:[#allocation4 + $0x8] sm:$0xff] }
 0x736   : > { %5785 = vst.msk [vmem:[#allocation4 + $0x28] sm:$0xff] %vm1652_vm6, %v5695_v58  ;;  %v6420_v11 = vpack.c.bf16 %v6389_v55, %v6388_v34  ;;  %v5836_v55 = vld [vmem:[#allocation3 + $0x1c7] sm:$0xff] }
 0x737   : > { %6106 = vrot.lane.b32.xlu0 %v6023_v46, %s8277_s18  ;;  %v5697_v7 = vpop.permute.xlu1 %5696  ;;  %v6390_v19 = vld [vmem:[#allocation4 + $0x10] sm:$0xff] }
 0x738   : > { %5786 = vst.msk [vmem:[#allocation4 + $0x30] sm:$0xff] %vm1652_vm6, %v5697_v7  ;;  %7902 = vmatprep.mubr.msk.bf16.mxu0 %vm2333_vm11, %v6420_v11  ;;  %v5837_v7 = vld [vmem:[#allocation3 + $0x1cf] sm:$0xff] }
 0x739   : > { %v5699_v36 = vpop.permute.xlu0 %5698  ;;  %6292 = vrot.lane.b32.xlu1 %v5638_v44, %s8278_s24  ;;  %v6391_v25 = vld [vmem:[#allocation4 + $0x18] sm:$0xff] }
 0x73a   : > { %5787 = vst.msk [vmem:[#allocation4 + $0x38] sm:$0xff] %vm1652_vm6, %v5699_v36  ;;  %v6421_v3 = vpack.c.bf16 %v6391_v25, %v6390_v19 }
 0x73b   : > { %6294 = vrot.lane.b32.xlu0 %v5639_v45, %s8278_s24  ;;  %v5885_v40 = vpop.permute.xlu1 %5884 }
 0x73c   : > { %5976 = vst.msk [vmem:[#allocation4 + $0x20] sm:$0xff] %vm1846_vm7, %v5885_v40  ;;  %7903 = vmatmul.mubr.msk.bf16.vlgmr.msra.gmra.mrb[16].mxu0 %vm2333_vm11, %v6421_v3  ;;  %v5838_v3 = vld [vmem:[#allocation3 + $0x1e7] sm:$0xff] }
 0x73d   : > { %v5887_v59 = vpop.permute.xlu0 %5886  ;;  %6296 = vrot.lane.b32.xlu1 %v6214_v29, %s8278_s24 }
 0x73e   : > { %5977 = vst.msk [vmem:[#allocation4 + $0x28] sm:$0xff] %vm1846_vm7, %v5887_v59  ;;  %v5839_v59 = vld [vmem:[#allocation3 + $0x1ef] sm:$0xff] }
 0x73f   : > { %6298 = vrot.lane.b32.xlu0 %v6215_v54, %s8278_s24  ;;  %v5889_v17 = vpop.permute.xlu1 %5888 }
 0x740   : > { %5978 = vst.msk [vmem:[#allocation4 + $0x30] sm:$0xff] %vm1846_vm7, %v5889_v17 }
 0x741   : > { %v5891_v28 = vpop.permute.xlu0 %5890  ;;  %5534 = vrot.lane.b32.xlu1 %v6023_v46, %s8274_s15 }
 0x742   : > { %5979 = vst.msk [vmem:[#allocation4 + $0x38] sm:$0xff] %vm1846_vm7, %v5891_v28 }
 0x743   : > { %5536 = vrot.lane.b32.xlu0 %v5450_v9, %s8274_s15  ;;  %v6077_v27 = vpop.permute.xlu1 %6076 }
 0x744   : > { %6168 = vst.msk [vmem:[#allocation4 + $0x20] sm:$0xff] %vm2039_vm9, %v6077_v27 }
 0x745   : > { %v6079_v41 = vpop.permute.xlu0 %6078  ;;  %5538 = vrot.lane.b32.xlu1 %v5451_v2, %s8274_s15 }
 0x746   : > { %6169 = vst.msk [vmem:[#allocation4 + $0x28] sm:$0xff] %vm2039_vm9, %v6079_v41 }
 0x747   : > { %5724 = vrot.lane.b32.xlu0 %v6214_v29, %s8275_s16  ;;  %v6081_v10 = vpop.permute.xlu1 %6080 }
 0x748   : > { %6170 = vst.msk [vmem:[#allocation4 + $0x30] sm:$0xff] %vm2039_vm9, %v6081_v10 }
 0x749   : > { %v6083_v21 = vpop.permute.xlu0 %6082  ;;  %5726 = vrot.lane.b32.xlu1 %v6215_v54, %s8275_s16 }
 0x74a   : > { %6171 = vst.msk [vmem:[#allocation4 + $0x38] sm:$0xff] %vm2039_vm9, %v6083_v21 }
 0x74b   : > { %5728 = vrot.lane.b32.xlu0 %v5642_v22, %s8275_s16  ;;  %v6269_v16 = vpop.permute.xlu1 %6268 }
 0x74c   : > { %6360 = vst.msk [vmem:[#allocation4 + $0x20] sm:$0xff] %vm2232_vm10, %v6269_v16 }
 0x74d   : > { %v6271_v13 = vpop.permute.xlu0 %6270  ;;  %5730 = vrot.lane.b32.xlu1 %v5643_v43, %s8275_s16 }
 0x74e   : > { %6361 = vst.msk [vmem:[#allocation4 + $0x28] sm:$0xff] %vm2232_vm10, %v6271_v13 }
 0x74f   : > { %5916 = vrot.lane.b32.xlu0 %v5832_v1, %s8276_s17  ;;  %v6273_v48 = vpop.permute.xlu1 %6272 }
 0x750   : > { %6362 = vst.msk [vmem:[#allocation4 + $0x30] sm:$0xff] %vm2232_vm10, %v6273_v48 }
 0x751   : > { %v6275_v57 = vpop.permute.xlu0 %6274  ;;  %5918 = vrot.lane.b32.xlu1 %v5833_v60, %s8276_s17  ;;  %v5458_v60 = vld [vmem:[#allocation3 + $0x208] sm:$0xff] }
 0x752   : > { %6363 = vst.msk [vmem:[#allocation4 + $0x38] sm:$0xff] %vm2232_vm10, %v6275_v57 }
 0x753   : > { %5920 = vrot.lane.b32.xlu0 %v5834_v23, %s8276_s17  ;;  %v5701_v39 = vpop.permute.xlu1 %5700  ;;  %v6392_v26 = vld [vmem:[#allocation4 + $0x20] sm:$0xff]  ;;  %v5459_v23 = vld [vmem:[#allocation3 + $0x210] sm:$0xff] }
 0x754   : > { %5788 = vst.msk [vmem:[#allocation4 + $0x40] sm:$0xff] %vm1652_vm6, %v5701_v39 }
 0x755   : > { %v5703_v35 = vpop.permute.xlu0 %5702  ;;  %5922 = vrot.lane.b32.xlu1 %v5835_v5, %s8276_s17  ;;  %v6393_v47 = vld [vmem:[#allocation4 + $0x28] sm:$0xff] }
 0x756   : > { %5789 = vst.msk [vmem:[#allocation4 + $0x48] sm:$0xff] %vm1652_vm6, %v5703_v35  ;;  %v6422_v14 = vpack.c.bf16 %v6393_v47, %v6392_v26 }
 0x757   : > { %6108 = vrot.lane.b32.xlu0 %v5450_v9, %s8277_s18  ;;  %v5705_v52 = vpop.permute.xlu1 %5704  ;;  %v6394_v53 = vld [vmem:[#allocation4 + $0x30] sm:$0xff]  ;;  %v6030_v9 = vld [vmem:[#allocation3 + $0x1e8] sm:$0xff] }
 0x758   : > { %5790 = vst.msk [vmem:[#allocation4 + $0x50] sm:$0xff] %vm1652_vm6, %v5705_v52  ;;  %7906 = vmatprep.mubr.msk.bf16.mxu0 %vm2333_vm11, %v6422_v14 }
 0x759   : > { %v5707_v37 = vpop.permute.xlu0 %5706  ;;  %6110 = vrot.lane.b32.xlu1 %v5451_v2, %s8277_s18  ;;  %v6395_v15 = vld [vmem:[#allocation4 + $0x38] sm:$0xff]  ;;  %v6031_v2 = vld [vmem:[#allocation3 + $0x1f0] sm:$0xff] }
 0x75a   : > { %5791 = vst.msk [vmem:[#allocation4 + $0x58] sm:$0xff] %vm1652_vm6, %v5707_v37  ;;  %v6423_v18 = vpack.c.bf16 %v6395_v15, %v6394_v53  ;;  %v5650_v53 = vld [vmem:[#allocation3 + $0x209] sm:$0xff] }
 0x75b   : > { %6112 = vrot.lane.b32.xlu0 %v6026_v38, %s8277_s18  ;;  %v5893_v56 = vpop.permute.xlu1 %5892 }
 0x75c   : > { %5980 = vst.msk [vmem:[#allocation4 + $0x40] sm:$0xff] %vm1846_vm7, %v5893_v56  ;;  %7907 = vmatmul.mubr.msk.bf16.gmra.mrb[20].mxu0 %vm2333_vm11, %v6423_v18  ;;  %v5651_v18 = vld [vmem:[#allocation3 + $0x211] sm:$0xff] }
 0x75d   : > { %v5895_v61 = vpop.permute.xlu0 %5894  ;;  %6114 = vrot.lane.b32.xlu1 %v6027_v32, %s8277_s18 }
 0x75e   : > { %5981 = vst.msk [vmem:[#allocation4 + $0x48] sm:$0xff] %vm1846_vm7, %v5895_v61 }
 0x75f   : > { %6300 = vrot.lane.b32.xlu0 %v5642_v22, %s8278_s24  ;;  %v5897_v42 = vpop.permute.xlu1 %5896  ;;  %v6222_v22 = vld [vmem:[#allocation3 + $0x1e9] sm:$0xff] }
 0x760   : > { %5982 = vst.msk [vmem:[#allocation4 + $0x50] sm:$0xff] %vm1846_vm7, %v5897_v42  ;;  %v5841_v42 = vld [vmem:[#allocation3 + $0x20f] sm:$0xff] }
 0x761   : > { %v5899_v24 = vpop.permute.xlu0 %5898  ;;  %6302 = vrot.lane.b32.xlu1 %v5643_v43, %s8278_s24  ;;  %v6223_v43 = vld [vmem:[#allocation3 + $0x1f1] sm:$0xff] }
 0x762   : > { %5983 = vst.msk [vmem:[#allocation4 + $0x58] sm:$0xff] %vm1846_vm7, %v5899_v24  ;;  %v5842_v24 = vld [vmem:[#allocation3 + $0x227] sm:$0xff] }
 0x763   : > { %6304 = vrot.lane.b32.xlu0 %v6218_v20, %s8278_s24  ;;  %v6085_v12 = vpop.permute.xlu1 %6084 }
 0x764   : > { %6172 = vst.msk [vmem:[#allocation4 + $0x40] sm:$0xff] %vm2039_vm9, %v6085_v12  ;;  %v5843_v12 = vld [vmem:[#allocation3 + $0x22f] sm:$0xff] }
 0x765   : > { %v6087_v44 = vpop.permute.xlu0 %6086  ;;  %6306 = vrot.lane.b32.xlu1 %v6219_v51, %s8278_s24 }
 0x766   : > { %6173 = vst.msk [vmem:[#allocation4 + $0x48] sm:$0xff] %vm2039_vm9, %v6087_v44 }
 0x767   : > { %5540 = vrot.lane.b32.xlu0 %v6026_v38, %s8274_s15  ;;  %v6089_v0 = vpop.permute.xlu1 %6088 }
 0x768   : > { %6174 = vst.msk [vmem:[#allocation4 + $0x50] sm:$0xff] %vm2039_vm9, %v6089_v0 }
 0x769   : > { %v6091_v45 = vpop.permute.xlu0 %6090  ;;  %5542 = vrot.lane.b32.xlu1 %v6027_v32, %s8274_s15  ;;  %v5840_v32 = vld [vmem:[#allocation3 + $0x207] sm:$0xff] }
 0x76a   : > { %6175 = vst.msk [vmem:[#allocation4 + $0x58] sm:$0xff] %vm2039_vm9, %v6091_v45  ;;  %v6034_v45 = vld [vmem:[#allocation3 + $0x228] sm:$0xff] }
 0x76b   : > { %5544 = vrot.lane.b32.xlu0 %v5454_v50, %s8274_s15  ;;  %v6277_v8 = vpop.permute.xlu1 %6276 }
 0x76c   : > { %6364 = vst.msk [vmem:[#allocation4 + $0x40] sm:$0xff] %vm2232_vm10, %v6277_v8  ;;  %v6035_v8 = vld [vmem:[#allocation3 + $0x230] sm:$0xff] }
 0x76d   : > { %v6279_v4 = vpop.permute.xlu0 %6278  ;;  %5546 = vrot.lane.b32.xlu1 %v5455_v31, %s8274_s15 }
 0x76e   : > { %6365 = vst.msk [vmem:[#allocation4 + $0x48] sm:$0xff] %vm2232_vm10, %v6279_v4 }
 0x76f   : > { %5732 = vrot.lane.b32.xlu0 %v6218_v20, %s8275_s16  ;;  %v6281_v49 = vpop.permute.xlu1 %6280 }
 0x770   : > { %6366 = vst.msk [vmem:[#allocation4 + $0x50] sm:$0xff] %vm2232_vm10, %v6281_v49 }
 0x771   : > { %v6283_v63 = vpop.permute.xlu0 %6282  ;;  %5734 = vrot.lane.b32.xlu1 %v6219_v51, %s8275_s16 }
 0x772   : > { %6367 = vst.msk [vmem:[#allocation4 + $0x58] sm:$0xff] %vm2232_vm10, %v6283_v63  ;;  %v6226_v63 = vld [vmem:[#allocation3 + $0x229] sm:$0xff] }
 0x773   : > { %5736 = vrot.lane.b32.xlu0 %v5646_v33, %s8275_s16  ;;  %v5709_v62 = vpop.permute.xlu1 %5708  ;;  %v6396_v58 = vld [vmem:[#allocation4 + $0x40] sm:$0xff] }
 0x774   : > { %5792 = vst.msk [vmem:[#allocation4 + $0x60] sm:$0xff] %vm1652_vm6, %v5709_v62  ;;  %v6227_v62 = vld [vmem:[#allocation3 + $0x231] sm:$0xff] }
 0x775   : > { %v5711_v30 = vpop.permute.xlu0 %5710  ;;  %5738 = vrot.lane.b32.xlu1 %v5647_v6, %s8275_s16  ;;  %v6397_v34 = vld [vmem:[#allocation4 + $0x48] sm:$0xff] }
 0x776   : > { %5793 = vst.msk [vmem:[#allocation4 + $0x68] sm:$0xff] %vm1652_vm6, %v5711_v30  ;;  %v6424_v46 = vpack.c.bf16 %v6397_v34, %v6396_v58 }
 0x777   : > { %5924 = vrot.lane.b32.xlu0 %v5836_v55, %s8276_s17  ;;  %v5713_v11 = vpop.permute.xlu1 %5712  ;;  %v6398_v19 = vld [vmem:[#allocation4 + $0x50] sm:$0xff] }
 0x778   : > { %5794 = vst.msk [vmem:[#allocation4 + $0x70] sm:$0xff] %vm1652_vm6, %v5713_v11  ;;  %7910 = vmatprep.mubr.msk.bf16.mxu0 %vm2333_vm11, %v6424_v46 }
 0x779   : > { %v5715_v36 = vpop.permute.xlu0 %5714  ;;  %5926 = vrot.lane.b32.xlu1 %v5837_v7, %s8276_s17  ;;  %v6399_v25 = vld [vmem:[#allocation4 + $0x58] sm:$0xff] }
 0x77a   : > { %5795 = vst.msk [vmem:[#allocation4 + $0x78] sm:$0xff] %vm1652_vm6, %v5715_v36  ;;  %v6425_v40 = vpack.c.bf16 %v6399_v25, %v6398_v19 }
 0x77b   : > { %5928 = vrot.lane.b32.xlu0 %v5838_v3, %s8276_s17  ;;  %v5901_v29 = vpop.permute.xlu1 %5900 }
 0x77c   : > { %5984 = vst.msk [vmem:[#allocation4 + $0x60] sm:$0xff] %vm1846_vm7, %v5901_v29  ;;  %7911 = vmatmul.mubr.msk.bf16.gmra.mrb[24].mxu0 %vm2333_vm11, %v6425_v40 }
 0x77d   : > { %v5903_v54 = vpop.permute.xlu0 %5902  ;;  %5930 = vrot.lane.b32.xlu1 %v5839_v59, %s8276_s17 }
 0x77e   : > { %5985 = vst.msk [vmem:[#allocation4 + $0x68] sm:$0xff] %vm1846_vm7, %v5903_v54 }
 0x77f   : > { %6116 = vrot.lane.b32.xlu0 %v5454_v50, %s8277_s18  ;;  %v5905_v17 = vpop.permute.xlu1 %5904 }
 0x780   : > { %5986 = vst.msk [vmem:[#allocation4 + $0x70] sm:$0xff] %vm1846_vm7, %v5905_v17 }
 0x781   : > { %v5907_v28 = vpop.permute.xlu0 %5906  ;;  %6118 = vrot.lane.b32.xlu1 %v5455_v31, %s8277_s18 }
 0x782   : > { %5987 = vst.msk [vmem:[#allocation4 + $0x78] sm:$0xff] %vm1846_vm7, %v5907_v28 }
 0x783   : > { %6120 = vrot.lane.b32.xlu0 %v6030_v9, %s8277_s18  ;;  %v6093_v27 = vpop.permute.xlu1 %6092 }
 0x784   : > { %6176 = vst.msk [vmem:[#allocation4 + $0x60] sm:$0xff] %vm2039_vm9, %v6093_v27 }
 0x785   : > { %v6095_v41 = vpop.permute.xlu0 %6094  ;;  %6122 = vrot.lane.b32.xlu1 %v6031_v2, %s8277_s18 }
 0x786   : > { %6177 = vst.msk [vmem:[#allocation4 + $0x68] sm:$0xff] %vm2039_vm9, %v6095_v41 }
 0x787   : > { %6308 = vrot.lane.b32.xlu0 %v5646_v33, %s8278_s24  ;;  %v6097_v10 = vpop.permute.xlu1 %6096 }
 0x788   : > { %6178 = vst.msk [vmem:[#allocation4 + $0x70] sm:$0xff] %vm2039_vm9, %v6097_v10 }
 0x789   : > { %v6099_v21 = vpop.permute.xlu0 %6098  ;;  %6310 = vrot.lane.b32.xlu1 %v5647_v6, %s8278_s24 }
 0x78a   : > { %6179 = vst.msk [vmem:[#allocation4 + $0x78] sm:$0xff] %vm2039_vm9, %v6099_v21 }
 0x78b   : > { %6312 = vrot.lane.b32.xlu0 %v6222_v22, %s8278_s24  ;;  %v6285_v16 = vpop.permute.xlu1 %6284 }
 0x78c   : > { %6368 = vst.msk [vmem:[#allocation4 + $0x60] sm:$0xff] %vm2232_vm10, %v6285_v16 }
 0x78d   : > { %v6287_v13 = vpop.permute.xlu0 %6286  ;;  %6314 = vrot.lane.b32.xlu1 %v6223_v43, %s8278_s24 }
 0x78e   : > { %6369 = vst.msk [vmem:[#allocation4 + $0x68] sm:$0xff] %vm2232_vm10, %v6287_v13 }
 0x78f   : > { %5548 = vrot.lane.b32.xlu0 %v6030_v9, %s8274_s15  ;;  %v6289_v1 = vpop.permute.xlu1 %6288 }
 0x790   : > { %6370 = vst.msk [vmem:[#allocation4 + $0x70] sm:$0xff] %vm2232_vm10, %v6289_v1 }
 0x791   : > { %v6291_v48 = vpop.permute.xlu0 %6290  ;;  %5550 = vrot.lane.b32.xlu1 %v6031_v2, %s8274_s15 }
 0x792   : > { %6371 = vst.msk [vmem:[#allocation4 + $0x78] sm:$0xff] %vm2232_vm10, %v6291_v48 }
 0x793   : > { %5552 = vrot.lane.b32.xlu0 %v5458_v60, %s8274_s15  ;;  %v5717_v57 = vpop.permute.xlu1 %5716  ;;  %v6400_v5 = vld [vmem:[#allocation4 + $0x60] sm:$0xff] }
 0x794   : > { %5796 = vst.msk [vmem:[#allocation4 + $0x80] sm:$0xff] %vm1652_vm6, %v5717_v57 }
 0x795   : > { %v5719_v39 = vpop.permute.xlu0 %5718  ;;  %5554 = vrot.lane.b32.xlu1 %v5459_v23, %s8274_s15  ;;  %v6401_v35 = vld [vmem:[#allocation4 + $0x68] sm:$0xff] }
 0x796   : > { %5797 = vst.msk [vmem:[#allocation4 + $0x88] sm:$0xff] %vm1652_vm6, %v5719_v39  ;;  %v6426_v26 = vpack.c.bf16 %v6401_v35, %v6400_v5 }
 0x797   : > { %5740 = vrot.lane.b32.xlu0 %v6222_v22, %s8275_s16  ;;  %v5721_v47 = vpop.permute.xlu1 %5720  ;;  %v6402_v52 = vld [vmem:[#allocation4 + $0x70] sm:$0xff] }
 0x798   : > { %5798 = vst.msk [vmem:[#allocation4 + $0x90] sm:$0xff] %vm1652_vm6, %v5721_v47  ;;  %7914 = vmatprep.mubr.msk.bf16.mxu0 %vm2333_vm11, %v6426_v26 }
 0x799   : > { %v5723_v14 = vpop.permute.xlu0 %5722  ;;  %5742 = vrot.lane.b32.xlu1 %v6223_v43, %s8275_s16  ;;  %v6403_v37 = vld [vmem:[#allocation4 + $0x78] sm:$0xff] }
 0x79a   : > { %5799 = vst.msk [vmem:[#allocation4 + $0x98] sm:$0xff] %vm1652_vm6, %v5723_v14  ;;  %v6427_v15 = vpack.c.bf16 %v6403_v37, %v6402_v52 }
 0x79b   : > { %5744 = vrot.lane.b32.xlu0 %v5650_v53, %s8275_s16  ;;  %v5909_v38 = vpop.permute.xlu1 %5908 }
 0x79c   : > { %5988 = vst.msk [vmem:[#allocation4 + $0x80] sm:$0xff] %vm1846_vm7, %v5909_v38  ;;  %7915 = vmatmul.mubr.msk.bf16.gmra.mrb[28].mxu0 %vm2333_vm11, %v6427_v15 }
 0x79d   : > { %v5911_v56 = vpop.permute.xlu0 %5910  ;;  %5746 = vrot.lane.b32.xlu1 %v5651_v18, %s8275_s16 }
 0x79e   : > { %5989 = vst.msk [vmem:[#allocation4 + $0x88] sm:$0xff] %vm1846_vm7, %v5911_v56 }
 0x79f   : > { %5932 = vrot.lane.b32.xlu0 %v5840_v32, %s8276_s17  ;;  %v5913_v61 = vpop.permute.xlu1 %5912 }
 0x7a0   : > { %5990 = vst.msk [vmem:[#allocation4 + $0x90] sm:$0xff] %vm1846_vm7, %v5913_v61 }
 0x7a1   : > { %v5915_v20 = vpop.permute.xlu0 %5914  ;;  %5934 = vrot.lane.b32.xlu1 %v5841_v42, %s8276_s17 }
 0x7a2   : > { %5991 = vst.msk [vmem:[#allocation4 + $0x98] sm:$0xff] %vm1846_vm7, %v5915_v20 }
 0x7a3   : > { %5936 = vrot.lane.b32.xlu0 %v5842_v24, %s8276_s17  ;;  %v6101_v51 = vpop.permute.xlu1 %6100 }
 0x7a4   : > { %6180 = vst.msk [vmem:[#allocation4 + $0x80] sm:$0xff] %vm2039_vm9, %v6101_v51 }
 0x7a5   : > { %v6103_v44 = vpop.permute.xlu0 %6102  ;;  %5938 = vrot.lane.b32.xlu1 %v5843_v12, %s8276_s17 }
 0x7a6   : > { %6181 = vst.msk [vmem:[#allocation4 + $0x88] sm:$0xff] %vm2039_vm9, %v6103_v44 }
 0x7a7   : > { %6124 = vrot.lane.b32.xlu0 %v5458_v60, %s8277_s18  ;;  %v6105_v0 = vpop.permute.xlu1 %6104 }
 0x7a8   : > { %6182 = vst.msk [vmem:[#allocation4 + $0x90] sm:$0xff] %vm2039_vm9, %v6105_v0 }
 0x7a9   : > { %v6107_v50 = vpop.permute.xlu0 %6106  ;;  %6126 = vrot.lane.b32.xlu1 %v5459_v23, %s8277_s18 }
 0x7aa   : > { %6183 = vst.msk [vmem:[#allocation4 + $0x98] sm:$0xff] %vm2039_vm9, %v6107_v50 }
 0x7ab   : > { %6128 = vrot.lane.b32.xlu0 %v6034_v45, %s8277_s18  ;;  %v6293_v31 = vpop.permute.xlu1 %6292 }
 0x7ac   : > { %6372 = vst.msk [vmem:[#allocation4 + $0x80] sm:$0xff] %vm2232_vm10, %v6293_v31 }
 0x7ad   : > { %v6295_v4 = vpop.permute.xlu0 %6294  ;;  %6130 = vrot.lane.b32.xlu1 %v6035_v8, %s8277_s18 }
 0x7ae   : > { %6373 = vst.msk [vmem:[#allocation4 + $0x88] sm:$0xff] %vm2232_vm10, %v6295_v4 }
 0x7af   : > { %6316 = vrot.lane.b32.xlu0 %v5650_v53, %s8278_s24  ;;  %v6297_v49 = vpop.permute.xlu1 %6296 }
 0x7b0   : > { %6374 = vst.msk [vmem:[#allocation4 + $0x90] sm:$0xff] %vm2232_vm10, %v6297_v49 }
 0x7b1   : > { %v6299_v33 = vpop.permute.xlu0 %6298  ;;  %6318 = vrot.lane.b32.xlu1 %v5651_v18, %s8278_s24 }
 0x7b2   : > { %6375 = vst.msk [vmem:[#allocation4 + $0x98] sm:$0xff] %vm2232_vm10, %v6299_v33 }
 0x7b3   : > { %v5535_v6 = vpop.permute.xlu1 %5534  ;;  %6320 = vrot.lane.b32.xlu0 %v6226_v63, %s8278_s24  ;;  %v6404_v58 = vld [vmem:[#allocation4 + $0x80] sm:$0xff] }
 0x7b4   : > { %5609 = vst.msk [vmem:[#allocation4 + $0xa8] sm:$0xff] %vm1459_vm5, %v5535_v6 }
 0x7b5   : > { %v5537_v30 = vpop.permute.xlu0 %5536  ;;  %6322 = vrot.lane.b32.xlu1 %v6227_v62, %s8278_s24  ;;  %v6405_v34 = vld [vmem:[#allocation4 + $0x88] sm:$0xff] }
 0x7b6   : > { %5610 = vst.msk [vmem:[#allocation4 + $0xb0] sm:$0xff] %vm1459_vm5, %v5537_v30  ;;  %v6428_v55 = vpack.c.bf16 %v6405_v34, %v6404_v58 }
 0x7b7   : > { %v5539_v46 = vpop.permute.xlu1 %5538  ;;  %v6406_v7 = vld [vmem:[#allocation4 + $0x90] sm:$0xff] }
 0x7b8   : > { %5611 = vst.msk [vmem:[#allocation4 + $0xb8] sm:$0xff] %vm1459_vm5, %v5539_v46  ;;  %7918 = vmatprep.mubr.msk.bf16.mxu0 %vm2333_vm11, %v6428_v55 }
 0x7b9   : > { %v5725_v11 = vpop.permute.xlu0 %5724  ;;  %v6407_v36 = vld [vmem:[#allocation4 + $0x98] sm:$0xff] }
 0x7ba   : > { %5800 = vst.msk [vmem:[#allocation4 + $0xa0] sm:$0xff] %vm1652_vm6, %v5725_v11  ;;  %v6429_v19 = vpack.c.bf16 %v6407_v36, %v6406_v7 }
 0x7bb   : > { %v5727_v25 = vpop.permute.xlu1 %5726 }
 0x7bc   : > { %5801 = vst.msk [vmem:[#allocation4 + $0xa8] sm:$0xff] %vm1652_vm6, %v5727_v25  ;;  %7919 = vmatmul.mubr.msk.bf16.gmra.mrb[32].mxu0 %vm2333_vm11, %v6429_v19 }
 0x7bd   : > { %v5729_v3 = vpop.permute.xlu0 %5728 }
 0x7be   : > { %5802 = vst.msk [vmem:[#allocation4 + $0xb0] sm:$0xff] %vm1652_vm6, %v5729_v3 }
 0x7bf   : > { %v5731_v40 = vpop.permute.xlu1 %5730 }
 0x7c0   : > { %5803 = vst.msk [vmem:[#allocation4 + $0xb8] sm:$0xff] %vm1652_vm6, %v5731_v40 }
 0x7c1   : > { %v5917_v29 = vpop.permute.xlu0 %5916 }
 0x7c2   : > { %5992 = vst.msk [vmem:[#allocation4 + $0xa0] sm:$0xff] %vm1846_vm7, %v5917_v29 }
 0x7c3   : > { %v5919_v59 = vpop.permute.xlu1 %5918 }
 0x7c4   : > { %5993 = vst.msk [vmem:[#allocation4 + $0xa8] sm:$0xff] %vm1846_vm7, %v5919_v59 }
 0x7c5   : > { %v5921_v54 = vpop.permute.xlu0 %5920 }
 0x7c6   : > { %5994 = vst.msk [vmem:[#allocation4 + $0xb0] sm:$0xff] %vm1846_vm7, %v5921_v54 }
 0x7c7   : > { %v5923_v17 = vpop.permute.xlu1 %5922 }
 0x7c8   : > { %5995 = vst.msk [vmem:[#allocation4 + $0xb8] sm:$0xff] %vm1846_vm7, %v5923_v17 }
 0x7c9   : > { %v6109_v28 = vpop.permute.xlu0 %6108 }
 0x7ca   : > { %6184 = vst.msk [vmem:[#allocation4 + $0xa0] sm:$0xff] %vm2039_vm9, %v6109_v28 }
 0x7cb   : > { %v6111_v9 = vpop.permute.xlu1 %6110 }
 0x7cc   : > { %6185 = vst.msk [vmem:[#allocation4 + $0xa8] sm:$0xff] %vm2039_vm9, %v6111_v9 }
 0x7cd   : > { %v6113_v27 = vpop.permute.xlu0 %6112 }
 0x7ce   : > { %6186 = vst.msk [vmem:[#allocation4 + $0xb0] sm:$0xff] %vm2039_vm9, %v6113_v27 }
 0x7cf   : > { %v6115_v2 = vpop.permute.xlu1 %6114 }
 0x7d0   : > { %6187 = vst.msk [vmem:[#allocation4 + $0xb8] sm:$0xff] %vm2039_vm9, %v6115_v2 }
 0x7d1   : > { %v6301_v41 = vpop.permute.xlu0 %6300 }
 0x7d2   : > { %6376 = vst.msk [vmem:[#allocation4 + $0xa0] sm:$0xff] %vm2232_vm10, %v6301_v41 }
 0x7d3   : > { %v6303_v10 = vpop.permute.xlu1 %6302 }
 0x7d4   : > { %6377 = vst.msk [vmem:[#allocation4 + $0xa8] sm:$0xff] %vm2232_vm10, %v6303_v10 }
 0x7d5   : > { %v6305_v21 = vpop.permute.xlu0 %6304 }
 0x7d6   : > { %6378 = vst.msk [vmem:[#allocation4 + $0xb0] sm:$0xff] %vm2232_vm10, %v6305_v21 }
 0x7d7   : > { %v6307_v22 = vpop.permute.xlu1 %6306 }
 0x7d8   : > { %6379 = vst.msk [vmem:[#allocation4 + $0xb8] sm:$0xff] %vm2232_vm10, %v6307_v22 }
 0x7d9   : > { %v5541_v16 = vpop.permute.xlu0 %5540  ;;  %v6408_v13 = vld [vmem:[#allocation4 + $0xa0] sm:$0xff] }
 0x7da   : > { %5612 = vst.msk [vmem:[#allocation4 + $0xc0] sm:$0xff] %vm1459_vm5, %v5541_v16 }
 0x7db   : > { %v5543_v43 = vpop.permute.xlu1 %5542  ;;  %v6409_v1 = vld [vmem:[#allocation4 + $0xa8] sm:$0xff] }
 0x7dc   : > { %5613 = vst.msk [vmem:[#allocation4 + $0xc8] sm:$0xff] %vm1459_vm5, %v5543_v43  ;;  %v6430_v48 = vpack.c.bf16 %v6409_v1, %v6408_v13 }
 0x7dd   : > { %v5545_v60 = vpop.permute.xlu0 %5544  ;;  %v6410_v23 = vld [vmem:[#allocation4 + $0xb0] sm:$0xff] }
 0x7de   : > { %5614 = vst.msk [vmem:[#allocation4 + $0xd0] sm:$0xff] %vm1459_vm5, %v5545_v60  ;;  %7922 = vmatprep.mubr.msk.bf16.mxu0 %vm2333_vm11, %v6430_v48 }
 0x7df   : > { %v5547_v57 = vpop.permute.xlu1 %5546  ;;  %v6411_v39 = vld [vmem:[#allocation4 + $0xb8] sm:$0xff] }
 0x7e0   : > { %5615 = vst.msk [vmem:[#allocation4 + $0xd8] sm:$0xff] %vm1459_vm5, %v5547_v57  ;;  %v6431_v5 = vpack.c.bf16 %v6411_v39, %v6410_v23 }
 0x7e1   : > { %v5733_v35 = vpop.permute.xlu0 %5732 }
 0x7e2   : > { %5804 = vst.msk [vmem:[#allocation4 + $0xc0] sm:$0xff] %vm1652_vm6, %v5733_v35  ;;  %7923 = vmatmul.mubr.msk.bf16.gmra.mrb[36].mxu0 %vm2333_vm11, %v6431_v5 }
 0x7e3   : > { %v5735_v26 = vpop.permute.xlu1 %5734 }
 0x7e4   : > { %5805 = vst.msk [vmem:[#allocation4 + $0xc8] sm:$0xff] %vm1652_vm6, %v5735_v26 }
 0x7e5   : > { %v5737_v47 = vpop.permute.xlu0 %5736 }
 0x7e6   : > { %5806 = vst.msk [vmem:[#allocation4 + $0xd0] sm:$0xff] %vm1652_vm6, %v5737_v47 }
 0x7e7   : > { %v5739_v14 = vpop.permute.xlu1 %5738 }
 0x7e8   : > { %5807 = vst.msk [vmem:[#allocation4 + $0xd8] sm:$0xff] %vm1652_vm6, %v5739_v14 }
 0x7e9   : > { %v5925_v52 = vpop.permute.xlu0 %5924 }
 0x7ea   : > { %5996 = vst.msk [vmem:[#allocation4 + $0xc0] sm:$0xff] %vm1846_vm7, %v5925_v52 }
 0x7eb   : > { %v5927_v37 = vpop.permute.xlu1 %5926 }
 0x7ec   : > { %5997 = vst.msk [vmem:[#allocation4 + $0xc8] sm:$0xff] %vm1846_vm7, %v5927_v37 }
 0x7ed   : > { %v5929_v53 = vpop.permute.xlu0 %5928 }
 0x7ee   : > { %5998 = vst.msk [vmem:[#allocation4 + $0xd0] sm:$0xff] %vm1846_vm7, %v5929_v53 }
 0x7ef   : > { %v5931_v15 = vpop.permute.xlu1 %5930 }
 0x7f0   : > { %5999 = vst.msk [vmem:[#allocation4 + $0xd8] sm:$0xff] %vm1846_vm7, %v5931_v15 }
 0x7f1   : > { %v6117_v38 = vpop.permute.xlu0 %6116 }
 0x7f2   : > { %6188 = vst.msk [vmem:[#allocation4 + $0xc0] sm:$0xff] %vm2039_vm9, %v6117_v38 }
 0x7f3   : > { %v6119_v18 = vpop.permute.xlu1 %6118 }
 0x7f4   : > { %6189 = vst.msk [vmem:[#allocation4 + $0xc8] sm:$0xff] %vm2039_vm9, %v6119_v18 }
 0x7f5   : > { %v6121_v56 = vpop.permute.xlu0 %6120 }
 0x7f6   : > { %6190 = vst.msk [vmem:[#allocation4 + $0xd0] sm:$0xff] %vm2039_vm9, %v6121_v56 }
 0x7f7   : > { %v6123_v32 = vpop.permute.xlu1 %6122 }
 0x7f8   : > { %6191 = vst.msk [vmem:[#allocation4 + $0xd8] sm:$0xff] %vm2039_vm9, %v6123_v32 }
 0x7f9   : > { %v6309_v61 = vpop.permute.xlu0 %6308 }
 0x7fa   : > { %6380 = vst.msk [vmem:[#allocation4 + $0xc0] sm:$0xff] %vm2232_vm10, %v6309_v61 }
 0x7fb   : > { %v6311_v42 = vpop.permute.xlu1 %6310 }
 0x7fc   : > { %6381 = vst.msk [vmem:[#allocation4 + $0xc8] sm:$0xff] %vm2232_vm10, %v6311_v42 }
 0x7fd   : > { %v6313_v24 = vpop.permute.xlu0 %6312 }
 0x7fe   : > { %6382 = vst.msk [vmem:[#allocation4 + $0xd0] sm:$0xff] %vm2232_vm10, %v6313_v24 }
 0x7ff   : > { %v6315_v20 = vpop.permute.xlu1 %6314 }
 0x800   : > { %6383 = vst.msk [vmem:[#allocation4 + $0xd8] sm:$0xff] %vm2232_vm10, %v6315_v20 }
 0x801   : > { %v5549_v12 = vpop.permute.xlu0 %5548  ;;  %v6412_v44 = vld [vmem:[#allocation4 + $0xc0] sm:$0xff] }
 0x802   : > { %5616 = vst.msk [vmem:[#allocation4 + $0xe0] sm:$0xff] %vm1459_vm5, %v5549_v12  ;;  %v7757_v12 = vld [vmem:[%s12575_s6] ss:$0 sm:$0xff] }
 0x803   : > { %v5551_v51 = vpop.permute.xlu1 %5550  ;;  %v6413_v0 = vld [vmem:[#allocation4 + $0xc8] sm:$0xff] }
 0x804   : > { %5617 = vst.msk [vmem:[#allocation4 + $0xe8] sm:$0xff] %vm1459_vm5, %v5551_v51  ;;  %v6432_v45 = vpack.c.bf16 %v6413_v0, %v6412_v44  ;;  %v8198_v51 = vld [vmem:[#allocation2 + $0x28] sm:$0xff]  ;;  %v8199_v44 = vld [vmem:[#allocation2 + $0x30] sm:$0xff] }
 0x805   : > { %v5553_v50 = vpop.permute.xlu0 %5552  ;;  %v6414_v31 = vld [vmem:[#allocation4 + $0xd0] sm:$0xff]  ;;  %v8200_v0 = vld [vmem:[#allocation2 + $0x48] sm:$0xff] }
 0x806   : > { %5618 = vst.msk [vmem:[#allocation4 + $0xf0] sm:$0xff] %vm1459_vm5, %v5553_v50  ;;  %7926 = vmatprep.mubr.msk.bf16.mxu0 %vm2333_vm11, %v6432_v45  ;;  %v8201_v45 = vld [vmem:[#allocation2 + $0x50] sm:$0xff]  ;;  %v8202_v50 = vld [vmem:[#allocation2 + $0x68] sm:$0xff] }
 0x807   : > { %v5555_v8 = vpop.permute.xlu1 %5554  ;;  %v6415_v4 = vld [vmem:[#allocation4 + $0xd8] sm:$0xff] }
 0x808   : > { %5619 = vst.msk [vmem:[#allocation4 + $0xf8] sm:$0xff] %vm1459_vm5, %v5555_v8  ;;  %v6433_v49 = vpack.c.bf16 %v6415_v4, %v6414_v31  ;;  %v8203_v8 = vld [vmem:[#allocation2 + $0x70] sm:$0xff]  ;;  %v8204_v31 = vld [vmem:[#allocation2 + $0x88] sm:$0xff] }
 0x809   : > { %v5741_v63 = vpop.permute.xlu0 %5740  ;;  %v8205_v4 = vld [vmem:[#allocation2 + $0x90] sm:$0xff] }
 0x80a   : > { %5808 = vst.msk [vmem:[#allocation4 + $0xe0] sm:$0xff] %vm1652_vm6, %v5741_v63  ;;  %7927 = vmatmul.mubr.msk.bf16.gmra.mrb[40].mxu0 %vm2333_vm11, %v6433_v49  ;;  %v8206_v49 = vld [vmem:[#allocation2 + $0xa8] sm:$0xff]  ;;  %v8207_v63 = vld [vmem:[#allocation2 + $0xb0] sm:$0xff] }
 0x80b   : > { %v5743_v33 = vpop.permute.xlu1 %5742 }
 0x80c   : > { %5809 = vst.msk [vmem:[#allocation4 + $0xe8] sm:$0xff] %vm1652_vm6, %v5743_v33  ;;  %v8208_v33 = vld [vmem:[#allocation2 + $0xc8] sm:$0xff] }
 0x80d   : > { %v5745_v62 = vpop.permute.xlu0 %5744 }
 0x80e   : > { %5810 = vst.msk [vmem:[#allocation4 + $0xf0] sm:$0xff] %vm1652_vm6, %v5745_v62  ;;  %v8209_v62 = vld [vmem:[#allocation2 + $0xd0] sm:$0xff] }
 0x80f   : > { %v7904_v6 = vpop.f32.mrb[16].mxu0  ;;  %v5747_v30 = vpop.permute.xlu1 %5746 }
 0x810   : > { %5811 = vst.msk [vmem:[#allocation4 + $0xf8] sm:$0xff] %vm1652_vm6, %v5747_v30  ;;  %v6541_v58 = vpop.f32.mrb[17].mxu0  ;;  %v8211_v30 = vld [vmem:[#allocation2 + $0xf0] sm:$0xff] }
 0x811   : > { %v5933_v34 = vpop.permute.xlu0 %5932  ;;  %6700 = vrot.lane.b32.xlu0 %v6541_v58, %s8272_s13  ;;  %v7905_v55 = vpop.f32.mrb[18].mxu0  ;;  %v8212_v58 = vld [vmem:[#allocation2 + $0x108] sm:$0xff] }
 0x812   : > { %6000 = vst.msk [vmem:[#allocation4 + $0xe0] sm:$0xff] %vm1846_vm7, %v5933_v34  ;;  %v6544_v46 = vpop.f32.mrb[19].mxu0  ;;  %v8213_v34 = vld [vmem:[#allocation2 + $0x110] sm:$0xff] }
 0x813   : > { %6702 = vrot.lane.b32.xlu1 %v6544_v46, %s8272_s13  ;;  %v5935_v11 = vpop.permute.xlu1 %5934 }
 0x814   : > { %6001 = vst.msk [vmem:[#allocation4 + $0xe8] sm:$0xff] %vm1846_vm7, %v5935_v11  ;;  %v8215_v11 = vld [vmem:[#allocation2 + $0x130] sm:$0xff] }
 0x815   : > { %v5937_v7 = vpop.permute.xlu0 %5936  ;;  %6704 = vrot.lane.b32.xlu0 %v7904_v6, %s8272_s13  ;;  %v8210_v6 = vld [vmem:[#allocation2 + $0xe8] sm:$0xff] }
 0x816   : > { %6002 = vst.msk [vmem:[#allocation4 + $0xf0] sm:$0xff] %vm1846_vm7, %v5937_v7  ;;  %v8216_v7 = vld [vmem:[#allocation2 + $0x148] sm:$0xff] }
 0x817   : > { %6706 = vrot.lane.b32.xlu1 %v7905_v55, %s8272_s13  ;;  %v5939_v36 = vpop.permute.xlu1 %5938  ;;  %v8214_v55 = vld [vmem:[#allocation2 + $0x128] sm:$0xff] }
 0x818   : > { %6003 = vst.msk [vmem:[#allocation4 + $0xf8] sm:$0xff] %vm1846_vm7, %v5939_v36  ;;  %v8217_v36 = vld [vmem:[#allocation2 + $0x150] sm:$0xff] }
 0x819   : > { %v6125_v19 = vpop.permute.xlu0 %6124 }
 0x81a   : > { %6192 = vst.msk [vmem:[#allocation4 + $0xe0] sm:$0xff] %vm2039_vm9, %v6125_v19 }
 0x81b   : > { %v6127_v25 = vpop.permute.xlu1 %6126 }
 0x81c   : > { %6193 = vst.msk [vmem:[#allocation4 + $0xe8] sm:$0xff] %vm2039_vm9, %v6127_v25  ;;  %v8218_v25 = vld [vmem:[#allocation2 + $0x168] sm:$0xff] }
 0x81d   : > { %v6129_v3 = vpop.permute.xlu0 %6128 }
 0x81e   : > { %6194 = vst.msk [vmem:[#allocation4 + $0xf0] sm:$0xff] %vm2039_vm9, %v6129_v3  ;;  %v8219_v3 = vld [vmem:[#allocation2 + $0x170] sm:$0xff] }
 0x81f   : > { %v6131_v40 = vpop.permute.xlu1 %6130 }
 0x820   : > { %6195 = vst.msk [vmem:[#allocation4 + $0xf8] sm:$0xff] %vm2039_vm9, %v6131_v40 }
 0x821   : > { %v6317_v29 = vpop.permute.xlu0 %6316 }
 0x822   : > { %6384 = vst.msk [vmem:[#allocation4 + $0xe0] sm:$0xff] %vm2232_vm10, %v6317_v29  ;;  %v8220_v29 = vld [vmem:[#allocation2 + $0x188] sm:$0xff] }
 0x823   : > { %v6319_v59 = vpop.permute.xlu1 %6318 }
 0x824   : > { %6385 = vst.msk [vmem:[#allocation4 + $0xe8] sm:$0xff] %vm2232_vm10, %v6319_v59  ;;  %v8221_v59 = vld [vmem:[#allocation2 + $0x190] sm:$0xff] }
 0x825   : > { %v6321_v54 = vpop.permute.xlu0 %6320 }
 0x826   : > { %6386 = vst.msk [vmem:[#allocation4 + $0xf0] sm:$0xff] %vm2232_vm10, %v6321_v54  ;;  %v8222_v54 = vld [vmem:[#allocation2 + $0x1a8] sm:$0xff] }
 0x827   : > { %v6323_v17 = vpop.permute.xlu1 %6322 }
 0x828   : > { %6387 = vst.msk [vmem:[#allocation4 + $0xf8] sm:$0xff] %vm2232_vm10, %v6323_v17 }
 0x829   : > { %v6416_v28 = vld [vmem:[#allocation4 + $0xe0] sm:$0xff] }
 0x82b   : > { %v6417_v9 = vld [vmem:[#allocation4 + $0xe8] sm:$0xff] }
 0x82c   : > { %v6434_v27 = vpack.c.bf16 %v6417_v9, %v6416_v28  ;;  %v8223_v28 = vld [vmem:[#allocation2 + $0x1b0] sm:$0xff]  ;;  %v8224_v9 = vld [vmem:[#allocation2 + $0x1c8] sm:$0xff] }
 0x82d   : > { %v6418_v2 = vld [vmem:[#allocation4 + $0xf0] sm:$0xff] }
 0x82e   : > { %7930 = vmatprep.mubr.msk.bf16.mxu0 %vm2333_vm11, %v6434_v27 }
 0x82f   : > { %v7908_v41 = vpop.f32.mrb[20].mxu0  ;;  %v6419_v10 = vld [vmem:[#allocation4 + $0xf8] sm:$0xff] }
 0x830   : > { %v6557_v21 = vpop.f32.mrb[21].mxu0  ;;  %v6435_v22 = vpack.c.bf16 %v6419_v10, %v6418_v2  ;;  %v8225_v2 = vld [vmem:[#allocation2 + $0x1d0] sm:$0xff] }
 0x831   : > { %6708 = vrot.lane.b32.xlu0 %v6557_v21, %s8272_s13  ;;  %v7909_v16 = vpop.f32.mrb[22].mxu0  ;;  %v8227_v10 = vld [vmem:[#allocation2 + $0x1f0] sm:$0xff] }
 0x832   : > { %v6560_v43 = vpop.f32.mrb[23].mxu0  ;;  %7931 = vmatmul.mubr.msk.bf16.gmra.mrb[44].mxu0 %vm2333_vm11, %v6435_v22  ;;  %v8228_v22 = vld [vmem:[#allocation2 + $0x208] sm:$0xff] }
 0x833   : > { %6710 = vrot.lane.b32.xlu1 %v6560_v43, %s8272_s13 }
 0x835   : > { %6712 = vrot.lane.b32.xlu0 %v7908_v41, %s8272_s13  ;;  %v8226_v41 = vld [vmem:[#allocation2 + $0x1e8] sm:$0xff] }
 0x837   : > { %6714 = vrot.lane.b32.xlu1 %v7909_v16, %s8272_s13  ;;  %v8229_v16 = vld [vmem:[#allocation2 + $0x210] sm:$0xff] }
 0x84f   : > { %v7912_v13 = vpop.f32.mrb[24].mxu0 }
 0x850   : > { %v6573_v1 = vpop.f32.mrb[25].mxu0 }
 0x851   : > { %6716 = vrot.lane.b32.xlu0 %v6573_v1, %s8272_s13  ;;  %v7913_v48 = vpop.f32.mrb[26].mxu0 }
 0x852   : > { %v6576_v60 = vpop.f32.mrb[27].mxu0 }
 0x853   : > { %6718 = vrot.lane.b32.xlu1 %v6576_v60, %s8272_s13 }
 0x855   : > { %6720 = vrot.lane.b32.xlu0 %v7912_v13, %s8272_s13 }
 0x857   : > { %6722 = vrot.lane.b32.xlu1 %v7913_v48, %s8272_s13 }
 0x86f   : > { %v7916_v57 = vpop.f32.mrb[28].mxu0 }
 0x870   : > { %v6589_v23 = vpop.f32.mrb[29].mxu0 }
 0x871   : > { %6724 = vrot.lane.b32.xlu0 %v6589_v23, %s8272_s13  ;;  %v7917_v39 = vpop.f32.mrb[30].mxu0 }
 0x872   : > { %v6592_v5 = vpop.f32.mrb[31].mxu0 }
 0x873   : > { %6726 = vrot.lane.b32.xlu1 %v6592_v5, %s8272_s13 }
 0x875   : > { %6728 = vrot.lane.b32.xlu0 %v7916_v57, %s8272_s13 }
 0x877   : > { %6730 = vrot.lane.b32.xlu1 %v7917_v39, %s8272_s13 }
 0x883   : > { %v6701_v46 = vpop.permute.xlu0 %6700 }
 0x885   : > { %v6703_v13 = vpop.permute.xlu1 %6702 }
 0x887   : > { %v6705_v19 = vpop.permute.xlu0 %6704 }
 0x889   : > { %v6707_v48 = vpop.permute.xlu1 %6706 }
 0x88f   : > { %v7920_v35 = vpop.f32.mrb[32].mxu0 }
 0x890   : > { %v6605_v26 = vpop.f32.mrb[33].mxu0 }
 0x891   : > { %6732 = vrot.lane.b32.xlu0 %v6605_v26, %s8272_s13  ;;  %v7921_v47 = vpop.f32.mrb[34].mxu0 }
 0x892   : > { %v6608_v14 = vpop.f32.mrb[35].mxu0 }
 0x893   : > { %6734 = vrot.lane.b32.xlu1 %v6608_v14, %s8272_s13 }
 0x895   : > { %6736 = vrot.lane.b32.xlu0 %v7920_v35, %s8272_s13 }
 0x897   : > { %6738 = vrot.lane.b32.xlu1 %v7921_v47, %s8272_s13 }
 0x8a3   : > { %v6709_v40 = vpop.permute.xlu0 %6708 }
 0x8a5   : > { %v6711_v57 = vpop.permute.xlu1 %6710 }
 0x8a7   : > { %v6713_v17 = vpop.permute.xlu0 %6712 }
 0x8a9   : > { %v6715_v39 = vpop.permute.xlu1 %6714 }
 0x8b5   : > { %v7924_v52 = vpop.f32.mrb[36].mxu0 }
 0x8b6   : > { %v6621_v37 = vpop.f32.mrb[37].mxu0 }
 0x8b7   : > { %6740 = vrot.lane.b32.xlu0 %v6621_v37, %s8272_s13  ;;  %v7925_v53 = vpop.f32.mrb[38].mxu0 }
 0x8b8   : > { %v6624_v15 = vpop.f32.mrb[39].mxu0 }
 0x8b9   : > { %6742 = vrot.lane.b32.xlu1 %v6624_v15, %s8272_s13 }
 0x8bb   : > { %6744 = vrot.lane.b32.xlu0 %v7924_v52, %s8272_s13 }
 0x8bd   : > { %6746 = vrot.lane.b32.xlu1 %v7925_v53, %s8272_s13 }
 0x8c3   : > { %v6717_v27 = vpop.permute.xlu0 %6716 }
 0x8c5   : > { %v6719_v35 = vpop.permute.xlu1 %6718 }
 0x8c7   : > { %v11946_v21 = vpop.permute.xlu0 %6720 }
 0x8c9   : > { %v6723_v47 = vpop.permute.xlu1 %6722 }
 0x8dd   : > { %v7928_v38 = vpop.f32.mrb[40].mxu0 }
 0x8de   : > { %v6637_v18 = vpop.f32.mrb[41].mxu0 }
 0x8df   : > { %6748 = vrot.lane.b32.xlu0 %v6637_v18, %s8272_s13  ;;  %v7929_v56 = vpop.f32.mrb[42].mxu0 }
 0x8e0   : > { %v6640_v32 = vpop.f32.mrb[43].mxu0 }
 0x8e1   : > { %6750 = vrot.lane.b32.xlu1 %v6640_v32, %s8272_s13 }
 0x8e3   : > { %6752 = vrot.lane.b32.xlu0 %v7928_v38, %s8272_s13  ;;  %v11950_v43 = vpop.permute.xlu0 %6724 }
 0x8e5   : > { %6754 = vrot.lane.b32.xlu1 %v7929_v56, %s8272_s13  ;;  %v6727_v52 = vpop.permute.xlu1 %6726  ;;  %v12953_v56 = vld [vmem:[#allocation37_spill] sm:$0xff] }
 0x8e6   : > { %v6796_v32 = vadd.f32 %v6701_v46, %v12953_v56  ;;  %v12960_v46 = vld [vmem:[#allocation40_spill] sm:$0xff] }
 0x8e7   : > { %v11952_v1 = vpop.permute.xlu0 %6728  ;;  %v12966_v56 = vld [vmem:[#allocation48_spill] sm:$0xff] }
 0x8e9   : > { %v11966_v53 = vpop.permute.xlu1 %6730 }
 0x903   : > { %v11954_v60 = vpop.permute.xlu0 %6732 }
 0x905   : > { %v7932_v61 = vpop.f32.mrb[44].mxu0  ;;  %v11970_v38 = vpop.permute.xlu1 %6734 }
 0x906   : > { %v6653_v42 = vpop.f32.mrb[45].mxu0 }
 0x907   : > { %6756 = vrot.lane.b32.xlu0 %v6653_v42, %s8272_s13  ;;  %v7933_v24 = vpop.f32.mrb[46].mxu0  ;;  %v11956_v23 = vpop.permute.xlu0 %6736 }
 0x908   : > { %v6656_v20 = vpop.f32.mrb[47].mxu0 }
 0x909   : > { %6758 = vrot.lane.b32.xlu1 %v6656_v20, %s8272_s13 }
 0x90b   : > { %6760 = vrot.lane.b32.xlu0 %v7932_v61, %s8272_s13  ;;  %v12954_v61 = vld [vmem:[#allocation39_spill] sm:$0xff] }
 0x90c   : > { %v6797_v42 = vadd.f32 %v6703_v13, %v12954_v61 }
 0x90d   : > { %6762 = vrot.lane.b32.xlu1 %v7933_v24, %s8272_s13  ;;  %v11976_v24 = vpop.permute.xlu1 %6738 }
 0x90f   : > { %6834 = vrot.lane.b32.xlu0 %v7757_v12, %s8272_s13  ;;  %v12955_v12 = vld [vmem:[#allocation38_spill] sm:$0xff] }
 0x911   : > { %6965 = vrot.lane.b32.xlu1 %v8198_v51, %s8271_s11  ;;  %v6799_v51 = vadd.f32 %v12955_v12, %v6707_v48 }
 0x913   : > { %6967 = vrot.lane.b32.xlu0 %v8199_v44, %s8271_s11 }
 0x915   : > { %6969 = vrot.lane.b32.xlu1 %v8200_v0, %s8271_s11 }
 0x917   : > { %6971 = vrot.lane.b32.xlu0 %v8201_v45, %s8271_s11  ;;  %v12956_v45 = vld [vmem:[#allocation36_spill] sm:$0xff] }
 0x919   : > { %6973 = vrot.lane.b32.xlu1 %v8202_v50, %s8271_s11  ;;  %v6798_v50 = vadd.f32 %v12956_v45, %v6705_v19 }
 0x91b   : > { %6975 = vrot.lane.b32.xlu0 %v8203_v8, %s8271_s11 }
 0x91d   : > { %6977 = vrot.lane.b32.xlu1 %v8204_v31, %s8271_s11 }
 0x91f   : > { %6979 = vrot.lane.b32.xlu0 %v8205_v4, %s8271_s11 }
 0x921   : > { %6981 = vrot.lane.b32.xlu1 %v8206_v49, %s8271_s11  ;;  %v12957_v49 = vld [vmem:[#allocation43_spill] sm:$0xff] }
 0x923   : > { %6983 = vrot.lane.b32.xlu0 %v8207_v63, %s8271_s11  ;;  %v6801_v63 = vadd.f32 %v6711_v57, %v12957_v49 }
 0x925   : > { %6985 = vrot.lane.b32.xlu1 %v8208_v33, %s8271_s11  ;;  %v12958_v33 = vld [vmem:[#allocation41_spill] sm:$0xff] }
 0x927   : > { %6987 = vrot.lane.b32.xlu0 %v8209_v62, %s8271_s11  ;;  %v6800_v62 = vadd.f32 %v6709_v40, %v12958_v33  ;;  %v12970_v33 = vld [vmem:[#allocation51_spill] sm:$0xff] }
 0x929   : > { %6989 = vrot.lane.b32.xlu1 %v8210_v6, %s8271_s11  ;;  %v11958_v5 = vpop.permute.xlu0 %6740 }
 0x92b   : > { %6991 = vrot.lane.b32.xlu0 %v8211_v30, %s8271_s11  ;;  %v11984_v8 = vpop.permute.xlu1 %6742 }
 0x92d   : > { %6993 = vrot.lane.b32.xlu1 %v8212_v58, %s8271_s11  ;;  %v11960_v26 = vpop.permute.xlu0 %6744  ;;  %v12959_v58 = vld [vmem:[#allocation42_spill] sm:$0xff] }
 0x92f   : > { %6995 = vrot.lane.b32.xlu0 %v8213_v34, %s8271_s11  ;;  %v6803_v34 = vadd.f32 %v12959_v58, %v6715_v39  ;;  %v12965_v39 = vld [vmem:[#allocation49_spill] sm:$0xff]  ;;  %v12971_v58 = vld [vmem:[#allocation52_spill] sm:$0xff] }
 0x931   : > { %6997 = vrot.lane.b32.xlu1 %v8214_v55, %s8271_s11  ;;  %v11993_v55 = vpop.permute.xlu1 %6746 }
 0x933   : > { %6999 = vrot.lane.b32.xlu0 %v8215_v11, %s8271_s11  ;;  %v6802_v11 = vadd.f32 %v12960_v46, %v6713_v17  ;;  %v12972_v46 = vld [vmem:[#allocation50_spill] sm:$0xff] }
 0x935   : > { %7001 = vrot.lane.b32.xlu1 %v8216_v7, %s8271_s11 }
 0x937   : > { %7003 = vrot.lane.b32.xlu0 %v8217_v36, %s8271_s11 }
 0x939   : > { %7005 = vrot.lane.b32.xlu1 %v8218_v25, %s8271_s11  ;;  %v12961_v25 = vld [vmem:[#allocation47_spill] sm:$0xff] }
 0x93b   : > { %7007 = vrot.lane.b32.xlu0 %v8219_v3, %s8271_s11  ;;  %v6805_v3 = vadd.f32 %v6719_v35, %v12961_v25  ;;  %v6809_v35 = vadd.f32 %v6727_v52, %v12965_v39 }
 0x93d   : > { %7009 = vrot.lane.b32.xlu1 %v8220_v29, %s8271_s11 }
 0x93f   : > { %7011 = vrot.lane.b32.xlu0 %v8221_v59, %s8271_s11  ;;  %v12962_v59 = vld [vmem:[#allocation45_spill] sm:$0xff] }
 0x941   : > { %7013 = vrot.lane.b32.xlu1 %v8222_v54, %s8271_s11  ;;  %v6804_v54 = vadd.f32 %v6717_v27, %v12962_v59 }
 0x943   : > { %7015 = vrot.lane.b32.xlu0 %v8223_v28, %s8271_s11 }
 0x945   : > { %7017 = vrot.lane.b32.xlu1 %v8224_v9, %s8271_s11 }
 0x947   : > { %7019 = vrot.lane.b32.xlu0 %v8225_v2, %s8271_s11  ;;  %v12963_v2 = vld [vmem:[#allocation46_spill] sm:$0xff] }
 0x949   : > { %7021 = vrot.lane.b32.xlu1 %v8226_v41, %s8271_s11  ;;  %v6807_v41 = vadd.f32 %v12963_v2, %v6723_v47  ;;  %v12975_v2 = vld [vmem:[#allocation56_spill] sm:$0xff] }
 0x94b   : > { %7023 = vrot.lane.b32.xlu0 %v8227_v10, %s8271_s11 }
 0x94d   : > { %7025 = vrot.lane.b32.xlu1 %v8228_v22, %s8271_s11  ;;  %v12964_v22 = vld [vmem:[#allocation44_spill] sm:$0xff] }
 0x94f   : > { %7027 = vrot.lane.b32.xlu0 %v8229_v16, %s8271_s11  ;;  %s8279_s11 = smov 124   ;;  %v6806_v16 = vadd.f32 %v12964_v22, %v11946_v21 }
 0x951   : > { %v11962_v14 = vpop.permute.xlu0 %6748 }
 0x953   : > { %v11999_v40 = vpop.permute.xlu1 %6750 }
 0x955   : > { %v11964_v37 = vpop.permute.xlu0 %6752 }
 0x957   : > { %v12010_v27 = vpop.permute.xlu1 %6754 }
 0x979   : > { %v11968_v15 = vpop.permute.xlu0 %6756 }
 0x97b   : > { %v12019_v21 = vpop.permute.xlu1 %6758 }
 0x97d   : > { %v11972_v18 = vpop.permute.xlu0 %6760 }
 0x981   : > { %v11978_v20 = vpop.permute.xlu0 %6834 }
 0x982   : > { %v6838_v44 = vadd.f32 %v11978_v20, %v6797_v42  ;;  %v6837_v0 = vadd.f32 %v11978_v20, %v6796_v32  ;;  %v6840_v31 = vadd.f32 %v11978_v20, %v6799_v51  ;;  %v6839_v4 = vadd.f32 %v11978_v20, %v6798_v50  ;;  %v12967_v51 = vld [vmem:[#allocation7_spill] sm:$0xff] }
 0x983   : > { %v6842_v6 = vadd.f32 %v11978_v20, %v6801_v63  ;;  %v6841_v30 = vadd.f32 %v11978_v20, %v6800_v62  ;;  %v6844_v7 = vadd.f32 %v11978_v20, %v6803_v34  ;;  %v6843_v36 = vadd.f32 %v11978_v20, %v6802_v11  ;;  %v12034_v63 = vpop.permute.xlu1 %6762 }
 0x984   : > { %8132 = vtanh.f32 %v6838_v44  ;;  %v6846_v17 = vadd.f32 %v11978_v20, %v6805_v3  ;;  %v6845_v28 = vadd.f32 %v11978_v20, %v6804_v54  ;;  %v6848_v13 = vadd.f32 %v11978_v20, %v6807_v41 }
 0x985   : > { %8134 = vtanh.f32 %v6837_v0  ;;  %v6847_v48 = vadd.f32 %v11978_v20, %v6806_v16  ;;  %v6808_v32 = vadd.f32 %v11950_v43, %v12966_v56  ;;  %v6850_v61 = vadd.f32 %v11978_v20, %v6809_v35  ;;  %v12968_v0 = vld [vmem:[#allocation6_spill] sm:$0xff]  ;;  %v12978_v35 = vld [vmem:[#allocation59_spill] sm:$0xff] }
 0x986   : > { %8136 = vtanh.f32 %v6840_v31  ;;  %v6811_v52 = vadd.f32 %v12967_v51, %v11966_v53  ;;  %v6810_v43 = vadd.f32 %v12968_v0, %v11952_v1  ;;  %v6812_v1 = vadd.f32 %v11954_v60, %v12970_v33 }
 0x987   : > { %8138 = vtanh.f32 %v6839_v4  ;;  %v6849_v42 = vadd.f32 %v11978_v20, %v6808_v32  ;;  %v12969_v4 = vld [vmem:[#allocation53_spill] sm:$0xff]  ;;  %v6814_v11 = vadd.f32 %v12972_v46, %v11956_v23  ;;  %v12049_v60 = vpop.permute.xlu1 %6965  ;;  %v12974_v23 = vld [vmem:[#allocation55_spill] sm:$0xff] }
 0x988   : > { %8140 = vtanh.f32 %v6842_v6  ;;  %v6852_v45 = vadd.f32 %v11978_v20, %v6811_v52  ;;  %v6851_v50 = vadd.f32 %v11978_v20, %v6810_v43  ;;  %v6813_v49 = vadd.f32 %v11970_v38, %v12969_v4 }
 0x989   : > { %8142 = vtanh.f32 %v6841_v30  ;;  %v6853_v6 = vadd.f32 %v11978_v20, %v6812_v1  ;;  %v6815_v38 = vadd.f32 %v12971_v58, %v11976_v24  ;;  %v12973_v24 = vld [vmem:[#allocation57_spill] sm:$0xff]  ;;  %v6816_v59 = vadd.f32 %v11958_v5, %v12974_v23  ;;  %v12976_v5 = vld [vmem:[#allocation54_spill] sm:$0xff] }
 0x98a   : > { %8144 = vtanh.f32 %v6844_v7  ;;  %v6854_v62 = vadd.f32 %v11978_v20, %v6813_v49  ;;  %v12046_v7 = vpop.permute.xlu0 %6967  ;;  %v6817_v3 = vadd.f32 %v11984_v8, %v12973_v24  ;;  %v6819_v8 = vadd.f32 %v12975_v2, %v11993_v55 }
 0x98b   : > { %8146 = vtanh.f32 %v6843_v36  ;;  %v6856_v36 = vadd.f32 %v11978_v20, %v6815_v38  ;;  %v12066_v41 = vpop.permute.xlu1 %6969  ;;  %v6818_v22 = vadd.f32 %v12976_v5, %v11960_v26 }
 0x98c   : > { %8148 = vtanh.f32 %v6846_v17  ;;  %v6858_v54 = vadd.f32 %v11978_v20, %v6817_v3  ;;  %v6860_v16 = vadd.f32 %v11978_v20, %v6819_v8 }
 0x98d   : > { %8150 = vtanh.f32 %v6845_v28  ;;  %v6857_v28 = vadd.f32 %v11978_v20, %v6816_v59 }
 0x98e   : > { %v8133_v19 = vpop.eup %8132  ;;  %8152 = vtanh.f32 %v6848_v13  ;;  %v12061_v17 = vpop.permute.xlu0 %6971  ;;  %v6859_v13 = vadd.f32 %v11978_v20, %v6818_v22 }
 0x98f   : > { %v8135_v29 = vpop.eup %8134  ;;  %7127 = vrot.lane.b32.xlu0 %v8133_v19, %s8279_s11  ;;  %8154 = vtanh.f32 %v6847_v48  ;;  %v6855_v19 = vadd.f32 %v11978_v20, %v6814_v11  ;;  %v12081_v26 = vpop.permute.xlu1 %6973 }
 0x990   : > { %7125 = vrot.lane.b32.xlu1 %v8135_v29, %s8279_s11  ;;  %v8137_v9 = vpop.eup %8136  ;;  %8156 = vtanh.f32 %v6850_v61 }
 0x991   : > { %v8139_v10 = vpop.eup %8138  ;;  %8158 = vtanh.f32 %v6849_v42 }
 0x992   : > { %v8141_v57 = vpop.eup %8140  ;;  %8160 = vtanh.f32 %v6852_v45  ;;  %v12078_v56 = vpop.permute.xlu0 %6975 }
 0x993   : > { %7131 = vrot.lane.b32.xlu0 %v8137_v9, %s8279_s11  ;;  %v8143_v47 = vpop.eup %8142  ;;  %8162 = vtanh.f32 %v6851_v50  ;;  %v12981_v50 = vld [vmem:[#allocation65_spill] sm:$0xff] }
 0x994   : > { %7129 = vrot.lane.b32.xlu1 %v8139_v10, %s8279_s11  ;;  %v8145_v12 = vpop.eup %8144  ;;  %8164 = vtanh.f32 %v6854_v62 }
 0x995   : > { %v8147_v44 = vpop.eup %8146  ;;  %8166 = vtanh.f32 %v6853_v6 }
 0x996   : > { %v8149_v31 = vpop.eup %8148  ;;  %8168 = vtanh.f32 %v6856_v36  ;;  %v12093_v0 = vpop.permute.xlu0 %6979 }
 0x997   : > { %7135 = vrot.lane.b32.xlu0 %v8141_v57, %s8279_s11  ;;  %v8151_v53 = vpop.eup %8150  ;;  %8170 = vtanh.f32 %v6855_v19  ;;  %v12977_v57 = vld [vmem:[#allocation61_spill] sm:$0xff] }
 0x998   : > { %7133 = vrot.lane.b32.xlu1 %v8143_v47, %s8279_s11  ;;  %v8153_v30 = vpop.eup %8152  ;;  %8172 = vtanh.f32 %v6858_v54  ;;  %v6821_v55 = vadd.f32 %v11999_v40, %v12977_v57  ;;  %v6820_v47 = vadd.f32 %v11962_v14, %v12978_v35  ;;  %v12979_v40 = vld [vmem:[#allocation60_spill] sm:$0xff]  ;;  %v12980_v14 = vld [vmem:[#allocation58_spill] sm:$0xff] }
 0x999   : > { %v8155_v34 = vpop.eup %8154  ;;  %8174 = vtanh.f32 %v6857_v28  ;;  %v6822_v52 = vadd.f32 %v12980_v14, %v11964_v37  ;;  %v12982_v37 = vld [vmem:[#allocation63_spill] sm:$0xff] }
 0x99a   : > { %v8157_v25 = vpop.eup %8156  ;;  %8176 = vtanh.f32 %v6860_v16  ;;  %v6862_v32 = vadd.f32 %v11978_v20, %v6821_v55  ;;  %v6861_v61 = vadd.f32 %v11978_v20, %v6820_v47  ;;  %v6824_v49 = vadd.f32 %v11968_v15, %v12982_v37  ;;  %v12110_v38 = vpop.permute.xlu0 %6983 }
 0x99b   : > { %7139 = vrot.lane.b32.xlu0 %v8145_v12, %s8279_s11  ;;  %v8159_v29 = vpop.eup %8158  ;;  %8178 = vtanh.f32 %v6859_v13  ;;  %v6823_v12 = vadd.f32 %v12979_v40, %v12010_v27  ;;  %v6863_v43 = vadd.f32 %v11978_v20, %v6822_v52  ;;  %v6825_v27 = vadd.f32 %v12019_v21, %v12981_v50 }
 0x99c   : > { %7137 = vrot.lane.b32.xlu1 %v8147_v44, %s8279_s11  ;;  %v8161_v9 = vpop.eup %8160  ;;  %8180 = vtanh.f32 %v6862_v32  ;;  %v6865_v62 = vadd.f32 %v11978_v20, %v6824_v49  ;;  %v12988_v49 = vld [vmem:[#allocation8_spill] sm:$0xff] }
 0x99d   : > { %v8163_v10 = vpop.eup %8162  ;;  %v6864_v44 = vadd.f32 %v11978_v20, %v6823_v12  ;;  %8182 = vtanh.f32 %v6861_v61  ;;  %v6866_v1 = vadd.f32 %v11978_v20, %v6825_v27  ;;  %v12986_v12 = vld [vmem:[#allocation9_spill] sm:$0xff]  ;;  %v12987_v27 = vld [vmem:[#allocation10_spill] sm:$0xff] }
 0x99e   : > { %v8165_v48 = vpop.eup %8164 }
 0x99f   : > { %7143 = vrot.lane.b32.xlu0 %v8149_v31, %s8279_s11  ;;  %v8167_v39 = vpop.eup %8166  ;;  %v12098_v31 = vpop.permute.xlu1 %6977  ;;  %8184 = vtanh.f32 %v6864_v44 }
 0x9a0   : > { %7141 = vrot.lane.b32.xlu1 %v8151_v53, %s8279_s11  ;;  %v8169_v42 = vpop.eup %8168  ;;  %v12983_v53 = vld [vmem:[#allocation64_spill] sm:$0xff]  ;;  %8186 = vtanh.f32 %v6863_v43 }
 0x9a1   : > { %v8171_v51 = vpop.eup %8170  ;;  %v6827_v33 = vadd.f32 %v12983_v53, %v12034_v63  ;;  %8188 = vtanh.f32 %v6866_v1  ;;  %v6903_v53 = vsub.f32 1.0, %v12988_v49 }
 0x9a2   : > { %v8173_v45 = vpop.eup %8172  ;;  %8190 = vtanh.f32 %v6865_v62 }
 0x9a3   : > { %7147 = vrot.lane.b32.xlu0 %v8153_v30, %s8279_s11  ;;  %v8175_v4 = vpop.eup %8174  ;;  %v12984_v30 = vld [vmem:[#allocation62_spill] sm:$0xff]  ;;  %v12113_v15 = vpop.permute.xlu1 %6981  ;;  %v6868_v63 = vadd.f32 %v11978_v20, %v6827_v33 }
 0x9a4   : > { %7145 = vrot.lane.b32.xlu1 %v8155_v34, %s8279_s11  ;;  %v8177_v21 = vpop.eup %8176  ;;  %v6826_v58 = vadd.f32 %v12984_v30, %v11972_v18  ;;  %v12120_v18 = vpop.permute.xlu0 %6987  ;;  %v12989_v30 = vld [vmem:[#allocation15_spill] sm:$0xff] }
 0x9a5   : > { %v8179_v6 = vpop.eup %8178  ;;  %8192 = vtanh.f32 %v6868_v63 }
 0x9a6   : > { %v6867_v34 = vadd.f32 %v11978_v20, %v6826_v58  ;;  %v8181_v46 = vpop.eup %8180  ;;  %v6906_v58 = vsub.f32 1.0, %v12989_v30 }
 0x9a7   : > { %7151 = vrot.lane.b32.xlu0 %v8157_v25, %s8279_s11  ;;  %v8183_v11 = vpop.eup %8182  ;;  %v12122_v19 = vpop.permute.xlu1 %6985 }
 0x9a8   : > { %7149 = vrot.lane.b32.xlu1 %v8159_v29, %s8279_s11  ;;  %8194 = vtanh.f32 %v6867_v34  ;;  %v12126_v3 = vpop.permute.xlu0 %6991  ;;  %v12990_v34 = vld [vmem:[#allocation13_spill] sm:$0xff] }
 0x9a9   : > { %v8185_v36 = vpop.eup %8184 }
 0x9aa   : > { %v8187_v25 = vpop.eup %8186 }
 0x9ab   : > { %7155 = vrot.lane.b32.xlu0 %v8161_v9, %s8279_s11  ;;  %v8189_v24 = vpop.eup %8188  ;;  %v12129_v29 = vpop.permute.xlu1 %6989 }
 0x9ac   : > { %7153 = vrot.lane.b32.xlu1 %v8163_v10, %s8279_s11  ;;  %v8191_v20 = vpop.eup %8190  ;;  %v12134_v54 = vpop.permute.xlu0 %6995 }
 0x9af   : > { %7159 = vrot.lane.b32.xlu0 %v8165_v48, %s8279_s11  ;;  %v8193_v23 = vpop.eup %8192  ;;  %v12136_v28 = vpop.permute.xlu1 %6993 }
 0x9b0   : > { %7157 = vrot.lane.b32.xlu1 %v8167_v39, %s8279_s11  ;;  %v12138_v9 = vpop.permute.xlu0 %6999 }
 0x9b2   : > { %v8195_v59 = vpop.eup %8194 }
 0x9b3   : > { %7163 = vrot.lane.b32.xlu0 %v8169_v42, %s8279_s11  ;;  %v12140_v2 = vpop.permute.xlu1 %6997  ;;  %v12985_v42 = vld [vmem:[#allocation11_spill] sm:$0xff] }
 0x9b4   : > { %7161 = vrot.lane.b32.xlu1 %v8171_v51, %s8279_s11  ;;  %v12142_v8 = vpop.permute.xlu0 %7003  ;;  %v6902_v40 = vsub.f32 1.0, %v12985_v42  ;;  %v6901_v51 = vsub.f32 1.0, %v12986_v12 }
 0x9b6   : > { %v7062_v52 = vmul.f32 %v12046_v7, %v6902_v40  ;;  %v7063_v7 = vmul.f32 %v12066_v41, %v6903_v53  ;;  %v12992_v40 = vld [vmem:[#allocation12_spill] sm:$0xff] }
 0x9b7   : > { %7167 = vrot.lane.b32.xlu0 %v8173_v45, %s8279_s11  ;;  %v12144_v10 = vpop.permute.xlu1 %7001  ;;  %v7061_v45 = vmul.f32 %v12049_v60, %v6901_v51 }
 0x9b8   : > { %7165 = vrot.lane.b32.xlu1 %v8175_v4, %s8279_s11  ;;  %v12146_v5 = vpop.permute.xlu0 %7007  ;;  %v6904_v4 = vsub.f32 1.0, %v12987_v27 }
 0x9ba   : > { %v7064_v62 = vmul.f32 %v12061_v17, %v6904_v4  ;;  %v7066_v17 = vmul.f32 %v12078_v56, %v6906_v58  ;;  %v12994_v4 = vld [vmem:[#allocation17_spill] sm:$0xff] }
 0x9bb   : > { %7171 = vrot.lane.b32.xlu0 %v8177_v21, %s8279_s11  ;;  %v12148_v22 = vpop.permute.xlu1 %7005 }
 0x9bc   : > { %7169 = vrot.lane.b32.xlu1 %v8179_v6, %s8279_s11  ;;  %v12150_v16 = vpop.permute.xlu0 %7011 }
 0x9bf   : > { %7175 = vrot.lane.b32.xlu0 %v8181_v46, %s8279_s11  ;;  %v12152_v13 = vpop.permute.xlu1 %7009  ;;  %v6905_v46 = vsub.f32 1.0, %v12990_v34 }
 0x9c0   : > { %7173 = vrot.lane.b32.xlu1 %v8183_v11, %s8279_s11  ;;  %v12154_v48 = vpop.permute.xlu0 %7015 }
 0x9c1   : > { %v7065_v41 = vmul.f32 %v12081_v26, %v6905_v46 }
 0x9c3   : > { %7179 = vrot.lane.b32.xlu0 %v8185_v36, %s8279_s11  ;;  %v12156_v57 = vpop.permute.xlu1 %7013 }
 0x9c4   : > { %7177 = vrot.lane.b32.xlu1 %v8187_v25, %s8279_s11  ;;  %v12158_v55 = vpop.permute.xlu0 %7019 }
 0x9c7   : > { %7183 = vrot.lane.b32.xlu0 %v8189_v24, %s8279_s11  ;;  %v12160_v39 = vpop.permute.xlu1 %7017 }
 0x9c8   : > { %7181 = vrot.lane.b32.xlu1 %v8191_v20, %s8279_s11  ;;  %v12162_v35 = vpop.permute.xlu0 %7023 }
 0x9cb   : > { %7187 = vrot.lane.b32.xlu0 %v8193_v23, %s8279_s11  ;;  %v12164_v47 = vpop.permute.xlu1 %7021  ;;  %v12991_v23 = vld [vmem:[#allocation14_spill] sm:$0xff] }
 0x9cc   : > { %7185 = vrot.lane.b32.xlu1 %v8195_v59, %s8279_s11  ;;  %v12166_v32 = vpop.permute.xlu0 %7027  ;;  %v6908_v59 = vsub.f32 1.0, %v12991_v23 }
 0x9ce   : > { %v7068_v56 = vmul.f32 %v12093_v0, %v6908_v59 }
 0x9cf   : > { %v12168_v61 = vpop.permute.xlu1 %7025 }
 0xa01   : > { %v7128_v14 = vpop.permute.xlu0 %7127 }
 0xa02   : > { %v7222_v44 = vmul.f32 %v12985_v42, %v7128_v14  ;;  %v7126_v43 = vpop.permute.xlu1 %7125 }
 0xa03   : > { %v7221_v50 = vmul.f32 %v12986_v12, %v7126_v43  ;;  %v6907_v12 = vsub.f32 1.0, %v12992_v40 }
 0xa04   : > { %v7254_v37 = vadd.f32 %v7222_v44, %v7062_v52 }
 0xa05   : > { %v7253_v33 = vadd.f32 %v7221_v50, %v7061_v45  ;;  %v7132_v1 = vpop.permute.xlu0 %7131  ;;  %v7067_v26 = vmul.f32 %v12098_v31, %v6907_v12  ;;  %v12993_v45 = vld [vmem:[#allocation19_spill] sm:$0xff]  ;;  %v12999_v12 = vld [vmem:[#allocation22_spill] sm:$0xff] }
 0xa06   : > { %v7224_v21 = vmul.f32 %v12987_v27, %v7132_v1  ;;  %v7130_v6 = vpop.permute.xlu1 %7129  ;;  %7319 = vrot.lane.b32.xlu0 %v7254_v37, %s8279_s11  ;;  %v6910_v50 = vsub.f32 1.0, %v12993_v45  ;;  %v6909_v37 = vsub.f32 1.0, %v12994_v4 }
 0xa07   : > { %v7223_v60 = vmul.f32 %v12988_v49, %v7130_v6  ;;  %7317 = vrot.lane.b32.xlu1 %v7253_v33, %s8279_s11 }
 0xa08   : > { %v7256_v63 = vadd.f32 %v7224_v21, %v7064_v62  ;;  %v7070_v0 = vmul.f32 %v12110_v38, %v6910_v50  ;;  %v7069_v31 = vmul.f32 %v12113_v15, %v6909_v37  ;;  %v12995_v21 = vld [vmem:[#allocation18_spill] sm:$0xff] }
 0xa09   : > { %v7255_v11 = vadd.f32 %v7223_v60, %v7063_v7  ;;  %v7136_v36 = vpop.permute.xlu0 %7135  ;;  %v6912_v6 = vsub.f32 1.0, %v12995_v21  ;;  %v12996_v60 = vld [vmem:[#allocation16_spill] sm:$0xff] }
 0xa0a   : > { %v7226_v25 = vmul.f32 %v12989_v30, %v7136_v36  ;;  %v7134_v24 = vpop.permute.xlu1 %7133  ;;  %7323 = vrot.lane.b32.xlu0 %v7256_v63, %s8279_s11  ;;  %v6911_v30 = vsub.f32 1.0, %v12996_v60  ;;  %v12997_v36 = vld [vmem:[#allocation23_spill] sm:$0xff] }
 0xa0b   : > { %v7225_v20 = vmul.f32 %v12990_v34, %v7134_v24  ;;  %7321 = vrot.lane.b32.xlu1 %v7255_v11, %s8279_s11  ;;  %v7072_v38 = vmul.f32 %v12120_v18, %v6912_v6  ;;  %v12998_v24 = vld [vmem:[#allocation21_spill] sm:$0xff] }
 0xa0c   : > { %v7258_v42 = vadd.f32 %v7226_v25, %v7066_v17  ;;  %v7071_v15 = vmul.f32 %v12122_v19, %v6911_v30  ;;  %v6914_v17 = vsub.f32 1.0, %v12997_v36 }
 0xa0d   : > { %v7257_v51 = vadd.f32 %v7225_v20, %v7065_v41  ;;  %v7140_v14 = vpop.permute.xlu0 %7139  ;;  %v6913_v41 = vsub.f32 1.0, %v12998_v24 }
 0xa0e   : > { %v7228_v52 = vmul.f32 %v12991_v23, %v7140_v14  ;;  %v7138_v44 = vpop.permute.xlu1 %7137  ;;  %7327 = vrot.lane.b32.xlu0 %v7258_v42, %s8279_s11  ;;  %v7074_v18 = vmul.f32 %v12126_v3, %v6914_v17  ;;  %v13006_v17 = vld [vmem:[#allocation30_spill] sm:$0xff] }
 0xa0f   : > { %v7227_v43 = vmul.f32 %v12992_v40, %v7138_v44  ;;  %7325 = vrot.lane.b32.xlu1 %v7257_v51, %s8279_s11  ;;  %v7073_v19 = vmul.f32 %v12129_v29, %v6913_v41  ;;  %v6916_v51 = vsub.f32 1.0, %v12999_v12 }
 0xa10   : > { %v7260_v27 = vadd.f32 %v7228_v52, %v7068_v56  ;;  %v13000_v56 = vld [vmem:[#allocation20_spill] sm:$0xff] }
 0xa11   : > { %v7259_v49 = vadd.f32 %v7227_v43, %v7067_v26  ;;  %v7144_v53 = vpop.permute.xlu0 %7143  ;;  %v6915_v52 = vsub.f32 1.0, %v13000_v56  ;;  %v7076_v3 = vmul.f32 %v12134_v54, %v6916_v51 }
 0xa12   : > { %v7230_v33 = vmul.f32 %v12993_v45, %v7144_v53  ;;  %v7142_v1 = vpop.permute.xlu1 %7141  ;;  %7331 = vrot.lane.b32.xlu0 %v7260_v27, %s8279_s11  ;;  %v13001_v27 = vld [vmem:[#allocation27_spill] sm:$0xff] }
 0xa13   : > { %v7229_v62 = vmul.f32 %v12994_v4, %v7142_v1  ;;  %7329 = vrot.lane.b32.xlu1 %v7259_v49, %s8279_s11  ;;  %v7075_v29 = vmul.f32 %v12136_v28, %v6915_v52  ;;  %v6918_v4 = vsub.f32 1.0, %v13001_v27  ;;  %v13002_v49 = vld [vmem:[#allocation26_spill] sm:$0xff] }
 0xa14   : > { %v7262_v7 = vadd.f32 %v7230_v33, %v7070_v0  ;;  %v6917_v53 = vsub.f32 1.0, %v13002_v49 }
 0xa15   : > { %v7261_v58 = vadd.f32 %v7229_v62, %v7069_v31  ;;  %v7148_v63 = vpop.permute.xlu0 %7147  ;;  %v7078_v54 = vmul.f32 %v12138_v9, %v6918_v4 }
 0xa16   : > { %v7232_v34 = vmul.f32 %v12995_v21, %v7148_v63  ;;  %v7146_v46 = vpop.permute.xlu1 %7145  ;;  %7335 = vrot.lane.b32.xlu0 %v7262_v7, %s8279_s11  ;;  %v7077_v28 = vmul.f32 %v12140_v2, %v6917_v53  ;;  %v13003_v21 = vld [vmem:[#allocation25_spill] sm:$0xff] }
 0xa17   : > { %v7231_v11 = vmul.f32 %v12996_v60, %v7146_v46  ;;  %7333 = vrot.lane.b32.xlu1 %v7261_v58, %s8279_s11  ;;  %v6920_v6 = vsub.f32 1.0, %v13003_v21  ;;  %v13004_v60 = vld [vmem:[#allocation24_spill] sm:$0xff]  ;;  %v13011_v53 = vld [vmem:[#allocation33_spill] sm:$0xff] }
 0xa18   : > { %v7264_v25 = vadd.f32 %v7232_v34, %v7072_v38  ;;  %v6919_v30 = vsub.f32 1.0, %v13004_v60 }
 0xa19   : > { %v7263_v20 = vadd.f32 %v7231_v11, %v7071_v15  ;;  %v7152_v23 = vpop.permute.xlu0 %7151  ;;  %v7080_v9 = vmul.f32 %v12142_v8, %v6920_v6  ;;  %v13005_v15 = vld [vmem:[#allocation31_spill] sm:$0xff] }
 0xa1a   : > { %v7234_v59 = vmul.f32 %v12997_v36, %v7152_v23  ;;  %v7150_v42 = vpop.permute.xlu1 %7149  ;;  %7339 = vrot.lane.b32.xlu0 %v7264_v25, %s8279_s11  ;;  %v7079_v2 = vmul.f32 %v12144_v10, %v6919_v30  ;;  %v6922_v11 = vsub.f32 1.0, %v13005_v15  ;;  %v6921_v25 = vsub.f32 1.0, %v13006_v17 }
 0xa1b   : > { %v7233_v40 = vmul.f32 %v12998_v24, %v7150_v42  ;;  %7337 = vrot.lane.b32.xlu1 %v7263_v20, %s8279_s11 }
 0xa1c   : > { %v7266_v14 = vadd.f32 %v7234_v59, %v7074_v18  ;;  %v7082_v8 = vmul.f32 %v12146_v5, %v6922_v11  ;;  %v7081_v10 = vmul.f32 %v12148_v22, %v6921_v25  ;;  %v13007_v59 = vld [vmem:[#allocation29_spill] sm:$0xff] }
 0xa1d   : > { %v7265_v44 = vadd.f32 %v7233_v40, %v7073_v19  ;;  %v7156_v26 = vpop.permute.xlu0 %7155  ;;  %v6924_v42 = vsub.f32 1.0, %v13007_v59  ;;  %v13008_v40 = vld [vmem:[#allocation28_spill] sm:$0xff] }
 0xa1e   : > { %v7236_v43 = vmul.f32 %v12999_v12, %v7156_v26  ;;  %v7154_v45 = vpop.permute.xlu1 %7153  ;;  %7343 = vrot.lane.b32.xlu0 %v7266_v14, %s8279_s11  ;;  %v6923_v12 = vsub.f32 1.0, %v13008_v40  ;;  %v13009_v26 = vld [vmem:[#allocation35_spill] sm:$0xff] }
 0xa1f   : > { %v7235_v50 = vmul.f32 %v13000_v56, %v7154_v45  ;;  %7341 = vrot.lane.b32.xlu1 %v7265_v44, %s8279_s11  ;;  %v7084_v5 = vmul.f32 %v12150_v16, %v6924_v42  ;;  %v13010_v45 = vld [vmem:[#allocation34_spill] sm:$0xff] }
 0xa20   : > { %v7268_v37 = vadd.f32 %v7236_v43, %v7076_v3  ;;  %v7083_v22 = vmul.f32 %v12152_v13, %v6923_v12  ;;  %v6926_v3 = vsub.f32 1.0, %v13009_v26 }
 0xa21   : > { %v7267_v0 = vadd.f32 %v7235_v50, %v7075_v29  ;;  %v7160_v33 = vpop.permute.xlu0 %7159  ;;  %v6925_v29 = vsub.f32 1.0, %v13010_v45 }
 0xa22   : > { %v7238_v1 = vmul.f32 %v13001_v27, %v7160_v33  ;;  %v7158_v31 = vpop.permute.xlu1 %7157  ;;  %7347 = vrot.lane.b32.xlu0 %v7268_v37, %s8279_s11  ;;  %v7086_v16 = vmul.f32 %v12154_v48, %v6926_v3 }
 0xa23   : > { %v7237_v62 = vmul.f32 %v13002_v49, %v7158_v31  ;;  %7345 = vrot.lane.b32.xlu1 %v7267_v0, %s8279_s11  ;;  %v7085_v13 = vmul.f32 %v12156_v57, %v6925_v29  ;;  %v6928_v0 = vsub.f32 1.0, %v13011_v53 }
 0xa24   : > { %v7270_v7 = vadd.f32 %v7238_v1, %v7078_v54  ;;  %v13012_v54 = vld [vmem:[#allocation32_spill] sm:$0xff] }
 0xa25   : > { %v7269_v58 = vadd.f32 %v7237_v62, %v7077_v28  ;;  %v7164_v63 = vpop.permute.xlu0 %7163  ;;  %v6927_v1 = vsub.f32 1.0, %v13012_v54  ;;  %v7088_v48 = vmul.f32 %v12158_v55, %v6928_v0 }
 0xa26   : > { %v7240_v38 = vmul.f32 %v13003_v21, %v7164_v63  ;;  %v7162_v34 = vpop.permute.xlu1 %7161  ;;  %7351 = vrot.lane.b32.xlu0 %v7270_v7, %s8279_s11  ;;  %v13013_v7 = vld [vmem:[#allocation69_spill] sm:$0xff] }
 0xa27   : > { %v7239_v46 = vmul.f32 %v13004_v60, %v7162_v34  ;;  %7349 = vrot.lane.b32.xlu1 %v7269_v58, %s8279_s11  ;;  %v7087_v57 = vmul.f32 %v12160_v39, %v6927_v1  ;;  %v6930_v60 = vsub.f32 1.0, %v13013_v7  ;;  %v13014_v58 = vld [vmem:[#allocation67_spill] sm:$0xff] }
 0xa28   : > { %v7272_v36 = vadd.f32 %v7240_v38, %v7080_v9  ;;  %v6929_v63 = vsub.f32 1.0, %v13014_v58 }
 0xa29   : > { %v7271_v24 = vadd.f32 %v7239_v46, %v7079_v2  ;;  %v7168_v41 = vpop.permute.xlu0 %7167  ;;  %v7090_v55 = vmul.f32 %v12162_v35, %v6930_v60 }
 0xa2a   : > { %v7242_v20 = vmul.f32 %v13005_v15, %v7168_v41  ;;  %v7166_v23 = vpop.permute.xlu1 %7165  ;;  %7355 = vrot.lane.b32.xlu0 %v7272_v36, %s8279_s11  ;;  %v7089_v39 = vmul.f32 %v12164_v47, %v6929_v63  ;;  %v13015_v15 = vld [vmem:[#allocation68_spill] sm:$0xff] }
 0xa2b   : > { %v7241_v18 = vmul.f32 %v13006_v17, %v7166_v23  ;;  %7353 = vrot.lane.b32.xlu1 %v7271_v24, %s8279_s11  ;;  %v6932_v11 = vsub.f32 1.0, %v13015_v15  ;;  %v13016_v17 = vld [vmem:[#allocation66_spill] sm:$0xff] }
 0xa2c   : > { %v7274_v19 = vadd.f32 %v7242_v20, %v7082_v8  ;;  %v6931_v25 = vsub.f32 1.0, %v13016_v17 }
 0xa2d   : > { %v7273_v51 = vadd.f32 %v7241_v18, %v7081_v10  ;;  %v7172_v14 = vpop.permute.xlu0 %7171  ;;  %v7092_v35 = vmul.f32 %v12166_v32, %v6932_v11 }
 0xa2e   : > { %v7244_v56 = vmul.f32 %v13007_v59, %v7172_v14  ;;  %v7170_v52 = vpop.permute.xlu1 %7169  ;;  %7359 = vrot.lane.b32.xlu0 %v7274_v19, %s8279_s11  ;;  %v7091_v47 = vmul.f32 %v12168_v61, %v6931_v25 }
 0xa2f   : > { %v7243_v44 = vmul.f32 %v13008_v40, %v7170_v52  ;;  %7357 = vrot.lane.b32.xlu1 %v7273_v51, %s8279_s11 }
 0xa30   : > { %v7276_v43 = vadd.f32 %v7244_v56, %v7084_v5 }
 0xa31   : > { %v7275_v50 = vadd.f32 %v7243_v44, %v7083_v22  ;;  %v7176_v27 = vpop.permute.xlu0 %7175 }
 0xa32   : > { %v7246_v4 = vmul.f32 %v13009_v26, %v7176_v27  ;;  %v7174_v37 = vpop.permute.xlu1 %7173  ;;  %7363 = vrot.lane.b32.xlu0 %v7276_v43, %s8279_s11 }
 0xa33   : > { %v7245_v49 = vmul.f32 %v13010_v45, %v7174_v37  ;;  %7361 = vrot.lane.b32.xlu1 %v7275_v50, %s8279_s11 }
 0xa34   : > { %v7278_v33 = vadd.f32 %v7246_v4, %v7086_v16 }
 0xa35   : > { %v7277_v31 = vadd.f32 %v7245_v49, %v7085_v13  ;;  %v7180_v28 = vpop.permute.xlu0 %7179 }
 0xa36   : > { %v7248_v62 = vmul.f32 %v13011_v53, %v7180_v28  ;;  %v7178_v21 = vpop.permute.xlu1 %7177  ;;  %7367 = vrot.lane.b32.xlu0 %v7278_v33, %s8279_s11 }
 0xa37   : > { %v7247_v6 = vmul.f32 %v13012_v54, %v7178_v21  ;;  %7365 = vrot.lane.b32.xlu1 %v7277_v31, %s8279_s11 }
 0xa38   : > { %v7280_v30 = vadd.f32 %v7248_v62, %v7088_v48 }
 0xa39   : > { %v7279_v9 = vadd.f32 %v7247_v6, %v7087_v57  ;;  %v7184_v38 = vpop.permute.xlu0 %7183 }
 0xa3a   : > { %v7250_v34 = vmul.f32 %v13013_v7, %v7184_v38  ;;  %v7182_v2 = vpop.permute.xlu1 %7181  ;;  %7371 = vrot.lane.b32.xlu0 %v7280_v30, %s8279_s11 }
 0xa3b   : > { %v7249_v46 = vmul.f32 %v13014_v58, %v7182_v2  ;;  %7369 = vrot.lane.b32.xlu1 %v7279_v9, %s8279_s11 }
 0xa3c   : > { %v7282_v36 = vadd.f32 %v7250_v34, %v7090_v55 }
 0xa3d   : > { %v7281_v24 = vadd.f32 %v7249_v46, %v7089_v39  ;;  %v7188_v41 = vpop.permute.xlu0 %7187 }
 0xa3e   : > { %v7252_v8 = vmul.f32 %v13015_v15, %v7188_v41  ;;  %v7186_v20 = vpop.permute.xlu1 %7185  ;;  %7375 = vrot.lane.b32.xlu0 %v7282_v36, %s8279_s11 }
 0xa3f   : > { %v7251_v23 = vmul.f32 %v13016_v17, %v7186_v20  ;;  %7373 = vrot.lane.b32.xlu1 %v7281_v24, %s8279_s11 }
 0xa40   : > { %v7284_v10 = vadd.f32 %v7252_v8, %v7092_v35 }
 0xa41   : > { %v7283_v18 = vadd.f32 %v7251_v23, %v7091_v47 }
 0xa42   : > { %7379 = vrot.lane.b32.xlu0 %v7284_v10, %s8279_s11 }
 0xa43   : > { %7377 = vrot.lane.b32.xlu1 %v7283_v18, %s8279_s11 }
 0xa78   : > { %v12298_v32 = vpop.permute.xlu0 %7319 }
 0xa79   : > { %7414 = vst.msk [vmem:[%s8377_s12 + $0x8] sm:$0xff] %vm623_vm1, %v12298_v32  ;;  %7446 = vst.msk [vmem:[#allocation2 + $0x30] sm:$0xff] %vm623_vm1, %v12298_v32  ;;  %v12305_v61 = vpop.permute.xlu1 %7317 }
 0xa7a   : > { %7413 = vst.msk [vmem:[%s8377_s12] sm:$0xff] %vm623_vm1, %v12305_v61  ;;  %7445 = vst.msk [vmem:[#allocation2 + $0x28] sm:$0xff] %vm623_vm1, %v12305_v61 }
 0xa7b   : > { %7481 = vst.msk [vmem:[%s8367_s22] sm:$0xff] (!%p7758_p8), %vm623_vm1, %v12305_v61  ;;  %7482 = vst.msk [vmem:[%s8367_s22 + $0x8] sm:$0xff] (!%p7758_p8), %vm623_vm1, %v12298_v32 }
 0xa7c   : > { %v12312_v59 = vpop.permute.xlu0 %7323 }
 0xa7d   : > { %7416 = vst.msk [vmem:[%s8377_s12 + $0x18] sm:$0xff] %vm623_vm1, %v12312_v59  ;;  %7448 = vst.msk [vmem:[#allocation2 + $0x50] sm:$0xff] %vm623_vm1, %v12312_v59  ;;  %v12319_v42 = vpop.permute.xlu1 %7321 }
 0xa7e   : > { %7415 = vst.msk [vmem:[%s8377_s12 + $0x10] sm:$0xff] %vm623_vm1, %v12319_v42  ;;  %7447 = vst.msk [vmem:[#allocation2 + $0x48] sm:$0xff] %vm623_vm1, %v12319_v42 }
 0xa7f   : > { %7483 = vst.msk [vmem:[%s8367_s22 + $0x10] sm:$0xff] (!%p7758_p8), %vm623_vm1, %v12319_v42  ;;  %7484 = vst.msk [vmem:[%s8367_s22 + $0x18] sm:$0xff] (!%p7758_p8), %vm623_vm1, %v12312_v59 }
 0xa80   : > { %v12326_v19 = vpop.permute.xlu0 %7327 }
 0xa81   : > { %7418 = vst.msk [vmem:[%s8377_s12 + $0x28] sm:$0xff] %vm623_vm1, %v12326_v19  ;;  %7450 = vst.msk [vmem:[#allocation2 + $0x70] sm:$0xff] %vm623_vm1, %v12326_v19  ;;  %v12333_v40 = vpop.permute.xlu1 %7325 }
 0xa82   : > { %7417 = vst.msk [vmem:[%s8377_s12 + $0x20] sm:$0xff] %vm623_vm1, %v12333_v40  ;;  %7449 = vst.msk [vmem:[#allocation2 + $0x68] sm:$0xff] %vm623_vm1, %v12333_v40 }
 0xa83   : > { %7485 = vst.msk [vmem:[%s8367_s22 + $0x20] sm:$0xff] (!%p7758_p8), %vm623_vm1, %v12333_v40  ;;  %7486 = vst.msk [vmem:[%s8367_s22 + $0x28] sm:$0xff] (!%p7758_p8), %vm623_vm1, %v12326_v19 }
 0xa84   : > { %v12340_v12 = vpop.permute.xlu0 %7331 }
 0xa85   : > { %7420 = vst.msk [vmem:[%s8377_s12 + $0x38] sm:$0xff] %vm623_vm1, %v12340_v12  ;;  %7452 = vst.msk [vmem:[#allocation2 + $0x90] sm:$0xff] %vm623_vm1, %v12340_v12  ;;  %v12347_v51 = vpop.permute.xlu1 %7329 }
 0xa86   : > { %7419 = vst.msk [vmem:[%s8377_s12 + $0x30] sm:$0xff] %vm623_vm1, %v12347_v51  ;;  %7451 = vst.msk [vmem:[#allocation2 + $0x88] sm:$0xff] %vm623_vm1, %v12347_v51 }
 0xa87   : > { %7487 = vst.msk [vmem:[%s8367_s22 + $0x30] sm:$0xff] (!%p7758_p8), %vm623_vm1, %v12347_v51  ;;  %7488 = vst.msk [vmem:[%s8367_s22 + $0x38] sm:$0xff] (!%p7758_p8), %vm623_vm1, %v12340_v12 }
 0xa88   : > { %v12354_v14 = vpop.permute.xlu0 %7335 }
 0xa89   : > { %7422 = vst.msk [vmem:[%s8377_s12 + $0x48] sm:$0xff] %vm623_vm1, %v12354_v14  ;;  %7454 = vst.msk [vmem:[#allocation2 + $0xb0] sm:$0xff] %vm623_vm1, %v12354_v14  ;;  %v12361_v5 = vpop.permute.xlu1 %7333 }
 0xa8a   : > { %7421 = vst.msk [vmem:[%s8377_s12 + $0x40] sm:$0xff] %vm623_vm1, %v12361_v5  ;;  %7453 = vst.msk [vmem:[#allocation2 + $0xa8] sm:$0xff] %vm623_vm1, %v12361_v5 }
 0xa8b   : > { %7489 = vst.msk [vmem:[%s8367_s22 + $0x40] sm:$0xff] (!%p7758_p8), %vm623_vm1, %v12361_v5  ;;  %7490 = vst.msk [vmem:[%s8367_s22 + $0x48] sm:$0xff] (!%p7758_p8), %vm623_vm1, %v12354_v14 }
 0xa8c   : > { %v12368_v56 = vpop.permute.xlu0 %7339 }
 0xa8d   : > { %7424 = vst.msk [vmem:[%s8377_s12 + $0x58] sm:$0xff] %vm623_vm1, %v12368_v56  ;;  %7456 = vst.msk [vmem:[#allocation2 + $0xd0] sm:$0xff] %vm623_vm1, %v12368_v56  ;;  %v12375_v52 = vpop.permute.xlu1 %7337 }
 0xa8e   : > { %7423 = vst.msk [vmem:[%s8377_s12 + $0x50] sm:$0xff] %vm623_vm1, %v12375_v52  ;;  %7455 = vst.msk [vmem:[#allocation2 + $0xc8] sm:$0xff] %vm623_vm1, %v12375_v52 }
 0xa8f   : > { %7491 = vst.msk [vmem:[%s8367_s22 + $0x50] sm:$0xff] (!%p7758_p8), %vm623_vm1, %v12375_v52  ;;  %7492 = vst.msk [vmem:[%s8367_s22 + $0x58] sm:$0xff] (!%p7758_p8), %vm623_vm1, %v12368_v56 }
 0xa90   : > { %v12382_v22 = vpop.permute.xlu0 %7343 }
 0xa91   : > { %7426 = vst.msk [vmem:[%s8377_s12 + $0x68] sm:$0xff] %vm623_vm1, %v12382_v22  ;;  %7458 = vst.msk [vmem:[#allocation2 + $0xf0] sm:$0xff] %vm623_vm1, %v12382_v22  ;;  %v12389_v44 = vpop.permute.xlu1 %7341 }
 0xa92   : > { %7425 = vst.msk [vmem:[%s8377_s12 + $0x60] sm:$0xff] %vm623_vm1, %v12389_v44  ;;  %7457 = vst.msk [vmem:[#allocation2 + $0xe8] sm:$0xff] %vm623_vm1, %v12389_v44 }
 0xa93   : > { %7493 = vst.msk [vmem:[%s8367_s22 + $0x60] sm:$0xff] (!%p7758_p8), %vm623_vm1, %v12389_v44  ;;  %7494 = vst.msk [vmem:[%s8367_s22 + $0x68] sm:$0xff] (!%p7758_p8), %vm623_vm1, %v12382_v22 }
 0xa94   : > { %v12396_v26 = vpop.permute.xlu0 %7347 }
 0xa95   : > { %7428 = vst.msk [vmem:[%s8377_s12 + $0x78] sm:$0xff] %vm623_vm1, %v12396_v26  ;;  %7460 = vst.msk [vmem:[#allocation2 + $0x110] sm:$0xff] %vm623_vm1, %v12396_v26  ;;  %v12403_v3 = vpop.permute.xlu1 %7345 }
 0xa96   : > { %7427 = vst.msk [vmem:[%s8377_s12 + $0x70] sm:$0xff] %vm623_vm1, %v12403_v3  ;;  %7459 = vst.msk [vmem:[#allocation2 + $0x108] sm:$0xff] %vm623_vm1, %v12403_v3 }
 0xa97   : > { %7495 = vst.msk [vmem:[%s8367_s22 + $0x70] sm:$0xff] (!%p7758_p8), %vm623_vm1, %v12403_v3  ;;  %7496 = vst.msk [vmem:[%s8367_s22 + $0x78] sm:$0xff] (!%p7758_p8), %vm623_vm1, %v12396_v26 }
 0xa98   : > { %v12410_v43 = vpop.permute.xlu0 %7351 }
 0xa99   : > { %7430 = vst.msk [vmem:[%s8377_s12 + $0x88] sm:$0xff] %vm623_vm1, %v12410_v43  ;;  %7462 = vst.msk [vmem:[#allocation2 + $0x130] sm:$0xff] %vm623_vm1, %v12410_v43  ;;  %v12417_v45 = vpop.permute.xlu1 %7349 }
 0xa9a   : > { %7429 = vst.msk [vmem:[%s8377_s12 + $0x80] sm:$0xff] %vm623_vm1, %v12417_v45  ;;  %7461 = vst.msk [vmem:[#allocation2 + $0x128] sm:$0xff] %vm623_vm1, %v12417_v45 }
 0xa9b   : > { %7497 = vst.msk [vmem:[%s8367_s22 + $0x80] sm:$0xff] (!%p7758_p8), %vm623_vm1, %v12417_v45  ;;  %7498 = vst.msk [vmem:[%s8367_s22 + $0x88] sm:$0xff] (!%p7758_p8), %vm623_vm1, %v12410_v43 }
 0xa9c   : > { %v12424_v29 = vpop.permute.xlu0 %7355 }
 0xa9d   : > { %7432 = vst.msk [vmem:[%s8377_s12 + $0x98] sm:$0xff] %vm623_vm1, %v12424_v29  ;;  %7464 = vst.msk [vmem:[#allocation2 + $0x150] sm:$0xff] %vm623_vm1, %v12424_v29  ;;  %v7354_v50 = vpop.permute.xlu1 %7353 }
 0xa9e   : > { %7431 = vst.msk [vmem:[%s8377_s12 + $0x90] sm:$0xff] %vm623_vm1, %v7354_v50  ;;  %7463 = vst.msk [vmem:[#allocation2 + $0x148] sm:$0xff] %vm623_vm1, %v7354_v50 }
 0xa9f   : > { %7499 = vst.msk [vmem:[%s8367_s22 + $0x90] sm:$0xff] (!%p7758_p8), %vm623_vm1, %v7354_v50  ;;  %7500 = vst.msk [vmem:[%s8367_s22 + $0x98] sm:$0xff] (!%p7758_p8), %vm623_vm1, %v12424_v29 }
 0xaa0   : > { %v7360_v27 = vpop.permute.xlu0 %7359 }
 0xaa1   : > { %7434 = vst.msk [vmem:[%s8377_s12 + $0xa8] sm:$0xff] %vm623_vm1, %v7360_v27  ;;  %7466 = vst.msk [vmem:[#allocation2 + $0x170] sm:$0xff] %vm623_vm1, %v7360_v27  ;;  %v7358_v16 = vpop.permute.xlu1 %7357 }
 0xaa2   : > { %7433 = vst.msk [vmem:[%s8377_s12 + $0xa0] sm:$0xff] %vm623_vm1, %v7358_v16  ;;  %7465 = vst.msk [vmem:[#allocation2 + $0x168] sm:$0xff] %vm623_vm1, %v7358_v16 }
 0xaa3   : > { %7501 = vst.msk [vmem:[%s8367_s22 + $0xa0] sm:$0xff] (!%p7758_p8), %vm623_vm1, %v7358_v16  ;;  %7502 = vst.msk [vmem:[%s8367_s22 + $0xa8] sm:$0xff] (!%p7758_p8), %vm623_vm1, %v7360_v27 }
 0xaa4   : > { %v7364_v4 = vpop.permute.xlu0 %7363 }
 0xaa5   : > { %7436 = vst.msk [vmem:[%s8377_s12 + $0xb8] sm:$0xff] %vm623_vm1, %v7364_v4  ;;  %7468 = vst.msk [vmem:[#allocation2 + $0x190] sm:$0xff] %vm623_vm1, %v7364_v4  ;;  %v7362_v37 = vpop.permute.xlu1 %7361 }
 0xaa6   : > { %7435 = vst.msk [vmem:[%s8377_s12 + $0xb0] sm:$0xff] %vm623_vm1, %v7362_v37  ;;  %7467 = vst.msk [vmem:[#allocation2 + $0x188] sm:$0xff] %vm623_vm1, %v7362_v37 }
 0xaa7   : > { %7503 = vst.msk [vmem:[%s8367_s22 + $0xb0] sm:$0xff] (!%p7758_p8), %vm623_vm1, %v7362_v37  ;;  %7504 = vst.msk [vmem:[%s8367_s22 + $0xb8] sm:$0xff] (!%p7758_p8), %vm623_vm1, %v7364_v4 }
 0xaa8   : > { %v7368_v13 = vpop.permute.xlu0 %7367 }
 0xaa9   : > { %7438 = vst.msk [vmem:[%s8377_s12 + $0xc8] sm:$0xff] %vm623_vm1, %v7368_v13  ;;  %7470 = vst.msk [vmem:[#allocation2 + $0x1b0] sm:$0xff] %vm623_vm1, %v7368_v13  ;;  %v7366_v49 = vpop.permute.xlu1 %7365 }
 0xaaa   : > { %7437 = vst.msk [vmem:[%s8377_s12 + $0xc0] sm:$0xff] %vm623_vm1, %v7366_v49  ;;  %7469 = vst.msk [vmem:[#allocation2 + $0x1a8] sm:$0xff] %vm623_vm1, %v7366_v49 }
 0xaab   : > { %7505 = vst.msk [vmem:[%s8367_s22 + $0xc0] sm:$0xff] (!%p7758_p8), %vm623_vm1, %v7366_v49  ;;  %7506 = vst.msk [vmem:[%s8367_s22 + $0xc8] sm:$0xff] (!%p7758_p8), %vm623_vm1, %v7368_v13 }
 0xaac   : > { %v7372_v53 = vpop.permute.xlu0 %7371 }
 0xaad   : > { %7440 = vst.msk [vmem:[%s8377_s12 + $0xd8] sm:$0xff] %vm623_vm1, %v7372_v53  ;;  %7472 = vst.msk [vmem:[#allocation2 + $0x1d0] sm:$0xff] %vm623_vm1, %v7372_v53  ;;  %v7370_v0 = vpop.permute.xlu1 %7369 }
 0xaae   : > { %7439 = vst.msk [vmem:[%s8377_s12 + $0xd0] sm:$0xff] %vm623_vm1, %v7370_v0  ;;  %7471 = vst.msk [vmem:[#allocation2 + $0x1c8] sm:$0xff] %vm623_vm1, %v7370_v0 }
 0xaaf   : > { %7507 = vst.msk [vmem:[%s8367_s22 + $0xd0] sm:$0xff] (!%p7758_p8), %vm623_vm1, %v7370_v0  ;;  %7508 = vst.msk [vmem:[%s8367_s22 + $0xd8] sm:$0xff] (!%p7758_p8), %vm623_vm1, %v7372_v53 }
 0xab0   : > { %v7376_v33 = vpop.permute.xlu0 %7375  ;;  %7480 = sbr.rel (%p7758_p8) target bundleno = 2744 (0xab8), region = 56 }
 0xab1   : > { %7442 = vst.msk [vmem:[%s8377_s12 + $0xe8] sm:$0xff] %vm623_vm1, %v7376_v33  ;;  %7474 = vst.msk [vmem:[#allocation2 + $0x1f0] sm:$0xff] %vm623_vm1, %v7376_v33  ;;  %v7374_v54 = vpop.permute.xlu1 %7373 }
 0xab2   : > { %7441 = vst.msk [vmem:[%s8377_s12 + $0xe0] sm:$0xff] %vm623_vm1, %v7374_v54  ;;  %7473 = vst.msk [vmem:[#allocation2 + $0x1e8] sm:$0xff] %vm623_vm1, %v7374_v54 }
 0xab3   : > { %7509 = vst.msk [vmem:[%s8367_s22 + $0xe0] sm:$0xff] (!%p7758_p8), %vm623_vm1, %v7374_v54  ;;  %7510 = vst.msk [vmem:[%s8367_s22 + $0xe8] sm:$0xff] (!%p7758_p8), %vm623_vm1, %v7376_v33 }
 0xab4   : > { %v7380_v1 = vpop.permute.xlu0 %7379 }
 0xab5   : > { %7444 = vst.msk [vmem:[%s8377_s12 + $0xf8] sm:$0xff] %vm623_vm1, %v7380_v1  ;;  %7476 = vst.msk [vmem:[#allocation2 + $0x210] sm:$0xff] %vm623_vm1, %v7380_v1  ;;  %v7378_v31 = vpop.permute.xlu1 %7377 }
 0xab6   : > { %7443 = vst.msk [vmem:[%s8377_s12 + $0xf0] sm:$0xff] %vm623_vm1, %v7378_v31  ;;  %7475 = vst.msk [vmem:[#allocation2 + $0x208] sm:$0xff] %vm623_vm1, %v7378_v31 }
 0xab7   : > { %7511 = vst.msk [vmem:[%s8367_s22 + $0xf0] sm:$0xff] %vm623_vm1, %v7378_v31  ;;  %7512 = vst.msk [vmem:[%s8367_s22 + $0xf8] sm:$0xff] %vm623_vm1, %v7380_v1 }
 0xab8 PF: > { %s19_s9 = sadd.s32 1, %s8268_s9   ;;  %s13017_s12 = sld [smem:[#allocation5_spill]] }
 0xab9   : > { %p16_p9 = scmp.ge.s32.totalorder %s19_s9, 8   ;;  %s13018_s27 = smov %s8260_s29 }
 0xaba   : > { %s13019_s28 = smov %s8264_s30  ;;  %s13020_s29 = smov %s13023_s10 }
 0xabb   :  { %18 = sbr.rel (!%p16_p9) target bundleno = 3 (0x3), region = 106 }
 0xabe   : > { %s13021_s30 = smov %s13017_s12 }

</bundles_post_ra>
